<compile_context>
chip_gen: v7x
topology: tpu7x:2x2x1
jax: 0.10.0
libtpu: 0.0.40
codegen_flags: <defaults>
</compile_context>

<pallas_src>
import functools

import jax
import jax.numpy as jnp
from jax import lax
from jax.experimental import pallas as pl
from jax.experimental.pallas import tpu as pltpu

LANE = 128  # each gate block / the hidden state is padded to one 128-lane vreg


# --------------------------------------------------------------------------
# Fused Pallas kernel
# --------------------------------------------------------------------------
def _lstm_cell(gates, c, P):
    """One LSTM step. gates: (1, 4P) lane-aligned blocks [i|f|g|o]; c: (1, P)."""
    sg = jax.nn.sigmoid(gates)                 # one EUP pass over all 4 blocks
    g_g = jnp.tanh(gates[:, 2 * P:3 * P])      # tanh only on the g block
    c_new = sg[:, P:2 * P] * c + sg[:, 0:P] * g_g
    h_new = sg[:, 3 * P:4 * P] * jnp.tanh(c_new)
    return h_new, c_new


def _lstm_ae_kernel(*refs, n_enc, n_dec, T_enc, T_dec, P):
    it = iter(refs)
    x_ref = next(it)
    enc_p = [(next(it), next(it), next(it)) for _ in range(n_enc)]
    dec_p = [(next(it), next(it), next(it)) for _ in range(n_dec)]
    dense_ref = next(it)
    out_ref = next(it)

    # Load weights once (tiny: ~2.5 MiB total, resident in VMEM/vregs).
    enc_w = [(w_ih[...], w_hh[...], b[...]) for (w_ih, w_hh, b) in enc_p]
    dec_w = [(w_ih[...], w_hh[...], b[...]) for (w_ih, w_hh, b) in dec_p]

    # ------------------------ Encoder (wavefront over layers) -------------
    x = x_ref[...]                                           # (T_enc, P)
    # Hoisted first-layer input projection: one (T, P)@(P, 4P) matmul.
    gx1 = jnp.dot(x, enc_w[0][0], preferred_element_type=jnp.float32) + enc_w[0][2]

    h = [jnp.zeros((1, P), jnp.float32) for _ in range(n_enc)]
    c = [jnp.zeros((1, P), jnp.float32) for _ in range(n_enc)]
    for t in range(T_enc):                                   # static unroll
        x_in = None
        for l in range(n_enc):
            w_ih, w_hh, b = enc_w[l]
            if l == 0:
                gates = gx1[t:t + 1, :] + jnp.dot(
                    h[0], w_hh, preferred_element_type=jnp.float32)
            else:
                # Per-step input projection of the downstream layer: off the
                # critical path, fills the MXU/EUP bubbles of layer l-1.
                gates = (jnp.dot(x_in, w_ih, preferred_element_type=jnp.float32)
                         + b
                         + jnp.dot(h[l], w_hh, preferred_element_type=jnp.float32))
            h[l], c[l] = _lstm_cell(gates, c[l], P)
            if l < n_enc - 1:
                x_in = jax.nn.sigmoid(h[l])                  # h_activ between layers
    z = jnp.tanh(h[n_enc - 1])                               # out_activ(h_n), (1, P)

    # ------------------------ Decoder (wavefront over layers) -------------
    hd = [jnp.zeros((1, P), jnp.float32) for _ in range(n_dec)]
    cd = [jnp.zeros((1, P), jnp.float32) for _ in range(n_dec)]
    # Layer 0 input is z repeated over time -> its gate pre-activation is
    # constant; compute it once.
    gx0 = jnp.dot(z, dec_w[0][0], preferred_element_type=jnp.float32) + dec_w[0][2]

    ys = []
    for t in range(T_dec):                                   # static unroll
        x_in = None
        for l in range(n_dec):
            w_ih, w_hh, b = dec_w[l]
            if l == 0:
                gates = gx0 + jnp.dot(
                    hd[0], w_hh, preferred_element_type=jnp.float32)
            else:
                gates = (jnp.dot(x_in, w_ih, preferred_element_type=jnp.float32)
                         + b
                         + jnp.dot(hd[l], w_hh, preferred_element_type=jnp.float32))
            hd[l], cd[l] = _lstm_cell(gates, cd[l], P)
            if l < n_dec - 1:
                x_in = jax.nn.sigmoid(hd[l])                 # h_activ between layers
        ys.append(hd[n_dec - 1])                             # raw last-layer output

    # Assemble the (T, P) output sequence in registers (no scratch round-trip)
    # and do ONE dense matmul + ONE HBM store.
    seq_d = jnp.concatenate(ys, axis=0)                      # (T_dec, P)
    out_ref[...] = jnp.dot(seq_d, dense_ref[...],
                           preferred_element_type=jnp.float32).astype(out_ref.dtype)


# --------------------------------------------------------------------------
# Wrapper: pad weights so every gate block is lane-aligned, then one call.
# --------------------------------------------------------------------------
def _pad_gate_cols(m, H, P):
    """(R, 4H) with gate blocks [i|f|g|o] -> (R, 4P), each block zero-padded."""
    blocks = [jnp.pad(m[:, g * H:(g + 1) * H], ((0, 0), (0, P - H)))
              for g in range(4)]
    return jnp.concatenate(blocks, axis=1)


def _pad_lstm_params(p, H, P):
    din = p["w_ih"].shape[0]
    w_ih = jnp.pad(_pad_gate_cols(p["w_ih"], H, P), ((0, P - din), (0, 0)))
    w_hh = jnp.pad(_pad_gate_cols(p["w_hh"], H, P), ((0, P - H), (0, 0)))
    b = _pad_gate_cols(p["b"], H, P)
    return w_ih, w_hh, b


def lstm_ae_forward(params, x, seq_len):
    """x: (T, input_dim) float32 -> output (seq_len, input_dim)."""
    P = LANE
    T_enc, in_dim = x.shape
    enc_hidden = tuple(p["w_hh"].shape[0] for p in params["enc"])
    dec_hidden = tuple(p["w_hh"].shape[0] for p in params["dec"])
    n_enc, n_dec = len(enc_hidden), len(dec_hidden)
    out_dim = params["dense"].shape[1]

    # Zero-pad the input and every weight so gates/state live on vreg
    # boundaries; padded lanes stay exactly zero through the recurrence.
    x_pad = jnp.pad(x.astype(jnp.float32), ((0, 0), (0, P - in_dim)))
    inputs = [x_pad]
    for p, H in zip(params["enc"], enc_hidden):
        inputs += list(_pad_lstm_params(p, H, P))
    for p, H in zip(params["dec"], dec_hidden):
        inputs += list(_pad_lstm_params(p, H, P))
    dense_pad = jnp.pad(params["dense"],
                        ((0, P - params["dense"].shape[0]), (0, 0)))
    inputs.append(dense_pad)

    kernel = functools.partial(_lstm_ae_kernel, n_enc=n_enc, n_dec=n_dec,
                               T_enc=T_enc, T_dec=seq_len, P=P)

    vmem = lambda: pl.BlockSpec(memory_space=pltpu.MemorySpace.VMEM)
    return pl.pallas_call(
        kernel,
        out_shape=jax.ShapeDtypeStruct((seq_len, out_dim), jnp.float32),
        in_specs=[vmem() for _ in inputs],
        out_specs=vmem(),
    )(*inputs)
    # TODO(synk): at much larger seq_len set
    # pltpu.CompilerParams(vmem_limit_bytes=...) and re-derive the VMEM budget
    # (everything scales linearly with T); irrelevant at these shapes.


# --------------------------------------------------------------------------
# Parameter init (deterministic, PyTorch-shaped)
# --------------------------------------------------------------------------
def init_lstm_params(key, in_dim, hidden):
    k1, k2, k3, k4 = jax.random.split(key, 4)
    s = 1.0 / jnp.sqrt(jnp.float32(hidden))
    w_ih = jax.random.uniform(k1, (4 * hidden, in_dim), jnp.float32, -s, s)
    w_hh = jax.random.uniform(k2, (4 * hidden, hidden), jnp.float32, -s, s)
    b_ih = jax.random.uniform(k3, (4 * hidden,), jnp.float32, -s, s)
    b_hh = jax.random.uniform(k4, (4 * hidden,), jnp.float32, -s, s)
    # stored pre-transposed: (in, 4H) / (H, 4H), gate order [i | f | g | o]
    return dict(w_ih=w_ih.T, w_hh=w_hh.T, b=(b_ih + b_hh)[None, :])


def init_lstm_ae_params(key, input_dim, encoding_dim, h_dims):
    keys = jax.random.split(key, 16)
    ki = iter(keys)

    enc_dims = [input_dim] + h_dims + [encoding_dim]
    enc = [init_lstm_params(next(ki), enc_dims[i], enc_dims[i + 1])
           for i in range(len(enc_dims) - 1)]

    rh = h_dims[::-1]
    dec_dims = [encoding_dim] + rh + [rh[-1]]
    dec = [init_lstm_params(next(ki), dec_dims[i], dec_dims[i + 1])
           for i in range(len(dec_dims) - 1)]

    # torch.rand((last_hidden, input_dim)) -> uniform [0, 1)
    dense = jax.random.uniform(next(ki), (dec_dims[-1], input_dim), jnp.float32)
    return dict(enc=enc, dec=dec, dense=dense)


# --------------------------------------------------------------------------
# Pure-JAX reference (numerical sanity check)
# --------------------------------------------------------------------------
def _lstm_ref(x, w_ih, w_hh, b):
    H = w_hh.shape[0]

    def step(carry, x_t):
        h, c = carry
        gates = (jnp.dot(x_t, w_ih, precision=lax.Precision.HIGHEST)
                 + jnp.dot(h, w_hh, precision=lax.Precision.HIGHEST) + b[0])
        i = jax.nn.sigmoid(gates[0:H])
        f = jax.nn.sigmoid(gates[H:2 * H])
        g = jnp.tanh(gates[2 * H:3 * H])
        o = jax.nn.sigmoid(gates[3 * H:4 * H])
        c = f * c + i * g
        h = o * jnp.tanh(c)
        return (h, c), h

    (h, _), ys = lax.scan(step, (jnp.zeros(H), jnp.zeros(H)), x)
    return ys, h


def lstm_ae_reference(params, x, seq_len):
    h = x
    n_enc = len(params["enc"])
    z = None
    for i, p in enumerate(params["enc"]):
        ys, h_n = _lstm_ref(h, p["w_ih"], p["w_hh"], p["b"])
        if i < n_enc - 1:
            h = jax.nn.sigmoid(ys)
        else:
            z = jnp.tanh(h_n)
    h = jnp.tile(z[None, :], (seq_len, 1))
    n_dec = len(params["dec"])
    for i, p in enumerate(params["dec"]):
        ys, _ = _lstm_ref(h, p["w_ih"], p["w_hh"], p["b"])
        h = jax.nn.sigmoid(ys) if i < n_dec - 1 else ys
    return jnp.dot(h, params["dense"], precision=lax.Precision.HIGHEST)


# --------------------------------------------------------------------------
if __name__ == "__main__":
    SEQ_LEN = 8
    INPUT_DIM = 16
    ENCODING_DIM = 8
    H_DIMS = [32]

    root = jax.random.PRNGKey(0)
    k_param, k_x = jax.random.split(root)

    params = init_lstm_ae_params(k_param, INPUT_DIM, ENCODING_DIM, H_DIMS)
    x = jax.random.normal(k_x, (SEQ_LEN, INPUT_DIM), jnp.float32)

    out = lstm_ae_forward(params, x, SEQ_LEN)
    out = jax.block_until_ready(out)

    assert out.shape == (SEQ_LEN, INPUT_DIM), out.shape
    assert bool(jnp.all(jnp.isfinite(out)))

    ref = lstm_ae_reference(params, x, SEQ_LEN)
    # Tolerance covers possible reduced-precision MXU passes for f32 operands
    # inside the kernel (reference is pinned to HIGHEST); structural bugs
    # (wrong gates / layer order) produce O(1) mismatches and would still fail.
    err = float(jnp.max(jnp.abs(out - ref)))
    assert jnp.allclose(out, ref, rtol=2e-2, atol=2e-2), err

    print("KERNEL_OK")
</pallas_src>

<mosaic_0001>
module attributes {stable_mosaic.version = 11 : i64} {
  func.func @_lstm_ae_kernel(%arg0: memref<8x128xf32, #tpu.memory_space<vmem>>, %arg1: memref<128x512xf32, #tpu.memory_space<vmem>>, %arg2: memref<128x512xf32, #tpu.memory_space<vmem>>, %arg3: memref<1x512xf32, #tpu.memory_space<vmem>>, %arg4: memref<128x512xf32, #tpu.memory_space<vmem>>, %arg5: memref<128x512xf32, #tpu.memory_space<vmem>>, %arg6: memref<1x512xf32, #tpu.memory_space<vmem>>, %arg7: memref<128x512xf32, #tpu.memory_space<vmem>>, %arg8: memref<128x512xf32, #tpu.memory_space<vmem>>, %arg9: memref<1x512xf32, #tpu.memory_space<vmem>>, %arg10: memref<128x512xf32, #tpu.memory_space<vmem>>, %arg11: memref<128x512xf32, #tpu.memory_space<vmem>>, %arg12: memref<1x512xf32, #tpu.memory_space<vmem>>, %arg13: memref<128x16xf32, #tpu.memory_space<vmem>>, %arg14: memref<8x16xf32, #tpu.memory_space<vmem>>) attributes {dimension_semantics = [], scalar_prefetch = 0 : i64, scratch_operands = 0 : i64, tpu.core_type = #tpu.core_type<tc>} {
    %c0 = arith.constant 0 : index
    %c0_0 = arith.constant 0 : index
    %0 = vector.load %arg1[%c0, %c0_0] : memref<128x512xf32, #tpu.memory_space<vmem>>, vector<128x512xf32>
    %c0_1 = arith.constant 0 : index
    %c0_2 = arith.constant 0 : index
    %1 = vector.load %arg2[%c0_1, %c0_2] : memref<128x512xf32, #tpu.memory_space<vmem>>, vector<128x512xf32>
    %c0_3 = arith.constant 0 : index
    %c0_4 = arith.constant 0 : index
    %2 = vector.load %arg3[%c0_3, %c0_4] : memref<1x512xf32, #tpu.memory_space<vmem>>, vector<1x512xf32>
    %c0_5 = arith.constant 0 : index
    %c0_6 = arith.constant 0 : index
    %3 = vector.load %arg4[%c0_5, %c0_6] : memref<128x512xf32, #tpu.memory_space<vmem>>, vector<128x512xf32>
    %c0_7 = arith.constant 0 : index
    %c0_8 = arith.constant 0 : index
    %4 = vector.load %arg5[%c0_7, %c0_8] : memref<128x512xf32, #tpu.memory_space<vmem>>, vector<128x512xf32>
    %c0_9 = arith.constant 0 : index
    %c0_10 = arith.constant 0 : index
    %5 = vector.load %arg6[%c0_9, %c0_10] : memref<1x512xf32, #tpu.memory_space<vmem>>, vector<1x512xf32>
    %c0_11 = arith.constant 0 : index
    %c0_12 = arith.constant 0 : index
    %6 = vector.load %arg7[%c0_11, %c0_12] : memref<128x512xf32, #tpu.memory_space<vmem>>, vector<128x512xf32>
    %c0_13 = arith.constant 0 : index
    %c0_14 = arith.constant 0 : index
    %7 = vector.load %arg8[%c0_13, %c0_14] : memref<128x512xf32, #tpu.memory_space<vmem>>, vector<128x512xf32>
    %c0_15 = arith.constant 0 : index
    %c0_16 = arith.constant 0 : index
    %8 = vector.load %arg9[%c0_15, %c0_16] : memref<1x512xf32, #tpu.memory_space<vmem>>, vector<1x512xf32>
    %c0_17 = arith.constant 0 : index
    %c0_18 = arith.constant 0 : index
    %9 = vector.load %arg10[%c0_17, %c0_18] : memref<128x512xf32, #tpu.memory_space<vmem>>, vector<128x512xf32>
    %c0_19 = arith.constant 0 : index
    %c0_20 = arith.constant 0 : index
    %10 = vector.load %arg11[%c0_19, %c0_20] : memref<128x512xf32, #tpu.memory_space<vmem>>, vector<128x512xf32>
    %c0_21 = arith.constant 0 : index
    %c0_22 = arith.constant 0 : index
    %11 = vector.load %arg12[%c0_21, %c0_22] : memref<1x512xf32, #tpu.memory_space<vmem>>, vector<1x512xf32>
    %c0_23 = arith.constant 0 : index
    %c0_24 = arith.constant 0 : index
    %12 = vector.load %arg0[%c0_23, %c0_24] : memref<8x128xf32, #tpu.memory_space<vmem>>, vector<8x128xf32>
    %cst = arith.constant dense<0.000000e+00> : vector<8x512xf32>
    %13 = tpu.matmul %12, %0, %cst {dimension_numbers = #tpu.dot_dimension_numbers<[1], [0], [0], [1], [0, 0, 1, 1], [], []>} : vector<8x128xf32>, vector<128x512xf32>, vector<8x512xf32> -> vector<8x512xf32>
    %14 = vector.broadcast %2 : vector<1x512xf32> to vector<8x512xf32>
    %15 = arith.addf %13, %14 : vector<8x512xf32>
    %cst_25 = arith.constant 0.000000e+00 : f32
    %16 = vector.broadcast %cst_25 : f32 to vector<1x128xf32>
    %cst_26 = arith.constant 0.000000e+00 : f32
    %17 = vector.broadcast %cst_26 : f32 to vector<1x128xf32>
    %cst_27 = arith.constant 0.000000e+00 : f32
    %18 = vector.broadcast %cst_27 : f32 to vector<1x128xf32>
    %cst_28 = arith.constant 0.000000e+00 : f32
    %19 = vector.broadcast %cst_28 : f32 to vector<1x128xf32>
    %20 = vector.extract_strided_slice %15 {offsets = [0, 0], sizes = [1, 512], strides = [1, 1]} : vector<8x512xf32> to vector<1x512xf32>
    %cst_29 = arith.constant dense<0.000000e+00> : vector<1x512xf32>
    %21 = tpu.matmul %16, %1, %cst_29 {dimension_numbers = #tpu.dot_dimension_numbers<[1], [0], [0], [1], [0, 0, 1, 1], [], []>} : vector<1x128xf32>, vector<128x512xf32>, vector<1x512xf32> -> vector<1x512xf32>
    %22 = arith.addf %20, %21 : vector<1x512xf32>
    %23 = arith.negf %22 : vector<1x512xf32>
    %24 = math.exp %23 : vector<1x512xf32>
    %cst_30 = arith.constant 1.000000e+00 : f32
    %25 = vector.broadcast %cst_30 : f32 to vector<1x512xf32>
    %26 = arith.addf %25, %24 : vector<1x512xf32>
    %27 = arith.divf %25, %26 : vector<1x512xf32>
    %28 = vector.extract_strided_slice %22 {offsets = [0, 256], sizes = [1, 128], strides = [1, 1]} : vector<1x512xf32> to vector<1x128xf32>
    %29 = math.tanh %28 : vector<1x128xf32>
    %30 = vector.extract_strided_slice %27 {offsets = [0, 128], sizes = [1, 128], strides = [1, 1]} : vector<1x512xf32> to vector<1x128xf32>
    %31 = arith.mulf %30, %18 : vector<1x128xf32>
    %32 = vector.extract_strided_slice %27 {offsets = [0, 0], sizes = [1, 128], strides = [1, 1]} : vector<1x512xf32> to vector<1x128xf32>
    %33 = arith.mulf %32, %29 : vector<1x128xf32>
    %34 = arith.addf %31, %33 : vector<1x128xf32>
    %35 = vector.extract_strided_slice %27 {offsets = [0, 384], sizes = [1, 128], strides = [1, 1]} : vector<1x512xf32> to vector<1x128xf32>
    %36 = math.tanh %34 : vector<1x128xf32>
    %37 = arith.mulf %35, %36 : vector<1x128xf32>
    %38 = arith.negf %37 : vector<1x128xf32>
    %39 = math.exp %38 : vector<1x128xf32>
    %cst_31 = arith.constant 1.000000e+00 : f32
    %40 = vector.broadcast %cst_31 : f32 to vector<1x128xf32>
    %41 = arith.addf %40, %39 : vector<1x128xf32>
    %42 = arith.divf %40, %41 : vector<1x128xf32>
    %cst_32 = arith.constant dense<0.000000e+00> : vector<1x512xf32>
    %43 = tpu.matmul %42, %3, %cst_32 {dimension_numbers = #tpu.dot_dimension_numbers<[1], [0], [0], [1], [0, 0, 1, 1], [], []>} : vector<1x128xf32>, vector<128x512xf32>, vector<1x512xf32> -> vector<1x512xf32>
    %44 = arith.addf %43, %5 : vector<1x512xf32>
    %cst_33 = arith.constant dense<0.000000e+00> : vector<1x512xf32>
    %45 = tpu.matmul %17, %4, %cst_33 {dimension_numbers = #tpu.dot_dimension_numbers<[1], [0], [0], [1], [0, 0, 1, 1], [], []>} : vector<1x128xf32>, vector<128x512xf32>, vector<1x512xf32> -> vector<1x512xf32>
    %46 = arith.addf %44, %45 : vector<1x512xf32>
    %47 = arith.negf %46 : vector<1x512xf32>
    %48 = math.exp %47 : vector<1x512xf32>
    %cst_34 = arith.constant 1.000000e+00 : f32
    %49 = vector.broadcast %cst_34 : f32 to vector<1x512xf32>
    %50 = arith.addf %49, %48 : vector<1x512xf32>
    %51 = arith.divf %49, %50 : vector<1x512xf32>
    %52 = vector.extract_strided_slice %46 {offsets = [0, 256], sizes = [1, 128], strides = [1, 1]} : vector<1x512xf32> to vector<1x128xf32>
    %53 = math.tanh %52 : vector<1x128xf32>
    %54 = vector.extract_strided_slice %51 {offsets = [0, 128], sizes = [1, 128], strides = [1, 1]} : vector<1x512xf32> to vector<1x128xf32>
    %55 = arith.mulf %54, %19 : vector<1x128xf32>
    %56 = vector.extract_strided_slice %51 {offsets = [0, 0], sizes = [1, 128], strides = [1, 1]} : vector<1x512xf32> to vector<1x128xf32>
    %57 = arith.mulf %56, %53 : vector<1x128xf32>
    %58 = arith.addf %55, %57 : vector<1x128xf32>
    %59 = vector.extract_strided_slice %51 {offsets = [0, 384], sizes = [1, 128], strides = [1, 1]} : vector<1x512xf32> to vector<1x128xf32>
    %60 = math.tanh %58 : vector<1x128xf32>
    %61 = arith.mulf %59, %60 : vector<1x128xf32>
    %62 = vector.extract_strided_slice %15 {offsets = [1, 0], sizes = [1, 512], strides = [1, 1]} : vector<8x512xf32> to vector<1x512xf32>
    %cst_35 = arith.constant dense<0.000000e+00> : vector<1x512xf32>
    %63 = tpu.matmul %37, %1, %cst_35 {dimension_numbers = #tpu.dot_dimension_numbers<[1], [0], [0], [1], [0, 0, 1, 1], [], []>} : vector<1x128xf32>, vector<128x512xf32>, vector<1x512xf32> -> vector<1x512xf32>
    %64 = arith.addf %62, %63 : vector<1x512xf32>
    %65 = arith.negf %64 : vector<1x512xf32>
    %66 = math.exp %65 : vector<1x512xf32>
    %cst_36 = arith.constant 1.000000e+00 : f32
    %67 = vector.broadcast %cst_36 : f32 to vector<1x512xf32>
    %68 = arith.addf %67, %66 : vector<1x512xf32>
    %69 = arith.divf %67, %68 : vector<1x512xf32>
    %70 = vector.extract_strided_slice %64 {offsets = [0, 256], sizes = [1, 128], strides = [1, 1]} : vector<1x512xf32> to vector<1x128xf32>
    %71 = math.tanh %70 : vector<1x128xf32>
    %72 = vector.extract_strided_slice %69 {offsets = [0, 128], sizes = [1, 128], strides = [1, 1]} : vector<1x512xf32> to vector<1x128xf32>
    %73 = arith.mulf %72, %34 : vector<1x128xf32>
    %74 = vector.extract_strided_slice %69 {offsets = [0, 0], sizes = [1, 128], strides = [1, 1]} : vector<1x512xf32> to vector<1x128xf32>
    %75 = arith.mulf %74, %71 : vector<1x128xf32>
    %76 = arith.addf %73, %75 : vector<1x128xf32>
    %77 = vector.extract_strided_slice %69 {offsets = [0, 384], sizes = [1, 128], strides = [1, 1]} : vector<1x512xf32> to vector<1x128xf32>
    %78 = math.tanh %76 : vector<1x128xf32>
    %79 = arith.mulf %77, %78 : vector<1x128xf32>
    %80 = arith.negf %79 : vector<1x128xf32>
    %81 = math.exp %80 : vector<1x128xf32>
    %cst_37 = arith.constant 1.000000e+00 : f32
    %82 = vector.broadcast %cst_37 : f32 to vector<1x128xf32>
    %83 = arith.addf %82, %81 : vector<1x128xf32>
    %84 = arith.divf %82, %83 : vector<1x128xf32>
    %cst_38 = arith.constant dense<0.000000e+00> : vector<1x512xf32>
    %85 = tpu.matmul %84, %3, %cst_38 {dimension_numbers = #tpu.dot_dimension_numbers<[1], [0], [0], [1], [0, 0, 1, 1], [], []>} : vector<1x128xf32>, vector<128x512xf32>, vector<1x512xf32> -> vector<1x512xf32>
    %86 = arith.addf %85, %5 : vector<1x512xf32>
    %cst_39 = arith.constant dense<0.000000e+00> : vector<1x512xf32>
    %87 = tpu.matmul %61, %4, %cst_39 {dimension_numbers = #tpu.dot_dimension_numbers<[1], [0], [0], [1], [0, 0, 1, 1], [], []>} : vector<1x128xf32>, vector<128x512xf32>, vector<1x512xf32> -> vector<1x512xf32>
    %88 = arith.addf %86, %87 : vector<1x512xf32>
    %89 = arith.negf %88 : vector<1x512xf32>
    %90 = math.exp %89 : vector<1x512xf32>
    %cst_40 = arith.constant 1.000000e+00 : f32
    %91 = vector.broadcast %cst_40 : f32 to vector<1x512xf32>
    %92 = arith.addf %91, %90 : vector<1x512xf32>
    %93 = arith.divf %91, %92 : vector<1x512xf32>
    %94 = vector.extract_strided_slice %88 {offsets = [0, 256], sizes = [1, 128], strides = [1, 1]} : vector<1x512xf32> to vector<1x128xf32>
    %95 = math.tanh %94 : vector<1x128xf32>
    %96 = vector.extract_strided_slice %93 {offsets = [0, 128], sizes = [1, 128], strides = [1, 1]} : vector<1x512xf32> to vector<1x128xf32>
    %97 = arith.mulf %96, %58 : vector<1x128xf32>
    %98 = vector.extract_strided_slice %93 {offsets = [0, 0], sizes = [1, 128], strides = [1, 1]} : vector<1x512xf32> to vector<1x128xf32>
    %99 = arith.mulf %98, %95 : vector<1x128xf32>
    %100 = arith.addf %97, %99 : vector<1x128xf32>
    %101 = vector.extract_strided_slice %93 {offsets = [0, 384], sizes = [1, 128], strides = [1, 1]} : vector<1x512xf32> to vector<1x128xf32>
    %102 = math.tanh %100 : vector<1x128xf32>
    %103 = arith.mulf %101, %102 : vector<1x128xf32>
    %104 = vector.extract_strided_slice %15 {offsets = [2, 0], sizes = [1, 512], strides = [1, 1]} : vector<8x512xf32> to vector<1x512xf32>
    %cst_41 = arith.constant dense<0.000000e+00> : vector<1x512xf32>
    %105 = tpu.matmul %79, %1, %cst_41 {dimension_numbers = #tpu.dot_dimension_numbers<[1], [0], [0], [1], [0, 0, 1, 1], [], []>} : vector<1x128xf32>, vector<128x512xf32>, vector<1x512xf32> -> vector<1x512xf32>
    %106 = arith.addf %104, %105 : vector<1x512xf32>
    %107 = arith.negf %106 : vector<1x512xf32>
    %108 = math.exp %107 : vector<1x512xf32>
    %cst_42 = arith.constant 1.000000e+00 : f32
    %109 = vector.broadcast %cst_42 : f32 to vector<1x512xf32>
    %110 = arith.addf %109, %108 : vector<1x512xf32>
    %111 = arith.divf %109, %110 : vector<1x512xf32>
    %112 = vector.extract_strided_slice %106 {offsets = [0, 256], sizes = [1, 128], strides = [1, 1]} : vector<1x512xf32> to vector<1x128xf32>
    %113 = math.tanh %112 : vector<1x128xf32>
    %114 = vector.extract_strided_slice %111 {offsets = [0, 128], sizes = [1, 128], strides = [1, 1]} : vector<1x512xf32> to vector<1x128xf32>
    %115 = arith.mulf %114, %76 : vector<1x128xf32>
    %116 = vector.extract_strided_slice %111 {offsets = [0, 0], sizes = [1, 128], strides = [1, 1]} : vector<1x512xf32> to vector<1x128xf32>
    %117 = arith.mulf %116, %113 : vector<1x128xf32>
    %118 = arith.addf %115, %117 : vector<1x128xf32>
    %119 = vector.extract_strided_slice %111 {offsets = [0, 384], sizes = [1, 128], strides = [1, 1]} : vector<1x512xf32> to vector<1x128xf32>
    %120 = math.tanh %118 : vector<1x128xf32>
    %121 = arith.mulf %119, %120 : vector<1x128xf32>
    %122 = arith.negf %121 : vector<1x128xf32>
    %123 = math.exp %122 : vector<1x128xf32>
    %cst_43 = arith.constant 1.000000e+00 : f32
    %124 = vector.broadcast %cst_43 : f32 to vector<1x128xf32>
    %125 = arith.addf %124, %123 : vector<1x128xf32>
    %126 = arith.divf %124, %125 : vector<1x128xf32>
    %cst_44 = arith.constant dense<0.000000e+00> : vector<1x512xf32>
    %127 = tpu.matmul %126, %3, %cst_44 {dimension_numbers = #tpu.dot_dimension_numbers<[1], [0], [0], [1], [0, 0, 1, 1], [], []>} : vector<1x128xf32>, vector<128x512xf32>, vector<1x512xf32> -> vector<1x512xf32>
    %128 = arith.addf %127, %5 : vector<1x512xf32>
    %cst_45 = arith.constant dense<0.000000e+00> : vector<1x512xf32>
    %129 = tpu.matmul %103, %4, %cst_45 {dimension_numbers = #tpu.dot_dimension_numbers<[1], [0], [0], [1], [0, 0, 1, 1], [], []>} : vector<1x128xf32>, vector<128x512xf32>, vector<1x512xf32> -> vector<1x512xf32>
    %130 = arith.addf %128, %129 : vector<1x512xf32>
    %131 = arith.negf %130 : vector<1x512xf32>
    %132 = math.exp %131 : vector<1x512xf32>
    %cst_46 = arith.constant 1.000000e+00 : f32
    %133 = vector.broadcast %cst_46 : f32 to vector<1x512xf32>
    %134 = arith.addf %133, %132 : vector<1x512xf32>
    %135 = arith.divf %133, %134 : vector<1x512xf32>
    %136 = vector.extract_strided_slice %130 {offsets = [0, 256], sizes = [1, 128], strides = [1, 1]} : vector<1x512xf32> to vector<1x128xf32>
    %137 = math.tanh %136 : vector<1x128xf32>
    %138 = vector.extract_strided_slice %135 {offsets = [0, 128], sizes = [1, 128], strides = [1, 1]} : vector<1x512xf32> to vector<1x128xf32>
    %139 = arith.mulf %138, %100 : vector<1x128xf32>
    %140 = vector.extract_strided_slice %135 {offsets = [0, 0], sizes = [1, 128], strides = [1, 1]} : vector<1x512xf32> to vector<1x128xf32>
    %141 = arith.mulf %140, %137 : vector<1x128xf32>
    %142 = arith.addf %139, %141 : vector<1x128xf32>
    %143 = vector.extract_strided_slice %135 {offsets = [0, 384], sizes = [1, 128], strides = [1, 1]} : vector<1x512xf32> to vector<1x128xf32>
    %144 = math.tanh %142 : vector<1x128xf32>
    %145 = arith.mulf %143, %144 : vector<1x128xf32>
    %146 = vector.extract_strided_slice %15 {offsets = [3, 0], sizes = [1, 512], strides = [1, 1]} : vector<8x512xf32> to vector<1x512xf32>
    %cst_47 = arith.constant dense<0.000000e+00> : vector<1x512xf32>
    %147 = tpu.matmul %121, %1, %cst_47 {dimension_numbers = #tpu.dot_dimension_numbers<[1], [0], [0], [1], [0, 0, 1, 1], [], []>} : vector<1x128xf32>, vector<128x512xf32>, vector<1x512xf32> -> vector<1x512xf32>
    %148 = arith.addf %146, %147 : vector<1x512xf32>
    %149 = arith.negf %148 : vector<1x512xf32>
    %150 = math.exp %149 : vector<1x512xf32>
    %cst_48 = arith.constant 1.000000e+00 : f32
    %151 = vector.broadcast %cst_48 : f32 to vector<1x512xf32>
    %152 = arith.addf %151, %150 : vector<1x512xf32>
    %153 = arith.divf %151, %152 : vector<1x512xf32>
    %154 = vector.extract_strided_slice %148 {offsets = [0, 256], sizes = [1, 128], strides = [1, 1]} : vector<1x512xf32> to vector<1x128xf32>
    %155 = math.tanh %154 : vector<1x128xf32>
    %156 = vector.extract_strided_slice %153 {offsets = [0, 128], sizes = [1, 128], strides = [1, 1]} : vector<1x512xf32> to vector<1x128xf32>
    %157 = arith.mulf %156, %118 : vector<1x128xf32>
    %158 = vector.extract_strided_slice %153 {offsets = [0, 0], sizes = [1, 128], strides = [1, 1]} : vector<1x512xf32> to vector<1x128xf32>
    %159 = arith.mulf %158, %155 : vector<1x128xf32>
    %160 = arith.addf %157, %159 : vector<1x128xf32>
    %161 = vector.extract_strided_slice %153 {offsets = [0, 384], sizes = [1, 128], strides = [1, 1]} : vector<1x512xf32> to vector<1x128xf32>
    %162 = math.tanh %160 : vector<1x128xf32>
    %163 = arith.mulf %161, %162 : vector<1x128xf32>
    %164 = arith.negf %163 : vector<1x128xf32>
    %165 = math.exp %164 : vector<1x128xf32>
    %cst_49 = arith.constant 1.000000e+00 : f32
    %166 = vector.broadcast %cst_49 : f32 to vector<1x128xf32>
    %167 = arith.addf %166, %165 : vector<1x128xf32>
    %168 = arith.divf %166, %167 : vector<1x128xf32>
    %cst_50 = arith.constant dense<0.000000e+00> : vector<1x512xf32>
    %169 = tpu.matmul %168, %3, %cst_50 {dimension_numbers = #tpu.dot_dimension_numbers<[1], [0], [0], [1], [0, 0, 1, 1], [], []>} : vector<1x128xf32>, vector<128x512xf32>, vector<1x512xf32> -> vector<1x512xf32>
    %170 = arith.addf %169, %5 : vector<1x512xf32>
    %cst_51 = arith.constant dense<0.000000e+00> : vector<1x512xf32>
    %171 = tpu.matmul %145, %4, %cst_51 {dimension_numbers = #tpu.dot_dimension_numbers<[1], [0], [0], [1], [0, 0, 1, 1], [], []>} : vector<1x128xf32>, vector<128x512xf32>, vector<1x512xf32> -> vector<1x512xf32>
    %172 = arith.addf %170, %171 : vector<1x512xf32>
    %173 = arith.negf %172 : vector<1x512xf32>
    %174 = math.exp %173 : vector<1x512xf32>
    %cst_52 = arith.constant 1.000000e+00 : f32
    %175 = vector.broadcast %cst_52 : f32 to vector<1x512xf32>
    %176 = arith.addf %175, %174 : vector<1x512xf32>
    %177 = arith.divf %175, %176 : vector<1x512xf32>
    %178 = vector.extract_strided_slice %172 {offsets = [0, 256], sizes = [1, 128], strides = [1, 1]} : vector<1x512xf32> to vector<1x128xf32>
    %179 = math.tanh %178 : vector<1x128xf32>
    %180 = vector.extract_strided_slice %177 {offsets = [0, 128], sizes = [1, 128], strides = [1, 1]} : vector<1x512xf32> to vector<1x128xf32>
    %181 = arith.mulf %180, %142 : vector<1x128xf32>
    %182 = vector.extract_strided_slice %177 {offsets = [0, 0], sizes = [1, 128], strides = [1, 1]} : vector<1x512xf32> to vector<1x128xf32>
    %183 = arith.mulf %182, %179 : vector<1x128xf32>
    %184 = arith.addf %181, %183 : vector<1x128xf32>
    %185 = vector.extract_strided_slice %177 {offsets = [0, 384], sizes = [1, 128], strides = [1, 1]} : vector<1x512xf32> to vector<1x128xf32>
    %186 = math.tanh %184 : vector<1x128xf32>
    %187 = arith.mulf %185, %186 : vector<1x128xf32>
    %188 = vector.extract_strided_slice %15 {offsets = [4, 0], sizes = [1, 512], strides = [1, 1]} : vector<8x512xf32> to vector<1x512xf32>
    %cst_53 = arith.constant dense<0.000000e+00> : vector<1x512xf32>
    %189 = tpu.matmul %163, %1, %cst_53 {dimension_numbers = #tpu.dot_dimension_numbers<[1], [0], [0], [1], [0, 0, 1, 1], [], []>} : vector<1x128xf32>, vector<128x512xf32>, vector<1x512xf32> -> vector<1x512xf32>
    %190 = arith.addf %188, %189 : vector<1x512xf32>
    %191 = arith.negf %190 : vector<1x512xf32>
    %192 = math.exp %191 : vector<1x512xf32>
    %cst_54 = arith.constant 1.000000e+00 : f32
    %193 = vector.broadcast %cst_54 : f32 to vector<1x512xf32>
    %194 = arith.addf %193, %192 : vector<1x512xf32>
    %195 = arith.divf %193, %194 : vector<1x512xf32>
    %196 = vector.extract_strided_slice %190 {offsets = [0, 256], sizes = [1, 128], strides = [1, 1]} : vector<1x512xf32> to vector<1x128xf32>
    %197 = math.tanh %196 : vector<1x128xf32>
    %198 = vector.extract_strided_slice %195 {offsets = [0, 128], sizes = [1, 128], strides = [1, 1]} : vector<1x512xf32> to vector<1x128xf32>
    %199 = arith.mulf %198, %160 : vector<1x128xf32>
    %200 = vector.extract_strided_slice %195 {offsets = [0, 0], sizes = [1, 128], strides = [1, 1]} : vector<1x512xf32> to vector<1x128xf32>
    %201 = arith.mulf %200, %197 : vector<1x128xf32>
    %202 = arith.addf %199, %201 : vector<1x128xf32>
    %203 = vector.extract_strided_slice %195 {offsets = [0, 384], sizes = [1, 128], strides = [1, 1]} : vector<1x512xf32> to vector<1x128xf32>
    %204 = math.tanh %202 : vector<1x128xf32>
    %205 = arith.mulf %203, %204 : vector<1x128xf32>
    %206 = arith.negf %205 : vector<1x128xf32>
    %207 = math.exp %206 : vector<1x128xf32>
    %cst_55 = arith.constant 1.000000e+00 : f32
    %208 = vector.broadcast %cst_55 : f32 to vector<1x128xf32>
    %209 = arith.addf %208, %207 : vector<1x128xf32>
    %210 = arith.divf %208, %209 : vector<1x128xf32>
    %cst_56 = arith.constant dense<0.000000e+00> : vector<1x512xf32>
    %211 = tpu.matmul %210, %3, %cst_56 {dimension_numbers = #tpu.dot_dimension_numbers<[1], [0], [0], [1], [0, 0, 1, 1], [], []>} : vector<1x128xf32>, vector<128x512xf32>, vector<1x512xf32> -> vector<1x512xf32>
    %212 = arith.addf %211, %5 : vector<1x512xf32>
    %cst_57 = arith.constant dense<0.000000e+00> : vector<1x512xf32>
    %213 = tpu.matmul %187, %4, %cst_57 {dimension_numbers = #tpu.dot_dimension_numbers<[1], [0], [0], [1], [0, 0, 1, 1], [], []>} : vector<1x128xf32>, vector<128x512xf32>, vector<1x512xf32> -> vector<1x512xf32>
    %214 = arith.addf %212, %213 : vector<1x512xf32>
    %215 = arith.negf %214 : vector<1x512xf32>
    %216 = math.exp %215 : vector<1x512xf32>
    %cst_58 = arith.constant 1.000000e+00 : f32
    %217 = vector.broadcast %cst_58 : f32 to vector<1x512xf32>
    %218 = arith.addf %217, %216 : vector<1x512xf32>
    %219 = arith.divf %217, %218 : vector<1x512xf32>
    %220 = vector.extract_strided_slice %214 {offsets = [0, 256], sizes = [1, 128], strides = [1, 1]} : vector<1x512xf32> to vector<1x128xf32>
    %221 = math.tanh %220 : vector<1x128xf32>
    %222 = vector.extract_strided_slice %219 {offsets = [0, 128], sizes = [1, 128], strides = [1, 1]} : vector<1x512xf32> to vector<1x128xf32>
    %223 = arith.mulf %222, %184 : vector<1x128xf32>
    %224 = vector.extract_strided_slice %219 {offsets = [0, 0], sizes = [1, 128], strides = [1, 1]} : vector<1x512xf32> to vector<1x128xf32>
    %225 = arith.mulf %224, %221 : vector<1x128xf32>
    %226 = arith.addf %223, %225 : vector<1x128xf32>
    %227 = vector.extract_strided_slice %219 {offsets = [0, 384], sizes = [1, 128], strides = [1, 1]} : vector<1x512xf32> to vector<1x128xf32>
    %228 = math.tanh %226 : vector<1x128xf32>
    %229 = arith.mulf %227, %228 : vector<1x128xf32>
    %230 = vector.extract_strided_slice %15 {offsets = [5, 0], sizes = [1, 512], strides = [1, 1]} : vector<8x512xf32> to vector<1x512xf32>
    %cst_59 = arith.constant dense<0.000000e+00> : vector<1x512xf32>
    %231 = tpu.matmul %205, %1, %cst_59 {dimension_numbers = #tpu.dot_dimension_numbers<[1], [0], [0], [1], [0, 0, 1, 1], [], []>} : vector<1x128xf32>, vector<128x512xf32>, vector<1x512xf32> -> vector<1x512xf32>
    %232 = arith.addf %230, %231 : vector<1x512xf32>
    %233 = arith.negf %232 : vector<1x512xf32>
    %234 = math.exp %233 : vector<1x512xf32>
    %cst_60 = arith.constant 1.000000e+00 : f32
    %235 = vector.broadcast %cst_60 : f32 to vector<1x512xf32>
    %236 = arith.addf %235, %234 : vector<1x512xf32>
    %237 = arith.divf %235, %236 : vector<1x512xf32>
    %238 = vector.extract_strided_slice %232 {offsets = [0, 256], sizes = [1, 128], strides = [1, 1]} : vector<1x512xf32> to vector<1x128xf32>
    %239 = math.tanh %238 : vector<1x128xf32>
    %240 = vector.extract_strided_slice %237 {offsets = [0, 128], sizes = [1, 128], strides = [1, 1]} : vector<1x512xf32> to vector<1x128xf32>
    %241 = arith.mulf %240, %202 : vector<1x128xf32>
    %242 = vector.extract_strided_slice %237 {offsets = [0, 0], sizes = [1, 128], strides = [1, 1]} : vector<1x512xf32> to vector<1x128xf32>
    %243 = arith.mulf %242, %239 : vector<1x128xf32>
    %244 = arith.addf %241, %243 : vector<1x128xf32>
    %245 = vector.extract_strided_slice %237 {offsets = [0, 384], sizes = [1, 128], strides = [1, 1]} : vector<1x512xf32> to vector<1x128xf32>
    %246 = math.tanh %244 : vector<1x128xf32>
    %247 = arith.mulf %245, %246 : vector<1x128xf32>
    %248 = arith.negf %247 : vector<1x128xf32>
    %249 = math.exp %248 : vector<1x128xf32>
    %cst_61 = arith.constant 1.000000e+00 : f32
    %250 = vector.broadcast %cst_61 : f32 to vector<1x128xf32>
    %251 = arith.addf %250, %249 : vector<1x128xf32>
    %252 = arith.divf %250, %251 : vector<1x128xf32>
    %cst_62 = arith.constant dense<0.000000e+00> : vector<1x512xf32>
    %253 = tpu.matmul %252, %3, %cst_62 {dimension_numbers = #tpu.dot_dimension_numbers<[1], [0], [0], [1], [0, 0, 1, 1], [], []>} : vector<1x128xf32>, vector<128x512xf32>, vector<1x512xf32> -> vector<1x512xf32>
    %254 = arith.addf %253, %5 : vector<1x512xf32>
    %cst_63 = arith.constant dense<0.000000e+00> : vector<1x512xf32>
    %255 = tpu.matmul %229, %4, %cst_63 {dimension_numbers = #tpu.dot_dimension_numbers<[1], [0], [0], [1], [0, 0, 1, 1], [], []>} : vector<1x128xf32>, vector<128x512xf32>, vector<1x512xf32> -> vector<1x512xf32>
    %256 = arith.addf %254, %255 : vector<1x512xf32>
    %257 = arith.negf %256 : vector<1x512xf32>
    %258 = math.exp %257 : vector<1x512xf32>
    %cst_64 = arith.constant 1.000000e+00 : f32
    %259 = vector.broadcast %cst_64 : f32 to vector<1x512xf32>
    %260 = arith.addf %259, %258 : vector<1x512xf32>
    %261 = arith.divf %259, %260 : vector<1x512xf32>
    %262 = vector.extract_strided_slice %256 {offsets = [0, 256], sizes = [1, 128], strides = [1, 1]} : vector<1x512xf32> to vector<1x128xf32>
    %263 = math.tanh %262 : vector<1x128xf32>
    %264 = vector.extract_strided_slice %261 {offsets = [0, 128], sizes = [1, 128], strides = [1, 1]} : vector<1x512xf32> to vector<1x128xf32>
    %265 = arith.mulf %264, %226 : vector<1x128xf32>
    %266 = vector.extract_strided_slice %261 {offsets = [0, 0], sizes = [1, 128], strides = [1, 1]} : vector<1x512xf32> to vector<1x128xf32>
    %267 = arith.mulf %266, %263 : vector<1x128xf32>
    %268 = arith.addf %265, %267 : vector<1x128xf32>
    %269 = vector.extract_strided_slice %261 {offsets = [0, 384], sizes = [1, 128], strides = [1, 1]} : vector<1x512xf32> to vector<1x128xf32>
    %270 = math.tanh %268 : vector<1x128xf32>
    %271 = arith.mulf %269, %270 : vector<1x128xf32>
    %272 = vector.extract_strided_slice %15 {offsets = [6, 0], sizes = [1, 512], strides = [1, 1]} : vector<8x512xf32> to vector<1x512xf32>
    %cst_65 = arith.constant dense<0.000000e+00> : vector<1x512xf32>
    %273 = tpu.matmul %247, %1, %cst_65 {dimension_numbers = #tpu.dot_dimension_numbers<[1], [0], [0], [1], [0, 0, 1, 1], [], []>} : vector<1x128xf32>, vector<128x512xf32>, vector<1x512xf32> -> vector<1x512xf32>
    %274 = arith.addf %272, %273 : vector<1x512xf32>
    %275 = arith.negf %274 : vector<1x512xf32>
    %276 = math.exp %275 : vector<1x512xf32>
    %cst_66 = arith.constant 1.000000e+00 : f32
    %277 = vector.broadcast %cst_66 : f32 to vector<1x512xf32>
    %278 = arith.addf %277, %276 : vector<1x512xf32>
    %279 = arith.divf %277, %278 : vector<1x512xf32>
    %280 = vector.extract_strided_slice %274 {offsets = [0, 256], sizes = [1, 128], strides = [1, 1]} : vector<1x512xf32> to vector<1x128xf32>
    %281 = math.tanh %280 : vector<1x128xf32>
    %282 = vector.extract_strided_slice %279 {offsets = [0, 128], sizes = [1, 128], strides = [1, 1]} : vector<1x512xf32> to vector<1x128xf32>
    %283 = arith.mulf %282, %244 : vector<1x128xf32>
    %284 = vector.extract_strided_slice %279 {offsets = [0, 0], sizes = [1, 128], strides = [1, 1]} : vector<1x512xf32> to vector<1x128xf32>
    %285 = arith.mulf %284, %281 : vector<1x128xf32>
    %286 = arith.addf %283, %285 : vector<1x128xf32>
    %287 = vector.extract_strided_slice %279 {offsets = [0, 384], sizes = [1, 128], strides = [1, 1]} : vector<1x512xf32> to vector<1x128xf32>
    %288 = math.tanh %286 : vector<1x128xf32>
    %289 = arith.mulf %287, %288 : vector<1x128xf32>
    %290 = arith.negf %289 : vector<1x128xf32>
    %291 = math.exp %290 : vector<1x128xf32>
    %cst_67 = arith.constant 1.000000e+00 : f32
    %292 = vector.broadcast %cst_67 : f32 to vector<1x128xf32>
    %293 = arith.addf %292, %291 : vector<1x128xf32>
    %294 = arith.divf %292, %293 : vector<1x128xf32>
    %cst_68 = arith.constant dense<0.000000e+00> : vector<1x512xf32>
    %295 = tpu.matmul %294, %3, %cst_68 {dimension_numbers = #tpu.dot_dimension_numbers<[1], [0], [0], [1], [0, 0, 1, 1], [], []>} : vector<1x128xf32>, vector<128x512xf32>, vector<1x512xf32> -> vector<1x512xf32>
    %296 = arith.addf %295, %5 : vector<1x512xf32>
    %cst_69 = arith.constant dense<0.000000e+00> : vector<1x512xf32>
    %297 = tpu.matmul %271, %4, %cst_69 {dimension_numbers = #tpu.dot_dimension_numbers<[1], [0], [0], [1], [0, 0, 1, 1], [], []>} : vector<1x128xf32>, vector<128x512xf32>, vector<1x512xf32> -> vector<1x512xf32>
    %298 = arith.addf %296, %297 : vector<1x512xf32>
    %299 = arith.negf %298 : vector<1x512xf32>
    %300 = math.exp %299 : vector<1x512xf32>
    %cst_70 = arith.constant 1.000000e+00 : f32
    %301 = vector.broadcast %cst_70 : f32 to vector<1x512xf32>
    %302 = arith.addf %301, %300 : vector<1x512xf32>
    %303 = arith.divf %301, %302 : vector<1x512xf32>
    %304 = vector.extract_strided_slice %298 {offsets = [0, 256], sizes = [1, 128], strides = [1, 1]} : vector<1x512xf32> to vector<1x128xf32>
    %305 = math.tanh %304 : vector<1x128xf32>
    %306 = vector.extract_strided_slice %303 {offsets = [0, 128], sizes = [1, 128], strides = [1, 1]} : vector<1x512xf32> to vector<1x128xf32>
    %307 = arith.mulf %306, %268 : vector<1x128xf32>
    %308 = vector.extract_strided_slice %303 {offsets = [0, 0], sizes = [1, 128], strides = [1, 1]} : vector<1x512xf32> to vector<1x128xf32>
    %309 = arith.mulf %308, %305 : vector<1x128xf32>
    %310 = arith.addf %307, %309 : vector<1x128xf32>
    %311 = vector.extract_strided_slice %303 {offsets = [0, 384], sizes = [1, 128], strides = [1, 1]} : vector<1x512xf32> to vector<1x128xf32>
    %312 = math.tanh %310 : vector<1x128xf32>
    %313 = arith.mulf %311, %312 : vector<1x128xf32>
    %314 = vector.extract_strided_slice %15 {offsets = [7, 0], sizes = [1, 512], strides = [1, 1]} : vector<8x512xf32> to vector<1x512xf32>
    %cst_71 = arith.constant dense<0.000000e+00> : vector<1x512xf32>
    %315 = tpu.matmul %289, %1, %cst_71 {dimension_numbers = #tpu.dot_dimension_numbers<[1], [0], [0], [1], [0, 0, 1, 1], [], []>} : vector<1x128xf32>, vector<128x512xf32>, vector<1x512xf32> -> vector<1x512xf32>
    %316 = arith.addf %314, %315 : vector<1x512xf32>
    %317 = arith.negf %316 : vector<1x512xf32>
    %318 = math.exp %317 : vector<1x512xf32>
    %cst_72 = arith.constant 1.000000e+00 : f32
    %319 = vector.broadcast %cst_72 : f32 to vector<1x512xf32>
    %320 = arith.addf %319, %318 : vector<1x512xf32>
    %321 = arith.divf %319, %320 : vector<1x512xf32>
    %322 = vector.extract_strided_slice %316 {offsets = [0, 256], sizes = [1, 128], strides = [1, 1]} : vector<1x512xf32> to vector<1x128xf32>
    %323 = math.tanh %322 : vector<1x128xf32>
    %324 = vector.extract_strided_slice %321 {offsets = [0, 128], sizes = [1, 128], strides = [1, 1]} : vector<1x512xf32> to vector<1x128xf32>
    %325 = arith.mulf %324, %286 : vector<1x128xf32>
    %326 = vector.extract_strided_slice %321 {offsets = [0, 0], sizes = [1, 128], strides = [1, 1]} : vector<1x512xf32> to vector<1x128xf32>
    %327 = arith.mulf %326, %323 : vector<1x128xf32>
    %328 = arith.addf %325, %327 : vector<1x128xf32>
    %329 = vector.extract_strided_slice %321 {offsets = [0, 384], sizes = [1, 128], strides = [1, 1]} : vector<1x512xf32> to vector<1x128xf32>
    %330 = math.tanh %328 : vector<1x128xf32>
    %331 = arith.mulf %329, %330 : vector<1x128xf32>
    %332 = arith.negf %331 : vector<1x128xf32>
    %333 = math.exp %332 : vector<1x128xf32>
    %cst_73 = arith.constant 1.000000e+00 : f32
    %334 = vector.broadcast %cst_73 : f32 to vector<1x128xf32>
    %335 = arith.addf %334, %333 : vector<1x128xf32>
    %336 = arith.divf %334, %335 : vector<1x128xf32>
    %cst_74 = arith.constant dense<0.000000e+00> : vector<1x512xf32>
    %337 = tpu.matmul %336, %3, %cst_74 {dimension_numbers = #tpu.dot_dimension_numbers<[1], [0], [0], [1], [0, 0, 1, 1], [], []>} : vector<1x128xf32>, vector<128x512xf32>, vector<1x512xf32> -> vector<1x512xf32>
    %338 = arith.addf %337, %5 : vector<1x512xf32>
    %cst_75 = arith.constant dense<0.000000e+00> : vector<1x512xf32>
    %339 = tpu.matmul %313, %4, %cst_75 {dimension_numbers = #tpu.dot_dimension_numbers<[1], [0], [0], [1], [0, 0, 1, 1], [], []>} : vector<1x128xf32>, vector<128x512xf32>, vector<1x512xf32> -> vector<1x512xf32>
    %340 = arith.addf %338, %339 : vector<1x512xf32>
    %341 = arith.negf %340 : vector<1x512xf32>
    %342 = math.exp %341 : vector<1x512xf32>
    %cst_76 = arith.constant 1.000000e+00 : f32
    %343 = vector.broadcast %cst_76 : f32 to vector<1x512xf32>
    %344 = arith.addf %343, %342 : vector<1x512xf32>
    %345 = arith.divf %343, %344 : vector<1x512xf32>
    %346 = vector.extract_strided_slice %340 {offsets = [0, 256], sizes = [1, 128], strides = [1, 1]} : vector<1x512xf32> to vector<1x128xf32>
    %347 = math.tanh %346 : vector<1x128xf32>
    %348 = vector.extract_strided_slice %345 {offsets = [0, 128], sizes = [1, 128], strides = [1, 1]} : vector<1x512xf32> to vector<1x128xf32>
    %349 = arith.mulf %348, %310 : vector<1x128xf32>
    %350 = vector.extract_strided_slice %345 {offsets = [0, 0], sizes = [1, 128], strides = [1, 1]} : vector<1x512xf32> to vector<1x128xf32>
    %351 = arith.mulf %350, %347 : vector<1x128xf32>
    %352 = arith.addf %349, %351 : vector<1x128xf32>
    %353 = vector.extract_strided_slice %345 {offsets = [0, 384], sizes = [1, 128], strides = [1, 1]} : vector<1x512xf32> to vector<1x128xf32>
    %354 = math.tanh %352 : vector<1x128xf32>
    %355 = arith.mulf %353, %354 : vector<1x128xf32>
    %356 = math.tanh %355 : vector<1x128xf32>
    %cst_77 = arith.constant 0.000000e+00 : f32
    %357 = vector.broadcast %cst_77 : f32 to vector<1x128xf32>
    %cst_78 = arith.constant 0.000000e+00 : f32
    %358 = vector.broadcast %cst_78 : f32 to vector<1x128xf32>
    %cst_79 = arith.constant 0.000000e+00 : f32
    %359 = vector.broadcast %cst_79 : f32 to vector<1x128xf32>
    %cst_80 = arith.constant 0.000000e+00 : f32
    %360 = vector.broadcast %cst_80 : f32 to vector<1x128xf32>
    %cst_81 = arith.constant dense<0.000000e+00> : vector<1x512xf32>
    %361 = tpu.matmul %356, %6, %cst_81 {dimension_numbers = #tpu.dot_dimension_numbers<[1], [0], [0], [1], [0, 0, 1, 1], [], []>} : vector<1x128xf32>, vector<128x512xf32>, vector<1x512xf32> -> vector<1x512xf32>
    %362 = arith.addf %361, %8 : vector<1x512xf32>
    %cst_82 = arith.constant dense<0.000000e+00> : vector<1x512xf32>
    %363 = tpu.matmul %357, %7, %cst_82 {dimension_numbers = #tpu.dot_dimension_numbers<[1], [0], [0], [1], [0, 0, 1, 1], [], []>} : vector<1x128xf32>, vector<128x512xf32>, vector<1x512xf32> -> vector<1x512xf32>
    %364 = arith.addf %362, %363 : vector<1x512xf32>
    %365 = arith.negf %364 : vector<1x512xf32>
    %366 = math.exp %365 : vector<1x512xf32>
    %cst_83 = arith.constant 1.000000e+00 : f32
    %367 = vector.broadcast %cst_83 : f32 to vector<1x512xf32>
    %368 = arith.addf %367, %366 : vector<1x512xf32>
    %369 = arith.divf %367, %368 : vector<1x512xf32>
    %370 = vector.extract_strided_slice %364 {offsets = [0, 256], sizes = [1, 128], strides = [1, 1]} : vector<1x512xf32> to vector<1x128xf32>
    %371 = math.tanh %370 : vector<1x128xf32>
    %372 = vector.extract_strided_slice %369 {offsets = [0, 128], sizes = [1, 128], strides = [1, 1]} : vector<1x512xf32> to vector<1x128xf32>
    %373 = arith.mulf %372, %359 : vector<1x128xf32>
    %374 = vector.extract_strided_slice %369 {offsets = [0, 0], sizes = [1, 128], strides = [1, 1]} : vector<1x512xf32> to vector<1x128xf32>
    %375 = arith.mulf %374, %371 : vector<1x128xf32>
    %376 = arith.addf %373, %375 : vector<1x128xf32>
    %377 = vector.extract_strided_slice %369 {offsets = [0, 384], sizes = [1, 128], strides = [1, 1]} : vector<1x512xf32> to vector<1x128xf32>
    %378 = math.tanh %376 : vector<1x128xf32>
    %379 = arith.mulf %377, %378 : vector<1x128xf32>
    %380 = arith.negf %379 : vector<1x128xf32>
    %381 = math.exp %380 : vector<1x128xf32>
    %cst_84 = arith.constant 1.000000e+00 : f32
    %382 = vector.broadcast %cst_84 : f32 to vector<1x128xf32>
    %383 = arith.addf %382, %381 : vector<1x128xf32>
    %384 = arith.divf %382, %383 : vector<1x128xf32>
    %cst_85 = arith.constant dense<0.000000e+00> : vector<1x512xf32>
    %385 = tpu.matmul %384, %9, %cst_85 {dimension_numbers = #tpu.dot_dimension_numbers<[1], [0], [0], [1], [0, 0, 1, 1], [], []>} : vector<1x128xf32>, vector<128x512xf32>, vector<1x512xf32> -> vector<1x512xf32>
    %386 = arith.addf %385, %11 : vector<1x512xf32>
    %cst_86 = arith.constant dense<0.000000e+00> : vector<1x512xf32>
    %387 = tpu.matmul %358, %10, %cst_86 {dimension_numbers = #tpu.dot_dimension_numbers<[1], [0], [0], [1], [0, 0, 1, 1], [], []>} : vector<1x128xf32>, vector<128x512xf32>, vector<1x512xf32> -> vector<1x512xf32>
    %388 = arith.addf %386, %387 : vector<1x512xf32>
    %389 = arith.negf %388 : vector<1x512xf32>
    %390 = math.exp %389 : vector<1x512xf32>
    %cst_87 = arith.constant 1.000000e+00 : f32
    %391 = vector.broadcast %cst_87 : f32 to vector<1x512xf32>
    %392 = arith.addf %391, %390 : vector<1x512xf32>
    %393 = arith.divf %391, %392 : vector<1x512xf32>
    %394 = vector.extract_strided_slice %388 {offsets = [0, 256], sizes = [1, 128], strides = [1, 1]} : vector<1x512xf32> to vector<1x128xf32>
    %395 = math.tanh %394 : vector<1x128xf32>
    %396 = vector.extract_strided_slice %393 {offsets = [0, 128], sizes = [1, 128], strides = [1, 1]} : vector<1x512xf32> to vector<1x128xf32>
    %397 = arith.mulf %396, %360 : vector<1x128xf32>
    %398 = vector.extract_strided_slice %393 {offsets = [0, 0], sizes = [1, 128], strides = [1, 1]} : vector<1x512xf32> to vector<1x128xf32>
    %399 = arith.mulf %398, %395 : vector<1x128xf32>
    %400 = arith.addf %397, %399 : vector<1x128xf32>
    %401 = vector.extract_strided_slice %393 {offsets = [0, 384], sizes = [1, 128], strides = [1, 1]} : vector<1x512xf32> to vector<1x128xf32>
    %402 = math.tanh %400 : vector<1x128xf32>
    %403 = arith.mulf %401, %402 : vector<1x128xf32>
    %cst_88 = arith.constant dense<0.000000e+00> : vector<1x512xf32>
    %404 = tpu.matmul %379, %7, %cst_88 {dimension_numbers = #tpu.dot_dimension_numbers<[1], [0], [0], [1], [0, 0, 1, 1], [], []>} : vector<1x128xf32>, vector<128x512xf32>, vector<1x512xf32> -> vector<1x512xf32>
    %405 = arith.addf %362, %404 : vector<1x512xf32>
    %406 = arith.negf %405 : vector<1x512xf32>
    %407 = math.exp %406 : vector<1x512xf32>
    %cst_89 = arith.constant 1.000000e+00 : f32
    %408 = vector.broadcast %cst_89 : f32 to vector<1x512xf32>
    %409 = arith.addf %408, %407 : vector<1x512xf32>
    %410 = arith.divf %408, %409 : vector<1x512xf32>
    %411 = vector.extract_strided_slice %405 {offsets = [0, 256], sizes = [1, 128], strides = [1, 1]} : vector<1x512xf32> to vector<1x128xf32>
    %412 = math.tanh %411 : vector<1x128xf32>
    %413 = vector.extract_strided_slice %410 {offsets = [0, 128], sizes = [1, 128], strides = [1, 1]} : vector<1x512xf32> to vector<1x128xf32>
    %414 = arith.mulf %413, %376 : vector<1x128xf32>
    %415 = vector.extract_strided_slice %410 {offsets = [0, 0], sizes = [1, 128], strides = [1, 1]} : vector<1x512xf32> to vector<1x128xf32>
    %416 = arith.mulf %415, %412 : vector<1x128xf32>
    %417 = arith.addf %414, %416 : vector<1x128xf32>
    %418 = vector.extract_strided_slice %410 {offsets = [0, 384], sizes = [1, 128], strides = [1, 1]} : vector<1x512xf32> to vector<1x128xf32>
    %419 = math.tanh %417 : vector<1x128xf32>
    %420 = arith.mulf %418, %419 : vector<1x128xf32>
    %421 = arith.negf %420 : vector<1x128xf32>
    %422 = math.exp %421 : vector<1x128xf32>
    %cst_90 = arith.constant 1.000000e+00 : f32
    %423 = vector.broadcast %cst_90 : f32 to vector<1x128xf32>
    %424 = arith.addf %423, %422 : vector<1x128xf32>
    %425 = arith.divf %423, %424 : vector<1x128xf32>
    %cst_91 = arith.constant dense<0.000000e+00> : vector<1x512xf32>
    %426 = tpu.matmul %425, %9, %cst_91 {dimension_numbers = #tpu.dot_dimension_numbers<[1], [0], [0], [1], [0, 0, 1, 1], [], []>} : vector<1x128xf32>, vector<128x512xf32>, vector<1x512xf32> -> vector<1x512xf32>
    %427 = arith.addf %426, %11 : vector<1x512xf32>
    %cst_92 = arith.constant dense<0.000000e+00> : vector<1x512xf32>
    %428 = tpu.matmul %403, %10, %cst_92 {dimension_numbers = #tpu.dot_dimension_numbers<[1], [0], [0], [1], [0, 0, 1, 1], [], []>} : vector<1x128xf32>, vector<128x512xf32>, vector<1x512xf32> -> vector<1x512xf32>
    %429 = arith.addf %427, %428 : vector<1x512xf32>
    %430 = arith.negf %429 : vector<1x512xf32>
    %431 = math.exp %430 : vector<1x512xf32>
    %cst_93 = arith.constant 1.000000e+00 : f32
    %432 = vector.broadcast %cst_93 : f32 to vector<1x512xf32>
    %433 = arith.addf %432, %431 : vector<1x512xf32>
    %434 = arith.divf %432, %433 : vector<1x512xf32>
    %435 = vector.extract_strided_slice %429 {offsets = [0, 256], sizes = [1, 128], strides = [1, 1]} : vector<1x512xf32> to vector<1x128xf32>
    %436 = math.tanh %435 : vector<1x128xf32>
    %437 = vector.extract_strided_slice %434 {offsets = [0, 128], sizes = [1, 128], strides = [1, 1]} : vector<1x512xf32> to vector<1x128xf32>
    %438 = arith.mulf %437, %400 : vector<1x128xf32>
    %439 = vector.extract_strided_slice %434 {offsets = [0, 0], sizes = [1, 128], strides = [1, 1]} : vector<1x512xf32> to vector<1x128xf32>
    %440 = arith.mulf %439, %436 : vector<1x128xf32>
    %441 = arith.addf %438, %440 : vector<1x128xf32>
    %442 = vector.extract_strided_slice %434 {offsets = [0, 384], sizes = [1, 128], strides = [1, 1]} : vector<1x512xf32> to vector<1x128xf32>
    %443 = math.tanh %441 : vector<1x128xf32>
    %444 = arith.mulf %442, %443 : vector<1x128xf32>
    %cst_94 = arith.constant dense<0.000000e+00> : vector<1x512xf32>
    %445 = tpu.matmul %420, %7, %cst_94 {dimension_numbers = #tpu.dot_dimension_numbers<[1], [0], [0], [1], [0, 0, 1, 1], [], []>} : vector<1x128xf32>, vector<128x512xf32>, vector<1x512xf32> -> vector<1x512xf32>
    %446 = arith.addf %362, %445 : vector<1x512xf32>
    %447 = arith.negf %446 : vector<1x512xf32>
    %448 = math.exp %447 : vector<1x512xf32>
    %cst_95 = arith.constant 1.000000e+00 : f32
    %449 = vector.broadcast %cst_95 : f32 to vector<1x512xf32>
    %450 = arith.addf %449, %448 : vector<1x512xf32>
    %451 = arith.divf %449, %450 : vector<1x512xf32>
    %452 = vector.extract_strided_slice %446 {offsets = [0, 256], sizes = [1, 128], strides = [1, 1]} : vector<1x512xf32> to vector<1x128xf32>
    %453 = math.tanh %452 : vector<1x128xf32>
    %454 = vector.extract_strided_slice %451 {offsets = [0, 128], sizes = [1, 128], strides = [1, 1]} : vector<1x512xf32> to vector<1x128xf32>
    %455 = arith.mulf %454, %417 : vector<1x128xf32>
    %456 = vector.extract_strided_slice %451 {offsets = [0, 0], sizes = [1, 128], strides = [1, 1]} : vector<1x512xf32> to vector<1x128xf32>
    %457 = arith.mulf %456, %453 : vector<1x128xf32>
    %458 = arith.addf %455, %457 : vector<1x128xf32>
    %459 = vector.extract_strided_slice %451 {offsets = [0, 384], sizes = [1, 128], strides = [1, 1]} : vector<1x512xf32> to vector<1x128xf32>
    %460 = math.tanh %458 : vector<1x128xf32>
    %461 = arith.mulf %459, %460 : vector<1x128xf32>
    %462 = arith.negf %461 : vector<1x128xf32>
    %463 = math.exp %462 : vector<1x128xf32>
    %cst_96 = arith.constant 1.000000e+00 : f32
    %464 = vector.broadcast %cst_96 : f32 to vector<1x128xf32>
    %465 = arith.addf %464, %463 : vector<1x128xf32>
    %466 = arith.divf %464, %465 : vector<1x128xf32>
    %cst_97 = arith.constant dense<0.000000e+00> : vector<1x512xf32>
    %467 = tpu.matmul %466, %9, %cst_97 {dimension_numbers = #tpu.dot_dimension_numbers<[1], [0], [0], [1], [0, 0, 1, 1], [], []>} : vector<1x128xf32>, vector<128x512xf32>, vector<1x512xf32> -> vector<1x512xf32>
    %468 = arith.addf %467, %11 : vector<1x512xf32>
    %cst_98 = arith.constant dense<0.000000e+00> : vector<1x512xf32>
    %469 = tpu.matmul %444, %10, %cst_98 {dimension_numbers = #tpu.dot_dimension_numbers<[1], [0], [0], [1], [0, 0, 1, 1], [], []>} : vector<1x128xf32>, vector<128x512xf32>, vector<1x512xf32> -> vector<1x512xf32>
    %470 = arith.addf %468, %469 : vector<1x512xf32>
    %471 = arith.negf %470 : vector<1x512xf32>
    %472 = math.exp %471 : vector<1x512xf32>
    %cst_99 = arith.constant 1.000000e+00 : f32
    %473 = vector.broadcast %cst_99 : f32 to vector<1x512xf32>
    %474 = arith.addf %473, %472 : vector<1x512xf32>
    %475 = arith.divf %473, %474 : vector<1x512xf32>
    %476 = vector.extract_strided_slice %470 {offsets = [0, 256], sizes = [1, 128], strides = [1, 1]} : vector<1x512xf32> to vector<1x128xf32>
    %477 = math.tanh %476 : vector<1x128xf32>
    %478 = vector.extract_strided_slice %475 {offsets = [0, 128], sizes = [1, 128], strides = [1, 1]} : vector<1x512xf32> to vector<1x128xf32>
    %479 = arith.mulf %478, %441 : vector<1x128xf32>
    %480 = vector.extract_strided_slice %475 {offsets = [0, 0], sizes = [1, 128], strides = [1, 1]} : vector<1x512xf32> to vector<1x128xf32>
    %481 = arith.mulf %480, %477 : vector<1x128xf32>
    %482 = arith.addf %479, %481 : vector<1x128xf32>
    %483 = vector.extract_strided_slice %475 {offsets = [0, 384], sizes = [1, 128], strides = [1, 1]} : vector<1x512xf32> to vector<1x128xf32>
    %484 = math.tanh %482 : vector<1x128xf32>
    %485 = arith.mulf %483, %484 : vector<1x128xf32>
    %cst_100 = arith.constant dense<0.000000e+00> : vector<1x512xf32>
    %486 = tpu.matmul %461, %7, %cst_100 {dimension_numbers = #tpu.dot_dimension_numbers<[1], [0], [0], [1], [0, 0, 1, 1], [], []>} : vector<1x128xf32>, vector<128x512xf32>, vector<1x512xf32> -> vector<1x512xf32>
    %487 = arith.addf %362, %486 : vector<1x512xf32>
    %488 = arith.negf %487 : vector<1x512xf32>
    %489 = math.exp %488 : vector<1x512xf32>
    %cst_101 = arith.constant 1.000000e+00 : f32
    %490 = vector.broadcast %cst_101 : f32 to vector<1x512xf32>
    %491 = arith.addf %490, %489 : vector<1x512xf32>
    %492 = arith.divf %490, %491 : vector<1x512xf32>
    %493 = vector.extract_strided_slice %487 {offsets = [0, 256], sizes = [1, 128], strides = [1, 1]} : vector<1x512xf32> to vector<1x128xf32>
    %494 = math.tanh %493 : vector<1x128xf32>
    %495 = vector.extract_strided_slice %492 {offsets = [0, 128], sizes = [1, 128], strides = [1, 1]} : vector<1x512xf32> to vector<1x128xf32>
    %496 = arith.mulf %495, %458 : vector<1x128xf32>
    %497 = vector.extract_strided_slice %492 {offsets = [0, 0], sizes = [1, 128], strides = [1, 1]} : vector<1x512xf32> to vector<1x128xf32>
    %498 = arith.mulf %497, %494 : vector<1x128xf32>
    %499 = arith.addf %496, %498 : vector<1x128xf32>
    %500 = vector.extract_strided_slice %492 {offsets = [0, 384], sizes = [1, 128], strides = [1, 1]} : vector<1x512xf32> to vector<1x128xf32>
    %501 = math.tanh %499 : vector<1x128xf32>
    %502 = arith.mulf %500, %501 : vector<1x128xf32>
    %503 = arith.negf %502 : vector<1x128xf32>
    %504 = math.exp %503 : vector<1x128xf32>
    %cst_102 = arith.constant 1.000000e+00 : f32
    %505 = vector.broadcast %cst_102 : f32 to vector<1x128xf32>
    %506 = arith.addf %505, %504 : vector<1x128xf32>
    %507 = arith.divf %505, %506 : vector<1x128xf32>
    %cst_103 = arith.constant dense<0.000000e+00> : vector<1x512xf32>
    %508 = tpu.matmul %507, %9, %cst_103 {dimension_numbers = #tpu.dot_dimension_numbers<[1], [0], [0], [1], [0, 0, 1, 1], [], []>} : vector<1x128xf32>, vector<128x512xf32>, vector<1x512xf32> -> vector<1x512xf32>
    %509 = arith.addf %508, %11 : vector<1x512xf32>
    %cst_104 = arith.constant dense<0.000000e+00> : vector<1x512xf32>
    %510 = tpu.matmul %485, %10, %cst_104 {dimension_numbers = #tpu.dot_dimension_numbers<[1], [0], [0], [1], [0, 0, 1, 1], [], []>} : vector<1x128xf32>, vector<128x512xf32>, vector<1x512xf32> -> vector<1x512xf32>
    %511 = arith.addf %509, %510 : vector<1x512xf32>
    %512 = arith.negf %511 : vector<1x512xf32>
    %513 = math.exp %512 : vector<1x512xf32>
    %cst_105 = arith.constant 1.000000e+00 : f32
    %514 = vector.broadcast %cst_105 : f32 to vector<1x512xf32>
    %515 = arith.addf %514, %513 : vector<1x512xf32>
    %516 = arith.divf %514, %515 : vector<1x512xf32>
    %517 = vector.extract_strided_slice %511 {offsets = [0, 256], sizes = [1, 128], strides = [1, 1]} : vector<1x512xf32> to vector<1x128xf32>
    %518 = math.tanh %517 : vector<1x128xf32>
    %519 = vector.extract_strided_slice %516 {offsets = [0, 128], sizes = [1, 128], strides = [1, 1]} : vector<1x512xf32> to vector<1x128xf32>
    %520 = arith.mulf %519, %482 : vector<1x128xf32>
    %521 = vector.extract_strided_slice %516 {offsets = [0, 0], sizes = [1, 128], strides = [1, 1]} : vector<1x512xf32> to vector<1x128xf32>
    %522 = arith.mulf %521, %518 : vector<1x128xf32>
    %523 = arith.addf %520, %522 : vector<1x128xf32>
    %524 = vector.extract_strided_slice %516 {offsets = [0, 384], sizes = [1, 128], strides = [1, 1]} : vector<1x512xf32> to vector<1x128xf32>
    %525 = math.tanh %523 : vector<1x128xf32>
    %526 = arith.mulf %524, %525 : vector<1x128xf32>
    %cst_106 = arith.constant dense<0.000000e+00> : vector<1x512xf32>
    %527 = tpu.matmul %502, %7, %cst_106 {dimension_numbers = #tpu.dot_dimension_numbers<[1], [0], [0], [1], [0, 0, 1, 1], [], []>} : vector<1x128xf32>, vector<128x512xf32>, vector<1x512xf32> -> vector<1x512xf32>
    %528 = arith.addf %362, %527 : vector<1x512xf32>
    %529 = arith.negf %528 : vector<1x512xf32>
    %530 = math.exp %529 : vector<1x512xf32>
    %cst_107 = arith.constant 1.000000e+00 : f32
    %531 = vector.broadcast %cst_107 : f32 to vector<1x512xf32>
    %532 = arith.addf %531, %530 : vector<1x512xf32>
    %533 = arith.divf %531, %532 : vector<1x512xf32>
    %534 = vector.extract_strided_slice %528 {offsets = [0, 256], sizes = [1, 128], strides = [1, 1]} : vector<1x512xf32> to vector<1x128xf32>
    %535 = math.tanh %534 : vector<1x128xf32>
    %536 = vector.extract_strided_slice %533 {offsets = [0, 128], sizes = [1, 128], strides = [1, 1]} : vector<1x512xf32> to vector<1x128xf32>
    %537 = arith.mulf %536, %499 : vector<1x128xf32>
    %538 = vector.extract_strided_slice %533 {offsets = [0, 0], sizes = [1, 128], strides = [1, 1]} : vector<1x512xf32> to vector<1x128xf32>
    %539 = arith.mulf %538, %535 : vector<1x128xf32>
    %540 = arith.addf %537, %539 : vector<1x128xf32>
    %541 = vector.extract_strided_slice %533 {offsets = [0, 384], sizes = [1, 128], strides = [1, 1]} : vector<1x512xf32> to vector<1x128xf32>
    %542 = math.tanh %540 : vector<1x128xf32>
    %543 = arith.mulf %541, %542 : vector<1x128xf32>
    %544 = arith.negf %543 : vector<1x128xf32>
    %545 = math.exp %544 : vector<1x128xf32>
    %cst_108 = arith.constant 1.000000e+00 : f32
    %546 = vector.broadcast %cst_108 : f32 to vector<1x128xf32>
    %547 = arith.addf %546, %545 : vector<1x128xf32>
    %548 = arith.divf %546, %547 : vector<1x128xf32>
    %cst_109 = arith.constant dense<0.000000e+00> : vector<1x512xf32>
    %549 = tpu.matmul %548, %9, %cst_109 {dimension_numbers = #tpu.dot_dimension_numbers<[1], [0], [0], [1], [0, 0, 1, 1], [], []>} : vector<1x128xf32>, vector<128x512xf32>, vector<1x512xf32> -> vector<1x512xf32>
    %550 = arith.addf %549, %11 : vector<1x512xf32>
    %cst_110 = arith.constant dense<0.000000e+00> : vector<1x512xf32>
    %551 = tpu.matmul %526, %10, %cst_110 {dimension_numbers = #tpu.dot_dimension_numbers<[1], [0], [0], [1], [0, 0, 1, 1], [], []>} : vector<1x128xf32>, vector<128x512xf32>, vector<1x512xf32> -> vector<1x512xf32>
    %552 = arith.addf %550, %551 : vector<1x512xf32>
    %553 = arith.negf %552 : vector<1x512xf32>
    %554 = math.exp %553 : vector<1x512xf32>
    %cst_111 = arith.constant 1.000000e+00 : f32
    %555 = vector.broadcast %cst_111 : f32 to vector<1x512xf32>
    %556 = arith.addf %555, %554 : vector<1x512xf32>
    %557 = arith.divf %555, %556 : vector<1x512xf32>
    %558 = vector.extract_strided_slice %552 {offsets = [0, 256], sizes = [1, 128], strides = [1, 1]} : vector<1x512xf32> to vector<1x128xf32>
    %559 = math.tanh %558 : vector<1x128xf32>
    %560 = vector.extract_strided_slice %557 {offsets = [0, 128], sizes = [1, 128], strides = [1, 1]} : vector<1x512xf32> to vector<1x128xf32>
    %561 = arith.mulf %560, %523 : vector<1x128xf32>
    %562 = vector.extract_strided_slice %557 {offsets = [0, 0], sizes = [1, 128], strides = [1, 1]} : vector<1x512xf32> to vector<1x128xf32>
    %563 = arith.mulf %562, %559 : vector<1x128xf32>
    %564 = arith.addf %561, %563 : vector<1x128xf32>
    %565 = vector.extract_strided_slice %557 {offsets = [0, 384], sizes = [1, 128], strides = [1, 1]} : vector<1x512xf32> to vector<1x128xf32>
    %566 = math.tanh %564 : vector<1x128xf32>
    %567 = arith.mulf %565, %566 : vector<1x128xf32>
    %cst_112 = arith.constant dense<0.000000e+00> : vector<1x512xf32>
    %568 = tpu.matmul %543, %7, %cst_112 {dimension_numbers = #tpu.dot_dimension_numbers<[1], [0], [0], [1], [0, 0, 1, 1], [], []>} : vector<1x128xf32>, vector<128x512xf32>, vector<1x512xf32> -> vector<1x512xf32>
    %569 = arith.addf %362, %568 : vector<1x512xf32>
    %570 = arith.negf %569 : vector<1x512xf32>
    %571 = math.exp %570 : vector<1x512xf32>
    %cst_113 = arith.constant 1.000000e+00 : f32
    %572 = vector.broadcast %cst_113 : f32 to vector<1x512xf32>
    %573 = arith.addf %572, %571 : vector<1x512xf32>
    %574 = arith.divf %572, %573 : vector<1x512xf32>
    %575 = vector.extract_strided_slice %569 {offsets = [0, 256], sizes = [1, 128], strides = [1, 1]} : vector<1x512xf32> to vector<1x128xf32>
    %576 = math.tanh %575 : vector<1x128xf32>
    %577 = vector.extract_strided_slice %574 {offsets = [0, 128], sizes = [1, 128], strides = [1, 1]} : vector<1x512xf32> to vector<1x128xf32>
    %578 = arith.mulf %577, %540 : vector<1x128xf32>
    %579 = vector.extract_strided_slice %574 {offsets = [0, 0], sizes = [1, 128], strides = [1, 1]} : vector<1x512xf32> to vector<1x128xf32>
    %580 = arith.mulf %579, %576 : vector<1x128xf32>
    %581 = arith.addf %578, %580 : vector<1x128xf32>
    %582 = vector.extract_strided_slice %574 {offsets = [0, 384], sizes = [1, 128], strides = [1, 1]} : vector<1x512xf32> to vector<1x128xf32>
    %583 = math.tanh %581 : vector<1x128xf32>
    %584 = arith.mulf %582, %583 : vector<1x128xf32>
    %585 = arith.negf %584 : vector<1x128xf32>
    %586 = math.exp %585 : vector<1x128xf32>
    %cst_114 = arith.constant 1.000000e+00 : f32
    %587 = vector.broadcast %cst_114 : f32 to vector<1x128xf32>
    %588 = arith.addf %587, %586 : vector<1x128xf32>
    %589 = arith.divf %587, %588 : vector<1x128xf32>
    %cst_115 = arith.constant dense<0.000000e+00> : vector<1x512xf32>
    %590 = tpu.matmul %589, %9, %cst_115 {dimension_numbers = #tpu.dot_dimension_numbers<[1], [0], [0], [1], [0, 0, 1, 1], [], []>} : vector<1x128xf32>, vector<128x512xf32>, vector<1x512xf32> -> vector<1x512xf32>
    %591 = arith.addf %590, %11 : vector<1x512xf32>
    %cst_116 = arith.constant dense<0.000000e+00> : vector<1x512xf32>
    %592 = tpu.matmul %567, %10, %cst_116 {dimension_numbers = #tpu.dot_dimension_numbers<[1], [0], [0], [1], [0, 0, 1, 1], [], []>} : vector<1x128xf32>, vector<128x512xf32>, vector<1x512xf32> -> vector<1x512xf32>
    %593 = arith.addf %591, %592 : vector<1x512xf32>
    %594 = arith.negf %593 : vector<1x512xf32>
    %595 = math.exp %594 : vector<1x512xf32>
    %cst_117 = arith.constant 1.000000e+00 : f32
    %596 = vector.broadcast %cst_117 : f32 to vector<1x512xf32>
    %597 = arith.addf %596, %595 : vector<1x512xf32>
    %598 = arith.divf %596, %597 : vector<1x512xf32>
    %599 = vector.extract_strided_slice %593 {offsets = [0, 256], sizes = [1, 128], strides = [1, 1]} : vector<1x512xf32> to vector<1x128xf32>
    %600 = math.tanh %599 : vector<1x128xf32>
    %601 = vector.extract_strided_slice %598 {offsets = [0, 128], sizes = [1, 128], strides = [1, 1]} : vector<1x512xf32> to vector<1x128xf32>
    %602 = arith.mulf %601, %564 : vector<1x128xf32>
    %603 = vector.extract_strided_slice %598 {offsets = [0, 0], sizes = [1, 128], strides = [1, 1]} : vector<1x512xf32> to vector<1x128xf32>
    %604 = arith.mulf %603, %600 : vector<1x128xf32>
    %605 = arith.addf %602, %604 : vector<1x128xf32>
    %606 = vector.extract_strided_slice %598 {offsets = [0, 384], sizes = [1, 128], strides = [1, 1]} : vector<1x512xf32> to vector<1x128xf32>
    %607 = math.tanh %605 : vector<1x128xf32>
    %608 = arith.mulf %606, %607 : vector<1x128xf32>
    %cst_118 = arith.constant dense<0.000000e+00> : vector<1x512xf32>
    %609 = tpu.matmul %584, %7, %cst_118 {dimension_numbers = #tpu.dot_dimension_numbers<[1], [0], [0], [1], [0, 0, 1, 1], [], []>} : vector<1x128xf32>, vector<128x512xf32>, vector<1x512xf32> -> vector<1x512xf32>
    %610 = arith.addf %362, %609 : vector<1x512xf32>
    %611 = arith.negf %610 : vector<1x512xf32>
    %612 = math.exp %611 : vector<1x512xf32>
    %cst_119 = arith.constant 1.000000e+00 : f32
    %613 = vector.broadcast %cst_119 : f32 to vector<1x512xf32>
    %614 = arith.addf %613, %612 : vector<1x512xf32>
    %615 = arith.divf %613, %614 : vector<1x512xf32>
    %616 = vector.extract_strided_slice %610 {offsets = [0, 256], sizes = [1, 128], strides = [1, 1]} : vector<1x512xf32> to vector<1x128xf32>
    %617 = math.tanh %616 : vector<1x128xf32>
    %618 = vector.extract_strided_slice %615 {offsets = [0, 128], sizes = [1, 128], strides = [1, 1]} : vector<1x512xf32> to vector<1x128xf32>
    %619 = arith.mulf %618, %581 : vector<1x128xf32>
    %620 = vector.extract_strided_slice %615 {offsets = [0, 0], sizes = [1, 128], strides = [1, 1]} : vector<1x512xf32> to vector<1x128xf32>
    %621 = arith.mulf %620, %617 : vector<1x128xf32>
    %622 = arith.addf %619, %621 : vector<1x128xf32>
    %623 = vector.extract_strided_slice %615 {offsets = [0, 384], sizes = [1, 128], strides = [1, 1]} : vector<1x512xf32> to vector<1x128xf32>
    %624 = math.tanh %622 : vector<1x128xf32>
    %625 = arith.mulf %623, %624 : vector<1x128xf32>
    %626 = arith.negf %625 : vector<1x128xf32>
    %627 = math.exp %626 : vector<1x128xf32>
    %cst_120 = arith.constant 1.000000e+00 : f32
    %628 = vector.broadcast %cst_120 : f32 to vector<1x128xf32>
    %629 = arith.addf %628, %627 : vector<1x128xf32>
    %630 = arith.divf %628, %629 : vector<1x128xf32>
    %cst_121 = arith.constant dense<0.000000e+00> : vector<1x512xf32>
    %631 = tpu.matmul %630, %9, %cst_121 {dimension_numbers = #tpu.dot_dimension_numbers<[1], [0], [0], [1], [0, 0, 1, 1], [], []>} : vector<1x128xf32>, vector<128x512xf32>, vector<1x512xf32> -> vector<1x512xf32>
    %632 = arith.addf %631, %11 : vector<1x512xf32>
    %cst_122 = arith.constant dense<0.000000e+00> : vector<1x512xf32>
    %633 = tpu.matmul %608, %10, %cst_122 {dimension_numbers = #tpu.dot_dimension_numbers<[1], [0], [0], [1], [0, 0, 1, 1], [], []>} : vector<1x128xf32>, vector<128x512xf32>, vector<1x512xf32> -> vector<1x512xf32>
    %634 = arith.addf %632, %633 : vector<1x512xf32>
    %635 = arith.negf %634 : vector<1x512xf32>
    %636 = math.exp %635 : vector<1x512xf32>
    %cst_123 = arith.constant 1.000000e+00 : f32
    %637 = vector.broadcast %cst_123 : f32 to vector<1x512xf32>
    %638 = arith.addf %637, %636 : vector<1x512xf32>
    %639 = arith.divf %637, %638 : vector<1x512xf32>
    %640 = vector.extract_strided_slice %634 {offsets = [0, 256], sizes = [1, 128], strides = [1, 1]} : vector<1x512xf32> to vector<1x128xf32>
    %641 = math.tanh %640 : vector<1x128xf32>
    %642 = vector.extract_strided_slice %639 {offsets = [0, 128], sizes = [1, 128], strides = [1, 1]} : vector<1x512xf32> to vector<1x128xf32>
    %643 = arith.mulf %642, %605 : vector<1x128xf32>
    %644 = vector.extract_strided_slice %639 {offsets = [0, 0], sizes = [1, 128], strides = [1, 1]} : vector<1x512xf32> to vector<1x128xf32>
    %645 = arith.mulf %644, %641 : vector<1x128xf32>
    %646 = arith.addf %643, %645 : vector<1x128xf32>
    %647 = vector.extract_strided_slice %639 {offsets = [0, 384], sizes = [1, 128], strides = [1, 1]} : vector<1x512xf32> to vector<1x128xf32>
    %648 = math.tanh %646 : vector<1x128xf32>
    %649 = arith.mulf %647, %648 : vector<1x128xf32>
    %cst_124 = arith.constant dense<0.000000e+00> : vector<1x512xf32>
    %650 = tpu.matmul %625, %7, %cst_124 {dimension_numbers = #tpu.dot_dimension_numbers<[1], [0], [0], [1], [0, 0, 1, 1], [], []>} : vector<1x128xf32>, vector<128x512xf32>, vector<1x512xf32> -> vector<1x512xf32>
    %651 = arith.addf %362, %650 : vector<1x512xf32>
    %652 = arith.negf %651 : vector<1x512xf32>
    %653 = math.exp %652 : vector<1x512xf32>
    %cst_125 = arith.constant 1.000000e+00 : f32
    %654 = vector.broadcast %cst_125 : f32 to vector<1x512xf32>
    %655 = arith.addf %654, %653 : vector<1x512xf32>
    %656 = arith.divf %654, %655 : vector<1x512xf32>
    %657 = vector.extract_strided_slice %651 {offsets = [0, 256], sizes = [1, 128], strides = [1, 1]} : vector<1x512xf32> to vector<1x128xf32>
    %658 = math.tanh %657 : vector<1x128xf32>
    %659 = vector.extract_strided_slice %656 {offsets = [0, 128], sizes = [1, 128], strides = [1, 1]} : vector<1x512xf32> to vector<1x128xf32>
    %660 = arith.mulf %659, %622 : vector<1x128xf32>
    %661 = vector.extract_strided_slice %656 {offsets = [0, 0], sizes = [1, 128], strides = [1, 1]} : vector<1x512xf32> to vector<1x128xf32>
    %662 = arith.mulf %661, %658 : vector<1x128xf32>
    %663 = arith.addf %660, %662 : vector<1x128xf32>
    %664 = vector.extract_strided_slice %656 {offsets = [0, 384], sizes = [1, 128], strides = [1, 1]} : vector<1x512xf32> to vector<1x128xf32>
    %665 = math.tanh %663 : vector<1x128xf32>
    %666 = arith.mulf %664, %665 : vector<1x128xf32>
    %667 = arith.negf %666 : vector<1x128xf32>
    %668 = math.exp %667 : vector<1x128xf32>
    %cst_126 = arith.constant 1.000000e+00 : f32
    %669 = vector.broadcast %cst_126 : f32 to vector<1x128xf32>
    %670 = arith.addf %669, %668 : vector<1x128xf32>
    %671 = arith.divf %669, %670 : vector<1x128xf32>
    %cst_127 = arith.constant dense<0.000000e+00> : vector<1x512xf32>
    %672 = tpu.matmul %671, %9, %cst_127 {dimension_numbers = #tpu.dot_dimension_numbers<[1], [0], [0], [1], [0, 0, 1, 1], [], []>} : vector<1x128xf32>, vector<128x512xf32>, vector<1x512xf32> -> vector<1x512xf32>
    %673 = arith.addf %672, %11 : vector<1x512xf32>
    %cst_128 = arith.constant dense<0.000000e+00> : vector<1x512xf32>
    %674 = tpu.matmul %649, %10, %cst_128 {dimension_numbers = #tpu.dot_dimension_numbers<[1], [0], [0], [1], [0, 0, 1, 1], [], []>} : vector<1x128xf32>, vector<128x512xf32>, vector<1x512xf32> -> vector<1x512xf32>
    %675 = arith.addf %673, %674 : vector<1x512xf32>
    %676 = arith.negf %675 : vector<1x512xf32>
    %677 = math.exp %676 : vector<1x512xf32>
    %cst_129 = arith.constant 1.000000e+00 : f32
    %678 = vector.broadcast %cst_129 : f32 to vector<1x512xf32>
    %679 = arith.addf %678, %677 : vector<1x512xf32>
    %680 = arith.divf %678, %679 : vector<1x512xf32>
    %681 = vector.extract_strided_slice %675 {offsets = [0, 256], sizes = [1, 128], strides = [1, 1]} : vector<1x512xf32> to vector<1x128xf32>
    %682 = math.tanh %681 : vector<1x128xf32>
    %683 = vector.extract_strided_slice %680 {offsets = [0, 128], sizes = [1, 128], strides = [1, 1]} : vector<1x512xf32> to vector<1x128xf32>
    %684 = arith.mulf %683, %646 : vector<1x128xf32>
    %685 = vector.extract_strided_slice %680 {offsets = [0, 0], sizes = [1, 128], strides = [1, 1]} : vector<1x512xf32> to vector<1x128xf32>
    %686 = arith.mulf %685, %682 : vector<1x128xf32>
    %687 = arith.addf %684, %686 : vector<1x128xf32>
    %688 = vector.extract_strided_slice %680 {offsets = [0, 384], sizes = [1, 128], strides = [1, 1]} : vector<1x512xf32> to vector<1x128xf32>
    %689 = math.tanh %687 : vector<1x128xf32>
    %690 = arith.mulf %688, %689 : vector<1x128xf32>
    %691 = tpu.concatenate %403, %444, %485, %526, %567, %608, %649, %690 in 0 : vector<1x128xf32>, vector<1x128xf32>, vector<1x128xf32>, vector<1x128xf32>, vector<1x128xf32>, vector<1x128xf32>, vector<1x128xf32>, vector<1x128xf32> -> vector<8x128xf32>
    %c0_130 = arith.constant 0 : index
    %c0_131 = arith.constant 0 : index
    %692 = vector.load %arg13[%c0_130, %c0_131] : memref<128x16xf32, #tpu.memory_space<vmem>>, vector<128x16xf32>
    %cst_132 = arith.constant dense<0.000000e+00> : vector<8x16xf32>
    %693 = tpu.matmul %691, %692, %cst_132 {dimension_numbers = #tpu.dot_dimension_numbers<[1], [0], [0], [1], [0, 0, 1, 1], [], []>} : vector<8x128xf32>, vector<128x16xf32>, vector<8x16xf32> -> vector<8x16xf32>
    %c0_133 = arith.constant 0 : index
    %c0_134 = arith.constant 0 : index
    %694 = vector.load %arg14[%c0_133, %c0_134] : memref<8x16xf32, #tpu.memory_space<vmem>>, vector<8x16xf32>
    tpu.vector_store %arg14[%c0_133, %c0_134], %693 {strides = array<i32>} : memref<8x16xf32, #tpu.memory_space<vmem>>, vector<8x16xf32>,
    return
  }
}

</mosaic_0001>

<bundles_post_ra>
// kernel: tpu_custom_call.1
= control target key start
LH: loop header
LB: loop body
LE: loop exit
PB: predicated region body
PF: predicated region fallthrough
CT: control target
= control target key end

     0   :  { %19 = vsyncpa [#allocation3], 0  ;;  %s16224_s0 = inlined_call_operand.vmem [shape: f32[8,128], index: 0, kind: input, shape index: {}]   ;;  %s16225_s1 = inlined_call_operand.hbm [shape: f32[128,512], index: 1, kind: input, shape index: {}]   ;;  %s16226_s2 = inlined_call_operand.hbm [shape: f32[128,512], index: 2, kind: input, shape index: {}]   ;;  %s16227_s3 = inlined_call_operand.vmem [shape: f32[1,512], index: 3, kind: input, shape index: {}]   ;;  %s16228_s4 = inlined_call_operand.hbm [shape: f32[128,512], index: 4, kind: input, shape index: {}]   ;;  %s16229_s5 = inlined_call_operand.hbm [shape: f32[128,512], index: 5, kind: input, shape index: {}]   ;;  %s16230_s6 = inlined_call_operand.vmem [shape: f32[1,512], index: 6, kind: input, shape index: {}]   ;;  %s16231_s7 = inlined_call_operand.hbm [shape: f32[128,512], index: 7, kind: input, shape index: {}]   ;;  %s16232_s8 = inlined_call_operand.hbm [shape: f32[128,512], index: 8, kind: input, shape index: {}]   ;;  %s16233_s9 = inlined_call_operand.vmem [shape: f32[1,512], index: 9, kind: input, shape index: {}]   ;;  %s16234_s10 = inlined_call_operand.hbm [shape: f32[128,512], index: 10, kind: input, shape index: {}]   ;;  %s16235_s11 = inlined_call_operand.hbm [shape: f32[128,512], index: 11, kind: input, shape index: {}]   ;;  %s16236_s12 = inlined_call_operand.vmem [shape: f32[1,512], index: 12, kind: input, shape index: {}]   ;;  %s16237_s13 = inlined_call_operand.vmem [shape: f32[128,16], index: 13, kind: input, shape index: {}]   ;;  %s16238_s14 = inlined_call_operand.hbm [shape: f32[8,16], index: 14, kind: output, shape index: {}]  }
   0x1   :  { %20 = vsyncpa [#allocation6], 0 }
   0x2   :  { %21 = vsyncpa [#allocation9], 0 }
   0x3   :  { %22 = vsyncpa [#allocation12], 0 }
   0x4   :  { %23 = vsyncpa [#allocation15], 0 }
   0x5   :  { %24 = vsyncpa [#allocation4], 0  ;;  %s13455_s29 = smov [#allocation5]   ;;  %s13456_s15 = smov [#allocation8]  }
   0x6   :  { %s44_s30 = sshll.u32 %s13455_s29, 4  ;;  %s70_s16 = sshll.u32 %s13456_s15, 4  ;;  %s45_s30 = int_to_ptr.vmem [resolvable:$true] %s44_s30  ;;  %s13544_s16 = int_to_ptr.vmem [resolvable:$true] %s70_s16 }
   0x7   :  { %s13245_s19 = scalar_lea.hbm %s16226_s2, 8192 }
   0x8   :  { %p13246_p0 = scmp.ne.s32.totalorder %s16226_s2, %s13245_s19  ;;  %p13249_p1 = scmp.lt.u32.totalorder %s13245_s19, %s16226_s2 }
   0xa   :  { %p13251_p2 = pnand %p13249_p1, %p13246_p0 }
   0xc   :  { %13254 = shalt.err (!%p13251_p2)
}
   0xd   :  { %s13255_s24 = scalar_lea.vmem %s45_s30, 8192  ;;  %p13260_p4 = scmp.lt.s32.totalorder %s45_s30, %s45_s30 }
   0xe   :  { %p13256_p3 = scmp.ne.s32.totalorder %s45_s30, %s13255_s24  ;;  %p13261_p5 = scmp.lt.s32.totalorder %s13255_s24, %s13255_s24 }
  0x10   :  { %p13262_p6 = por %p13261_p5, %p13260_p4 }
  0x12   :  { %p13263_p7 = pnand %p13262_p6, %p13256_p3 }
  0x14   :  { %13266 = shalt.err (!%p13263_p7)
}
  0x15   :  { %s13457_s25 = smov 512   ;;  %s13458_s26 = smov 32  }
  0x16   :  { %50 = dma.hbm_to_vmem [thread:$0]  %s16226_s2, 8192, %s45_s30, [#allocation6], %s13457_s25, %s13457_s25, %s13458_s26  }
  0x17   :  { %s13267_s17 = scalar_lea.hbm %s16229_s5, 8192 }
  0x18   :  { %p13268_p8 = scmp.ne.s32.totalorder %s16229_s5, %s13267_s17  ;;  %p13271_p9 = scmp.lt.u32.totalorder %s13267_s17, %s16229_s5 }
  0x1a   :  { %p13273_p10 = pnand %p13271_p9, %p13268_p8 }
  0x1c   :  { %13276 = shalt.err (!%p13273_p10)
}
  0x1d   :  { %s13277_s22 = scalar_lea.vmem %s13544_s16, 8192  ;;  %p13282_p12 = scmp.lt.s32.totalorder %s13544_s16, %s13544_s16 }
  0x1e   :  { %p13278_p11 = scmp.ne.s32.totalorder %s13544_s16, %s13277_s22  ;;  %p13283_p13 = scmp.lt.s32.totalorder %s13277_s22, %s13277_s22 }
  0x20   :  { %p13284_p0 = por %p13283_p13, %p13282_p12 }
  0x22   :  { %p13285_p1 = pnand %p13284_p0, %p13278_p11 }
  0x24   :  { %13288 = shalt.err (!%p13285_p1)
}
  0x25   :  { %76 = dma.hbm_to_vmem [thread:$0]  %s16229_s5, 8192, %s13544_s16, [#allocation9], %s13457_s25, %s13457_s25, %s13458_s26  }
  0x26   :  { %s13459_s23 = smov [#allocation11]   ;;  %s13460_s27 = smov [#allocation2]  }
  0x27   :  { %s96_s24 = sshll.u32 %s13459_s23, 4  ;;  %s32_s28 = sshll.u32 %s13460_s27, 4  ;;  %s97_s24 = int_to_ptr.vmem [resolvable:$true] %s96_s24  ;;  %s13581_s28 = int_to_ptr.vmem [resolvable:$true] %s32_s28 }
  0x28   :  { %s13289_s17 = scalar_lea.hbm %s16232_s8, 8192 }
  0x29   :  { %p13290_p2 = scmp.ne.s32.totalorder %s16232_s8, %s13289_s17  ;;  %p13293_p3 = scmp.lt.u32.totalorder %s13289_s17, %s16232_s8 }
  0x2b   :  { %p13295_p4 = pnand %p13293_p3, %p13290_p2 }
  0x2d   :  { %13298 = shalt.err (!%p13295_p4)
}
  0x2e   :  { %s13299_s5 = scalar_lea.vmem %s97_s24, 8192  ;;  %p13304_p6 = scmp.lt.s32.totalorder %s97_s24, %s97_s24 }
  0x2f   :  { %p13300_p5 = scmp.ne.s32.totalorder %s97_s24, %s13299_s5  ;;  %p13305_p7 = scmp.lt.s32.totalorder %s13299_s5, %s13299_s5 }
  0x31   :  { %p13306_p8 = por %p13305_p7, %p13304_p6 }
  0x33   :  { %p13307_p9 = pnand %p13306_p8, %p13300_p5 }
  0x35   :  { %13310 = shalt.err (!%p13307_p9)
}
  0x36   :  { %102 = dma.hbm_to_vmem [thread:$0]  %s16232_s8, 8192, %s97_s24, [#allocation12], %s13457_s25, %s13457_s25, %s13458_s26  }
  0x37   :  { %s13311_s23 = scalar_lea.hbm %s16225_s1, 8192 }
  0x38   :  { %p13312_p10 = scmp.ne.s32.totalorder %s16225_s1, %s13311_s23  ;;  %p13315_p11 = scmp.lt.u32.totalorder %s13311_s23, %s16225_s1 }
  0x3a   :  { %p13317_p12 = pnand %p13315_p11, %p13312_p10 }
  0x3c   :  { %13320 = shalt.err (!%p13317_p12)
}
  0x3d   :  { %s13321_s18 = scalar_lea.vmem %s13581_s28, 8192  ;;  %p13326_p0 = scmp.lt.s32.totalorder %s13581_s28, %s13581_s28 }
  0x3e   :  { %p13322_p13 = scmp.ne.s32.totalorder %s13581_s28, %s13321_s18  ;;  %p13327_p1 = scmp.lt.s32.totalorder %s13321_s18, %s13321_s18 }
  0x40   :  { %p13328_p2 = por %p13327_p1, %p13326_p0 }
  0x42   :  { %p13329_p3 = pnand %p13328_p2, %p13322_p13 }
  0x44   :  { %13332 = shalt.err (!%p13329_p3)
}
  0x45   :  { %38 = dma.hbm_to_vmem [thread:$0]  %s16225_s1, 8192, %s13581_s28, [#allocation3], %s13457_s25, %s13457_s25, %s13458_s26  }
  0x46   :  { %s13461_s19 = smov [#allocation7]   ;;  %s13462_s21 = smov [#allocation10]  }
  0x47   :  { %s58_s20 = sshll.u32 %s13461_s19, 4  ;;  %s84_s5 = sshll.u32 %s13462_s21, 4  ;;  %s59_s20 = int_to_ptr.vmem [resolvable:$true] %s58_s20  ;;  %s13618_s5 = int_to_ptr.vmem [resolvable:$true] %s84_s5 }
  0x48   :  { %s13333_s2 = scalar_lea.hbm %s16228_s4, 8192 }
  0x49   :  { %p13334_p4 = scmp.ne.s32.totalorder %s16228_s4, %s13333_s2  ;;  %p13337_p5 = scmp.lt.u32.totalorder %s13333_s2, %s16228_s4 }
  0x4b   :  { %p13339_p6 = pnand %p13337_p5, %p13334_p4 }
  0x4d   :  { %13342 = shalt.err (!%p13339_p6)
}
  0x4e   :  { %s13343_s1 = scalar_lea.vmem %s59_s20, 8192  ;;  %p13348_p8 = scmp.lt.s32.totalorder %s59_s20, %s59_s20 }
  0x4f   :  { %p13344_p7 = scmp.ne.s32.totalorder %s59_s20, %s13343_s1  ;;  %p13349_p9 = scmp.lt.s32.totalorder %s13343_s1, %s13343_s1 }
  0x51   :  { %p13350_p10 = por %p13349_p9, %p13348_p8 }
  0x53   :  { %p13351_p11 = pnand %p13350_p10, %p13344_p7 }
  0x55   :  { %13354 = shalt.err (!%p13351_p11)
}
  0x56   :  { %64 = dma.hbm_to_vmem [thread:$0]  %s16228_s4, 8192, %s59_s20, [#allocation6], %s13457_s25, %s13457_s25, %s13458_s26  }
  0x57   :  { %s13355_s8 = scalar_lea.hbm %s16231_s7, 8192 }
  0x58   :  { %p13356_p12 = scmp.ne.s32.totalorder %s16231_s7, %s13355_s8  ;;  %p13359_p13 = scmp.lt.u32.totalorder %s13355_s8, %s16231_s7 }
  0x5a   :  { %p13361_p0 = pnand %p13359_p13, %p13356_p12 }
  0x5c   :  { %13364 = shalt.err (!%p13361_p0)
}
  0x5d   :  { %s13365_s22 = scalar_lea.vmem %s13618_s5, 8192  ;;  %p13370_p2 = scmp.lt.s32.totalorder %s13618_s5, %s13618_s5 }
  0x5e   :  { %p13366_p1 = scmp.ne.s32.totalorder %s13618_s5, %s13365_s22  ;;  %p13371_p3 = scmp.lt.s32.totalorder %s13365_s22, %s13365_s22 }
  0x60   :  { %p13372_p4 = por %p13371_p3, %p13370_p2 }
  0x62   :  { %p13373_p5 = pnand %p13372_p4, %p13366_p1 }
  0x64   :  { %13376 = shalt.err (!%p13373_p5)
}
  0x65   :  { %90 = dma.hbm_to_vmem [thread:$0]  %s16231_s7, 8192, %s13618_s5, [#allocation9], %s13457_s25, %s13457_s25, %s13458_s26  }
  0x66   :  { %s13463_s2 = smov [#allocation13]   ;;  %s13464_s23 = smov [#allocation14]  }
  0x67   :  { %s110_s30 = sshll.u32 %s13463_s2, 4  ;;  %s122_s27 = sshll.u32 %s13464_s23, 4  ;;  %s111_s30 = int_to_ptr.vmem [resolvable:$true] %s110_s30  ;;  %s13655_s27 = int_to_ptr.vmem [resolvable:$true] %s122_s27 }
  0x68   :  { %s13377_s28 = scalar_lea.hbm %s16234_s10, 8192 }
  0x69   :  { %p13378_p6 = scmp.ne.s32.totalorder %s16234_s10, %s13377_s28  ;;  %p13381_p7 = scmp.lt.u32.totalorder %s13377_s28, %s16234_s10 }
  0x6b   :  { %p13383_p8 = pnand %p13381_p7, %p13378_p6 }
  0x6d   :  { %13386 = shalt.err (!%p13383_p8)
}
  0x6e   :  { %s13387_s7 = scalar_lea.vmem %s111_s30, 8192  ;;  %p13392_p10 = scmp.lt.s32.totalorder %s111_s30, %s111_s30 }
  0x6f   :  { %p13388_p9 = scmp.ne.s32.totalorder %s111_s30, %s13387_s7  ;;  %p13393_p11 = scmp.lt.s32.totalorder %s13387_s7, %s13387_s7 }
  0x71   :  { %p13394_p12 = por %p13393_p11, %p13392_p10 }
  0x73   :  { %p13395_p13 = pnand %p13394_p12, %p13388_p9 }
  0x75   :  { %13398 = shalt.err (!%p13395_p13)
}
  0x76   :  { %116 = dma.hbm_to_vmem [thread:$0]  %s16234_s10, 8192, %s111_s30, [#allocation12], %s13457_s25, %s13457_s25, %s13458_s26  }
  0x77   :  { %s13399_s16 = scalar_lea.hbm %s16235_s11, 8192 }
  0x78   :  { %p13400_p0 = scmp.ne.s32.totalorder %s16235_s11, %s13399_s16  ;;  %p13403_p1 = scmp.lt.u32.totalorder %s13399_s16, %s16235_s11 }
  0x7a   :  { %p13405_p2 = pnand %p13403_p1, %p13400_p0 }
  0x7c   :  { %13408 = shalt.err (!%p13405_p2)
}
  0x7d   :  { %s13409_s23 = scalar_lea.vmem %s13655_s27, 8192  ;;  %p13414_p4 = scmp.lt.s32.totalorder %s13655_s27, %s13655_s27 }
  0x7e   :  { %p13410_p3 = scmp.ne.s32.totalorder %s13655_s27, %s13409_s23  ;;  %p13415_p5 = scmp.lt.s32.totalorder %s13409_s23, %s13409_s23 }
  0x80   :  { %p13416_p6 = por %p13415_p5, %p13414_p4 }
  0x82   :  { %p13417_p7 = pnand %p13416_p6, %p13410_p3 }
  0x84   :  { %13420 = shalt.err (!%p13417_p7)
}
  0x85   :  { %128 = dma.hbm_to_vmem [thread:$0]  %s16235_s11, 8192, %s13655_s27, [#allocation15], %s13457_s25, %s13457_s25, %s13458_s26  }
  0x86   :  { %13443 = dma.done.wait [#allocation3], 8192  }
  0x87   :  { %13444 = vsyncadd [#allocation3], 4294959104 }
  0x88   :  { %13445 = dma.done.wait [#allocation6], 16384  }
  0x89   :  { %13446 = vsyncadd [#allocation6], 4294950912 }
  0x8a   :  { %13447 = dma.done.wait [#allocation9], 16384  }
  0x8b   :  { %13448 = vsyncadd [#allocation9], 4294950912 }
  0x8c   :  { %13449 = dma.done.wait [#allocation12], 16384  }
  0x8d   :  { %13450 = vsyncadd [#allocation12], 4294950912 }
  0x8e   :  { %13451 = dma.done.wait [#allocation15], 8192  }
  0x8f   :  { %13452 = vsyncadd [#allocation15], 4294959104  ;;  %v16239_v0 = vmov 0.0   ;;  %v158_v1 = vld [vmem:[#allocation2 + $0x8] sm:$0xff]  ;;  %v160_v3 = vld [vmem:[#allocation2 + $0x18] sm:$0xff]  ;;  %vm13467_vm0 = vmmov 0  }
  0x90   :  { %759 = vmatprep.mubr.f32.mxu0 %v16239_v0  ;;  %830 = vmatprep.mubr.f32.mxu1 %v16239_v0  ;;  %v162_v2 = vld [vmem:[#allocation2 + $0x28] sm:$0xff]  ;;  %v164_v5 = vld [vmem:[#allocation2 + $0x38] sm:$0xff]  ;;  %v157_v6 = vld [vmem:[#allocation2] sm:$0xff]  ;;  %vm9016_vm1 = vcmask 1040384   ;;  %vm9018_vm2 = vcmask 1041408   ;;  %vm9020_vm3 = vcmask 1042432  }
  0x91   :  { %v9301_v4 = vpack.c.bf16 %v162_v2, %v158_v1  ;;  %v161_v7 = vld [vmem:[#allocation2 + $0x20] sm:$0xff]  ;;  %v9333_v8 = vpack.c.bf16 %v164_v5, %v160_v3  ;;  %v159_v10 = vld [vmem:[#allocation2 + $0x10] sm:$0xff]  ;;  %v166_v12 = vld [vmem:[#allocation2 + $0x48] sm:$0xff]  ;;  %vm9022_vm4 = vcmask 1043456   ;;  %vm9024_vm5 = vcmask 1044480  }
  0x92   :  { %v9303_v9 = vpack.c.bf16 %v161_v7, %v157_v6  ;;  %v163_v11 = vld [vmem:[#allocation2 + $0x30] sm:$0xff]  ;;  %v170_v14 = vld [vmem:[#allocation2 + $0x68] sm:$0xff]  ;;  %v168_v15 = vld [vmem:[#allocation2 + $0x58] sm:$0xff]  ;;  %vm9026_vm6 = vcmask 1045504   ;;  %vm9028_vm7 = vcmask 1046528   ;;  %vm9116_vm8 = vcmask 130048  }
  0x93   :  { %9302 = vmatprep.subr.bf16.mxu0 %v9301_v4  ;;  %v9335_v13 = vpack.c.bf16 %v163_v11, %v159_v10  ;;  %v172_v16 = vld [vmem:[#allocation2 + $0x78] sm:$0xff]  ;;  %9334 = vmatprep.subr.bf16.mxu1 %v9333_v8  ;;  %v9305_v17 = vpack.c.bf16 %v170_v14, %v166_v12  ;;  %v165_v19 = vld [vmem:[#allocation2 + $0x40] sm:$0xff]  ;;  %v167_v21 = vld [vmem:[#allocation2 + $0x50] sm:$0xff] }
  0x94   :  { %9304 = vmatpush1.bf16.msra.mxu0 %v9303_v9  ;;  %v9337_v18 = vpack.c.bf16 %v172_v16, %v168_v15  ;;  %v169_v20 = vld [vmem:[#allocation2 + $0x60] sm:$0xff]  ;;  %v171_v23 = vld [vmem:[#allocation2 + $0x70] sm:$0xff]  ;;  %v174_v24 = vld [vmem:[#allocation2 + $0x88] sm:$0xff] }
  0x95   :  { %9336 = vmatpush1.bf16.msra.mxu1 %v9335_v13  ;;  %v9307_v22 = vpack.c.bf16 %v169_v20, %v165_v19  ;;  %v178_v25 = vld [vmem:[#allocation2 + $0xa8] sm:$0xff]  ;;  %9306 = vmatprep.subr.bf16.mxu0 %v9305_v17  ;;  %v9339_v26 = vpack.c.bf16 %v171_v23, %v167_v21  ;;  %v176_v28 = vld [vmem:[#allocation2 + $0x98] sm:$0xff]  ;;  %v173_v30 = vld [vmem:[#allocation2 + $0x80] sm:$0xff] }
  0x96   :  { %9338 = vmatprep.subr.bf16.mxu1 %v9337_v18  ;;  %v9309_v27 = vpack.c.bf16 %v178_v25, %v174_v24  ;;  %v180_v29 = vld [vmem:[#allocation2 + $0xb8] sm:$0xff]  ;;  %v177_v32 = vld [vmem:[#allocation2 + $0xa0] sm:$0xff]  ;;  %v175_v33 = vld [vmem:[#allocation2 + $0x90] sm:$0xff] }
  0x97   :  { %v9341_v31 = vpack.c.bf16 %v180_v29, %v176_v28  ;;  %v179_v34 = vld [vmem:[#allocation2 + $0xb0] sm:$0xff]  ;;  %v9311_v35 = vpack.c.bf16 %v177_v32, %v173_v30  ;;  %v182_v36 = vld [vmem:[#allocation2 + $0xc8] sm:$0xff]  ;;  %v184_v38 = vld [vmem:[#allocation2 + $0xd8] sm:$0xff] }
  0x98   :  { %9308 = vmatpush1.bf16.msra.mxu0 %v9307_v22  ;;  %v186_v37 = vld [vmem:[#allocation2 + $0xe8] sm:$0xff]  ;;  %v9343_v39 = vpack.c.bf16 %v179_v34, %v175_v33  ;;  %v188_v41 = vld [vmem:[#allocation2 + $0xf8] sm:$0xff]  ;;  %v181_v42 = vld [vmem:[#allocation2 + $0xc0] sm:$0xff] }
  0x99   :  { %9340 = vmatpush1.bf16.msra.mxu1 %v9339_v26  ;;  %9310 = vmatprep.subr.bf16.mxu0 %v9309_v27  ;;  %v9313_v40 = vpack.c.bf16 %v186_v37, %v182_v36  ;;  %v185_v43 = vld [vmem:[#allocation2 + $0xe0] sm:$0xff]  ;;  %v9345_v44 = vpack.c.bf16 %v188_v41, %v184_v38  ;;  %v183_v45 = vld [vmem:[#allocation2 + $0xd0] sm:$0xff]  ;;  %v190_v47 = vld [vmem:[#allocation2 + $0x108] sm:$0xff] }
  0x9a   :  { %9342 = vmatprep.subr.bf16.mxu1 %v9341_v31  ;;  %v187_v46 = vld [vmem:[#allocation2 + $0xf0] sm:$0xff]  ;;  %v194_v48 = vld [vmem:[#allocation2 + $0x128] sm:$0xff]  ;;  %v192_v49 = vld [vmem:[#allocation2 + $0x118] sm:$0xff]  ;;  %v9315_v51 = vpack.c.bf16 %v185_v43, %v181_v42 }
  0x9b   :  { %v196_v50 = vld [vmem:[#allocation2 + $0x138] sm:$0xff]  ;;  %v9347_v52 = vpack.c.bf16 %v187_v46, %v183_v45  ;;  %v9317_v53 = vpack.c.bf16 %v194_v48, %v190_v47  ;;  %v189_v54 = vld [vmem:[#allocation2 + $0x100] sm:$0xff]  ;;  %v191_v56 = vld [vmem:[#allocation2 + $0x110] sm:$0xff] }
  0x9c   :  { %9312 = vmatpush1.bf16.msra.mxu0 %v9311_v35  ;;  %v193_v55 = vld [vmem:[#allocation2 + $0x120] sm:$0xff]  ;;  %v9349_v57 = vpack.c.bf16 %v196_v50, %v192_v49  ;;  %v195_v58 = vld [vmem:[#allocation2 + $0x130] sm:$0xff]  ;;  %v198_v59 = vld [vmem:[#allocation2 + $0x148] sm:$0xff] }
  0x9d   :  { %9344 = vmatpush1.bf16.msra.mxu1 %v9343_v39  ;;  %9314 = vmatprep.subr.bf16.mxu0 %v9313_v40  ;;  %v202_v60 = vld [vmem:[#allocation2 + $0x168] sm:$0xff]  ;;  %v200_v61 = vld [vmem:[#allocation2 + $0x158] sm:$0xff]  ;;  %v9319_v63 = vpack.c.bf16 %v193_v55, %v189_v54  ;;  %v9351_v1 = vpack.c.bf16 %v195_v58, %v191_v56  ;;  %v197_v3 = vld [vmem:[#allocation2 + $0x140] sm:$0xff] }
  0x9e   :  { %9346 = vmatprep.subr.bf16.mxu1 %v9345_v44  ;;  %v204_v62 = vld [vmem:[#allocation2 + $0x178] sm:$0xff]  ;;  %v9321_v2 = vpack.c.bf16 %v202_v60, %v198_v59  ;;  %v201_v4 = vld [vmem:[#allocation2 + $0x160] sm:$0xff]  ;;  %v199_v5 = vld [vmem:[#allocation2 + $0x150] sm:$0xff] }
  0x9f   :  { %v9353_v6 = vpack.c.bf16 %v204_v62, %v200_v61  ;;  %v203_v7 = vld [vmem:[#allocation2 + $0x170] sm:$0xff]  ;;  %v206_v8 = vld [vmem:[#allocation2 + $0x188] sm:$0xff]  ;;  %v208_v10 = vld [vmem:[#allocation2 + $0x198] sm:$0xff]  ;;  %v9323_v12 = vpack.c.bf16 %v201_v4, %v197_v3 }
  0xa0   :  { %9316 = vmatpush1.bf16.msra.mxu0 %v9315_v51  ;;  %v210_v9 = vld [vmem:[#allocation2 + $0x1a8] sm:$0xff]  ;;  %v212_v11 = vld [vmem:[#allocation2 + $0x1b8] sm:$0xff]  ;;  %v9355_v13 = vpack.c.bf16 %v203_v7, %v199_v5  ;;  %v205_v15 = vld [vmem:[#allocation2 + $0x180] sm:$0xff] }
  0xa1   :  { %9348 = vmatpush1.bf16.msra.mxu1 %v9347_v52  ;;  %9318 = vmatprep.subr.bf16.mxu0 %v9317_v53  ;;  %v9325_v14 = vpack.c.bf16 %v210_v9, %v206_v8  ;;  %v209_v16 = vld [vmem:[#allocation2 + $0x1a0] sm:$0xff]  ;;  %v207_v17 = vld [vmem:[#allocation2 + $0x190] sm:$0xff]  ;;  %v9357_v18 = vpack.c.bf16 %v212_v11, %v208_v10  ;;  %v214_v20 = vld [vmem:[#allocation2 + $0x1c8] sm:$0xff] }
  0xa2   :  { %9350 = vmatprep.subr.bf16.mxu1 %v9349_v57  ;;  %v211_v19 = vld [vmem:[#allocation2 + $0x1b0] sm:$0xff]  ;;  %v218_v21 = vld [vmem:[#allocation2 + $0x1e8] sm:$0xff]  ;;  %v216_v22 = vld [vmem:[#allocation2 + $0x1d8] sm:$0xff]  ;;  %v9327_v24 = vpack.c.bf16 %v209_v16, %v205_v15 }
  0xa3   :  { %v220_v23 = vld [vmem:[#allocation2 + $0x1f8] sm:$0xff]  ;;  %v9359_v25 = vpack.c.bf16 %v211_v19, %v207_v17  ;;  %v9329_v26 = vpack.c.bf16 %v218_v21, %v214_v20  ;;  %v213_v27 = vld [vmem:[#allocation2 + $0x1c0] sm:$0xff]  ;;  %v215_v29 = vld [vmem:[#allocation2 + $0x1d0] sm:$0xff] }
  0xa4   :  { %9320 = vmatpush1.bf16.msra.mxu0 %v9319_v63  ;;  %v217_v28 = vld [vmem:[#allocation2 + $0x1e0] sm:$0xff]  ;;  %v9361_v30 = vpack.c.bf16 %v220_v23, %v216_v22  ;;  %v219_v31 = vld [vmem:[#allocation2 + $0x1f0] sm:$0xff]  ;;  %v222_v32 = vld [vmem:[#allocation5 + $0x8] sm:$0xff] }
  0xa5   :  { %9352 = vmatpush1.bf16.msra.mxu1 %v9351_v1  ;;  %9322 = vmatprep.subr.bf16.mxu0 %v9321_v2  ;;  %v226_v33 = vld [vmem:[#allocation5 + $0x28] sm:$0xff]  ;;  %v224_v34 = vld [vmem:[#allocation5 + $0x18] sm:$0xff]  ;;  %v9331_v36 = vpack.c.bf16 %v217_v28, %v213_v27  ;;  %v9363_v37 = vpack.c.bf16 %v219_v31, %v215_v29  ;;  %v221_v39 = vld [vmem:[#allocation5] sm:$0xff] }
  0xa6   :  { %9354 = vmatprep.subr.bf16.mxu1 %v9353_v6  ;;  %v228_v35 = vld [vmem:[#allocation5 + $0x38] sm:$0xff]  ;;  %v13694_v38 = vpack.c.bf16 %v226_v33, %v222_v32  ;;  %v225_v40 = vld [vmem:[#allocation5 + $0x20] sm:$0xff]  ;;  %v223_v41 = vld [vmem:[#allocation5 + $0x10] sm:$0xff] }
  0xa7   :  { %v13696_v42 = vpack.c.bf16 %v228_v35, %v224_v34  ;;  %v227_v43 = vld [vmem:[#allocation5 + $0x30] sm:$0xff]  ;;  %v230_v44 = vld [vmem:[#allocation5 + $0x48] sm:$0xff]  ;;  %v232_v46 = vld [vmem:[#allocation5 + $0x58] sm:$0xff]  ;;  %v13701_v49 = vpack.c.bf16 %v225_v40, %v221_v39 }
  0xa8   :  { %9324 = vmatpush1.bf16.msra.mxu0 %v9323_v12  ;;  %v234_v45 = vld [vmem:[#allocation5 + $0x68] sm:$0xff]  ;;  %v236_v47 = vld [vmem:[#allocation5 + $0x78] sm:$0xff]  ;;  %v673_v48 = vld [vmem:[%s16224_s0] sm:$0xff]  ;;  %v13704_v50 = vpack.c.bf16 %v227_v43, %v223_v41 }
  0xa9   :  { %9356 = vmatpush1.bf16.msra.mxu1 %v9355_v13  ;;  %9326 = vmatprep.subr.bf16.mxu0 %v9325_v14  ;;  %v13706_v51 = vpack.c.bf16 %v234_v45, %v230_v44  ;;  %v229_v52 = vld [vmem:[#allocation5 + $0x40] sm:$0xff]  ;;  %v231_v54 = vld [vmem:[#allocation5 + $0x50] sm:$0xff]  ;;  %v13709_v55 = vpack.c.bf16 %v236_v47, %v232_v46  ;;  %v238_v57 = vld [vmem:[#allocation5 + $0x88] sm:$0xff] }
  0xaa   :  { %9358 = vmatprep.subr.bf16.mxu1 %v9357_v18  ;;  %v233_v53 = vld [vmem:[#allocation5 + $0x60] sm:$0xff]  ;;  %v235_v56 = vld [vmem:[#allocation5 + $0x70] sm:$0xff]  ;;  %v242_v58 = vld [vmem:[#allocation5 + $0xa8] sm:$0xff] }
  0xab   :  { %v240_v59 = vld [vmem:[#allocation5 + $0x98] sm:$0xff]  ;;  %v13712_v61 = vpack.c.bf16 %v233_v53, %v229_v52  ;;  %v13716_v62 = vpack.c.bf16 %v235_v56, %v231_v54  ;;  %v13718_v63 = vpack.c.bf16 %v242_v58, %v238_v57  ;;  %v237_v1 = vld [vmem:[#allocation5 + $0x80] sm:$0xff]  ;;  %v239_v3 = vld [vmem:[#allocation5 + $0x90] sm:$0xff] }
  0xac   :  { %9328 = vmatpush1.bf16.msra.mxu0 %v9327_v24  ;;  %v244_v60 = vld [vmem:[#allocation5 + $0xb8] sm:$0xff]  ;;  %v241_v2 = vld [vmem:[#allocation5 + $0xa0] sm:$0xff]  ;;  %v243_v5 = vld [vmem:[#allocation5 + $0xb0] sm:$0xff] }
  0xad   :  { %9360 = vmatpush1.bf16.msra.mxu1 %v9359_v25  ;;  %9330 = vmatprep.subr.bf16.mxu0 %v9329_v26  ;;  %16596 = vst [vmem:[#allocation23_spill] sm:$0xff] %v13716_v62  ;;  %16597 = vst [vmem:[#allocation24_spill] sm:$0xff] %v13718_v63  ;;  %v13721_v4 = vpack.c.bf16 %v244_v60, %v240_v59  ;;  %v246_v6 = vld [vmem:[#allocation5 + $0xc8] sm:$0xff]  ;;  %v248_v8 = vld [vmem:[#allocation5 + $0xd8] sm:$0xff]  ;;  %v13726_v10 = vpack.c.bf16 %v241_v2, %v237_v1 }
  0xae   :  { %9362 = vmatprep.subr.bf16.mxu1 %v9361_v30  ;;  %v250_v7 = vld [vmem:[#allocation5 + $0xe8] sm:$0xff]  ;;  %v252_v9 = vld [vmem:[#allocation5 + $0xf8] sm:$0xff]  ;;  %v13730_v11 = vpack.c.bf16 %v243_v5, %v239_v3  ;;  %v245_v13 = vld [vmem:[#allocation5 + $0xc0] sm:$0xff] }
  0xaf   :  { %16598 = vst [vmem:[#allocation25_spill] sm:$0xff] %v13721_v4  ;;  %16599 = vst [vmem:[#allocation26_spill] sm:$0xff] %v13726_v10  ;;  %v13732_v12 = vpack.c.bf16 %v250_v7, %v246_v6  ;;  %v249_v14 = vld [vmem:[#allocation5 + $0xe0] sm:$0xff]  ;;  %v247_v15 = vld [vmem:[#allocation5 + $0xd0] sm:$0xff]  ;;  %v13735_v16 = vpack.c.bf16 %v252_v9, %v248_v8 }
  0xb0   :  { %9332 = vmatpush1.bf16.msra.mxu0 %v9331_v36  ;;  %16600 = vst [vmem:[#allocation27_spill] sm:$0xff] %v13730_v11  ;;  %v251_v17 = vld [vmem:[#allocation5 + $0xf0] sm:$0xff]  ;;  %v254_v18 = vld [vmem:[#allocation5 + $0x108] sm:$0xff]  ;;  %v256_v20 = vld [vmem:[#allocation5 + $0x118] sm:$0xff]  ;;  %v13738_v22 = vpack.c.bf16 %v249_v14, %v245_v13 }
  0xb1   :  { %9364 = vmatpush1.bf16.msra.mxu1 %v9363_v37  ;;  %9366 = vmatprep.subr.bf16.mxu0 %v13694_v38  ;;  %16601 = vst [vmem:[#allocation28_spill] sm:$0xff] %v13732_v12  ;;  %16602 = vst [vmem:[#allocation29_spill] sm:$0xff] %v13735_v16  ;;  %v258_v19 = vld [vmem:[#allocation5 + $0x128] sm:$0xff]  ;;  %v260_v21 = vld [vmem:[#allocation5 + $0x138] sm:$0xff]  ;;  %v13742_v23 = vpack.c.bf16 %v251_v17, %v247_v15 }
  0xb2   :  { %9398 = vmatprep.subr.bf16.mxu1 %v13696_v42  ;;  %16603 = vst [vmem:[#allocation30_spill] sm:$0xff] %v13738_v22  ;;  %v13744_v24 = vpack.c.bf16 %v258_v19, %v254_v18  ;;  %v253_v25 = vld [vmem:[#allocation5 + $0x100] sm:$0xff]  ;;  %v255_v27 = vld [vmem:[#allocation5 + $0x110] sm:$0xff]  ;;  %v13747_v28 = vpack.c.bf16 %v260_v21, %v256_v20  ;;  %v262_v30 = vld [vmem:[#allocation5 + $0x148] sm:$0xff] }
  0xb3   :  { %760 = vmatmul.mubr.f32.vlgmr.msra.gmra.mrb[0].mxu0 %v673_v48  ;;  %16604 = vst [vmem:[#allocation31_spill] sm:$0xff] %v13742_v23  ;;  %v257_v26 = vld [vmem:[#allocation5 + $0x120] sm:$0xff]  ;;  %v259_v29 = vld [vmem:[#allocation5 + $0x130] sm:$0xff]  ;;  %v266_v31 = vld [vmem:[#allocation5 + $0x168] sm:$0xff] }
  0xb4   :  { %831 = vmatmul.mubr.f32.vlgmr.msra.gmra.mrb[0].mxu1 %v673_v48  ;;  %9368 = vmatpush1.bf16.msra.mxu0 %v13701_v49  ;;  %16605 = vst [vmem:[#allocation32_spill] sm:$0xff] %v13744_v24  ;;  %16606 = vst [vmem:[#allocation33_spill] sm:$0xff] %v13747_v28  ;;  %v264_v32 = vld [vmem:[#allocation5 + $0x158] sm:$0xff]  ;;  %v13750_v34 = vpack.c.bf16 %v257_v26, %v253_v25  ;;  %v13754_v35 = vpack.c.bf16 %v259_v29, %v255_v27  ;;  %v261_v37 = vld [vmem:[#allocation5 + $0x140] sm:$0xff] }
  0xb5   :  { %9400 = vmatpush1.bf16.msra.mxu1 %v13704_v50  ;;  %9370 = vmatprep.subr.bf16.mxu0 %v13706_v51  ;;  %v268_v33 = vld [vmem:[#allocation5 + $0x178] sm:$0xff]  ;;  %v13756_v36 = vpack.c.bf16 %v266_v31, %v262_v30  ;;  %v265_v39 = vld [vmem:[#allocation5 + $0x160] sm:$0xff]  ;;  %v263_v40 = vld [vmem:[#allocation5 + $0x150] sm:$0xff] }
  0xb6   :  { %9402 = vmatprep.subr.bf16.mxu1 %v13709_v55  ;;  %901 = vmatprep.mubr.f32.mxu0 %v16239_v0  ;;  %16607 = vst [vmem:[#allocation34_spill] sm:$0xff] %v13750_v34  ;;  %16608 = vst [vmem:[#allocation35_spill] sm:$0xff] %v13754_v35  ;;  %v13759_v41 = vpack.c.bf16 %v268_v33, %v264_v32  ;;  %v267_v43 = vld [vmem:[#allocation5 + $0x170] sm:$0xff]  ;;  %v270_v44 = vld [vmem:[#allocation5 + $0x188] sm:$0xff]  ;;  %v13762_v48 = vpack.c.bf16 %v265_v39, %v261_v37 }
  0xb7   :  { %972 = vmatprep.mubr.f32.mxu1 %v16239_v0  ;;  %16609 = vst [vmem:[#allocation36_spill] sm:$0xff] %v13756_v36  ;;  %v274_v45 = vld [vmem:[#allocation5 + $0x1a8] sm:$0xff]  ;;  %v272_v46 = vld [vmem:[#allocation5 + $0x198] sm:$0xff]  ;;  %v13766_v52 = vpack.c.bf16 %v267_v43, %v263_v40  ;;  %v269_v54 = vld [vmem:[#allocation5 + $0x180] sm:$0xff] }
  0xb8   :  { %9372 = vmatpush1.bf16.msra.mxu0 %v13712_v61  ;;  %16610 = vst [vmem:[#allocation37_spill] sm:$0xff] %v13759_v41  ;;  %v276_v47 = vld [vmem:[#allocation5 + $0x1b8] sm:$0xff]  ;;  %16611 = vst [vmem:[#allocation38_spill] sm:$0xff] %v13762_v48  ;;  %v13768_v53 = vpack.c.bf16 %v274_v45, %v270_v44  ;;  %v273_v56 = vld [vmem:[#allocation5 + $0x1a0] sm:$0xff] }
  0xb9   :  { %9404 = vmatpush1.bf16.msra.mxu1 %v13716_v62  ;;  %9374 = vmatprep.subr.bf16.mxu0 %v13718_v63  ;;  %16612 = vst [vmem:[#allocation39_spill] sm:$0xff] %v13766_v52  ;;  %v271_v57 = vld [vmem:[#allocation5 + $0x190] sm:$0xff]  ;;  %v13771_v58 = vpack.c.bf16 %v276_v47, %v272_v46  ;;  %v278_v60 = vld [vmem:[#allocation5 + $0x1c8] sm:$0xff]  ;;  %v280_v2 = vld [vmem:[#allocation5 + $0x1d8] sm:$0xff]  ;;  %v13774_v5 = vpack.c.bf16 %v273_v56, %v269_v54 }
  0xba   :  { %9406 = vmatprep.subr.bf16.mxu1 %v13721_v4  ;;  %16613 = vst [vmem:[#allocation40_spill] sm:$0xff] %v13768_v53  ;;  %v275_v59 = vld [vmem:[#allocation5 + $0x1b0] sm:$0xff]  ;;  %v282_v1 = vld [vmem:[#allocation5 + $0x1e8] sm:$0xff]  ;;  %v284_v3 = vld [vmem:[#allocation5 + $0x1f8] sm:$0xff] }
  0xbb   :  { %16614 = vst [vmem:[#allocation41_spill] sm:$0xff] %v13771_v58  ;;  %16615 = vst [vmem:[#allocation42_spill] sm:$0xff] %v13774_v5  ;;  %v13778_v6 = vpack.c.bf16 %v275_v59, %v271_v57  ;;  %v13780_v7 = vpack.c.bf16 %v282_v1, %v278_v60  ;;  %v277_v8 = vld [vmem:[#allocation5 + $0x1c0] sm:$0xff]  ;;  %v13783_v13 = vpack.c.bf16 %v284_v3, %v280_v2  ;;  %v279_v14 = vld [vmem:[#allocation5 + $0x1d0] sm:$0xff] }
  0xbc   :  { %9376 = vmatpush1.bf16.msra.mxu0 %v13726_v10  ;;  %v281_v9 = vld [vmem:[#allocation5 + $0x1e0] sm:$0xff]  ;;  %v283_v15 = vld [vmem:[#allocation5 + $0x1f0] sm:$0xff]  ;;  %v287_v19 = vld [vmem:[#allocation7 + $0x8] sm:$0xff] }
  0xbd   :  { %9408 = vmatpush1.bf16.msra.mxu1 %v13730_v11  ;;  %9378 = vmatprep.subr.bf16.mxu0 %v13732_v12  ;;  %16616 = vst [vmem:[#allocation43_spill] sm:$0xff] %v13778_v6  ;;  %16617 = vst [vmem:[#allocation44_spill] sm:$0xff] %v13780_v7  ;;  %v13786_v17 = vpack.c.bf16 %v281_v9, %v277_v8  ;;  %v13790_v18 = vpack.c.bf16 %v283_v15, %v279_v14  ;;  %v291_v20 = vld [vmem:[#allocation7 + $0x28] sm:$0xff]  ;;  %v289_v21 = vld [vmem:[#allocation7 + $0x18] sm:$0xff] }
  0xbe   :  { %9410 = vmatprep.subr.bf16.mxu1 %v13735_v16  ;;  %16618 = vst [vmem:[#allocation45_spill] sm:$0xff] %v13783_v13  ;;  %v13799_v25 = vpack.c.bf16 %v291_v20, %v287_v19  ;;  %v293_v26 = vld [vmem:[#allocation7 + $0x38] sm:$0xff]  ;;  %v286_v27 = vld [vmem:[#allocation7] sm:$0xff]  ;;  %v288_v32 = vld [vmem:[#allocation7 + $0x10] sm:$0xff] }
  0xbf   :  { %16619 = vst [vmem:[#allocation46_spill] sm:$0xff] %v13786_v17  ;;  %16620 = vst [vmem:[#allocation47_spill] sm:$0xff] %v13790_v18  ;;  %v290_v29 = vld [vmem:[#allocation7 + $0x20] sm:$0xff]  ;;  %v13801_v30 = vpack.c.bf16 %v293_v26, %v289_v21  ;;  %v292_v33 = vld [vmem:[#allocation7 + $0x30] sm:$0xff] }
  0xc0   :  { %9380 = vmatpush1.bf16.msra.mxu0 %v13738_v22  ;;  %16621 = vst [vmem:[#allocation48_spill] sm:$0xff] %v13799_v25  ;;  %v13803_v31 = vpack.c.bf16 %v290_v29, %v286_v27  ;;  %v13806_v37 = vpack.c.bf16 %v292_v33, %v288_v32  ;;  %v295_v39 = vld [vmem:[#allocation7 + $0x48] sm:$0xff]  ;;  %v297_v43 = vld [vmem:[#allocation7 + $0x58] sm:$0xff]  ;;  %v294_v46 = vld [vmem:[#allocation7 + $0x40] sm:$0xff] }
  0xc1   :  { %9412 = vmatpush1.bf16.msra.mxu1 %v13742_v23  ;;  %9382 = vmatprep.subr.bf16.mxu0 %v13744_v24  ;;  %16622 = vst [vmem:[#allocation49_spill] sm:$0xff] %v13801_v30  ;;  %v299_v40 = vld [vmem:[#allocation7 + $0x68] sm:$0xff]  ;;  %v301_v45 = vld [vmem:[#allocation7 + $0x78] sm:$0xff]  ;;  %v298_v47 = vld [vmem:[#allocation7 + $0x60] sm:$0xff] }
  0xc2   :  { %9414 = vmatprep.subr.bf16.mxu1 %v13747_v28  ;;  %16623 = vst [vmem:[#allocation50_spill] sm:$0xff] %v13803_v31  ;;  %16624 = vst [vmem:[#allocation51_spill] sm:$0xff] %v13806_v37  ;;  %v13811_v44 = vpack.c.bf16 %v299_v40, %v295_v39  ;;  %v13813_v54 = vpack.c.bf16 %v301_v45, %v297_v43  ;;  %v13815_v56 = vpack.c.bf16 %v298_v47, %v294_v46  ;;  %v296_v57 = vld [vmem:[#allocation7 + $0x50] sm:$0xff]  ;;  %v303_v1 = vld [vmem:[#allocation7 + $0x88] sm:$0xff] }
  0xc3   :  { %v300_v59 = vld [vmem:[#allocation7 + $0x70] sm:$0xff]  ;;  %v307_v2 = vld [vmem:[#allocation7 + $0xa8] sm:$0xff]  ;;  %v305_v3 = vld [vmem:[#allocation7 + $0x98] sm:$0xff] }
  0xc4   :  { %9384 = vmatpush1.bf16.msra.mxu0 %v13750_v34  ;;  %16625 = vst [vmem:[#allocation52_spill] sm:$0xff] %v13811_v44  ;;  %16626 = vst [vmem:[#allocation53_spill] sm:$0xff] %v13813_v54  ;;  %v13818_v60 = vpack.c.bf16 %v300_v59, %v296_v57  ;;  %v13823_v8 = vpack.c.bf16 %v307_v2, %v303_v1  ;;  %v309_v9 = vld [vmem:[#allocation7 + $0xb8] sm:$0xff]  ;;  %v302_v14 = vld [vmem:[#allocation7 + $0x80] sm:$0xff] }
  0xc5   :  { %9416 = vmatpush1.bf16.msra.mxu1 %v13754_v35  ;;  %9386 = vmatprep.subr.bf16.mxu0 %v13756_v36  ;;  %16627 = vst [vmem:[#allocation54_spill] sm:$0xff] %v13815_v56  ;;  %v306_v15 = vld [vmem:[#allocation7 + $0xa0] sm:$0xff]  ;;  %v13825_v19 = vpack.c.bf16 %v309_v9, %v305_v3  ;;  %v304_v21 = vld [vmem:[#allocation7 + $0x90] sm:$0xff]  ;;  %v311_v29 = vld [vmem:[#allocation7 + $0xc8] sm:$0xff] }
  0xc6   :  { %9418 = vmatprep.subr.bf16.mxu1 %v13759_v41  ;;  %16628 = vst [vmem:[#allocation55_spill] sm:$0xff] %v13818_v60  ;;  %16629 = vst [vmem:[#allocation56_spill] sm:$0xff] %v13823_v8  ;;  %v13827_v20 = vpack.c.bf16 %v306_v15, %v302_v14  ;;  %v308_v26 = vld [vmem:[#allocation7 + $0xb0] sm:$0xff]  ;;  %v315_v32 = vld [vmem:[#allocation7 + $0xe8] sm:$0xff] }
  0xc7   :  { %16630 = vst [vmem:[#allocation57_spill] sm:$0xff] %v13825_v19  ;;  %v13830_v27 = vpack.c.bf16 %v308_v26, %v304_v21  ;;  %v313_v33 = vld [vmem:[#allocation7 + $0xd8] sm:$0xff]  ;;  %v13835_v39 = vpack.c.bf16 %v315_v32, %v311_v29  ;;  %v310_v43 = vld [vmem:[#allocation7 + $0xc0] sm:$0xff]  ;;  %v312_v57 = vld [vmem:[#allocation7 + $0xd0] sm:$0xff] }
  0xc8   :  { %9388 = vmatpush1.bf16.msra.mxu0 %v13762_v48  ;;  %16631 = vst [vmem:[#allocation58_spill] sm:$0xff] %v13827_v20  ;;  %v317_v40 = vld [vmem:[#allocation7 + $0xf8] sm:$0xff]  ;;  %v314_v45 = vld [vmem:[#allocation7 + $0xe0] sm:$0xff]  ;;  %v316_v59 = vld [vmem:[#allocation7 + $0xf0] sm:$0xff] }
  0xc9   :  { %9420 = vmatpush1.bf16.msra.mxu1 %v13766_v52  ;;  %9390 = vmatprep.subr.bf16.mxu0 %v13768_v53  ;;  %16632 = vst [vmem:[#allocation59_spill] sm:$0xff] %v13830_v27  ;;  %16633 = vst [vmem:[#allocation60_spill] sm:$0xff] %v13835_v39  ;;  %v13837_v46 = vpack.c.bf16 %v317_v40, %v313_v33  ;;  %v13839_v47 = vpack.c.bf16 %v314_v45, %v310_v43  ;;  %v319_v2 = vld [vmem:[#allocation7 + $0x108] sm:$0xff]  ;;  %v321_v9 = vld [vmem:[#allocation7 + $0x118] sm:$0xff] }
  0xca   :  { %9422 = vmatprep.subr.bf16.mxu1 %v13771_v58  ;;  %v13842_v1 = vpack.c.bf16 %v316_v59, %v312_v57  ;;  %v323_v3 = vld [vmem:[#allocation7 + $0x128] sm:$0xff]  ;;  %v325_v15 = vld [vmem:[#allocation7 + $0x138] sm:$0xff]  ;;  %v318_v21 = vld [vmem:[#allocation7 + $0x100] sm:$0xff] }
  0xcb   :  { %16634 = vst [vmem:[#allocation61_spill] sm:$0xff] %v13837_v46  ;;  %16635 = vst [vmem:[#allocation62_spill] sm:$0xff] %v13839_v47  ;;  %v13847_v14 = vpack.c.bf16 %v323_v3, %v319_v2  ;;  %v322_v26 = vld [vmem:[#allocation7 + $0x120] sm:$0xff]  ;;  %v13849_v29 = vpack.c.bf16 %v325_v15, %v321_v9  ;;  %v320_v33 = vld [vmem:[#allocation7 + $0x110] sm:$0xff] }
  0xcc   :  { %9392 = vmatpush1.bf16.msra.mxu0 %v13774_v5  ;;  %16636 = vst [vmem:[#allocation63_spill] sm:$0xff] %v13842_v1  ;;  %v13851_v32 = vpack.c.bf16 %v322_v26, %v318_v21  ;;  %v324_v40 = vld [vmem:[#allocation7 + $0x130] sm:$0xff]  ;;  %v327_v45 = vld [vmem:[#allocation7 + $0x148] sm:$0xff]  ;;  %v329_v59 = vld [vmem:[#allocation7 + $0x158] sm:$0xff] }
  0xcd   :  { %9424 = vmatpush1.bf16.msra.mxu1 %v13778_v6  ;;  %9394 = vmatprep.subr.bf16.mxu0 %v13780_v7  ;;  %16637 = vst [vmem:[#allocation64_spill] sm:$0xff] %v13847_v14  ;;  %16638 = vst [vmem:[#allocation65_spill] sm:$0xff] %v13849_v29  ;;  %v13854_v43 = vpack.c.bf16 %v324_v40, %v320_v33  ;;  %v331_v57 = vld [vmem:[#allocation7 + $0x168] sm:$0xff]  ;;  %v333_v3 = vld [vmem:[#allocation7 + $0x178] sm:$0xff] }
  0xce   :  { %9426 = vmatprep.subr.bf16.mxu1 %v13783_v13  ;;  %16639 = vst [vmem:[#allocation66_spill] sm:$0xff] %v13851_v32  ;;  %v13859_v2 = vpack.c.bf16 %v331_v57, %v327_v45  ;;  %v326_v9 = vld [vmem:[#allocation7 + $0x140] sm:$0xff]  ;;  %v13861_v21 = vpack.c.bf16 %v333_v3, %v329_v59  ;;  %v328_v33 = vld [vmem:[#allocation7 + $0x150] sm:$0xff]  ;;  %v339_v45 = vld [vmem:[#allocation7 + $0x1a8] sm:$0xff] }
  0xcf   :  { %16640 = vst [vmem:[#allocation67_spill] sm:$0xff] %v13854_v43  ;;  %v330_v15 = vld [vmem:[#allocation7 + $0x160] sm:$0xff]  ;;  %v332_v40 = vld [vmem:[#allocation7 + $0x170] sm:$0xff]  ;;  %v337_v57 = vld [vmem:[#allocation7 + $0x198] sm:$0xff] }
  0xd0   :  { %9396 = vmatpush1.bf16.msra.mxu0 %v13786_v17  ;;  %16641 = vst [vmem:[#allocation68_spill] sm:$0xff] %v13859_v2  ;;  %16642 = vst [vmem:[#allocation69_spill] sm:$0xff] %v13861_v21  ;;  %v13863_v26 = vpack.c.bf16 %v330_v15, %v326_v9  ;;  %v341_v59 = vld [vmem:[#allocation7 + $0x1b8] sm:$0xff]  ;;  %v334_v3 = vld [vmem:[#allocation7 + $0x180] sm:$0xff] }
  0xd1   :  { %9428 = vmatpush1.bf16.msra.mxu1 %v13790_v18  ;;  %9430 = vmatprep.subr.bf16.mxu0 %v13799_v25  ;;  %v338_v9 = vld [vmem:[#allocation7 + $0x1a0] sm:$0xff]  ;;  %v13873_v15 = vpack.c.bf16 %v341_v59, %v337_v57 }
  0xd2   :  { %9462 = vmatprep.subr.bf16.mxu1 %v13801_v30  ;;  %16643 = vst [vmem:[#allocation70_spill] sm:$0xff] %v13863_v26  ;;  %v342_v57 = vld [vmem:[#allocation7 + $0x1c0] sm:$0xff] }
  0xd3   :  { %902 = vmatmul.mubr.f32.vlgmr.msra.gmra.mrb[2].mxu0 %v16239_v0  ;;  %16646 = vst [vmem:[#allocation73_spill] sm:$0xff] %v13873_v15  ;;  %v346_v59 = vld [vmem:[#allocation7 + $0x1e0] sm:$0xff] }
  0xd4   :  { %973 = vmatmul.mubr.f32.vlgmr.msra.gmra.mrb[2].mxu1 %v16239_v0  ;;  %1098 = vmatprep.mubr.f32.mxu0 %v16239_v0 }
  0xd5   :  { %1169 = vmatprep.mubr.f32.mxu1 %v16239_v0  ;;  %9432 = vmatpush1.bf16.msra.mxu0 %v13803_v31  ;;  %v13866_v0 = vpack.c.bf16 %v332_v40, %v328_v33  ;;  %v336_v33 = vld [vmem:[#allocation7 + $0x190] sm:$0xff] }
  0xd6   :  { %9464 = vmatpush1.bf16.msra.mxu1 %v13806_v37  ;;  %9434 = vmatprep.subr.bf16.mxu0 %v13811_v44  ;;  %v340_v40 = vld [vmem:[#allocation7 + $0x1b0] sm:$0xff] }
  0xd7   :  { %9466 = vmatprep.subr.bf16.mxu1 %v13813_v54  ;;  %16644 = vst [vmem:[#allocation71_spill] sm:$0xff] %v13866_v0 }
  0xd9   :  { %9436 = vmatpush1.bf16.msra.mxu0 %v13815_v56 }
  0xda   :  { %9468 = vmatpush1.bf16.msra.mxu1 %v13818_v60  ;;  %9438 = vmatprep.subr.bf16.mxu0 %v13823_v8  ;;  %v385_v8 = vld [vmem:[#allocation8 + $0x118] sm:$0xff] }
  0xdb   :  { %9470 = vmatprep.subr.bf16.mxu1 %v13825_v19  ;;  %v377_v19 = vld [vmem:[#allocation8 + $0xd8] sm:$0xff] }
  0xdd   :  { %9440 = vmatpush1.bf16.msra.mxu0 %v13827_v20 }
  0xde   :  { %9472 = vmatpush1.bf16.msra.mxu1 %v13830_v27  ;;  %9442 = vmatprep.subr.bf16.mxu0 %v13835_v39 }
  0xdf   :  { %9474 = vmatprep.subr.bf16.mxu1 %v13837_v46 }
  0xe1   :  { %9444 = vmatpush1.bf16.msra.mxu0 %v13839_v47 }
  0xe2   :  { %9476 = vmatpush1.bf16.msra.mxu1 %v13842_v1  ;;  %9446 = vmatprep.subr.bf16.mxu0 %v13847_v14  ;;  %v345_v14 = vld [vmem:[#allocation7 + $0x1d8] sm:$0xff] }
  0xe3   :  { %9478 = vmatprep.subr.bf16.mxu1 %v13849_v29  ;;  %v13875_v29 = vpack.c.bf16 %v338_v9, %v334_v3  ;;  %v349_v1 = vld [vmem:[#allocation7 + $0x1f8] sm:$0xff]  ;;  %v344_v3 = vld [vmem:[#allocation7 + $0x1d0] sm:$0xff]  ;;  %v13887_v9 = vpack.c.bf16 %v346_v59, %v342_v57 }
  0xe5   :  { %9448 = vmatpush1.bf16.msra.mxu0 %v13851_v32  ;;  %16647 = vst [vmem:[#allocation74_spill] sm:$0xff] %v13875_v29  ;;  %16651 = vst [vmem:[#allocation78_spill] sm:$0xff] %v13887_v9 }
  0xe6   :  { %9480 = vmatpush1.bf16.msra.mxu1 %v13854_v43  ;;  %9450 = vmatprep.subr.bf16.mxu0 %v13859_v2  ;;  %v335_v43 = vld [vmem:[#allocation7 + $0x188] sm:$0xff] }
  0xe7   :  { %9482 = vmatprep.subr.bf16.mxu1 %v13861_v21  ;;  %v13871_v32 = vpack.c.bf16 %v339_v45, %v335_v43  ;;  %v343_v2 = vld [vmem:[#allocation7 + $0x1c8] sm:$0xff]  ;;  %v13884_v45 = vpack.c.bf16 %v349_v1, %v345_v14  ;;  %v353_v1 = vld [vmem:[#allocation8 + $0x18] sm:$0xff] }
  0xe8   :  { %v347_v21 = vld [vmem:[#allocation7 + $0x1e8] sm:$0xff]  ;;  %v357_v14 = vld [vmem:[#allocation8 + $0x38] sm:$0xff] }
  0xe9   :  { %9452 = vmatpush1.bf16.msra.mxu0 %v13863_v26  ;;  %16645 = vst [vmem:[#allocation72_spill] sm:$0xff] %v13871_v32  ;;  %v13878_v26 = vpack.c.bf16 %v340_v40, %v336_v33  ;;  %v13882_v43 = vpack.c.bf16 %v347_v21, %v343_v2  ;;  %16650 = vst [vmem:[#allocation77_spill] sm:$0xff] %v13884_v45  ;;  %v348_v33 = vld [vmem:[#allocation7 + $0x1f0] sm:$0xff]  ;;  %v351_v40 = vld [vmem:[#allocation8 + $0x8] sm:$0xff]  ;;  %v13895_v21 = vpack.c.bf16 %v357_v14, %v353_v1 }
  0xea   :  { %9484 = vmatpush1.bf16.msra.mxu1 %v13866_v0  ;;  %9454 = vmatprep.subr.bf16.mxu0 %v13871_v32  ;;  %v355_v32 = vld [vmem:[#allocation8 + $0x28] sm:$0xff] }
  0xeb   :  { %16648 = vst [vmem:[#allocation75_spill] sm:$0xff] %v13878_v26  ;;  %9486 = vmatprep.subr.bf16.mxu1 %v13873_v15  ;;  %16649 = vst [vmem:[#allocation76_spill] sm:$0xff] %v13882_v43  ;;  %v13891_v15 = vpack.c.bf16 %v348_v33, %v344_v3  ;;  %v13893_v2 = vpack.c.bf16 %v355_v32, %v351_v40  ;;  %v675_v3 = vlaneseq  ;;  %v285_v40 = vld [vmem:[%s16227_s3] sm:$0xf] }
  0xec   :  { %16654 = vst [vmem:[#allocation81_spill] sm:$0xff] %v13895_v21 }
  0xed   :  { %9456 = vmatpush1.bf16.msra.mxu0 %v13875_v29  ;;  %16652 = vst [vmem:[#allocation79_spill] sm:$0xff] %v13891_v15  ;;  %16653 = vst [vmem:[#allocation80_spill] sm:$0xff] %v13893_v2  ;;  %v676_v33 = vshrl.u32 %v675_v3, 7 }
  0xee   :  { %9488 = vmatpush1.bf16.msra.mxu1 %v13878_v26  ;;  %9458 = vmatprep.subr.bf16.mxu0 %v13882_v43 }
  0xef   :  { %9490 = vmatprep.subr.bf16.mxu1 %v13884_v45  ;;  %v13901_v32 = vsub.s32 0, %v676_v33  ;;  %v13906_v1 = vsub.s32 1, %v676_v33  ;;  %v13919_v27 = vsub.s32 2, %v676_v33 }
  0xf1   :  { %9460 = vmatpush1.bf16.msra.mxu0 %v13887_v9  ;;  %16655 = vst [vmem:[#allocation82_spill] sm:$0xff] %v13901_v32  ;;  %16656 = vst [vmem:[#allocation83_spill] sm:$0xff] %v13906_v1  ;;  %v678_v14 = vrot.slane %v285_v40, %v13901_v32 }
  0xf2   :  { %9492 = vmatpush1.bf16.msra.mxu1 %v13891_v15  ;;  %9494 = vmatprep.subr.bf16.mxu0 %v13893_v2  ;;  %v682_v2 = vrot.slane %v285_v40, %v13906_v1  ;;  %v13910_v15 = vsub.s32 3, %v676_v33  ;;  %16660 = vst [vmem:[#allocation87_spill] sm:$0xff] %v13919_v27 }
  0xf3   :  { %9526 = vmatprep.subr.bf16.mxu1 %v13895_v21 }
  0xf4   :  { %16657 = vst [vmem:[#allocation84_spill] sm:$0xff] %v13910_v15  ;;  %v690_v47 = vrot.slane %v285_v40, %v13910_v15 }
 0x186   :  { %v761_v57 = vpop.f32.mrb[0].mxu0 }
 0x187   :  { %v763_v59 = vpop.f32.mrb[1].mxu0  ;;  %v832_v43 = vpop.f32.mrb[0].mxu1  ;;  %v13912_v21 = vadd.f32 %v761_v57, %v678_v14 }
 0x188   :  { %v834_v45 = vpop.f32.mrb[1].mxu1  ;;  %v13914_v9 = vadd.f32 %v763_v59, %v682_v2  ;;  %v686_v2 = vrot.slane %v285_v40, %v13919_v27  ;;  %v373_v27 = vld [vmem:[#allocation8 + $0xb8] sm:$0xff] }
 0x189   :  { %16658 = vst [vmem:[#allocation85_spill] sm:$0xff] %v13912_v21  ;;  %v13921_v20 = vadd.f32 %v834_v45, %v690_v47 }
 0x18a   :  { %16659 = vst [vmem:[#allocation86_spill] sm:$0xff] %v13914_v9 }
 0x18b   :  { %16661 = vst [vmem:[#allocation88_spill] sm:$0xff] %v13921_v20 }
 0x1a6   :  { %v903_v26 = vpop.f32.mrb[2].mxu0 }
 0x1a7   :  { %v979_v3 = vadd.f32 %v903_v26, %v13912_v21  ;;  %v974_v29 = vpop.f32.mrb[2].mxu1  ;;  %v905_v0 = vpop.f32.mrb[3].mxu0  ;;  %v13925_v26 = vadd.f32 %v832_v43, %v686_v2  ;;  %v369_v21 = vld [vmem:[#allocation8 + $0x98] sm:$0xff] }
 0x1a8   :  { %v980_v46 = vadd.f32 %v905_v0, %v13914_v9  ;;  %v976_v39 = vpop.f32.mrb[3].mxu1 }
 0x1a9   :  { %v9137_v32 = vmul.f32 -1.442695, %v979_v3  ;;  %v982_v57 = vadd.f32 %v976_v39, %v13921_v20  ;;  %16662 = vst [vmem:[#allocation89_spill] sm:$0xff] %v13925_v26  ;;  %v981_v14 = vadd.f32 %v974_v29, %v13925_v26  ;;  %v371_v20 = vld [vmem:[#allocation8 + $0xa8] sm:$0xff] }
 0x1aa   :  { %v9138_v1 = vmul.f32 -1.442695, %v980_v46 }
 0x1ab   :  { %12667 = vpow2.f32 %v9137_v32  ;;  %v9139_v59 = vmul.f32 -1.442695, %v982_v57 }
 0x1ac   :  { %12669 = vpow2.f32 %v9138_v1 }
 0x1ad   :  { %12671 = vpow2.f32 %v9139_v59  ;;  %v350_v59 = vld [vmem:[#allocation8] sm:$0xff] }
 0x1ae   :  { %12673 = vtanh.f32 %v981_v14  ;;  %v354_v14 = vld [vmem:[#allocation8 + $0x20] sm:$0xff] }
 0x1b5   :  { %v12668_v15 = vpop.eup %12667 }
 0x1b6   :  { %v12670_v0 = vpop.eup %12669  ;;  %v992_v9 = vadd.f32 1.0, %v12668_v15 }
 0x1b7   :  { %v993_v33 = vadd.f32 1.0, %v12670_v0  ;;  %v12672_v46 = vpop.eup %12671  ;;  %v352_v0 = vld [vmem:[#allocation8 + $0x10] sm:$0xff] }
 0x1b8   :  { %12675 = vrcp.f32 %v992_v9  ;;  %v12674_v47 = vpop.eup %12673  ;;  %v994_v1 = vadd.f32 1.0, %v12672_v46  ;;  %v359_v46 = vld [vmem:[#allocation8 + $0x48] sm:$0xff] }
 0x1b9   :  { %12677 = vrcp.f32 %v993_v33  ;;  %v356_v33 = vld [vmem:[#allocation8 + $0x30] sm:$0xff] }
 0x1ba   :  { %12679 = vrcp.f32 %v994_v1  ;;  %v13936_v1 = vpack.c.bf16 %v356_v33, %v352_v0  ;;  %v366_v0 = vld [vmem:[#allocation8 + $0x80] sm:$0xff] }
 0x1bb   :  { %v370_v33 = vld [vmem:[#allocation8 + $0xa0] sm:$0xff] }
 0x1bc   :  { %16665 = vst [vmem:[#allocation92_spill] sm:$0xff] %v13936_v1 }
 0x1c2   :  { %v12676_v45 = vpop.eup %12675 }
 0x1c3   :  { %v12678_v32 = vpop.eup %12677  ;;  %v1003_v40 = vmul.f32 %v12676_v45, %v12674_v47  ;;  %v363_v47 = vld [vmem:[#allocation8 + $0x68] sm:$0xff]  ;;  %v361_v45 = vld [vmem:[#allocation8 + $0x58] sm:$0xff] }
 0x1c4   :  { %v1002_v39 = vmul.f32 0.0, %v12678_v32  ;;  %v12680_v29 = vpop.eup %12679  ;;  %v365_v32 = vld [vmem:[#allocation8 + $0x78] sm:$0xff] }
 0x1c6   :  { %v13928_v43 = vadd.f32 %v1003_v40, %v1002_v39  ;;  %v13934_v40 = vpack.c.bf16 %v354_v14, %v350_v59  ;;  %v358_v39 = vld [vmem:[#allocation8 + $0x40] sm:$0xff] }
 0x1c8   :  { %16663 = vst [vmem:[#allocation90_spill] sm:$0xff] %v13928_v43  ;;  %12681 = vtanh.f32 %v13928_v43  ;;  %16664 = vst [vmem:[#allocation91_spill] sm:$0xff] %v13934_v40  ;;  %v367_v43 = vld [vmem:[#allocation8 + $0x88] sm:$0xff] }
 0x1d2   :  { %v12682_v3 = vpop.eup %12681 }
 0x1d3   :  { %v13931_v15 = vmul.f32 %v12682_v3, %v12680_v29  ;;  %v362_v29 = vld [vmem:[#allocation8 + $0x60] sm:$0xff]  ;;  %v13938_v3 = vpack.c.bf16 %v363_v47, %v359_v46  ;;  %v13950_v46 = vpack.c.bf16 %v371_v20, %v367_v43  ;;  %v13952_v47 = vpack.c.bf16 %v373_v27, %v369_v21 }
 0x1d4   :  { %v13944_v59 = vpack.c.bf16 %v362_v29, %v358_v39  ;;  %v16672_v39 = vmov 0.0   ;;  %v13958_v29 = vpack.c.bf16 %v370_v33, %v366_v0  ;;  %v374_v27 = vld [vmem:[#allocation8 + $0xc0] sm:$0xff] }
 0x1d5   :  { %v9140_v2 = vmul.f32 -1.442695, %v13931_v15  ;;  %16666 = vst [vmem:[#allocation93_spill] sm:$0xff] %v13938_v3  ;;  %16670 = vst [vmem:[#allocation97_spill] sm:$0xff] %v13950_v46  ;;  %v378_v21 = vld [vmem:[#allocation8 + $0xe0] sm:$0xff] }
 0x1d6   :  { %16668 = vst [vmem:[#allocation95_spill] sm:$0xff] %v13944_v59  ;;  %16671 = vst [vmem:[#allocation98_spill] sm:$0xff] %v13952_v47  ;;  %v13970_v0 = vpack.c.bf16 %v378_v21, %v374_v27  ;;  %v390_v21 = vld [vmem:[#allocation8 + $0x140] sm:$0xff] }
 0x1d7   :  { %12683 = vpow2.f32 %v9140_v2  ;;  %v13940_v2 = vpack.c.bf16 %v365_v32, %v361_v45  ;;  %v368_v45 = vld [vmem:[#allocation8 + $0x90] sm:$0xff]  ;;  %v375_v32 = vld [vmem:[#allocation8 + $0xc8] sm:$0xff]  ;;  %16673 = vst [vmem:[#allocation99_spill] sm:$0xff] %v13958_v29 }
 0x1d8   :  { %16677 = vst [vmem:[#allocation103_spill] sm:$0xff] %v13970_v0 }
 0x1d9   :  { %16667 = vst [vmem:[#allocation94_spill] sm:$0xff] %v13940_v2 }
 0x1e1   :  { %v12684_v9 = vpop.eup %12683 }
 0x1e2   :  { %v1010_v57 = vadd.f32 1.0, %v12684_v9  ;;  %v360_v9 = vld [vmem:[#allocation8 + $0x50] sm:$0xff] }
 0x1e4   :  { %12685 = vrcp.f32 %v1010_v57  ;;  %v364_v57 = vld [vmem:[#allocation8 + $0x70] sm:$0xff] }
 0x1e5   :  { %v13946_v14 = vpack.c.bf16 %v364_v57, %v360_v9  ;;  %v376_v57 = vld [vmem:[#allocation8 + $0xd0] sm:$0xff] }
 0x1e7   :  { %16669 = vst [vmem:[#allocation96_spill] sm:$0xff] %v13946_v14 }
 0x1ee   :  { %v12686_v26 = vpop.eup %12685 }
 0x1ef   :  { %1099 = vmatmul.mubr.f32.vlgmr.msra.gmra.mrb[4].mxu0 %v12686_v26  ;;  %1170 = vmatmul.mubr.f32.vlgmr.msra.gmra.mrb[4].mxu1 %v12686_v26  ;;  %v372_v26 = vld [vmem:[#allocation8 + $0xb0] sm:$0xff] }
 0x1f0   :  { %9496 = vmatpush1.bf16.msra.mxu0 %v13934_v40  ;;  %9528 = vmatpush1.bf16.msra.mxu1 %v13936_v1  ;;  %v379_v40 = vld [vmem:[#allocation8 + $0xe8] sm:$0xff]  ;;  %v381_v1 = vld [vmem:[#allocation8 + $0xf8] sm:$0xff]  ;;  %v13960_v20 = vpack.c.bf16 %v372_v26, %v368_v45  ;;  %v382_v45 = vld [vmem:[#allocation8 + $0x100] sm:$0xff] }
 0x1f1   :  { %9498 = vmatprep.subr.bf16.mxu0 %v13938_v3  ;;  %9530 = vmatprep.subr.bf16.mxu1 %v13940_v2  ;;  %v13964_v43 = vpack.c.bf16 %v379_v40, %v375_v32  ;;  %v13966_v9 = vpack.c.bf16 %v381_v1, %v377_v19  ;;  %v380_v2 = vld [vmem:[#allocation8 + $0xf0] sm:$0xff]  ;;  %v383_v3 = vld [vmem:[#allocation8 + $0x108] sm:$0xff]  ;;  %v386_v26 = vld [vmem:[#allocation8 + $0x120] sm:$0xff] }
 0x1f2   :  { %1240 = vmatprep.mubr.f32.mxu0 %v16672_v39  ;;  %1311 = vmatprep.mubr.f32.mxu1 %v16672_v39  ;;  %16674 = vst [vmem:[#allocation100_spill] sm:$0xff] %v13960_v20  ;;  %v13972_v33 = vpack.c.bf16 %v380_v2, %v376_v57  ;;  %v384_v1 = vld [vmem:[#allocation8 + $0x110] sm:$0xff]  ;;  %v13982_v2 = vpack.c.bf16 %v386_v26, %v382_v45  ;;  %v394_v57 = vld [vmem:[#allocation8 + $0x160] sm:$0xff] }
 0x1f3   :  { %16675 = vst [vmem:[#allocation101_spill] sm:$0xff] %v13964_v43  ;;  %16676 = vst [vmem:[#allocation102_spill] sm:$0xff] %v13966_v9  ;;  %v388_v32 = vld [vmem:[#allocation8 + $0x130] sm:$0xff]  ;;  %v13994_v45 = vpack.c.bf16 %v394_v57, %v390_v21 }
 0x1f4   :  { %9500 = vmatpush1.bf16.msra.mxu0 %v13944_v59  ;;  %9532 = vmatpush1.bf16.msra.mxu1 %v13946_v14  ;;  %v387_v59 = vld [vmem:[#allocation8 + $0x128] sm:$0xff]  ;;  %v389_v14 = vld [vmem:[#allocation8 + $0x138] sm:$0xff]  ;;  %16678 = vst [vmem:[#allocation104_spill] sm:$0xff] %v13972_v33  ;;  %16681 = vst [vmem:[#allocation107_spill] sm:$0xff] %v13982_v2  ;;  %v13984_v27 = vpack.c.bf16 %v388_v32, %v384_v1 }
 0x1f5   :  { %9502 = vmatprep.subr.bf16.mxu0 %v13950_v46  ;;  %9534 = vmatprep.subr.bf16.mxu1 %v13952_v47  ;;  %v13976_v19 = vpack.c.bf16 %v387_v59, %v383_v3  ;;  %v13978_v40 = vpack.c.bf16 %v389_v14, %v385_v8  ;;  %v391_v47 = vld [vmem:[#allocation8 + $0x148] sm:$0xff]  ;;  %v393_v46 = vld [vmem:[#allocation8 + $0x158] sm:$0xff]  ;;  %v392_v59 = vld [vmem:[#allocation8 + $0x150] sm:$0xff] }
 0x1f6   :  { %16682 = vst [vmem:[#allocation108_spill] sm:$0xff] %v13984_v27  ;;  %v396_v14 = vld [vmem:[#allocation8 + $0x170] sm:$0xff]  ;;  %v398_v1 = vld [vmem:[#allocation8 + $0x180] sm:$0xff] }
 0x1f7   :  { %16679 = vst [vmem:[#allocation105_spill] sm:$0xff] %v13976_v19  ;;  %16680 = vst [vmem:[#allocation106_spill] sm:$0xff] %v13978_v40  ;;  %v13996_v26 = vpack.c.bf16 %v396_v14, %v392_v59  ;;  %v402_v32 = vld [vmem:[#allocation8 + $0x1a0] sm:$0xff]  ;;  %v412_v14 = vld [vmem:[#allocation8 + $0x1f0] sm:$0xff] }
 0x1f8   :  { %9504 = vmatpush1.bf16.msra.mxu0 %v13958_v29  ;;  %9536 = vmatpush1.bf16.msra.mxu1 %v13960_v20  ;;  %v395_v29 = vld [vmem:[#allocation8 + $0x168] sm:$0xff]  ;;  %v397_v20 = vld [vmem:[#allocation8 + $0x178] sm:$0xff]  ;;  %v14006_v21 = vpack.c.bf16 %v402_v32, %v398_v1  ;;  %v406_v59 = vld [vmem:[#allocation8 + $0x1c0] sm:$0xff] }
 0x1f9   :  { %9506 = vmatprep.subr.bf16.mxu0 %v13964_v43  ;;  %9538 = vmatprep.subr.bf16.mxu1 %v13966_v9  ;;  %v13988_v8 = vpack.c.bf16 %v395_v29, %v391_v47  ;;  %v13990_v3 = vpack.c.bf16 %v397_v20, %v393_v46  ;;  %v399_v9 = vld [vmem:[#allocation8 + $0x188] sm:$0xff]  ;;  %v401_v43 = vld [vmem:[#allocation8 + $0x198] sm:$0xff]  ;;  %v400_v29 = vld [vmem:[#allocation8 + $0x190] sm:$0xff] }
 0x1fa   :  { %v404_v20 = vld [vmem:[#allocation8 + $0x1b0] sm:$0xff] }
 0x1fb   :  { %16683 = vst [vmem:[#allocation109_spill] sm:$0xff] %v13988_v8  ;;  %v14008_v57 = vpack.c.bf16 %v404_v20, %v400_v29  ;;  %v16689_v29 = vld [vmem:[#allocation61_spill] sm:$0xff]  ;;  %v16690_v20 = vld [vmem:[#allocation62_spill] sm:$0xff] }
 0x1fc   :  { %9508 = vmatpush1.bf16.msra.mxu0 %v13970_v0  ;;  %9540 = vmatpush1.bf16.msra.mxu1 %v13972_v33  ;;  %v403_v0 = vld [vmem:[#allocation8 + $0x1a8] sm:$0xff]  ;;  %v405_v33 = vld [vmem:[#allocation8 + $0x1b8] sm:$0xff] }
 0x1fd   :  { %9510 = vmatprep.subr.bf16.mxu0 %v13976_v19  ;;  %9542 = vmatprep.subr.bf16.mxu1 %v13978_v40  ;;  %v14000_v46 = vpack.c.bf16 %v403_v0, %v399_v9  ;;  %v14002_v47 = vpack.c.bf16 %v405_v33, %v401_v43  ;;  %v407_v40 = vld [vmem:[#allocation8 + $0x1c8] sm:$0xff]  ;;  %v409_v19 = vld [vmem:[#allocation8 + $0x1d8] sm:$0xff]  ;;  %v410_v0 = vld [vmem:[#allocation8 + $0x1e0] sm:$0xff] }
 0x1fe   :  { %v408_v33 = vld [vmem:[#allocation8 + $0x1d0] sm:$0xff]  ;;  %v14018_v1 = vpack.c.bf16 %v410_v0, %v406_v59  ;;  %v16691_v59 = vld [vmem:[#allocation63_spill] sm:$0xff] }
 0x1ff   :  { %v14020_v32 = vpack.c.bf16 %v412_v14, %v408_v33  ;;  %v16692_v0 = vld [vmem:[#allocation64_spill] sm:$0xff]  ;;  %v16693_v33 = vld [vmem:[#allocation65_spill] sm:$0xff]  ;;  %v16694_v14 = vld [vmem:[#allocation66_spill] sm:$0xff] }
 0x200   :  { %9512 = vmatpush1.bf16.msra.mxu0 %v13982_v2  ;;  %9544 = vmatpush1.bf16.msra.mxu1 %v13984_v27  ;;  %v411_v2 = vld [vmem:[#allocation8 + $0x1e8] sm:$0xff]  ;;  %v413_v27 = vld [vmem:[#allocation8 + $0x1f8] sm:$0xff] }
 0x201   :  { %9514 = vmatprep.subr.bf16.mxu0 %v13988_v8  ;;  %9546 = vmatprep.subr.bf16.mxu1 %v13990_v3  ;;  %v14012_v43 = vpack.c.bf16 %v411_v2, %v407_v40  ;;  %v14014_v9 = vpack.c.bf16 %v413_v27, %v409_v19  ;;  %v16684_v19 = vld [vmem:[#allocation56_spill] sm:$0xff]  ;;  %v16685_v40 = vld [vmem:[#allocation57_spill] sm:$0xff]  ;;  %v16687_v2 = vld [vmem:[#allocation59_spill] sm:$0xff] }
 0x202   :  { %v16688_v27 = vld [vmem:[#allocation60_spill] sm:$0xff] }
 0x204   :  { %9516 = vmatpush1.bf16.msra.mxu0 %v13994_v45  ;;  %9548 = vmatpush1.bf16.msra.mxu1 %v13996_v26 }
 0x205   :  { %9518 = vmatprep.subr.bf16.mxu0 %v14000_v46  ;;  %9550 = vmatprep.subr.bf16.mxu1 %v14002_v47 }
 0x208   :  { %9520 = vmatpush1.bf16.msra.mxu0 %v14006_v21  ;;  %9552 = vmatpush1.bf16.msra.mxu1 %v14008_v57 }
 0x209   :  { %9522 = vmatprep.subr.bf16.mxu0 %v14012_v43  ;;  %9554 = vmatprep.subr.bf16.mxu1 %v14014_v9 }
 0x20c   :  { %9524 = vmatpush1.bf16.msra.mxu0 %v14018_v1  ;;  %9556 = vmatpush1.bf16.msra.mxu1 %v14020_v32 }
 0x20d   :  { %9558 = vmatprep.subr.bf16.mxu0 %v13694_v38  ;;  %9590 = vmatprep.subr.bf16.mxu1 %v13696_v42 }
 0x20f   :  { %1241 = vmatmul.mubr.f32.vlgmr.msra.gmra.mrb[4].mxu0 %v16672_v39  ;;  %1312 = vmatmul.mubr.f32.vlgmr.msra.gmra.mrb[4].mxu1 %v16672_v39 }
 0x210   :  { %9560 = vmatpush1.bf16.msra.mxu0 %v13701_v49  ;;  %9592 = vmatpush1.bf16.msra.mxu1 %v13704_v50 }
 0x211   :  { %9562 = vmatprep.subr.bf16.mxu0 %v13706_v51  ;;  %9594 = vmatprep.subr.bf16.mxu1 %v13709_v55 }
 0x212   :  { %1410 = vmatprep.mubr.f32.mxu0 %v16672_v39  ;;  %1481 = vmatprep.mubr.f32.mxu1 %v16672_v39 }
 0x214   :  { %9564 = vmatpush1.bf16.msra.mxu0 %v13712_v61  ;;  %9596 = vmatpush1.bf16.msra.mxu1 %v13716_v62 }
 0x215   :  { %9566 = vmatprep.subr.bf16.mxu0 %v13718_v63  ;;  %9598 = vmatprep.subr.bf16.mxu1 %v13721_v4 }
 0x218   :  { %9568 = vmatpush1.bf16.msra.mxu0 %v13726_v10  ;;  %9600 = vmatpush1.bf16.msra.mxu1 %v13730_v11 }
 0x219   :  { %9570 = vmatprep.subr.bf16.mxu0 %v13732_v12  ;;  %9602 = vmatprep.subr.bf16.mxu1 %v13735_v16 }
 0x21c   :  { %9572 = vmatpush1.bf16.msra.mxu0 %v13738_v22  ;;  %9604 = vmatpush1.bf16.msra.mxu1 %v13742_v23 }
 0x21d   :  { %9574 = vmatprep.subr.bf16.mxu0 %v13744_v24  ;;  %9606 = vmatprep.subr.bf16.mxu1 %v13747_v28 }
 0x220   :  { %9576 = vmatpush1.bf16.msra.mxu0 %v13750_v34  ;;  %9608 = vmatpush1.bf16.msra.mxu1 %v13754_v35 }
 0x221   :  { %9578 = vmatprep.subr.bf16.mxu0 %v13756_v36  ;;  %9610 = vmatprep.subr.bf16.mxu1 %v13759_v41 }
 0x224   :  { %9580 = vmatpush1.bf16.msra.mxu0 %v13762_v48  ;;  %9612 = vmatpush1.bf16.msra.mxu1 %v13766_v52 }
 0x225   :  { %9582 = vmatprep.subr.bf16.mxu0 %v13768_v53  ;;  %9614 = vmatprep.subr.bf16.mxu1 %v13771_v58 }
 0x228   :  { %9584 = vmatpush1.bf16.msra.mxu0 %v13774_v5  ;;  %9616 = vmatpush1.bf16.msra.mxu1 %v13778_v6 }
 0x229   :  { %9586 = vmatprep.subr.bf16.mxu0 %v13780_v7  ;;  %9618 = vmatprep.subr.bf16.mxu1 %v13783_v13  ;;  %v16718_v13 = vld [vmem:[#allocation88_spill] sm:$0xff] }
 0x22c   :  { %9588 = vmatpush1.bf16.msra.mxu0 %v13786_v17  ;;  %9620 = vmatpush1.bf16.msra.mxu1 %v13790_v18 }
 0x22d   :  { %9622 = vmatprep.subr.bf16.mxu0 %v13799_v25  ;;  %9654 = vmatprep.subr.bf16.mxu1 %v13801_v30 }
 0x22f   :  { %1411 = vmatmul.mubr.f32.vlgmr.msra.gmra.mrb[6].mxu0 %v13931_v15  ;;  %1482 = vmatmul.mubr.f32.vlgmr.msra.gmra.mrb[6].mxu1 %v13931_v15  ;;  %v16686_v15 = vld [vmem:[#allocation58_spill] sm:$0xff] }
 0x230   :  { %9624 = vmatpush1.bf16.msra.mxu0 %v13803_v31  ;;  %9656 = vmatpush1.bf16.msra.mxu1 %v13806_v37 }
 0x231   :  { %9626 = vmatprep.subr.bf16.mxu0 %v13811_v44  ;;  %9658 = vmatprep.subr.bf16.mxu1 %v13813_v54  ;;  %v16714_v54 = vld [vmem:[#allocation87_spill] sm:$0xff] }
 0x232   :  { %1604 = vmatprep.mubr.f32.mxu0 %v16672_v39  ;;  %1675 = vmatprep.mubr.f32.mxu1 %v16672_v39 }
 0x234   :  { %9628 = vmatpush1.bf16.msra.mxu0 %v13815_v56  ;;  %9660 = vmatpush1.bf16.msra.mxu1 %v13818_v60 }
 0x235   :  { %9630 = vmatprep.subr.bf16.mxu0 %v16684_v19  ;;  %9662 = vmatprep.subr.bf16.mxu1 %v16685_v40  ;;  %v16695_v19 = vld [vmem:[#allocation67_spill] sm:$0xff]  ;;  %v16696_v40 = vld [vmem:[#allocation68_spill] sm:$0xff] }
 0x238   :  { %9632 = vmatpush1.bf16.msra.mxu0 %v16686_v15  ;;  %9664 = vmatpush1.bf16.msra.mxu1 %v16687_v2  ;;  %v16697_v15 = vld [vmem:[#allocation69_spill] sm:$0xff]  ;;  %v16698_v2 = vld [vmem:[#allocation70_spill] sm:$0xff] }
 0x239   :  { %9634 = vmatprep.subr.bf16.mxu0 %v16688_v27  ;;  %9666 = vmatprep.subr.bf16.mxu1 %v16689_v29  ;;  %v16699_v27 = vld [vmem:[#allocation71_spill] sm:$0xff]  ;;  %v16700_v29 = vld [vmem:[#allocation72_spill] sm:$0xff] }
 0x23c   :  { %9636 = vmatpush1.bf16.msra.mxu0 %v16690_v20  ;;  %9668 = vmatpush1.bf16.msra.mxu1 %v16691_v59  ;;  %v16701_v20 = vld [vmem:[#allocation73_spill] sm:$0xff]  ;;  %v16702_v59 = vld [vmem:[#allocation74_spill] sm:$0xff] }
 0x23d   :  { %9638 = vmatprep.subr.bf16.mxu0 %v16692_v0  ;;  %9670 = vmatprep.subr.bf16.mxu1 %v16693_v33  ;;  %v16703_v0 = vld [vmem:[#allocation75_spill] sm:$0xff]  ;;  %v16704_v33 = vld [vmem:[#allocation76_spill] sm:$0xff] }
 0x240   :  { %9640 = vmatpush1.bf16.msra.mxu0 %v16694_v14  ;;  %9672 = vmatpush1.bf16.msra.mxu1 %v16695_v19  ;;  %v16705_v14 = vld [vmem:[#allocation77_spill] sm:$0xff]  ;;  %v16706_v19 = vld [vmem:[#allocation78_spill] sm:$0xff] }
 0x241   :  { %9642 = vmatprep.subr.bf16.mxu0 %v16696_v40  ;;  %9674 = vmatprep.subr.bf16.mxu1 %v16697_v15  ;;  %v16707_v40 = vld [vmem:[#allocation79_spill] sm:$0xff]  ;;  %v16708_v15 = vld [vmem:[#allocation80_spill] sm:$0xff] }
 0x244   :  { %9644 = vmatpush1.bf16.msra.mxu0 %v16698_v2  ;;  %9676 = vmatpush1.bf16.msra.mxu1 %v16699_v27  ;;  %v16709_v2 = vld [vmem:[#allocation81_spill] sm:$0xff] }
 0x245   :  { %9646 = vmatprep.subr.bf16.mxu0 %v16700_v29  ;;  %9678 = vmatprep.subr.bf16.mxu1 %v16701_v20  ;;  %v14103_v20 = vld [vmem:[%s16230_s6] sm:$0xf] }
 0x248   :  { %9648 = vmatpush1.bf16.msra.mxu0 %v16702_v59  ;;  %9680 = vmatpush1.bf16.msra.mxu1 %v16703_v0  ;;  %v16710_v59 = vld [vmem:[#allocation82_spill] sm:$0xff] }
 0x249   :  { %9650 = vmatprep.subr.bf16.mxu0 %v16704_v33  ;;  %9682 = vmatprep.subr.bf16.mxu1 %v16705_v14  ;;  %v14107_v0 = vrot.slane %v14103_v20, %v16710_v59  ;;  %v16712_v33 = vld [vmem:[#allocation83_spill] sm:$0xff]  ;;  %v14119_v59 = vrot.slane %v14103_v20, %v16714_v54 }
 0x24a   :  { %v14111_v14 = vrot.slane %v14103_v20, %v16712_v33 }
 0x24b   :  { %16711 = vst [vmem:[#allocation110_spill] sm:$0xff] %v14107_v0  ;;  %16715 = vst [vmem:[#allocation112_spill] sm:$0xff] %v14119_v59 }
 0x24c   :  { %9652 = vmatpush1.bf16.msra.mxu0 %v16706_v19  ;;  %9684 = vmatpush1.bf16.msra.mxu1 %v16707_v40  ;;  %16713 = vst [vmem:[#allocation111_spill] sm:$0xff] %v14111_v14 }
 0x24d   :  { %9686 = vmatprep.subr.bf16.mxu0 %v16708_v15  ;;  %9718 = vmatprep.subr.bf16.mxu1 %v16709_v2 }
 0x2e2   :  { %v1242_v19 = vpop.f32.mrb[4].mxu0  ;;  %v1313_v29 = vpop.f32.mrb[4].mxu1 }
 0x2e3   :  { %v12525_v40 = vadd.f32 %v1242_v19, %v14107_v0  ;;  %v1244_v15 = vpop.f32.mrb[5].mxu0  ;;  %v14114_v27 = vpop.f32.mrb[5].mxu1  ;;  %v12527_v33 = vadd.f32 %v1313_v29, %v14119_v59  ;;  %v16716_v59 = vld [vmem:[#allocation85_spill] sm:$0xff] }
 0x2e4   :  { %v12526_v2 = vadd.f32 %v1244_v15, %v14111_v14 }
 0x2e5   :  { %v9141_v60 = vmul.f32 -1.442695, %v12525_v40 }
 0x2e6   :  { %v9142_v56 = vmul.f32 -1.442695, %v12526_v2 }
 0x2e7   :  { %12687 = vpow2.f32 %v9141_v60 }
 0x2e8   :  { %12689 = vpow2.f32 %v9142_v56 }
 0x2e9   :  { %12691 = vtanh.f32 %v12527_v33 }
 0x2f1   :  { %v12688_v44 = vpop.eup %12687 }
 0x2f2   :  { %v12690_v37 = vpop.eup %12689  ;;  %v1331_v31 = vadd.f32 1.0, %v12688_v44  ;;  %v16717_v44 = vld [vmem:[#allocation86_spill] sm:$0xff] }
 0x2f3   :  { %v1332_v19 = vadd.f32 1.0, %v12690_v37  ;;  %v12692_v0 = vpop.eup %12691 }
 0x2f4   :  { %12693 = vrcp.f32 %v1331_v31 }
 0x2f5   :  { %12695 = vrcp.f32 %v1332_v19 }
 0x2fe   :  { %v12694_v30 = vpop.eup %12693 }
 0x2ff   :  { %v12696_v15 = vpop.eup %12695  ;;  %v1342_v40 = vmul.f32 %v12694_v30, %v12692_v0 }
 0x300   :  { %v1341_v2 = vmul.f32 0.0, %v12696_v15 }
 0x302   :  { %v14122_v60 = vadd.f32 %v1342_v40, %v1341_v2  ;;  %v1412_v56 = vpop.f32.mrb[6].mxu0  ;;  %v1483_v14 = vpop.f32.mrb[6].mxu1  ;;  %v16719_v40 = vld [vmem:[#allocation89_spill] sm:$0xff] }
 0x303   :  { %v1492_v54 = vrot.slane %v1412_v56, 7  ;;  %v1414_v25 = vpop.f32.mrb[7].mxu0  ;;  %v1485_v18 = vpop.f32.mrb[7].mxu1  ;;  %v1494_v0 = vrot.slane %v1483_v14, 7 }
 0x304   :  { %v1493_v29 = vrot.slane %v1414_v25, 7  ;;  %v1495_v19 = vrot.slane %v1485_v18, 7  ;;  %v16720_v18 = vld [vmem:[#allocation90_spill] sm:$0xff] }
 0x305   :  { %v1500_v17 = vadd.f32 %v1492_v54, %v16716_v59  ;;  %v1502_v2 = vadd.f32 %v1494_v0, %v16719_v40 }
 0x306   :  { %v1501_v33 = vadd.f32 %v1493_v29, %v16717_v44  ;;  %v1503_v30 = vadd.f32 %v1495_v19, %v16718_v13 }
 0x307   :  { %v9144_v37 = vmul.f32 -1.442695, %v1500_v17 }
 0x308   :  { %v9145_v31 = vmul.f32 -1.442695, %v1501_v33  ;;  %v9146_v15 = vmul.f32 -1.442695, %v1503_v30  ;;  %v1524_v33 = vrot.slane %v16720_v18, 7 }
 0x309   :  { %12697 = vpow2.f32 %v9144_v37 }
 0x30a   :  { %12699 = vpow2.f32 %v9145_v31 }
 0x30b   :  { %12701 = vpow2.f32 %v9146_v15 }
 0x30c   :  { %12703 = vtanh.f32 %v1502_v2 }
 0x313   :  { %v12698_v7 = vpop.eup %12697 }
 0x314   :  { %v12700_v56 = vpop.eup %12699  ;;  %v1513_v6 = vadd.f32 1.0, %v12698_v7 }
 0x315   :  { %v1514_v25 = vadd.f32 1.0, %v12700_v56  ;;  %v12702_v54 = vpop.eup %12701 }
 0x316   :  { %12705 = vrcp.f32 %v1513_v6  ;;  %v12704_v17 = vpop.eup %12703  ;;  %v1515_v19 = vadd.f32 1.0, %v12702_v54 }
 0x317   :  { %12707 = vrcp.f32 %v1514_v25  ;;  %v16721_v25 = vld [vmem:[#allocation84_spill] sm:$0xff] }
 0x318   :  { %12709 = vrcp.f32 %v1515_v19  ;;  %v16724_v19 = vld [vmem:[#allocation93_spill] sm:$0xff] }
 0x320   :  { %v12706_v29 = vpop.eup %12705 }
 0x321   :  { %v12708_v37 = vpop.eup %12707  ;;  %v1527_v31 = vmul.f32 %v12706_v29, %v12704_v17  ;;  %v14137_v17 = vrot.slane %v14103_v20, %v16721_v25  ;;  %v16726_v20 = vld [vmem:[#allocation95_spill] sm:$0xff]  ;;  %v16736_v25 = vld [vmem:[#allocation105_spill] sm:$0xff] }
 0x322   :  { %v1526_v14 = vmul.f32 %v12708_v37, %v1524_v33  ;;  %v12710_v7 = vpop.eup %12709  ;;  %v16722_v37 = vld [vmem:[#allocation91_spill] sm:$0xff] }
 0x323   :  { %v12528_v54 = vadd.f32 %v14114_v27, %v14137_v17  ;;  %v16727_v27 = vld [vmem:[#allocation96_spill] sm:$0xff] }
 0x324   :  { %v14129_v30 = vadd.f32 %v1527_v31, %v1526_v14  ;;  %v16723_v31 = vld [vmem:[#allocation92_spill] sm:$0xff]  ;;  %v16725_v14 = vld [vmem:[#allocation94_spill] sm:$0xff] }
 0x325   :  { %v9143_v18 = vmul.f32 -1.442695, %v12528_v54  ;;  %v16733_v54 = vld [vmem:[#allocation102_spill] sm:$0xff] }
 0x326   :  { %12711 = vtanh.f32 %v14129_v30 }
 0x330   :  { %v12712_v0 = vpop.eup %12711 }
 0x331   :  { %v14132_v15 = vmul.f32 %v12712_v0, %v12710_v7  ;;  %v16728_v7 = vld [vmem:[#allocation97_spill] sm:$0xff]  ;;  %v16729_v0 = vld [vmem:[#allocation98_spill] sm:$0xff] }
 0x333   :  { %v9147_v6 = vmul.f32 -1.442695, %v14132_v15 }
 0x335   :  { %12713 = vpow2.f32 %v9147_v6  ;;  %v16730_v6 = vld [vmem:[#allocation99_spill] sm:$0xff] }
 0x33f   :  { %v12714_v2 = vpop.eup %12713 }
 0x340   :  { %v1534_v56 = vadd.f32 1.0, %v12714_v2  ;;  %v16731_v2 = vld [vmem:[#allocation100_spill] sm:$0xff] }
 0x342   :  { %12715 = vrcp.f32 %v1534_v56  ;;  %v16732_v56 = vld [vmem:[#allocation101_spill] sm:$0xff] }
 0x343   :  { %12717 = vpow2.f32 %v9143_v18  ;;  %v16734_v18 = vld [vmem:[#allocation103_spill] sm:$0xff] }
 0x344   :  { %12719 = vtanh.f32 %v14122_v60 }
 0x34c   :  { %v12716_v29 = vpop.eup %12715 }
 0x34d   :  { %v1538_v33 = vrot.slane %v12716_v29, 1  ;;  %v12718_v29 = vpop.eup %12717 }
 0x34f   :  { %1605 = vmatmul.mubr.f32.vlgmr.msra.gmra.mrb[8].mxu0 %v1538_v33  ;;  %1676 = vmatmul.mubr.f32.vlgmr.msra.gmra.mrb[8].mxu1 %v1538_v33  ;;  %v16735_v33 = vld [vmem:[#allocation104_spill] sm:$0xff] }
 0x350   :  { %9688 = vmatpush1.bf16.msra.mxu0 %v16722_v37  ;;  %9720 = vmatpush1.bf16.msra.mxu1 %v16723_v31 }
 0x351   :  { %9690 = vmatprep.subr.bf16.mxu0 %v16724_v19  ;;  %9722 = vmatprep.subr.bf16.mxu1 %v16725_v14 }
 0x352   :  { %1746 = vmatprep.mubr.f32.mxu0 %v16672_v39  ;;  %1817 = vmatprep.mubr.f32.mxu1 %v16672_v39 }
 0x354   :  { %9692 = vmatpush1.bf16.msra.mxu0 %v16726_v20  ;;  %9724 = vmatpush1.bf16.msra.mxu1 %v16727_v27  ;;  %v16737_v27 = vld [vmem:[#allocation106_spill] sm:$0xff] }
 0x355   :  { %9694 = vmatprep.subr.bf16.mxu0 %v16728_v7  ;;  %9726 = vmatprep.subr.bf16.mxu1 %v16729_v0  ;;  %v1333_v7 = vadd.f32 1.0, %v12718_v29  ;;  %v16738_v0 = vld [vmem:[#allocation107_spill] sm:$0xff]  ;;  %v12720_v29 = vpop.eup %12719 }
 0x357   :  { %12721 = vrcp.f32 %v1333_v7 }
 0x358   :  { %9696 = vmatpush1.bf16.msra.mxu0 %v16730_v6  ;;  %9728 = vmatpush1.bf16.msra.mxu1 %v16731_v2  ;;  %v16739_v6 = vld [vmem:[#allocation108_spill] sm:$0xff] }
 0x359   :  { %9698 = vmatprep.subr.bf16.mxu0 %v16732_v56  ;;  %9730 = vmatprep.subr.bf16.mxu1 %v16733_v54 }
 0x35c   :  { %9700 = vmatpush1.bf16.msra.mxu0 %v16734_v18  ;;  %9732 = vmatpush1.bf16.msra.mxu1 %v16735_v33 }
 0x35d   :  { %9702 = vmatprep.subr.bf16.mxu0 %v16736_v25  ;;  %9734 = vmatprep.subr.bf16.mxu1 %v16737_v27 }
 0x360   :  { %9704 = vmatpush1.bf16.msra.mxu0 %v16738_v0  ;;  %9736 = vmatpush1.bf16.msra.mxu1 %v16739_v6 }
 0x361   :  { %9706 = vmatprep.subr.bf16.mxu0 %v13988_v8  ;;  %9738 = vmatprep.subr.bf16.mxu1 %v13990_v3  ;;  %v12722_v8 = vpop.eup %12721 }
 0x362   :  { %v1345_v7 = vmul.f32 %v12722_v8, %v12720_v29  ;;  %v16740_v8 = vld [vmem:[#allocation43_spill] sm:$0xff]  ;;  %v16741_v29 = vld [vmem:[#allocation44_spill] sm:$0xff] }
 0x364   :  { %9708 = vmatpush1.bf16.msra.mxu0 %v13994_v45  ;;  %9740 = vmatpush1.bf16.msra.mxu1 %v13996_v26 }
 0x365   :  { %9710 = vmatprep.subr.bf16.mxu0 %v14000_v46  ;;  %9742 = vmatprep.subr.bf16.mxu1 %v14002_v47 }
 0x368   :  { %9712 = vmatpush1.bf16.msra.mxu0 %v14006_v21  ;;  %9744 = vmatpush1.bf16.msra.mxu1 %v14008_v57 }
 0x369   :  { %9714 = vmatprep.subr.bf16.mxu0 %v14012_v43  ;;  %9746 = vmatprep.subr.bf16.mxu1 %v14014_v9 }
 0x36c   :  { %9716 = vmatpush1.bf16.msra.mxu0 %v14018_v1  ;;  %9748 = vmatpush1.bf16.msra.mxu1 %v14020_v32 }
 0x36d   :  { %9750 = vmatprep.subr.bf16.mxu0 %v13694_v38  ;;  %9782 = vmatprep.subr.bf16.mxu1 %v13696_v42 }
 0x36f   :  { %1747 = vmatmul.mubr.f32.vlgmr.msra.gmra.mrb[8].mxu0 %v1345_v7  ;;  %1818 = vmatmul.mubr.f32.vlgmr.msra.gmra.mrb[8].mxu1 %v1345_v7  ;;  %v16742_v7 = vld [vmem:[#allocation45_spill] sm:$0xff] }
 0x370   :  { %9752 = vmatpush1.bf16.msra.mxu0 %v13701_v49  ;;  %9784 = vmatpush1.bf16.msra.mxu1 %v13704_v50 }
 0x371   :  { %9754 = vmatprep.subr.bf16.mxu0 %v13706_v51  ;;  %9786 = vmatprep.subr.bf16.mxu1 %v13709_v55 }
 0x372   :  { %1919 = vmatprep.mubr.f32.mxu0 %v16672_v39  ;;  %1990 = vmatprep.mubr.f32.mxu1 %v16672_v39 }
 0x374   :  { %9756 = vmatpush1.bf16.msra.mxu0 %v13712_v61  ;;  %9788 = vmatpush1.bf16.msra.mxu1 %v13716_v62 }
 0x375   :  { %9758 = vmatprep.subr.bf16.mxu0 %v13718_v63  ;;  %9790 = vmatprep.subr.bf16.mxu1 %v13721_v4 }
 0x378   :  { %9760 = vmatpush1.bf16.msra.mxu0 %v13726_v10  ;;  %9792 = vmatpush1.bf16.msra.mxu1 %v13730_v11 }
 0x379   :  { %9762 = vmatprep.subr.bf16.mxu0 %v13732_v12  ;;  %9794 = vmatprep.subr.bf16.mxu1 %v13735_v16 }
 0x37c   :  { %9764 = vmatpush1.bf16.msra.mxu0 %v13738_v22  ;;  %9796 = vmatpush1.bf16.msra.mxu1 %v13742_v23 }
 0x37d   :  { %9766 = vmatprep.subr.bf16.mxu0 %v13744_v24  ;;  %9798 = vmatprep.subr.bf16.mxu1 %v13747_v28 }
 0x380   :  { %9768 = vmatpush1.bf16.msra.mxu0 %v13750_v34  ;;  %9800 = vmatpush1.bf16.msra.mxu1 %v13754_v35  ;;  %v16743_v35 = vld [vmem:[#allocation46_spill] sm:$0xff] }
 0x381   :  { %9770 = vmatprep.subr.bf16.mxu0 %v13756_v36  ;;  %9802 = vmatprep.subr.bf16.mxu1 %v13759_v41  ;;  %v16744_v36 = vld [vmem:[#allocation47_spill] sm:$0xff]  ;;  %v16745_v41 = vld [vmem:[#allocation48_spill] sm:$0xff] }
 0x384   :  { %9772 = vmatpush1.bf16.msra.mxu0 %v13762_v48  ;;  %9804 = vmatpush1.bf16.msra.mxu1 %v13766_v52  ;;  %v1853_v48 = vrot.slane %v14132_v15, 1  ;;  %v16746_v52 = vld [vmem:[#allocation49_spill] sm:$0xff]  ;;  %v16752_v15 = vld [vmem:[#allocation55_spill] sm:$0xff] }
 0x385   :  { %9774 = vmatprep.subr.bf16.mxu0 %v13768_v53  ;;  %9806 = vmatprep.subr.bf16.mxu1 %v13771_v58  ;;  %v16747_v58 = vld [vmem:[#allocation50_spill] sm:$0xff] }
 0x386   :  { %v16779_v53 = vld [vmem:[#allocation110_spill] sm:$0xff] }
 0x388   :  { %9776 = vmatpush1.bf16.msra.mxu0 %v13774_v5  ;;  %9808 = vmatpush1.bf16.msra.mxu1 %v16740_v8  ;;  %v16748_v5 = vld [vmem:[#allocation51_spill] sm:$0xff]  ;;  %v16749_v8 = vld [vmem:[#allocation52_spill] sm:$0xff] }
 0x389   :  { %9778 = vmatprep.subr.bf16.mxu0 %v16741_v29  ;;  %9810 = vmatprep.subr.bf16.mxu1 %v16742_v7  ;;  %v16750_v29 = vld [vmem:[#allocation53_spill] sm:$0xff]  ;;  %v16761_v7 = vld [vmem:[#allocation64_spill] sm:$0xff] }
 0x38c   :  { %9780 = vmatpush1.bf16.msra.mxu0 %v16743_v35  ;;  %9812 = vmatpush1.bf16.msra.mxu1 %v16744_v36  ;;  %v16751_v36 = vld [vmem:[#allocation54_spill] sm:$0xff]  ;;  %v16760_v35 = vld [vmem:[#allocation63_spill] sm:$0xff] }
 0x38d   :  { %9814 = vmatprep.subr.bf16.mxu0 %v16745_v41  ;;  %9846 = vmatprep.subr.bf16.mxu1 %v16746_v52  ;;  %v16753_v41 = vld [vmem:[#allocation56_spill] sm:$0xff]  ;;  %v16754_v52 = vld [vmem:[#allocation57_spill] sm:$0xff] }
 0x38f   :  { %1920 = vmatmul.mubr.f32.vlgmr.msra.gmra.mrb[10].mxu0 %v1853_v48  ;;  %1991 = vmatmul.mubr.f32.vlgmr.msra.gmra.mrb[10].mxu1 %v1853_v48  ;;  %v16755_v48 = vld [vmem:[#allocation58_spill] sm:$0xff] }
 0x390   :  { %9816 = vmatpush1.bf16.msra.mxu0 %v16747_v58  ;;  %9848 = vmatpush1.bf16.msra.mxu1 %v16748_v5  ;;  %v16756_v58 = vld [vmem:[#allocation59_spill] sm:$0xff]  ;;  %v16757_v5 = vld [vmem:[#allocation60_spill] sm:$0xff] }
 0x391   :  { %9818 = vmatprep.subr.bf16.mxu0 %v16749_v8  ;;  %9850 = vmatprep.subr.bf16.mxu1 %v16750_v29  ;;  %v16758_v8 = vld [vmem:[#allocation61_spill] sm:$0xff]  ;;  %v16759_v29 = vld [vmem:[#allocation62_spill] sm:$0xff] }
 0x392   :  { %2113 = vmatprep.mubr.f32.mxu0 %v16672_v39  ;;  %2184 = vmatprep.mubr.f32.mxu1 %v16672_v39 }
 0x394   :  { %9820 = vmatpush1.bf16.msra.mxu0 %v16751_v36  ;;  %9852 = vmatpush1.bf16.msra.mxu1 %v16752_v15  ;;  %v16762_v36 = vld [vmem:[#allocation65_spill] sm:$0xff]  ;;  %v16763_v15 = vld [vmem:[#allocation66_spill] sm:$0xff] }
 0x395   :  { %9822 = vmatprep.subr.bf16.mxu0 %v16753_v41  ;;  %9854 = vmatprep.subr.bf16.mxu1 %v16754_v52  ;;  %v16764_v41 = vld [vmem:[#allocation67_spill] sm:$0xff]  ;;  %v16765_v52 = vld [vmem:[#allocation68_spill] sm:$0xff] }
 0x398   :  { %9824 = vmatpush1.bf16.msra.mxu0 %v16755_v48  ;;  %9856 = vmatpush1.bf16.msra.mxu1 %v16756_v58  ;;  %v16766_v48 = vld [vmem:[#allocation69_spill] sm:$0xff]  ;;  %v16767_v58 = vld [vmem:[#allocation70_spill] sm:$0xff] }
 0x399   :  { %9826 = vmatprep.subr.bf16.mxu0 %v16757_v5  ;;  %9858 = vmatprep.subr.bf16.mxu1 %v16758_v8  ;;  %v16768_v5 = vld [vmem:[#allocation71_spill] sm:$0xff]  ;;  %v16769_v8 = vld [vmem:[#allocation72_spill] sm:$0xff] }
 0x39c   :  { %9828 = vmatpush1.bf16.msra.mxu0 %v16759_v29  ;;  %9860 = vmatpush1.bf16.msra.mxu1 %v16760_v35  ;;  %v16770_v29 = vld [vmem:[#allocation73_spill] sm:$0xff]  ;;  %v16771_v35 = vld [vmem:[#allocation74_spill] sm:$0xff] }
 0x39d   :  { %9830 = vmatprep.subr.bf16.mxu0 %v16761_v7  ;;  %9862 = vmatprep.subr.bf16.mxu1 %v16762_v36  ;;  %v16772_v7 = vld [vmem:[#allocation75_spill] sm:$0xff]  ;;  %v16773_v36 = vld [vmem:[#allocation76_spill] sm:$0xff] }
 0x3a0   :  { %9832 = vmatpush1.bf16.msra.mxu0 %v16763_v15  ;;  %9864 = vmatpush1.bf16.msra.mxu1 %v16764_v41  ;;  %v16774_v15 = vld [vmem:[#allocation77_spill] sm:$0xff]  ;;  %v16775_v41 = vld [vmem:[#allocation78_spill] sm:$0xff] }
 0x3a1   :  { %9834 = vmatprep.subr.bf16.mxu0 %v16765_v52  ;;  %9866 = vmatprep.subr.bf16.mxu1 %v16766_v48  ;;  %v16776_v52 = vld [vmem:[#allocation79_spill] sm:$0xff]  ;;  %v16777_v48 = vld [vmem:[#allocation80_spill] sm:$0xff] }
 0x3a4   :  { %9836 = vmatpush1.bf16.msra.mxu0 %v16767_v58  ;;  %9868 = vmatpush1.bf16.msra.mxu1 %v16768_v5  ;;  %v16778_v58 = vld [vmem:[#allocation81_spill] sm:$0xff] }
 0x3a5   :  { %9838 = vmatprep.subr.bf16.mxu0 %v16769_v8  ;;  %9870 = vmatprep.subr.bf16.mxu1 %v16770_v29 }
 0x3a8   :  { %9840 = vmatpush1.bf16.msra.mxu0 %v16771_v35  ;;  %9872 = vmatpush1.bf16.msra.mxu1 %v16772_v7  ;;  %v16780_v7 = vld [vmem:[#allocation111_spill] sm:$0xff] }
 0x3a9   :  { %9842 = vmatprep.subr.bf16.mxu0 %v16773_v36  ;;  %9874 = vmatprep.subr.bf16.mxu1 %v16774_v15 }
 0x3ac   :  { %9844 = vmatpush1.bf16.msra.mxu0 %v16775_v41  ;;  %9876 = vmatpush1.bf16.msra.mxu1 %v16776_v52  ;;  %v16781_v41 = vld [vmem:[#allocation112_spill] sm:$0xff] }
 0x3ad   :  { %9878 = vmatprep.subr.bf16.mxu0 %v16777_v48  ;;  %9910 = vmatprep.subr.bf16.mxu1 %v16778_v58 }
 0x442   :  { %v1748_v5 = vpop.f32.mrb[8].mxu0  ;;  %v1819_v8 = vpop.f32.mrb[8].mxu1 }
 0x443   :  { %v12529_v29 = vadd.f32 %v1748_v5, %v16779_v53  ;;  %v1750_v34 = vpop.f32.mrb[9].mxu0  ;;  %v14246_v35 = vpop.f32.mrb[9].mxu1  ;;  %v12531_v15 = vadd.f32 %v1819_v8, %v16781_v41 }
 0x444   :  { %v12530_v28 = vadd.f32 %v1750_v34, %v16780_v7 }
 0x445   :  { %v9148_v36 = vmul.f32 -1.442695, %v12529_v29 }
 0x446   :  { %v9149_v24 = vmul.f32 -1.442695, %v12530_v28 }
 0x447   :  { %12723 = vpow2.f32 %v9148_v36 }
 0x448   :  { %12725 = vpow2.f32 %v9149_v24 }
 0x449   :  { %12727 = vtanh.f32 %v12531_v15 }
 0x451   :  { %v12724_v52 = vpop.eup %12723 }
 0x452   :  { %v12726_v23 = vpop.eup %12725  ;;  %v1837_v48 = vadd.f32 1.0, %v12724_v52 }
 0x453   :  { %v1838_v58 = vadd.f32 1.0, %v12726_v23  ;;  %v12728_v22 = vpop.eup %12727 }
 0x454   :  { %12729 = vrcp.f32 %v1837_v48 }
 0x455   :  { %12731 = vrcp.f32 %v1838_v58 }
 0x45e   :  { %v12730_v5 = vpop.eup %12729 }
 0x45f   :  { %v12732_v53 = vpop.eup %12731  ;;  %v1848_v16 = vmul.f32 %v12730_v5, %v12728_v22 }
 0x460   :  { %v1847_v12 = vmul.f32 %v12732_v53, %v14122_v60 }
 0x462   :  { %v14251_v34 = vadd.f32 %v1848_v16, %v1847_v12  ;;  %v1921_v28 = vpop.f32.mrb[10].mxu0  ;;  %v1992_v36 = vpop.f32.mrb[10].mxu1 }
 0x463   :  { %v2001_v24 = vrot.slane %v1921_v28, 6  ;;  %v1923_v29 = vpop.f32.mrb[11].mxu0  ;;  %v1994_v8 = vpop.f32.mrb[11].mxu1  ;;  %v2003_v53 = vrot.slane %v1992_v36, 6 }
 0x464   :  { %v2002_v41 = vrot.slane %v1923_v29, 6  ;;  %v2004_v48 = vrot.slane %v1994_v8, 6  ;;  %v2033_v8 = vrot.slane %v14129_v30, 7  ;;  %v12532_v30 = vadd.f32 %v14246_v35, %v14137_v17  ;;  %v16782_v35 = vld [vmem:[#allocation96_spill] sm:$0xff] }
 0x465   :  { %v2009_v52 = vadd.f32 %v2001_v24, %v16716_v59  ;;  %v2011_v16 = vadd.f32 %v2003_v53, %v16719_v40 }
 0x466   :  { %v2010_v23 = vadd.f32 %v2002_v41, %v16717_v44  ;;  %v2012_v22 = vadd.f32 %v2004_v48, %v16718_v13 }
 0x467   :  { %v9151_v15 = vmul.f32 -1.442695, %v2009_v52 }
 0x468   :  { %v9152_v58 = vmul.f32 -1.442695, %v2010_v23  ;;  %v9153_v12 = vmul.f32 -1.442695, %v2012_v22 }
 0x469   :  { %12733 = vpow2.f32 %v9151_v15 }
 0x46a   :  { %12735 = vpow2.f32 %v9152_v58 }
 0x46b   :  { %12737 = vpow2.f32 %v9153_v12 }
 0x46c   :  { %12739 = vtanh.f32 %v2011_v16 }
 0x473   :  { %v12734_v60 = vpop.eup %12733 }
 0x474   :  { %v12736_v5 = vpop.eup %12735  ;;  %v2022_v28 = vadd.f32 1.0, %v12734_v60 }
 0x475   :  { %v2023_v29 = vadd.f32 1.0, %v12736_v5  ;;  %v12738_v41 = vpop.eup %12737 }
 0x476   :  { %12741 = vrcp.f32 %v2022_v28  ;;  %v12740_v24 = vpop.eup %12739  ;;  %v2024_v58 = vadd.f32 1.0, %v12738_v41 }
 0x477   :  { %12743 = vrcp.f32 %v2023_v29  ;;  %v9150_v29 = vmul.f32 -1.442695, %v12532_v30  ;;  %v16790_v30 = vld [vmem:[#allocation31_spill] sm:$0xff] }
 0x478   :  { %12745 = vrcp.f32 %v2024_v58  ;;  %v16786_v58 = vld [vmem:[#allocation109_spill] sm:$0xff] }
 0x480   :  { %v12742_v52 = vpop.eup %12741 }
 0x481   :  { %v12744_v23 = vpop.eup %12743  ;;  %v2036_v15 = vmul.f32 %v12742_v52, %v12740_v24  ;;  %v16783_v24 = vld [vmem:[#allocation97_spill] sm:$0xff]  ;;  %v16784_v52 = vld [vmem:[#allocation98_spill] sm:$0xff] }
 0x482   :  { %v2035_v36 = vmul.f32 %v12744_v23, %v2033_v8  ;;  %v12746_v22 = vpop.eup %12745  ;;  %v16785_v8 = vld [vmem:[#allocation99_spill] sm:$0xff] }
 0x484   :  { %v14258_v48 = vadd.f32 %v2036_v15, %v2035_v36 }
 0x486   :  { %12747 = vtanh.f32 %v14258_v48 }
 0x490   :  { %v12748_v53 = vpop.eup %12747 }
 0x491   :  { %v14261_v12 = vmul.f32 %v12748_v53, %v12746_v22 }
 0x493   :  { %v9154_v16 = vmul.f32 -1.442695, %v14261_v12 }
 0x495   :  { %12749 = vpow2.f32 %v9154_v16  ;;  %v16787_v16 = vld [vmem:[#allocation28_spill] sm:$0xff] }
 0x49f   :  { %v12750_v60 = vpop.eup %12749 }
 0x4a0   :  { %v2043_v5 = vadd.f32 1.0, %v12750_v60  ;;  %v16788_v60 = vld [vmem:[#allocation29_spill] sm:$0xff] }
 0x4a2   :  { %12751 = vrcp.f32 %v2043_v5  ;;  %v16789_v5 = vld [vmem:[#allocation30_spill] sm:$0xff] }
 0x4a3   :  { %12753 = vpow2.f32 %v9150_v29  ;;  %v16792_v29 = vld [vmem:[#allocation33_spill] sm:$0xff] }
 0x4a4   :  { %12755 = vtanh.f32 %v14251_v34 }
 0x4ac   :  { %v12752_v28 = vpop.eup %12751 }
 0x4ad   :  { %v2047_v41 = vrot.slane %v12752_v28, 2  ;;  %v12754_v23 = vpop.eup %12753  ;;  %v16791_v28 = vld [vmem:[#allocation32_spill] sm:$0xff] }
 0x4ae   :  { %v1839_v15 = vadd.f32 1.0, %v12754_v23  ;;  %v12756_v36 = vpop.eup %12755  ;;  %v16794_v23 = vld [vmem:[#allocation35_spill] sm:$0xff] }
 0x4af   :  { %2114 = vmatmul.mubr.f32.vlgmr.msra.gmra.mrb[12].mxu0 %v2047_v41  ;;  %2185 = vmatmul.mubr.f32.vlgmr.msra.gmra.mrb[12].mxu1 %v2047_v41  ;;  %v16793_v41 = vld [vmem:[#allocation34_spill] sm:$0xff] }
 0x4b0   :  { %9880 = vmatpush1.bf16.msra.mxu0 %v16722_v37  ;;  %9912 = vmatpush1.bf16.msra.mxu1 %v16723_v31  ;;  %12757 = vrcp.f32 %v1839_v15  ;;  %v16795_v15 = vld [vmem:[#allocation36_spill] sm:$0xff] }
 0x4b1   :  { %9882 = vmatprep.subr.bf16.mxu0 %v16724_v19  ;;  %9914 = vmatprep.subr.bf16.mxu1 %v16725_v14 }
 0x4b2   :  { %2255 = vmatprep.mubr.f32.mxu0 %v16672_v39  ;;  %2326 = vmatprep.mubr.f32.mxu1 %v16672_v39 }
 0x4b4   :  { %9884 = vmatpush1.bf16.msra.mxu0 %v16726_v20  ;;  %9916 = vmatpush1.bf16.msra.mxu1 %v16782_v35 }
 0x4b5   :  { %9886 = vmatprep.subr.bf16.mxu0 %v16783_v24  ;;  %9918 = vmatprep.subr.bf16.mxu1 %v16784_v52 }
 0x4b8   :  { %9888 = vmatpush1.bf16.msra.mxu0 %v16785_v8  ;;  %9920 = vmatpush1.bf16.msra.mxu1 %v16731_v2 }
 0x4b9   :  { %9890 = vmatprep.subr.bf16.mxu0 %v16732_v56  ;;  %9922 = vmatprep.subr.bf16.mxu1 %v16733_v54 }
 0x4ba   :  { %v12758_v22 = vpop.eup %12757 }
 0x4bb   :  { %v1851_v53 = vmul.f32 %v12758_v22, %v12756_v36  ;;  %v16796_v36 = vld [vmem:[#allocation37_spill] sm:$0xff]  ;;  %v16797_v22 = vld [vmem:[#allocation38_spill] sm:$0xff] }
 0x4bc   :  { %9892 = vmatpush1.bf16.msra.mxu0 %v16734_v18  ;;  %9924 = vmatpush1.bf16.msra.mxu1 %v16735_v33 }
 0x4bd   :  { %9894 = vmatprep.subr.bf16.mxu0 %v16736_v25  ;;  %9926 = vmatprep.subr.bf16.mxu1 %v16737_v27 }
 0x4c0   :  { %9896 = vmatpush1.bf16.msra.mxu0 %v16738_v0  ;;  %9928 = vmatpush1.bf16.msra.mxu1 %v16739_v6 }
 0x4c1   :  { %9898 = vmatprep.subr.bf16.mxu0 %v16786_v58  ;;  %9930 = vmatprep.subr.bf16.mxu1 %v13990_v3 }
 0x4c4   :  { %9900 = vmatpush1.bf16.msra.mxu0 %v13994_v45  ;;  %9932 = vmatpush1.bf16.msra.mxu1 %v13996_v26 }
 0x4c5   :  { %9902 = vmatprep.subr.bf16.mxu0 %v14000_v46  ;;  %9934 = vmatprep.subr.bf16.mxu1 %v14002_v47 }
 0x4c8   :  { %9904 = vmatpush1.bf16.msra.mxu0 %v14006_v21  ;;  %9936 = vmatpush1.bf16.msra.mxu1 %v14008_v57 }
 0x4c9   :  { %9906 = vmatprep.subr.bf16.mxu0 %v14012_v43  ;;  %9938 = vmatprep.subr.bf16.mxu1 %v14014_v9 }
 0x4cc   :  { %9908 = vmatpush1.bf16.msra.mxu0 %v14018_v1  ;;  %9940 = vmatpush1.bf16.msra.mxu1 %v14020_v32 }
 0x4cd   :  { %9942 = vmatprep.subr.bf16.mxu0 %v13694_v38  ;;  %9974 = vmatprep.subr.bf16.mxu1 %v13696_v42 }
 0x4cf   :  { %2256 = vmatmul.mubr.f32.vlgmr.msra.gmra.mrb[12].mxu0 %v1851_v53  ;;  %2327 = vmatmul.mubr.f32.vlgmr.msra.gmra.mrb[12].mxu1 %v1851_v53  ;;  %v16798_v53 = vld [vmem:[#allocation39_spill] sm:$0xff] }
 0x4d0   :  { %9944 = vmatpush1.bf16.msra.mxu0 %v13701_v49  ;;  %9976 = vmatpush1.bf16.msra.mxu1 %v13704_v50 }
 0x4d1   :  { %9946 = vmatprep.subr.bf16.mxu0 %v13706_v51  ;;  %9978 = vmatprep.subr.bf16.mxu1 %v13709_v55 }
 0x4d2   :  { %2428 = vmatprep.mubr.f32.mxu0 %v16672_v39  ;;  %2499 = vmatprep.mubr.f32.mxu1 %v16672_v39 }
 0x4d4   :  { %9948 = vmatpush1.bf16.msra.mxu0 %v13712_v61  ;;  %9980 = vmatpush1.bf16.msra.mxu1 %v13716_v62 }
 0x4d5   :  { %9950 = vmatprep.subr.bf16.mxu0 %v13718_v63  ;;  %9982 = vmatprep.subr.bf16.mxu1 %v13721_v4 }
 0x4d8   :  { %9952 = vmatpush1.bf16.msra.mxu0 %v13726_v10  ;;  %9984 = vmatpush1.bf16.msra.mxu1 %v13730_v11 }
 0x4d9   :  { %9954 = vmatprep.subr.bf16.mxu0 %v16787_v16  ;;  %9986 = vmatprep.subr.bf16.mxu1 %v16788_v60  ;;  %v16799_v60 = vld [vmem:[#allocation40_spill] sm:$0xff] }
 0x4dc   :  { %9956 = vmatpush1.bf16.msra.mxu0 %v16789_v5  ;;  %9988 = vmatpush1.bf16.msra.mxu1 %v16790_v30  ;;  %v16800_v5 = vld [vmem:[#allocation41_spill] sm:$0xff]  ;;  %v16801_v30 = vld [vmem:[#allocation42_spill] sm:$0xff] }
 0x4dd   :  { %9958 = vmatprep.subr.bf16.mxu0 %v16791_v28  ;;  %9990 = vmatprep.subr.bf16.mxu1 %v16792_v29  ;;  %v16802_v28 = vld [vmem:[#allocation43_spill] sm:$0xff]  ;;  %v16803_v29 = vld [vmem:[#allocation44_spill] sm:$0xff] }
 0x4e0   :  { %9960 = vmatpush1.bf16.msra.mxu0 %v16793_v41  ;;  %9992 = vmatpush1.bf16.msra.mxu1 %v16794_v23  ;;  %v16804_v41 = vld [vmem:[#allocation45_spill] sm:$0xff]  ;;  %v16805_v23 = vld [vmem:[#allocation46_spill] sm:$0xff] }
 0x4e1   :  { %9962 = vmatprep.subr.bf16.mxu0 %v16795_v15  ;;  %9994 = vmatprep.subr.bf16.mxu1 %v16796_v36  ;;  %v16806_v15 = vld [vmem:[#allocation47_spill] sm:$0xff]  ;;  %v16807_v36 = vld [vmem:[#allocation48_spill] sm:$0xff] }
 0x4e4   :  { %9964 = vmatpush1.bf16.msra.mxu0 %v16797_v22  ;;  %9996 = vmatpush1.bf16.msra.mxu1 %v16798_v53  ;;  %v2362_v22 = vrot.slane %v14261_v12, 2  ;;  %v16808_v53 = vld [vmem:[#allocation49_spill] sm:$0xff]  ;;  %v16814_v12 = vld [vmem:[#allocation55_spill] sm:$0xff] }
 0x4e5   :  { %9966 = vmatprep.subr.bf16.mxu0 %v16799_v60  ;;  %9998 = vmatprep.subr.bf16.mxu1 %v16800_v5  ;;  %v16809_v5 = vld [vmem:[#allocation50_spill] sm:$0xff] }
 0x4e6   :  { %v16841_v60 = vld [vmem:[#allocation110_spill] sm:$0xff] }
 0x4e8   :  { %9968 = vmatpush1.bf16.msra.mxu0 %v16801_v30  ;;  %10000 = vmatpush1.bf16.msra.mxu1 %v16802_v28  ;;  %v16810_v30 = vld [vmem:[#allocation51_spill] sm:$0xff]  ;;  %v16811_v28 = vld [vmem:[#allocation52_spill] sm:$0xff] }
 0x4e9   :  { %9970 = vmatprep.subr.bf16.mxu0 %v16803_v29  ;;  %10002 = vmatprep.subr.bf16.mxu1 %v16804_v41  ;;  %v16812_v29 = vld [vmem:[#allocation53_spill] sm:$0xff]  ;;  %v16823_v41 = vld [vmem:[#allocation64_spill] sm:$0xff] }
 0x4ec   :  { %9972 = vmatpush1.bf16.msra.mxu0 %v16805_v23  ;;  %10004 = vmatpush1.bf16.msra.mxu1 %v16806_v15  ;;  %v16813_v15 = vld [vmem:[#allocation54_spill] sm:$0xff]  ;;  %v16822_v23 = vld [vmem:[#allocation63_spill] sm:$0xff] }
 0x4ed   :  { %10006 = vmatprep.subr.bf16.mxu0 %v16807_v36  ;;  %10038 = vmatprep.subr.bf16.mxu1 %v16808_v53  ;;  %v16815_v36 = vld [vmem:[#allocation56_spill] sm:$0xff]  ;;  %v16816_v53 = vld [vmem:[#allocation57_spill] sm:$0xff] }
 0x4ef   :  { %2429 = vmatmul.mubr.f32.vlgmr.msra.gmra.mrb[14].mxu0 %v2362_v22  ;;  %2500 = vmatmul.mubr.f32.vlgmr.msra.gmra.mrb[14].mxu1 %v2362_v22  ;;  %v16817_v22 = vld [vmem:[#allocation58_spill] sm:$0xff] }
 0x4f0   :  { %10008 = vmatpush1.bf16.msra.mxu0 %v16809_v5  ;;  %10040 = vmatpush1.bf16.msra.mxu1 %v16810_v30  ;;  %v16818_v5 = vld [vmem:[#allocation59_spill] sm:$0xff]  ;;  %v16819_v30 = vld [vmem:[#allocation60_spill] sm:$0xff] }
 0x4f1   :  { %10010 = vmatprep.subr.bf16.mxu0 %v16811_v28  ;;  %10042 = vmatprep.subr.bf16.mxu1 %v16812_v29  ;;  %v16820_v28 = vld [vmem:[#allocation61_spill] sm:$0xff]  ;;  %v16821_v29 = vld [vmem:[#allocation62_spill] sm:$0xff] }
 0x4f2   :  { %2622 = vmatprep.mubr.f32.mxu0 %v16672_v39  ;;  %2693 = vmatprep.mubr.f32.mxu1 %v16672_v39 }
 0x4f4   :  { %10012 = vmatpush1.bf16.msra.mxu0 %v16813_v15  ;;  %10044 = vmatpush1.bf16.msra.mxu1 %v16814_v12  ;;  %v16824_v15 = vld [vmem:[#allocation65_spill] sm:$0xff]  ;;  %v16825_v12 = vld [vmem:[#allocation66_spill] sm:$0xff] }
 0x4f5   :  { %10014 = vmatprep.subr.bf16.mxu0 %v16815_v36  ;;  %10046 = vmatprep.subr.bf16.mxu1 %v16816_v53  ;;  %v16826_v36 = vld [vmem:[#allocation67_spill] sm:$0xff]  ;;  %v16827_v53 = vld [vmem:[#allocation68_spill] sm:$0xff] }
 0x4f8   :  { %10016 = vmatpush1.bf16.msra.mxu0 %v16817_v22  ;;  %10048 = vmatpush1.bf16.msra.mxu1 %v16818_v5  ;;  %v16828_v22 = vld [vmem:[#allocation69_spill] sm:$0xff]  ;;  %v16829_v5 = vld [vmem:[#allocation70_spill] sm:$0xff] }
 0x4f9   :  { %10018 = vmatprep.subr.bf16.mxu0 %v16819_v30  ;;  %10050 = vmatprep.subr.bf16.mxu1 %v16820_v28  ;;  %v16830_v30 = vld [vmem:[#allocation71_spill] sm:$0xff]  ;;  %v16831_v28 = vld [vmem:[#allocation72_spill] sm:$0xff] }
 0x4fc   :  { %10020 = vmatpush1.bf16.msra.mxu0 %v16821_v29  ;;  %10052 = vmatpush1.bf16.msra.mxu1 %v16822_v23  ;;  %v16832_v29 = vld [vmem:[#allocation73_spill] sm:$0xff]  ;;  %v16833_v23 = vld [vmem:[#allocation74_spill] sm:$0xff] }
 0x4fd   :  { %10022 = vmatprep.subr.bf16.mxu0 %v16823_v41  ;;  %10054 = vmatprep.subr.bf16.mxu1 %v16824_v15  ;;  %v16834_v41 = vld [vmem:[#allocation75_spill] sm:$0xff]  ;;  %v16835_v15 = vld [vmem:[#allocation76_spill] sm:$0xff] }
 0x500   :  { %10024 = vmatpush1.bf16.msra.mxu0 %v16825_v12  ;;  %10056 = vmatpush1.bf16.msra.mxu1 %v16826_v36  ;;  %v16836_v12 = vld [vmem:[#allocation77_spill] sm:$0xff]  ;;  %v16837_v36 = vld [vmem:[#allocation78_spill] sm:$0xff] }
 0x501   :  { %10026 = vmatprep.subr.bf16.mxu0 %v16827_v53  ;;  %10058 = vmatprep.subr.bf16.mxu1 %v16828_v22  ;;  %v16838_v53 = vld [vmem:[#allocation79_spill] sm:$0xff]  ;;  %v16839_v22 = vld [vmem:[#allocation80_spill] sm:$0xff] }
 0x504   :  { %10028 = vmatpush1.bf16.msra.mxu0 %v16829_v5  ;;  %10060 = vmatpush1.bf16.msra.mxu1 %v16830_v30  ;;  %v16840_v5 = vld [vmem:[#allocation81_spill] sm:$0xff] }
 0x505   :  { %10030 = vmatprep.subr.bf16.mxu0 %v16831_v28  ;;  %10062 = vmatprep.subr.bf16.mxu1 %v16832_v29 }
 0x508   :  { %10032 = vmatpush1.bf16.msra.mxu0 %v16833_v23  ;;  %10064 = vmatpush1.bf16.msra.mxu1 %v16834_v41 }
 0x509   :  { %10034 = vmatprep.subr.bf16.mxu0 %v16835_v15  ;;  %10066 = vmatprep.subr.bf16.mxu1 %v16836_v12 }
 0x50c   :  { %10036 = vmatpush1.bf16.msra.mxu0 %v16837_v36  ;;  %10068 = vmatpush1.bf16.msra.mxu1 %v16838_v53  ;;  %v16842_v36 = vld [vmem:[#allocation112_spill] sm:$0xff] }
 0x50d   :  { %10070 = vmatprep.subr.bf16.mxu0 %v16839_v22  ;;  %10102 = vmatprep.subr.bf16.mxu1 %v16840_v5 }
 0x5a2   :  { %v2257_v30 = vpop.f32.mrb[12].mxu0  ;;  %v2328_v28 = vpop.f32.mrb[12].mxu1 }
 0x5a3   :  { %v12533_v29 = vadd.f32 %v2257_v30, %v16841_v60  ;;  %v2259_v16 = vpop.f32.mrb[13].mxu0  ;;  %v14371_v23 = vpop.f32.mrb[13].mxu1  ;;  %v12535_v12 = vadd.f32 %v2328_v28, %v16842_v36 }
 0x5a4   :  { %v12534_v41 = vadd.f32 %v2259_v16, %v16780_v7 }
 0x5a5   :  { %v9155_v15 = vmul.f32 -1.442695, %v12533_v29 }
 0x5a6   :  { %v9156_v11 = vmul.f32 -1.442695, %v12534_v41 }
 0x5a7   :  { %12759 = vpow2.f32 %v9155_v15 }
 0x5a8   :  { %12761 = vpow2.f32 %v9156_v11 }
 0x5a9   :  { %12763 = vtanh.f32 %v12535_v12 }
 0x5b1   :  { %v12760_v53 = vpop.eup %12759 }
 0x5b2   :  { %v12762_v10 = vpop.eup %12761  ;;  %v2346_v22 = vadd.f32 1.0, %v12760_v53 }
 0x5b3   :  { %v2347_v5 = vadd.f32 1.0, %v12762_v10  ;;  %v12764_v4 = vpop.eup %12763 }
 0x5b4   :  { %12765 = vrcp.f32 %v2346_v22 }
 0x5b5   :  { %12767 = vrcp.f32 %v2347_v5 }
 0x5be   :  { %v12766_v30 = vpop.eup %12765 }
 0x5bf   :  { %v12768_v60 = vpop.eup %12767  ;;  %v2357_v63 = vmul.f32 %v12766_v30, %v12764_v4 }
 0x5c0   :  { %v2356_v62 = vmul.f32 %v12768_v60, %v14251_v34 }
 0x5c2   :  { %v14376_v16 = vadd.f32 %v2357_v63, %v2356_v62  ;;  %v2430_v29 = vpop.f32.mrb[14].mxu0  ;;  %v2501_v41 = vpop.f32.mrb[14].mxu1 }
 0x5c3   :  { %v2510_v11 = vrot.slane %v2430_v29, 5  ;;  %v2432_v15 = vpop.f32.mrb[15].mxu0  ;;  %v2503_v28 = vpop.f32.mrb[15].mxu1  ;;  %v2512_v34 = vrot.slane %v2501_v41, 5 }
 0x5c4   :  { %v2511_v36 = vrot.slane %v2432_v15, 5  ;;  %v2513_v22 = vrot.slane %v2503_v28, 5  ;;  %v2542_v28 = vrot.slane %v14258_v48, 7  ;;  %v12536_v48 = vadd.f32 %v14371_v23, %v14137_v17 }
 0x5c5   :  { %v2518_v53 = vadd.f32 %v2510_v11, %v16716_v59  ;;  %v2520_v63 = vadd.f32 %v2512_v34, %v16719_v40 }
 0x5c6   :  { %v2519_v10 = vadd.f32 %v2511_v36, %v16717_v44  ;;  %v2521_v4 = vadd.f32 %v2513_v22, %v16718_v13 }
 0x5c7   :  { %v9158_v12 = vmul.f32 -1.442695, %v2518_v53 }
 0x5c8   :  { %v9159_v5 = vmul.f32 -1.442695, %v2519_v10  ;;  %v9160_v62 = vmul.f32 -1.442695, %v2521_v4 }
 0x5c9   :  { %12769 = vpow2.f32 %v9158_v12 }
 0x5ca   :  { %12771 = vpow2.f32 %v9159_v5 }
 0x5cb   :  { %12773 = vpow2.f32 %v9160_v62 }
 0x5cc   :  { %12775 = vtanh.f32 %v2520_v63 }
 0x5d3   :  { %v12770_v60 = vpop.eup %12769 }
 0x5d4   :  { %v12772_v30 = vpop.eup %12771  ;;  %v2531_v29 = vadd.f32 1.0, %v12770_v60 }
 0x5d5   :  { %v2532_v15 = vadd.f32 1.0, %v12772_v30  ;;  %v12774_v36 = vpop.eup %12773 }
 0x5d6   :  { %12777 = vrcp.f32 %v2531_v29  ;;  %v12776_v11 = vpop.eup %12775  ;;  %v2533_v5 = vadd.f32 1.0, %v12774_v36 }
 0x5d7   :  { %12779 = vrcp.f32 %v2532_v15  ;;  %v9157_v15 = vmul.f32 -1.442695, %v12536_v48  ;;  %v16851_v48 = vld [vmem:[#allocation31_spill] sm:$0xff] }
 0x5d8   :  { %12781 = vrcp.f32 %v2533_v5  ;;  %v16844_v5 = vld [vmem:[#allocation24_spill] sm:$0xff] }
 0x5e0   :  { %v12778_v53 = vpop.eup %12777 }
 0x5e1   :  { %v12780_v10 = vpop.eup %12779  ;;  %v2545_v12 = vmul.f32 %v12778_v53, %v12776_v11 }
 0x5e2   :  { %v2544_v41 = vmul.f32 %v12780_v10, %v2542_v28  ;;  %v12782_v4 = vpop.eup %12781 }
 0x5e4   :  { %v14383_v22 = vadd.f32 %v2545_v12, %v2544_v41  ;;  %v16843_v12 = vld [vmem:[#allocation23_spill] sm:$0xff]  ;;  %v16845_v41 = vld [vmem:[#allocation25_spill] sm:$0xff] }
 0x5e6   :  { %12783 = vtanh.f32 %v14383_v22 }
 0x5f0   :  { %v12784_v34 = vpop.eup %12783 }
 0x5f1   :  { %v14386_v62 = vmul.f32 %v12784_v34, %v12782_v4  ;;  %v16846_v4 = vld [vmem:[#allocation26_spill] sm:$0xff]  ;;  %v16847_v34 = vld [vmem:[#allocation27_spill] sm:$0xff] }
 0x5f3   :  { %v9161_v63 = vmul.f32 -1.442695, %v14386_v62 }
 0x5f5   :  { %12785 = vpow2.f32 %v9161_v63  ;;  %v16848_v63 = vld [vmem:[#allocation28_spill] sm:$0xff] }
 0x5ff   :  { %v12786_v60 = vpop.eup %12785 }
 0x600   :  { %v2552_v30 = vadd.f32 1.0, %v12786_v60  ;;  %v16849_v60 = vld [vmem:[#allocation29_spill] sm:$0xff] }
 0x602   :  { %12787 = vrcp.f32 %v2552_v30  ;;  %v16850_v30 = vld [vmem:[#allocation30_spill] sm:$0xff] }
 0x603   :  { %12789 = vpow2.f32 %v9157_v15  ;;  %v16853_v15 = vld [vmem:[#allocation33_spill] sm:$0xff] }
 0x604   :  { %12791 = vtanh.f32 %v14376_v16 }
 0x60c   :  { %v12788_v29 = vpop.eup %12787 }
 0x60d   :  { %v2556_v36 = vrot.slane %v12788_v29, 3  ;;  %v12790_v23 = vpop.eup %12789  ;;  %v16852_v29 = vld [vmem:[#allocation32_spill] sm:$0xff] }
 0x60e   :  { %v2348_v11 = vadd.f32 1.0, %v12790_v23  ;;  %v12792_v53 = vpop.eup %12791  ;;  %v16855_v23 = vld [vmem:[#allocation35_spill] sm:$0xff] }
 0x60f   :  { %2623 = vmatmul.mubr.f32.vlgmr.msra.gmra.mrb[16].mxu0 %v2556_v36  ;;  %2694 = vmatmul.mubr.f32.vlgmr.msra.gmra.mrb[16].mxu1 %v2556_v36  ;;  %v16854_v36 = vld [vmem:[#allocation34_spill] sm:$0xff] }
 0x610   :  { %10072 = vmatpush1.bf16.msra.mxu0 %v16722_v37  ;;  %10104 = vmatpush1.bf16.msra.mxu1 %v16723_v31  ;;  %12793 = vrcp.f32 %v2348_v11  ;;  %v16856_v11 = vld [vmem:[#allocation36_spill] sm:$0xff] }
 0x611   :  { %10074 = vmatprep.subr.bf16.mxu0 %v16724_v19  ;;  %10106 = vmatprep.subr.bf16.mxu1 %v16725_v14 }
 0x612   :  { %2764 = vmatprep.mubr.f32.mxu0 %v16672_v39  ;;  %2835 = vmatprep.mubr.f32.mxu1 %v16672_v39 }
 0x614   :  { %10076 = vmatpush1.bf16.msra.mxu0 %v16726_v20  ;;  %10108 = vmatpush1.bf16.msra.mxu1 %v16782_v35 }
 0x615   :  { %10078 = vmatprep.subr.bf16.mxu0 %v16783_v24  ;;  %10110 = vmatprep.subr.bf16.mxu1 %v16784_v52 }
 0x618   :  { %10080 = vmatpush1.bf16.msra.mxu0 %v16785_v8  ;;  %10112 = vmatpush1.bf16.msra.mxu1 %v16731_v2 }
 0x619   :  { %10082 = vmatprep.subr.bf16.mxu0 %v16732_v56  ;;  %10114 = vmatprep.subr.bf16.mxu1 %v16733_v54 }
 0x61a   :  { %v12794_v28 = vpop.eup %12793 }
 0x61b   :  { %v2360_v10 = vmul.f32 %v12794_v28, %v12792_v53  ;;  %v16857_v53 = vld [vmem:[#allocation37_spill] sm:$0xff]  ;;  %v16858_v28 = vld [vmem:[#allocation38_spill] sm:$0xff] }
 0x61c   :  { %10084 = vmatpush1.bf16.msra.mxu0 %v16734_v18  ;;  %10116 = vmatpush1.bf16.msra.mxu1 %v16735_v33 }
 0x61d   :  { %10086 = vmatprep.subr.bf16.mxu0 %v16736_v25  ;;  %10118 = vmatprep.subr.bf16.mxu1 %v16737_v27 }
 0x620   :  { %10088 = vmatpush1.bf16.msra.mxu0 %v16738_v0  ;;  %10120 = vmatpush1.bf16.msra.mxu1 %v16739_v6 }
 0x621   :  { %10090 = vmatprep.subr.bf16.mxu0 %v16786_v58  ;;  %10122 = vmatprep.subr.bf16.mxu1 %v13990_v3 }
 0x624   :  { %10092 = vmatpush1.bf16.msra.mxu0 %v13994_v45  ;;  %10124 = vmatpush1.bf16.msra.mxu1 %v13996_v26 }
 0x625   :  { %10094 = vmatprep.subr.bf16.mxu0 %v14000_v46  ;;  %10126 = vmatprep.subr.bf16.mxu1 %v14002_v47 }
 0x628   :  { %10096 = vmatpush1.bf16.msra.mxu0 %v14006_v21  ;;  %10128 = vmatpush1.bf16.msra.mxu1 %v14008_v57 }
 0x629   :  { %10098 = vmatprep.subr.bf16.mxu0 %v14012_v43  ;;  %10130 = vmatprep.subr.bf16.mxu1 %v14014_v9 }
 0x62c   :  { %10100 = vmatpush1.bf16.msra.mxu0 %v14018_v1  ;;  %10132 = vmatpush1.bf16.msra.mxu1 %v14020_v32 }
 0x62d   :  { %10134 = vmatprep.subr.bf16.mxu0 %v13694_v38  ;;  %10166 = vmatprep.subr.bf16.mxu1 %v13696_v42 }
 0x62f   :  { %2765 = vmatmul.mubr.f32.vlgmr.msra.gmra.mrb[16].mxu0 %v2360_v10  ;;  %2836 = vmatmul.mubr.f32.vlgmr.msra.gmra.mrb[16].mxu1 %v2360_v10  ;;  %v16859_v10 = vld [vmem:[#allocation39_spill] sm:$0xff] }
 0x630   :  { %10136 = vmatpush1.bf16.msra.mxu0 %v13701_v49  ;;  %10168 = vmatpush1.bf16.msra.mxu1 %v13704_v50 }
 0x631   :  { %10138 = vmatprep.subr.bf16.mxu0 %v13706_v51  ;;  %10170 = vmatprep.subr.bf16.mxu1 %v13709_v55 }
 0x632   :  { %2937 = vmatprep.mubr.f32.mxu0 %v16672_v39  ;;  %3008 = vmatprep.mubr.f32.mxu1 %v16672_v39 }
 0x634   :  { %10140 = vmatpush1.bf16.msra.mxu0 %v13712_v61  ;;  %10172 = vmatpush1.bf16.msra.mxu1 %v16843_v12 }
 0x635   :  { %10142 = vmatprep.subr.bf16.mxu0 %v16844_v5  ;;  %10174 = vmatprep.subr.bf16.mxu1 %v16845_v41 }
 0x638   :  { %10144 = vmatpush1.bf16.msra.mxu0 %v16846_v4  ;;  %10176 = vmatpush1.bf16.msra.mxu1 %v16847_v34 }
 0x639   :  { %10146 = vmatprep.subr.bf16.mxu0 %v16848_v63  ;;  %10178 = vmatprep.subr.bf16.mxu1 %v16849_v60  ;;  %v16860_v60 = vld [vmem:[#allocation40_spill] sm:$0xff] }
 0x63c   :  { %10148 = vmatpush1.bf16.msra.mxu0 %v16850_v30  ;;  %10180 = vmatpush1.bf16.msra.mxu1 %v16851_v48  ;;  %v16861_v30 = vld [vmem:[#allocation41_spill] sm:$0xff]  ;;  %v16862_v48 = vld [vmem:[#allocation42_spill] sm:$0xff] }
 0x63d   :  { %10150 = vmatprep.subr.bf16.mxu0 %v16852_v29  ;;  %10182 = vmatprep.subr.bf16.mxu1 %v16853_v15  ;;  %v16863_v29 = vld [vmem:[#allocation43_spill] sm:$0xff]  ;;  %v16864_v15 = vld [vmem:[#allocation44_spill] sm:$0xff] }
 0x640   :  { %10152 = vmatpush1.bf16.msra.mxu0 %v16854_v36  ;;  %10184 = vmatpush1.bf16.msra.mxu1 %v16855_v23  ;;  %v16865_v36 = vld [vmem:[#allocation45_spill] sm:$0xff]  ;;  %v16866_v23 = vld [vmem:[#allocation46_spill] sm:$0xff] }
 0x641   :  { %10154 = vmatprep.subr.bf16.mxu0 %v16856_v11  ;;  %10186 = vmatprep.subr.bf16.mxu1 %v16857_v53  ;;  %v16867_v11 = vld [vmem:[#allocation47_spill] sm:$0xff]  ;;  %v16868_v53 = vld [vmem:[#allocation48_spill] sm:$0xff] }
 0x644   :  { %10156 = vmatpush1.bf16.msra.mxu0 %v16858_v28  ;;  %10188 = vmatpush1.bf16.msra.mxu1 %v16859_v10  ;;  %v2871_v28 = vrot.slane %v14386_v62, 3  ;;  %v16869_v10 = vld [vmem:[#allocation49_spill] sm:$0xff]  ;;  %v16875_v62 = vld [vmem:[#allocation55_spill] sm:$0xff] }
 0x645   :  { %10158 = vmatprep.subr.bf16.mxu0 %v16860_v60  ;;  %10190 = vmatprep.subr.bf16.mxu1 %v16861_v30  ;;  %v16870_v30 = vld [vmem:[#allocation50_spill] sm:$0xff] }
 0x646   :  { %v16902_v60 = vld [vmem:[#allocation110_spill] sm:$0xff] }
 0x648   :  { %10160 = vmatpush1.bf16.msra.mxu0 %v16862_v48  ;;  %10192 = vmatpush1.bf16.msra.mxu1 %v16863_v29  ;;  %v16871_v48 = vld [vmem:[#allocation51_spill] sm:$0xff]  ;;  %v16872_v29 = vld [vmem:[#allocation52_spill] sm:$0xff] }
 0x649   :  { %10162 = vmatprep.subr.bf16.mxu0 %v16864_v15  ;;  %10194 = vmatprep.subr.bf16.mxu1 %v16865_v36  ;;  %v16873_v15 = vld [vmem:[#allocation53_spill] sm:$0xff]  ;;  %v16884_v36 = vld [vmem:[#allocation64_spill] sm:$0xff] }
 0x64c   :  { %10164 = vmatpush1.bf16.msra.mxu0 %v16866_v23  ;;  %10196 = vmatpush1.bf16.msra.mxu1 %v16867_v11  ;;  %v16874_v11 = vld [vmem:[#allocation54_spill] sm:$0xff]  ;;  %v16883_v23 = vld [vmem:[#allocation63_spill] sm:$0xff] }
 0x64d   :  { %10198 = vmatprep.subr.bf16.mxu0 %v16868_v53  ;;  %10230 = vmatprep.subr.bf16.mxu1 %v16869_v10  ;;  %v16876_v53 = vld [vmem:[#allocation56_spill] sm:$0xff]  ;;  %v16877_v10 = vld [vmem:[#allocation57_spill] sm:$0xff] }
 0x64f   :  { %2938 = vmatmul.mubr.f32.vlgmr.msra.gmra.mrb[18].mxu0 %v2871_v28  ;;  %3009 = vmatmul.mubr.f32.vlgmr.msra.gmra.mrb[18].mxu1 %v2871_v28  ;;  %v16878_v28 = vld [vmem:[#allocation58_spill] sm:$0xff] }
 0x650   :  { %10200 = vmatpush1.bf16.msra.mxu0 %v16870_v30  ;;  %10232 = vmatpush1.bf16.msra.mxu1 %v16871_v48  ;;  %v16879_v30 = vld [vmem:[#allocation59_spill] sm:$0xff]  ;;  %v16880_v48 = vld [vmem:[#allocation60_spill] sm:$0xff] }
 0x651   :  { %10202 = vmatprep.subr.bf16.mxu0 %v16872_v29  ;;  %10234 = vmatprep.subr.bf16.mxu1 %v16873_v15  ;;  %v16881_v29 = vld [vmem:[#allocation61_spill] sm:$0xff]  ;;  %v16882_v15 = vld [vmem:[#allocation62_spill] sm:$0xff] }
 0x652   :  { %3131 = vmatprep.mubr.f32.mxu0 %v16672_v39  ;;  %3202 = vmatprep.mubr.f32.mxu1 %v16672_v39 }
 0x654   :  { %10204 = vmatpush1.bf16.msra.mxu0 %v16874_v11  ;;  %10236 = vmatpush1.bf16.msra.mxu1 %v16875_v62  ;;  %v16885_v11 = vld [vmem:[#allocation65_spill] sm:$0xff]  ;;  %v16886_v62 = vld [vmem:[#allocation66_spill] sm:$0xff] }
 0x655   :  { %10206 = vmatprep.subr.bf16.mxu0 %v16876_v53  ;;  %10238 = vmatprep.subr.bf16.mxu1 %v16877_v10  ;;  %v16887_v53 = vld [vmem:[#allocation67_spill] sm:$0xff]  ;;  %v16888_v10 = vld [vmem:[#allocation68_spill] sm:$0xff] }
 0x658   :  { %10208 = vmatpush1.bf16.msra.mxu0 %v16878_v28  ;;  %10240 = vmatpush1.bf16.msra.mxu1 %v16879_v30  ;;  %v16889_v28 = vld [vmem:[#allocation69_spill] sm:$0xff]  ;;  %v16890_v30 = vld [vmem:[#allocation70_spill] sm:$0xff] }
 0x659   :  { %10210 = vmatprep.subr.bf16.mxu0 %v16880_v48  ;;  %10242 = vmatprep.subr.bf16.mxu1 %v16881_v29  ;;  %v16891_v48 = vld [vmem:[#allocation71_spill] sm:$0xff]  ;;  %v16892_v29 = vld [vmem:[#allocation72_spill] sm:$0xff] }
 0x65c   :  { %10212 = vmatpush1.bf16.msra.mxu0 %v16882_v15  ;;  %10244 = vmatpush1.bf16.msra.mxu1 %v16883_v23  ;;  %v16893_v15 = vld [vmem:[#allocation73_spill] sm:$0xff]  ;;  %v16894_v23 = vld [vmem:[#allocation74_spill] sm:$0xff] }
 0x65d   :  { %10214 = vmatprep.subr.bf16.mxu0 %v16884_v36  ;;  %10246 = vmatprep.subr.bf16.mxu1 %v16885_v11  ;;  %v16895_v36 = vld [vmem:[#allocation75_spill] sm:$0xff]  ;;  %v16896_v11 = vld [vmem:[#allocation76_spill] sm:$0xff] }
 0x660   :  { %10216 = vmatpush1.bf16.msra.mxu0 %v16886_v62  ;;  %10248 = vmatpush1.bf16.msra.mxu1 %v16887_v53  ;;  %v16897_v62 = vld [vmem:[#allocation77_spill] sm:$0xff]  ;;  %v16898_v53 = vld [vmem:[#allocation78_spill] sm:$0xff] }
 0x661   :  { %10218 = vmatprep.subr.bf16.mxu0 %v16888_v10  ;;  %10250 = vmatprep.subr.bf16.mxu1 %v16889_v28  ;;  %v16899_v10 = vld [vmem:[#allocation79_spill] sm:$0xff]  ;;  %v16900_v28 = vld [vmem:[#allocation80_spill] sm:$0xff] }
 0x664   :  { %10220 = vmatpush1.bf16.msra.mxu0 %v16890_v30  ;;  %10252 = vmatpush1.bf16.msra.mxu1 %v16891_v48  ;;  %v16901_v30 = vld [vmem:[#allocation81_spill] sm:$0xff] }
 0x665   :  { %10222 = vmatprep.subr.bf16.mxu0 %v16892_v29  ;;  %10254 = vmatprep.subr.bf16.mxu1 %v16893_v15 }
 0x668   :  { %10224 = vmatpush1.bf16.msra.mxu0 %v16894_v23  ;;  %10256 = vmatpush1.bf16.msra.mxu1 %v16895_v36 }
 0x669   :  { %10226 = vmatprep.subr.bf16.mxu0 %v16896_v11  ;;  %10258 = vmatprep.subr.bf16.mxu1 %v16897_v62 }
 0x66c   :  { %10228 = vmatpush1.bf16.msra.mxu0 %v16898_v53  ;;  %10260 = vmatpush1.bf16.msra.mxu1 %v16899_v10  ;;  %v16903_v53 = vld [vmem:[#allocation112_spill] sm:$0xff] }
 0x66d   :  { %10262 = vmatprep.subr.bf16.mxu0 %v16900_v28  ;;  %10294 = vmatprep.subr.bf16.mxu1 %v16901_v30 }
 0x702   :  { %v2766_v48 = vpop.f32.mrb[16].mxu0  ;;  %v2837_v29 = vpop.f32.mrb[16].mxu1 }
 0x703   :  { %v12537_v15 = vadd.f32 %v2766_v48, %v16902_v60  ;;  %v2768_v63 = vpop.f32.mrb[17].mxu0  ;;  %v14496_v23 = vpop.f32.mrb[17].mxu1  ;;  %v12539_v62 = vadd.f32 %v2837_v29, %v16903_v53 }
 0x704   :  { %v12538_v36 = vadd.f32 %v2768_v63, %v16780_v7 }
 0x705   :  { %v9162_v11 = vmul.f32 -1.442695, %v12537_v15 }
 0x706   :  { %v9163_v34 = vmul.f32 -1.442695, %v12538_v36 }
 0x707   :  { %12795 = vpow2.f32 %v9162_v11 }
 0x708   :  { %12797 = vpow2.f32 %v9163_v34 }
 0x709   :  { %12799 = vtanh.f32 %v12539_v62 }
 0x711   :  { %v12796_v10 = vpop.eup %12795 }
 0x712   :  { %v12798_v4 = vpop.eup %12797  ;;  %v2855_v28 = vadd.f32 1.0, %v12796_v10 }
 0x713   :  { %v2856_v30 = vadd.f32 1.0, %v12798_v4  ;;  %v12800_v41 = vpop.eup %12799 }
 0x714   :  { %12801 = vrcp.f32 %v2855_v28 }
 0x715   :  { %12803 = vrcp.f32 %v2856_v30 }
 0x71e   :  { %v12802_v48 = vpop.eup %12801 }
 0x71f   :  { %v12804_v60 = vpop.eup %12803  ;;  %v2866_v5 = vmul.f32 %v12802_v48, %v12800_v41 }
 0x720   :  { %v2865_v12 = vmul.f32 %v12804_v60, %v14376_v16 }
 0x722   :  { %v14501_v63 = vadd.f32 %v2866_v5, %v2865_v12  ;;  %v2939_v15 = vpop.f32.mrb[18].mxu0  ;;  %v3010_v36 = vpop.f32.mrb[18].mxu1 }
 0x723   :  { %v3019_v34 = vrot.slane %v2939_v15, 4  ;;  %v2941_v11 = vpop.f32.mrb[19].mxu0  ;;  %v3012_v29 = vpop.f32.mrb[19].mxu1  ;;  %v3021_v16 = vrot.slane %v3010_v36, 4 }
 0x724   :  { %v3020_v53 = vrot.slane %v2941_v11, 4  ;;  %v3022_v28 = vrot.slane %v3012_v29, 4  ;;  %v3051_v29 = vrot.slane %v14383_v22, 7  ;;  %v12540_v22 = vadd.f32 %v14496_v23, %v14137_v17 }
 0x725   :  { %v3027_v10 = vadd.f32 %v3019_v34, %v16716_v59  ;;  %v3029_v5 = vadd.f32 %v3021_v16, %v16719_v40 }
 0x726   :  { %v3028_v4 = vadd.f32 %v3020_v53, %v16717_v44  ;;  %v3030_v41 = vadd.f32 %v3022_v28, %v16718_v13 }
 0x727   :  { %v9165_v62 = vmul.f32 -1.442695, %v3027_v10 }
 0x728   :  { %v9166_v30 = vmul.f32 -1.442695, %v3028_v4  ;;  %v9167_v12 = vmul.f32 -1.442695, %v3030_v41 }
 0x729   :  { %12805 = vpow2.f32 %v9165_v62 }
 0x72a   :  { %12807 = vpow2.f32 %v9166_v30 }
 0x72b   :  { %12809 = vpow2.f32 %v9167_v12 }
 0x72c   :  { %12811 = vtanh.f32 %v3029_v5 }
 0x733   :  { %v12806_v60 = vpop.eup %12805 }
 0x734   :  { %v12808_v48 = vpop.eup %12807  ;;  %v3040_v15 = vadd.f32 1.0, %v12806_v60 }
 0x735   :  { %v3041_v11 = vadd.f32 1.0, %v12808_v48  ;;  %v12810_v53 = vpop.eup %12809 }
 0x736   :  { %12813 = vrcp.f32 %v3040_v15  ;;  %v12812_v34 = vpop.eup %12811  ;;  %v3042_v30 = vadd.f32 1.0, %v12810_v53 }
 0x737   :  { %12815 = vrcp.f32 %v3041_v11  ;;  %v9164_v11 = vmul.f32 -1.442695, %v12540_v22  ;;  %v16912_v22 = vld [vmem:[#allocation31_spill] sm:$0xff] }
 0x738   :  { %12817 = vrcp.f32 %v3042_v30  ;;  %v16905_v30 = vld [vmem:[#allocation24_spill] sm:$0xff] }
 0x740   :  { %v12814_v10 = vpop.eup %12813 }
 0x741   :  { %v12816_v4 = vpop.eup %12815  ;;  %v3054_v62 = vmul.f32 %v12814_v10, %v12812_v34 }
 0x742   :  { %v3053_v36 = vmul.f32 %v12816_v4, %v3051_v29  ;;  %v12818_v41 = vpop.eup %12817 }
 0x744   :  { %v14508_v28 = vadd.f32 %v3054_v62, %v3053_v36  ;;  %v16904_v62 = vld [vmem:[#allocation23_spill] sm:$0xff]  ;;  %v16906_v36 = vld [vmem:[#allocation25_spill] sm:$0xff] }
 0x746   :  { %12819 = vtanh.f32 %v14508_v28 }
 0x750   :  { %v12820_v16 = vpop.eup %12819 }
 0x751   :  { %v14511_v12 = vmul.f32 %v12820_v16, %v12818_v41  ;;  %v16907_v41 = vld [vmem:[#allocation26_spill] sm:$0xff]  ;;  %v16908_v16 = vld [vmem:[#allocation27_spill] sm:$0xff] }
 0x753   :  { %v9168_v5 = vmul.f32 -1.442695, %v14511_v12 }
 0x755   :  { %12821 = vpow2.f32 %v9168_v5  ;;  %v16909_v5 = vld [vmem:[#allocation28_spill] sm:$0xff] }
 0x75f   :  { %v12822_v60 = vpop.eup %12821 }
 0x760   :  { %v3061_v48 = vadd.f32 1.0, %v12822_v60  ;;  %v16910_v60 = vld [vmem:[#allocation29_spill] sm:$0xff] }
 0x762   :  { %12823 = vrcp.f32 %v3061_v48  ;;  %v16911_v48 = vld [vmem:[#allocation30_spill] sm:$0xff] }
 0x763   :  { %12825 = vpow2.f32 %v9164_v11  ;;  %v16914_v11 = vld [vmem:[#allocation33_spill] sm:$0xff] }
 0x764   :  { %12827 = vtanh.f32 %v14501_v63 }
 0x76c   :  { %v12824_v15 = vpop.eup %12823 }
 0x76d   :  { %v3065_v53 = vrot.slane %v12824_v15, 4  ;;  %v12826_v23 = vpop.eup %12825  ;;  %v16913_v15 = vld [vmem:[#allocation32_spill] sm:$0xff] }
 0x76e   :  { %v2857_v34 = vadd.f32 1.0, %v12826_v23  ;;  %v12828_v10 = vpop.eup %12827  ;;  %v16916_v23 = vld [vmem:[#allocation35_spill] sm:$0xff] }
 0x76f   :  { %3132 = vmatmul.mubr.f32.vlgmr.msra.gmra.mrb[20].mxu0 %v3065_v53  ;;  %3203 = vmatmul.mubr.f32.vlgmr.msra.gmra.mrb[20].mxu1 %v3065_v53  ;;  %v16915_v53 = vld [vmem:[#allocation34_spill] sm:$0xff] }
 0x770   :  { %10264 = vmatpush1.bf16.msra.mxu0 %v16722_v37  ;;  %10296 = vmatpush1.bf16.msra.mxu1 %v16723_v31  ;;  %12829 = vrcp.f32 %v2857_v34  ;;  %v16917_v34 = vld [vmem:[#allocation36_spill] sm:$0xff] }
 0x771   :  { %10266 = vmatprep.subr.bf16.mxu0 %v16724_v19  ;;  %10298 = vmatprep.subr.bf16.mxu1 %v16725_v14 }
 0x772   :  { %3273 = vmatprep.mubr.f32.mxu0 %v16672_v39  ;;  %3344 = vmatprep.mubr.f32.mxu1 %v16672_v39 }
 0x774   :  { %10268 = vmatpush1.bf16.msra.mxu0 %v16726_v20  ;;  %10300 = vmatpush1.bf16.msra.mxu1 %v16782_v35 }
 0x775   :  { %10270 = vmatprep.subr.bf16.mxu0 %v16783_v24  ;;  %10302 = vmatprep.subr.bf16.mxu1 %v16784_v52 }
 0x778   :  { %10272 = vmatpush1.bf16.msra.mxu0 %v16785_v8  ;;  %10304 = vmatpush1.bf16.msra.mxu1 %v16731_v2 }
 0x779   :  { %10274 = vmatprep.subr.bf16.mxu0 %v16732_v56  ;;  %10306 = vmatprep.subr.bf16.mxu1 %v16733_v54 }
 0x77a   :  { %v12830_v29 = vpop.eup %12829 }
 0x77b   :  { %v2869_v4 = vmul.f32 %v12830_v29, %v12828_v10  ;;  %v16918_v10 = vld [vmem:[#allocation37_spill] sm:$0xff]  ;;  %v16919_v29 = vld [vmem:[#allocation38_spill] sm:$0xff] }
 0x77c   :  { %10276 = vmatpush1.bf16.msra.mxu0 %v16734_v18  ;;  %10308 = vmatpush1.bf16.msra.mxu1 %v16735_v33 }
 0x77d   :  { %10278 = vmatprep.subr.bf16.mxu0 %v16736_v25  ;;  %10310 = vmatprep.subr.bf16.mxu1 %v16737_v27 }
 0x780   :  { %10280 = vmatpush1.bf16.msra.mxu0 %v16738_v0  ;;  %10312 = vmatpush1.bf16.msra.mxu1 %v16739_v6 }
 0x781   :  { %10282 = vmatprep.subr.bf16.mxu0 %v16786_v58  ;;  %10314 = vmatprep.subr.bf16.mxu1 %v13990_v3 }
 0x784   :  { %10284 = vmatpush1.bf16.msra.mxu0 %v13994_v45  ;;  %10316 = vmatpush1.bf16.msra.mxu1 %v13996_v26 }
 0x785   :  { %10286 = vmatprep.subr.bf16.mxu0 %v14000_v46  ;;  %10318 = vmatprep.subr.bf16.mxu1 %v14002_v47 }
 0x788   :  { %10288 = vmatpush1.bf16.msra.mxu0 %v14006_v21  ;;  %10320 = vmatpush1.bf16.msra.mxu1 %v14008_v57 }
 0x789   :  { %10290 = vmatprep.subr.bf16.mxu0 %v14012_v43  ;;  %10322 = vmatprep.subr.bf16.mxu1 %v14014_v9 }
 0x78c   :  { %10292 = vmatpush1.bf16.msra.mxu0 %v14018_v1  ;;  %10324 = vmatpush1.bf16.msra.mxu1 %v14020_v32 }
 0x78d   :  { %10326 = vmatprep.subr.bf16.mxu0 %v13694_v38  ;;  %10358 = vmatprep.subr.bf16.mxu1 %v13696_v42 }
 0x78f   :  { %3274 = vmatmul.mubr.f32.vlgmr.msra.gmra.mrb[20].mxu0 %v2869_v4  ;;  %3345 = vmatmul.mubr.f32.vlgmr.msra.gmra.mrb[20].mxu1 %v2869_v4  ;;  %v16920_v4 = vld [vmem:[#allocation39_spill] sm:$0xff] }
 0x790   :  { %10328 = vmatpush1.bf16.msra.mxu0 %v13701_v49  ;;  %10360 = vmatpush1.bf16.msra.mxu1 %v13704_v50 }
 0x791   :  { %10330 = vmatprep.subr.bf16.mxu0 %v13706_v51  ;;  %10362 = vmatprep.subr.bf16.mxu1 %v13709_v55 }
 0x792   :  { %3446 = vmatprep.mubr.f32.mxu0 %v16672_v39  ;;  %3517 = vmatprep.mubr.f32.mxu1 %v16672_v39 }
 0x794   :  { %10332 = vmatpush1.bf16.msra.mxu0 %v13712_v61  ;;  %10364 = vmatpush1.bf16.msra.mxu1 %v16904_v62 }
 0x795   :  { %10334 = vmatprep.subr.bf16.mxu0 %v16905_v30  ;;  %10366 = vmatprep.subr.bf16.mxu1 %v16906_v36 }
 0x798   :  { %10336 = vmatpush1.bf16.msra.mxu0 %v16907_v41  ;;  %10368 = vmatpush1.bf16.msra.mxu1 %v16908_v16 }
 0x799   :  { %10338 = vmatprep.subr.bf16.mxu0 %v16909_v5  ;;  %10370 = vmatprep.subr.bf16.mxu1 %v16910_v60  ;;  %v16921_v60 = vld [vmem:[#allocation40_spill] sm:$0xff] }
 0x79c   :  { %10340 = vmatpush1.bf16.msra.mxu0 %v16911_v48  ;;  %10372 = vmatpush1.bf16.msra.mxu1 %v16912_v22  ;;  %v16922_v48 = vld [vmem:[#allocation41_spill] sm:$0xff]  ;;  %v16923_v22 = vld [vmem:[#allocation42_spill] sm:$0xff] }
 0x79d   :  { %10342 = vmatprep.subr.bf16.mxu0 %v16913_v15  ;;  %10374 = vmatprep.subr.bf16.mxu1 %v16914_v11  ;;  %v16924_v15 = vld [vmem:[#allocation43_spill] sm:$0xff]  ;;  %v16925_v11 = vld [vmem:[#allocation44_spill] sm:$0xff] }
 0x7a0   :  { %10344 = vmatpush1.bf16.msra.mxu0 %v16915_v53  ;;  %10376 = vmatpush1.bf16.msra.mxu1 %v16916_v23  ;;  %v16926_v53 = vld [vmem:[#allocation45_spill] sm:$0xff]  ;;  %v16927_v23 = vld [vmem:[#allocation46_spill] sm:$0xff] }
 0x7a1   :  { %10346 = vmatprep.subr.bf16.mxu0 %v16917_v34  ;;  %10378 = vmatprep.subr.bf16.mxu1 %v16918_v10  ;;  %v16928_v34 = vld [vmem:[#allocation47_spill] sm:$0xff]  ;;  %v16929_v10 = vld [vmem:[#allocation48_spill] sm:$0xff] }
 0x7a4   :  { %10348 = vmatpush1.bf16.msra.mxu0 %v16919_v29  ;;  %10380 = vmatpush1.bf16.msra.mxu1 %v16920_v4  ;;  %v3380_v29 = vrot.slane %v14511_v12, 4  ;;  %v16930_v4 = vld [vmem:[#allocation49_spill] sm:$0xff]  ;;  %v16936_v12 = vld [vmem:[#allocation55_spill] sm:$0xff] }
 0x7a5   :  { %10350 = vmatprep.subr.bf16.mxu0 %v16921_v60  ;;  %10382 = vmatprep.subr.bf16.mxu1 %v16922_v48  ;;  %v16931_v48 = vld [vmem:[#allocation50_spill] sm:$0xff] }
 0x7a6   :  { %v16963_v60 = vld [vmem:[#allocation110_spill] sm:$0xff] }
 0x7a8   :  { %10352 = vmatpush1.bf16.msra.mxu0 %v16923_v22  ;;  %10384 = vmatpush1.bf16.msra.mxu1 %v16924_v15  ;;  %v16932_v22 = vld [vmem:[#allocation51_spill] sm:$0xff]  ;;  %v16933_v15 = vld [vmem:[#allocation52_spill] sm:$0xff] }
 0x7a9   :  { %10354 = vmatprep.subr.bf16.mxu0 %v16925_v11  ;;  %10386 = vmatprep.subr.bf16.mxu1 %v16926_v53  ;;  %v16934_v11 = vld [vmem:[#allocation53_spill] sm:$0xff]  ;;  %v16945_v53 = vld [vmem:[#allocation64_spill] sm:$0xff] }
 0x7ac   :  { %10356 = vmatpush1.bf16.msra.mxu0 %v16927_v23  ;;  %10388 = vmatpush1.bf16.msra.mxu1 %v16928_v34  ;;  %v16935_v34 = vld [vmem:[#allocation54_spill] sm:$0xff]  ;;  %v16944_v23 = vld [vmem:[#allocation63_spill] sm:$0xff] }
 0x7ad   :  { %10390 = vmatprep.subr.bf16.mxu0 %v16929_v10  ;;  %10422 = vmatprep.subr.bf16.mxu1 %v16930_v4  ;;  %v16937_v10 = vld [vmem:[#allocation56_spill] sm:$0xff]  ;;  %v16938_v4 = vld [vmem:[#allocation57_spill] sm:$0xff] }
 0x7af   :  { %3447 = vmatmul.mubr.f32.vlgmr.msra.gmra.mrb[22].mxu0 %v3380_v29  ;;  %3518 = vmatmul.mubr.f32.vlgmr.msra.gmra.mrb[22].mxu1 %v3380_v29  ;;  %v16939_v29 = vld [vmem:[#allocation58_spill] sm:$0xff] }
 0x7b0   :  { %10392 = vmatpush1.bf16.msra.mxu0 %v16931_v48  ;;  %10424 = vmatpush1.bf16.msra.mxu1 %v16932_v22  ;;  %v16940_v48 = vld [vmem:[#allocation59_spill] sm:$0xff]  ;;  %v16941_v22 = vld [vmem:[#allocation60_spill] sm:$0xff] }
 0x7b1   :  { %10394 = vmatprep.subr.bf16.mxu0 %v16933_v15  ;;  %10426 = vmatprep.subr.bf16.mxu1 %v16934_v11  ;;  %v16942_v15 = vld [vmem:[#allocation61_spill] sm:$0xff]  ;;  %v16943_v11 = vld [vmem:[#allocation62_spill] sm:$0xff] }
 0x7b2   :  { %3640 = vmatprep.mubr.f32.mxu0 %v16672_v39  ;;  %3711 = vmatprep.mubr.f32.mxu1 %v16672_v39 }
 0x7b4   :  { %10396 = vmatpush1.bf16.msra.mxu0 %v16935_v34  ;;  %10428 = vmatpush1.bf16.msra.mxu1 %v16936_v12  ;;  %v16946_v34 = vld [vmem:[#allocation65_spill] sm:$0xff]  ;;  %v16947_v12 = vld [vmem:[#allocation66_spill] sm:$0xff] }
 0x7b5   :  { %10398 = vmatprep.subr.bf16.mxu0 %v16937_v10  ;;  %10430 = vmatprep.subr.bf16.mxu1 %v16938_v4  ;;  %v16948_v10 = vld [vmem:[#allocation67_spill] sm:$0xff]  ;;  %v16949_v4 = vld [vmem:[#allocation68_spill] sm:$0xff] }
 0x7b8   :  { %10400 = vmatpush1.bf16.msra.mxu0 %v16939_v29  ;;  %10432 = vmatpush1.bf16.msra.mxu1 %v16940_v48  ;;  %v16950_v29 = vld [vmem:[#allocation69_spill] sm:$0xff]  ;;  %v16951_v48 = vld [vmem:[#allocation70_spill] sm:$0xff] }
 0x7b9   :  { %10402 = vmatprep.subr.bf16.mxu0 %v16941_v22  ;;  %10434 = vmatprep.subr.bf16.mxu1 %v16942_v15  ;;  %v16952_v22 = vld [vmem:[#allocation71_spill] sm:$0xff]  ;;  %v16953_v15 = vld [vmem:[#allocation72_spill] sm:$0xff] }
 0x7bc   :  { %10404 = vmatpush1.bf16.msra.mxu0 %v16943_v11  ;;  %10436 = vmatpush1.bf16.msra.mxu1 %v16944_v23  ;;  %v16954_v11 = vld [vmem:[#allocation73_spill] sm:$0xff]  ;;  %v16955_v23 = vld [vmem:[#allocation74_spill] sm:$0xff] }
 0x7bd   :  { %10406 = vmatprep.subr.bf16.mxu0 %v16945_v53  ;;  %10438 = vmatprep.subr.bf16.mxu1 %v16946_v34  ;;  %v16956_v53 = vld [vmem:[#allocation75_spill] sm:$0xff]  ;;  %v16957_v34 = vld [vmem:[#allocation76_spill] sm:$0xff] }
 0x7c0   :  { %10408 = vmatpush1.bf16.msra.mxu0 %v16947_v12  ;;  %10440 = vmatpush1.bf16.msra.mxu1 %v16948_v10  ;;  %v16958_v12 = vld [vmem:[#allocation77_spill] sm:$0xff]  ;;  %v16959_v10 = vld [vmem:[#allocation78_spill] sm:$0xff] }
 0x7c1   :  { %10410 = vmatprep.subr.bf16.mxu0 %v16949_v4  ;;  %10442 = vmatprep.subr.bf16.mxu1 %v16950_v29  ;;  %v16960_v4 = vld [vmem:[#allocation79_spill] sm:$0xff]  ;;  %v16961_v29 = vld [vmem:[#allocation80_spill] sm:$0xff] }
 0x7c4   :  { %10412 = vmatpush1.bf16.msra.mxu0 %v16951_v48  ;;  %10444 = vmatpush1.bf16.msra.mxu1 %v16952_v22  ;;  %v16962_v48 = vld [vmem:[#allocation81_spill] sm:$0xff] }
 0x7c5   :  { %10414 = vmatprep.subr.bf16.mxu0 %v16953_v15  ;;  %10446 = vmatprep.subr.bf16.mxu1 %v16954_v11 }
 0x7c8   :  { %10416 = vmatpush1.bf16.msra.mxu0 %v16955_v23  ;;  %10448 = vmatpush1.bf16.msra.mxu1 %v16956_v53 }
 0x7c9   :  { %10418 = vmatprep.subr.bf16.mxu0 %v16957_v34  ;;  %10450 = vmatprep.subr.bf16.mxu1 %v16958_v12 }
 0x7cc   :  { %10420 = vmatpush1.bf16.msra.mxu0 %v16959_v10  ;;  %10452 = vmatpush1.bf16.msra.mxu1 %v16960_v4  ;;  %v16964_v10 = vld [vmem:[#allocation112_spill] sm:$0xff] }
 0x7cd   :  { %10454 = vmatprep.subr.bf16.mxu0 %v16961_v29  ;;  %10486 = vmatprep.subr.bf16.mxu1 %v16962_v48 }
 0x862   :  { %v3275_v22 = vpop.f32.mrb[20].mxu0  ;;  %v3346_v15 = vpop.f32.mrb[20].mxu1 }
 0x863   :  { %v12541_v11 = vadd.f32 %v3275_v22, %v16963_v60  ;;  %v3277_v5 = vpop.f32.mrb[21].mxu0  ;;  %v14621_v23 = vpop.f32.mrb[21].mxu1  ;;  %v12543_v12 = vadd.f32 %v3346_v15, %v16964_v10 }
 0x864   :  { %v12542_v53 = vadd.f32 %v3277_v5, %v16780_v7 }
 0x865   :  { %v9169_v34 = vmul.f32 -1.442695, %v12541_v11 }
 0x866   :  { %v9170_v16 = vmul.f32 -1.442695, %v12542_v53 }
 0x867   :  { %12831 = vpow2.f32 %v9169_v34 }
 0x868   :  { %12833 = vpow2.f32 %v9170_v16 }
 0x869   :  { %12835 = vtanh.f32 %v12543_v12 }
 0x871   :  { %v12832_v4 = vpop.eup %12831 }
 0x872   :  { %v12834_v41 = vpop.eup %12833  ;;  %v3364_v29 = vadd.f32 1.0, %v12832_v4 }
 0x873   :  { %v3365_v48 = vadd.f32 1.0, %v12834_v41  ;;  %v12836_v36 = vpop.eup %12835 }
 0x874   :  { %12837 = vrcp.f32 %v3364_v29 }
 0x875   :  { %12839 = vrcp.f32 %v3365_v48 }
 0x87e   :  { %v12838_v22 = vpop.eup %12837 }
 0x87f   :  { %v12840_v60 = vpop.eup %12839  ;;  %v3375_v30 = vmul.f32 %v12838_v22, %v12836_v36 }
 0x880   :  { %v3374_v62 = vmul.f32 %v12840_v60, %v14501_v63 }
 0x882   :  { %v14626_v5 = vadd.f32 %v3375_v30, %v3374_v62  ;;  %v3448_v11 = vpop.f32.mrb[22].mxu0  ;;  %v3519_v53 = vpop.f32.mrb[22].mxu1 }
 0x883   :  { %v3528_v16 = vrot.slane %v3448_v11, 3  ;;  %v3450_v34 = vpop.f32.mrb[23].mxu0  ;;  %v3521_v15 = vpop.f32.mrb[23].mxu1  ;;  %v3530_v63 = vrot.slane %v3519_v53, 3 }
 0x884   :  { %v3529_v10 = vrot.slane %v3450_v34, 3  ;;  %v3531_v29 = vrot.slane %v3521_v15, 3  ;;  %v3560_v15 = vrot.slane %v14508_v28, 7  ;;  %v12544_v28 = vadd.f32 %v14621_v23, %v14137_v17 }
 0x885   :  { %v3536_v4 = vadd.f32 %v3528_v16, %v16716_v59  ;;  %v3538_v30 = vadd.f32 %v3530_v63, %v16719_v40 }
 0x886   :  { %v3537_v41 = vadd.f32 %v3529_v10, %v16717_v44  ;;  %v3539_v36 = vadd.f32 %v3531_v29, %v16718_v13 }
 0x887   :  { %v9172_v12 = vmul.f32 -1.442695, %v3536_v4 }
 0x888   :  { %v9173_v48 = vmul.f32 -1.442695, %v3537_v41  ;;  %v9174_v62 = vmul.f32 -1.442695, %v3539_v36 }
 0x889   :  { %12841 = vpow2.f32 %v9172_v12 }
 0x88a   :  { %12843 = vpow2.f32 %v9173_v48 }
 0x88b   :  { %12845 = vpow2.f32 %v9174_v62 }
 0x88c   :  { %12847 = vtanh.f32 %v3538_v30 }
 0x893   :  { %v12842_v60 = vpop.eup %12841 }
 0x894   :  { %v12844_v22 = vpop.eup %12843  ;;  %v3549_v11 = vadd.f32 1.0, %v12842_v60 }
 0x895   :  { %v3550_v34 = vadd.f32 1.0, %v12844_v22  ;;  %v12846_v10 = vpop.eup %12845 }
 0x896   :  { %12849 = vrcp.f32 %v3549_v11  ;;  %v12848_v16 = vpop.eup %12847  ;;  %v3551_v48 = vadd.f32 1.0, %v12846_v10 }
 0x897   :  { %12851 = vrcp.f32 %v3550_v34  ;;  %v9171_v34 = vmul.f32 -1.442695, %v12544_v28  ;;  %v16973_v28 = vld [vmem:[#allocation31_spill] sm:$0xff] }
 0x898   :  { %12853 = vrcp.f32 %v3551_v48  ;;  %v16966_v48 = vld [vmem:[#allocation24_spill] sm:$0xff] }
 0x8a0   :  { %v12850_v4 = vpop.eup %12849 }
 0x8a1   :  { %v12852_v41 = vpop.eup %12851  ;;  %v3563_v12 = vmul.f32 %v12850_v4, %v12848_v16 }
 0x8a2   :  { %v3562_v53 = vmul.f32 %v12852_v41, %v3560_v15  ;;  %v12854_v36 = vpop.eup %12853 }
 0x8a4   :  { %v14633_v29 = vadd.f32 %v3563_v12, %v3562_v53  ;;  %v16965_v12 = vld [vmem:[#allocation23_spill] sm:$0xff]  ;;  %v16967_v53 = vld [vmem:[#allocation25_spill] sm:$0xff] }
 0x8a6   :  { %12855 = vtanh.f32 %v14633_v29 }
 0x8b0   :  { %v12856_v63 = vpop.eup %12855 }
 0x8b1   :  { %v14636_v62 = vmul.f32 %v12856_v63, %v12854_v36  ;;  %v16968_v36 = vld [vmem:[#allocation26_spill] sm:$0xff]  ;;  %v16969_v63 = vld [vmem:[#allocation27_spill] sm:$0xff] }
 0x8b3   :  { %v9175_v30 = vmul.f32 -1.442695, %v14636_v62 }
 0x8b5   :  { %12857 = vpow2.f32 %v9175_v30  ;;  %v16970_v30 = vld [vmem:[#allocation28_spill] sm:$0xff] }
 0x8bf   :  { %v12858_v60 = vpop.eup %12857 }
 0x8c0   :  { %v3570_v22 = vadd.f32 1.0, %v12858_v60  ;;  %v16971_v60 = vld [vmem:[#allocation29_spill] sm:$0xff] }
 0x8c2   :  { %12859 = vrcp.f32 %v3570_v22  ;;  %v16972_v22 = vld [vmem:[#allocation30_spill] sm:$0xff] }
 0x8c3   :  { %12861 = vpow2.f32 %v9171_v34  ;;  %v16975_v34 = vld [vmem:[#allocation33_spill] sm:$0xff] }
 0x8c4   :  { %12863 = vtanh.f32 %v14626_v5 }
 0x8cc   :  { %v12860_v11 = vpop.eup %12859 }
 0x8cd   :  { %v3574_v10 = vrot.slane %v12860_v11, 5  ;;  %v12862_v23 = vpop.eup %12861  ;;  %v16974_v11 = vld [vmem:[#allocation32_spill] sm:$0xff] }
 0x8ce   :  { %v3366_v16 = vadd.f32 1.0, %v12862_v23  ;;  %v12864_v4 = vpop.eup %12863  ;;  %v16977_v23 = vld [vmem:[#allocation35_spill] sm:$0xff] }
 0x8cf   :  { %3641 = vmatmul.mubr.f32.vlgmr.msra.gmra.mrb[24].mxu0 %v3574_v10  ;;  %3712 = vmatmul.mubr.f32.vlgmr.msra.gmra.mrb[24].mxu1 %v3574_v10  ;;  %v16976_v10 = vld [vmem:[#allocation34_spill] sm:$0xff] }
 0x8d0   :  { %10456 = vmatpush1.bf16.msra.mxu0 %v16722_v37  ;;  %10488 = vmatpush1.bf16.msra.mxu1 %v16723_v31  ;;  %12865 = vrcp.f32 %v3366_v16  ;;  %v16978_v16 = vld [vmem:[#allocation36_spill] sm:$0xff] }
 0x8d1   :  { %10458 = vmatprep.subr.bf16.mxu0 %v16724_v19  ;;  %10490 = vmatprep.subr.bf16.mxu1 %v16725_v14 }
 0x8d2   :  { %3782 = vmatprep.mubr.f32.mxu0 %v16672_v39  ;;  %3853 = vmatprep.mubr.f32.mxu1 %v16672_v39 }
 0x8d4   :  { %10460 = vmatpush1.bf16.msra.mxu0 %v16726_v20  ;;  %10492 = vmatpush1.bf16.msra.mxu1 %v16782_v35 }
 0x8d5   :  { %10462 = vmatprep.subr.bf16.mxu0 %v16783_v24  ;;  %10494 = vmatprep.subr.bf16.mxu1 %v16784_v52 }
 0x8d8   :  { %10464 = vmatpush1.bf16.msra.mxu0 %v16785_v8  ;;  %10496 = vmatpush1.bf16.msra.mxu1 %v16731_v2 }
 0x8d9   :  { %10466 = vmatprep.subr.bf16.mxu0 %v16732_v56  ;;  %10498 = vmatprep.subr.bf16.mxu1 %v16733_v54 }
 0x8da   :  { %v12866_v15 = vpop.eup %12865 }
 0x8db   :  { %v3378_v41 = vmul.f32 %v12866_v15, %v12864_v4  ;;  %v16979_v4 = vld [vmem:[#allocation37_spill] sm:$0xff]  ;;  %v16980_v15 = vld [vmem:[#allocation38_spill] sm:$0xff] }
 0x8dc   :  { %10468 = vmatpush1.bf16.msra.mxu0 %v16734_v18  ;;  %10500 = vmatpush1.bf16.msra.mxu1 %v16735_v33 }
 0x8dd   :  { %10470 = vmatprep.subr.bf16.mxu0 %v16736_v25  ;;  %10502 = vmatprep.subr.bf16.mxu1 %v16737_v27 }
 0x8e0   :  { %10472 = vmatpush1.bf16.msra.mxu0 %v16738_v0  ;;  %10504 = vmatpush1.bf16.msra.mxu1 %v16739_v6 }
 0x8e1   :  { %10474 = vmatprep.subr.bf16.mxu0 %v16786_v58  ;;  %10506 = vmatprep.subr.bf16.mxu1 %v13990_v3 }
 0x8e4   :  { %10476 = vmatpush1.bf16.msra.mxu0 %v13994_v45  ;;  %10508 = vmatpush1.bf16.msra.mxu1 %v13996_v26 }
 0x8e5   :  { %10478 = vmatprep.subr.bf16.mxu0 %v14000_v46  ;;  %10510 = vmatprep.subr.bf16.mxu1 %v14002_v47 }
 0x8e8   :  { %10480 = vmatpush1.bf16.msra.mxu0 %v14006_v21  ;;  %10512 = vmatpush1.bf16.msra.mxu1 %v14008_v57 }
 0x8e9   :  { %10482 = vmatprep.subr.bf16.mxu0 %v14012_v43  ;;  %10514 = vmatprep.subr.bf16.mxu1 %v14014_v9 }
 0x8ec   :  { %10484 = vmatpush1.bf16.msra.mxu0 %v14018_v1  ;;  %10516 = vmatpush1.bf16.msra.mxu1 %v14020_v32 }
 0x8ed   :  { %10518 = vmatprep.subr.bf16.mxu0 %v13694_v38  ;;  %10550 = vmatprep.subr.bf16.mxu1 %v13696_v42 }
 0x8ef   :  { %3783 = vmatmul.mubr.f32.vlgmr.msra.gmra.mrb[24].mxu0 %v3378_v41  ;;  %3854 = vmatmul.mubr.f32.vlgmr.msra.gmra.mrb[24].mxu1 %v3378_v41  ;;  %v16981_v41 = vld [vmem:[#allocation39_spill] sm:$0xff] }
 0x8f0   :  { %10520 = vmatpush1.bf16.msra.mxu0 %v13701_v49  ;;  %10552 = vmatpush1.bf16.msra.mxu1 %v13704_v50 }
 0x8f1   :  { %10522 = vmatprep.subr.bf16.mxu0 %v13706_v51  ;;  %10554 = vmatprep.subr.bf16.mxu1 %v13709_v55 }
 0x8f2   :  { %3955 = vmatprep.mubr.f32.mxu0 %v16672_v39  ;;  %4026 = vmatprep.mubr.f32.mxu1 %v16672_v39 }
 0x8f4   :  { %10524 = vmatpush1.bf16.msra.mxu0 %v13712_v61  ;;  %10556 = vmatpush1.bf16.msra.mxu1 %v16965_v12 }
 0x8f5   :  { %10526 = vmatprep.subr.bf16.mxu0 %v16966_v48  ;;  %10558 = vmatprep.subr.bf16.mxu1 %v16967_v53 }
 0x8f8   :  { %10528 = vmatpush1.bf16.msra.mxu0 %v16968_v36  ;;  %10560 = vmatpush1.bf16.msra.mxu1 %v16969_v63 }
 0x8f9   :  { %10530 = vmatprep.subr.bf16.mxu0 %v16970_v30  ;;  %10562 = vmatprep.subr.bf16.mxu1 %v16971_v60  ;;  %v16982_v60 = vld [vmem:[#allocation40_spill] sm:$0xff] }
 0x8fc   :  { %10532 = vmatpush1.bf16.msra.mxu0 %v16972_v22  ;;  %10564 = vmatpush1.bf16.msra.mxu1 %v16973_v28  ;;  %v16983_v22 = vld [vmem:[#allocation41_spill] sm:$0xff]  ;;  %v16984_v28 = vld [vmem:[#allocation42_spill] sm:$0xff] }
 0x8fd   :  { %10534 = vmatprep.subr.bf16.mxu0 %v16974_v11  ;;  %10566 = vmatprep.subr.bf16.mxu1 %v16975_v34  ;;  %v16985_v11 = vld [vmem:[#allocation43_spill] sm:$0xff]  ;;  %v16986_v34 = vld [vmem:[#allocation44_spill] sm:$0xff] }
 0x900   :  { %10536 = vmatpush1.bf16.msra.mxu0 %v16976_v10  ;;  %10568 = vmatpush1.bf16.msra.mxu1 %v16977_v23  ;;  %v16987_v10 = vld [vmem:[#allocation45_spill] sm:$0xff]  ;;  %v16988_v23 = vld [vmem:[#allocation46_spill] sm:$0xff] }
 0x901   :  { %10538 = vmatprep.subr.bf16.mxu0 %v16978_v16  ;;  %10570 = vmatprep.subr.bf16.mxu1 %v16979_v4  ;;  %v16989_v16 = vld [vmem:[#allocation47_spill] sm:$0xff]  ;;  %v16990_v4 = vld [vmem:[#allocation48_spill] sm:$0xff] }
 0x904   :  { %10540 = vmatpush1.bf16.msra.mxu0 %v16980_v15  ;;  %10572 = vmatpush1.bf16.msra.mxu1 %v16981_v41  ;;  %v3889_v15 = vrot.slane %v14636_v62, 5  ;;  %v16991_v41 = vld [vmem:[#allocation49_spill] sm:$0xff]  ;;  %v16997_v62 = vld [vmem:[#allocation55_spill] sm:$0xff] }
 0x905   :  { %10542 = vmatprep.subr.bf16.mxu0 %v16982_v60  ;;  %10574 = vmatprep.subr.bf16.mxu1 %v16983_v22  ;;  %v16992_v22 = vld [vmem:[#allocation50_spill] sm:$0xff] }
 0x906   :  { %v17024_v60 = vld [vmem:[#allocation110_spill] sm:$0xff] }
 0x908   :  { %10544 = vmatpush1.bf16.msra.mxu0 %v16984_v28  ;;  %10576 = vmatpush1.bf16.msra.mxu1 %v16985_v11  ;;  %v16993_v28 = vld [vmem:[#allocation51_spill] sm:$0xff]  ;;  %v16994_v11 = vld [vmem:[#allocation52_spill] sm:$0xff] }
 0x909   :  { %10546 = vmatprep.subr.bf16.mxu0 %v16986_v34  ;;  %10578 = vmatprep.subr.bf16.mxu1 %v16987_v10  ;;  %v16995_v34 = vld [vmem:[#allocation53_spill] sm:$0xff]  ;;  %v17006_v10 = vld [vmem:[#allocation64_spill] sm:$0xff] }
 0x90c   :  { %10548 = vmatpush1.bf16.msra.mxu0 %v16988_v23  ;;  %10580 = vmatpush1.bf16.msra.mxu1 %v16989_v16  ;;  %v16996_v16 = vld [vmem:[#allocation54_spill] sm:$0xff]  ;;  %v17005_v23 = vld [vmem:[#allocation63_spill] sm:$0xff] }
 0x90d   :  { %10582 = vmatprep.subr.bf16.mxu0 %v16990_v4  ;;  %10614 = vmatprep.subr.bf16.mxu1 %v16991_v41  ;;  %v16998_v4 = vld [vmem:[#allocation56_spill] sm:$0xff]  ;;  %v16999_v41 = vld [vmem:[#allocation57_spill] sm:$0xff] }
 0x90f   :  { %3956 = vmatmul.mubr.f32.vlgmr.msra.gmra.mrb[26].mxu0 %v3889_v15  ;;  %4027 = vmatmul.mubr.f32.vlgmr.msra.gmra.mrb[26].mxu1 %v3889_v15  ;;  %v17000_v15 = vld [vmem:[#allocation58_spill] sm:$0xff] }
 0x910   :  { %10584 = vmatpush1.bf16.msra.mxu0 %v16992_v22  ;;  %10616 = vmatpush1.bf16.msra.mxu1 %v16993_v28  ;;  %v17001_v22 = vld [vmem:[#allocation59_spill] sm:$0xff]  ;;  %v17002_v28 = vld [vmem:[#allocation60_spill] sm:$0xff] }
 0x911   :  { %10586 = vmatprep.subr.bf16.mxu0 %v16994_v11  ;;  %10618 = vmatprep.subr.bf16.mxu1 %v16995_v34  ;;  %v17003_v11 = vld [vmem:[#allocation61_spill] sm:$0xff]  ;;  %v17004_v34 = vld [vmem:[#allocation62_spill] sm:$0xff] }
 0x912   :  { %4149 = vmatprep.mubr.f32.mxu0 %v16672_v39  ;;  %4220 = vmatprep.mubr.f32.mxu1 %v16672_v39 }
 0x914   :  { %10588 = vmatpush1.bf16.msra.mxu0 %v16996_v16  ;;  %10620 = vmatpush1.bf16.msra.mxu1 %v16997_v62  ;;  %v17007_v16 = vld [vmem:[#allocation65_spill] sm:$0xff]  ;;  %v17008_v62 = vld [vmem:[#allocation66_spill] sm:$0xff] }
 0x915   :  { %10590 = vmatprep.subr.bf16.mxu0 %v16998_v4  ;;  %10622 = vmatprep.subr.bf16.mxu1 %v16999_v41  ;;  %v17009_v4 = vld [vmem:[#allocation67_spill] sm:$0xff]  ;;  %v17010_v41 = vld [vmem:[#allocation68_spill] sm:$0xff] }
 0x918   :  { %10592 = vmatpush1.bf16.msra.mxu0 %v17000_v15  ;;  %10624 = vmatpush1.bf16.msra.mxu1 %v17001_v22  ;;  %v17011_v15 = vld [vmem:[#allocation69_spill] sm:$0xff]  ;;  %v17012_v22 = vld [vmem:[#allocation70_spill] sm:$0xff] }
 0x919   :  { %10594 = vmatprep.subr.bf16.mxu0 %v17002_v28  ;;  %10626 = vmatprep.subr.bf16.mxu1 %v17003_v11  ;;  %v17013_v28 = vld [vmem:[#allocation71_spill] sm:$0xff]  ;;  %v17014_v11 = vld [vmem:[#allocation72_spill] sm:$0xff] }
 0x91c   :  { %10596 = vmatpush1.bf16.msra.mxu0 %v17004_v34  ;;  %10628 = vmatpush1.bf16.msra.mxu1 %v17005_v23  ;;  %v17015_v34 = vld [vmem:[#allocation73_spill] sm:$0xff]  ;;  %v17016_v23 = vld [vmem:[#allocation74_spill] sm:$0xff] }
 0x91d   :  { %10598 = vmatprep.subr.bf16.mxu0 %v17006_v10  ;;  %10630 = vmatprep.subr.bf16.mxu1 %v17007_v16  ;;  %v17017_v10 = vld [vmem:[#allocation75_spill] sm:$0xff]  ;;  %v17018_v16 = vld [vmem:[#allocation76_spill] sm:$0xff] }
 0x920   :  { %10600 = vmatpush1.bf16.msra.mxu0 %v17008_v62  ;;  %10632 = vmatpush1.bf16.msra.mxu1 %v17009_v4  ;;  %v17019_v62 = vld [vmem:[#allocation77_spill] sm:$0xff]  ;;  %v17020_v4 = vld [vmem:[#allocation78_spill] sm:$0xff] }
 0x921   :  { %10602 = vmatprep.subr.bf16.mxu0 %v17010_v41  ;;  %10634 = vmatprep.subr.bf16.mxu1 %v17011_v15  ;;  %v17021_v41 = vld [vmem:[#allocation79_spill] sm:$0xff]  ;;  %v17022_v15 = vld [vmem:[#allocation80_spill] sm:$0xff] }
 0x924   :  { %10604 = vmatpush1.bf16.msra.mxu0 %v17012_v22  ;;  %10636 = vmatpush1.bf16.msra.mxu1 %v17013_v28  ;;  %v17023_v22 = vld [vmem:[#allocation81_spill] sm:$0xff] }
 0x925   :  { %10606 = vmatprep.subr.bf16.mxu0 %v17014_v11  ;;  %10638 = vmatprep.subr.bf16.mxu1 %v17015_v34 }
 0x928   :  { %10608 = vmatpush1.bf16.msra.mxu0 %v17016_v23  ;;  %10640 = vmatpush1.bf16.msra.mxu1 %v17017_v10 }
 0x929   :  { %10610 = vmatprep.subr.bf16.mxu0 %v17018_v16  ;;  %10642 = vmatprep.subr.bf16.mxu1 %v17019_v62 }
 0x92c   :  { %10612 = vmatpush1.bf16.msra.mxu0 %v17020_v4  ;;  %10644 = vmatpush1.bf16.msra.mxu1 %v17021_v41  ;;  %v17025_v4 = vld [vmem:[#allocation112_spill] sm:$0xff] }
 0x92d   :  { %10646 = vmatprep.subr.bf16.mxu0 %v17022_v15  ;;  %10678 = vmatprep.subr.bf16.mxu1 %v17023_v22 }
 0x9c2   :  { %v3784_v28 = vpop.f32.mrb[24].mxu0  ;;  %v3855_v11 = vpop.f32.mrb[24].mxu1 }
 0x9c3   :  { %v12545_v34 = vadd.f32 %v3784_v28, %v17024_v60  ;;  %v3786_v30 = vpop.f32.mrb[25].mxu0  ;;  %v14746_v23 = vpop.f32.mrb[25].mxu1  ;;  %v12547_v62 = vadd.f32 %v3855_v11, %v17025_v4 }
 0x9c4   :  { %v12546_v10 = vadd.f32 %v3786_v30, %v16780_v7 }
 0x9c5   :  { %v9176_v16 = vmul.f32 -1.442695, %v12545_v34 }
 0x9c6   :  { %v9177_v63 = vmul.f32 -1.442695, %v12546_v10 }
 0x9c7   :  { %12867 = vpow2.f32 %v9176_v16 }
 0x9c8   :  { %12869 = vpow2.f32 %v9177_v63 }
 0x9c9   :  { %12871 = vtanh.f32 %v12547_v62 }
 0x9d1   :  { %v12868_v41 = vpop.eup %12867 }
 0x9d2   :  { %v12870_v36 = vpop.eup %12869  ;;  %v3873_v15 = vadd.f32 1.0, %v12868_v41 }
 0x9d3   :  { %v3874_v22 = vadd.f32 1.0, %v12870_v36  ;;  %v12872_v53 = vpop.eup %12871 }
 0x9d4   :  { %12873 = vrcp.f32 %v3873_v15 }
 0x9d5   :  { %12875 = vrcp.f32 %v3874_v22 }
 0x9de   :  { %v12874_v28 = vpop.eup %12873 }
 0x9df   :  { %v12876_v60 = vpop.eup %12875  ;;  %v3884_v48 = vmul.f32 %v12874_v28, %v12872_v53 }
 0x9e0   :  { %v3883_v12 = vmul.f32 %v12876_v60, %v14626_v5 }
 0x9e2   :  { %v14751_v30 = vadd.f32 %v3884_v48, %v3883_v12  ;;  %v3957_v34 = vpop.f32.mrb[26].mxu0  ;;  %v4028_v10 = vpop.f32.mrb[26].mxu1 }
 0x9e3   :  { %v4037_v63 = vrot.slane %v3957_v34, 2  ;;  %v3959_v16 = vpop.f32.mrb[27].mxu0  ;;  %v4030_v11 = vpop.f32.mrb[27].mxu1  ;;  %v4039_v5 = vrot.slane %v4028_v10, 2 }
 0x9e4   :  { %v4038_v4 = vrot.slane %v3959_v16, 2  ;;  %v4040_v15 = vrot.slane %v4030_v11, 2  ;;  %v4069_v11 = vrot.slane %v14633_v29, 7  ;;  %v12548_v29 = vadd.f32 %v14746_v23, %v14137_v17 }
 0x9e5   :  { %v4045_v41 = vadd.f32 %v4037_v63, %v16716_v59  ;;  %v4047_v48 = vadd.f32 %v4039_v5, %v16719_v40 }
 0x9e6   :  { %v4046_v36 = vadd.f32 %v4038_v4, %v16717_v44  ;;  %v4048_v53 = vadd.f32 %v4040_v15, %v16718_v13 }
 0x9e7   :  { %v9179_v62 = vmul.f32 -1.442695, %v4045_v41 }
 0x9e8   :  { %v9180_v22 = vmul.f32 -1.442695, %v4046_v36  ;;  %v9181_v12 = vmul.f32 -1.442695, %v4048_v53 }
 0x9e9   :  { %12877 = vpow2.f32 %v9179_v62 }
 0x9ea   :  { %12879 = vpow2.f32 %v9180_v22 }
 0x9eb   :  { %12881 = vpow2.f32 %v9181_v12 }
 0x9ec   :  { %12883 = vtanh.f32 %v4047_v48 }
 0x9f3   :  { %v12878_v60 = vpop.eup %12877 }
 0x9f4   :  { %v12880_v28 = vpop.eup %12879  ;;  %v4058_v34 = vadd.f32 1.0, %v12878_v60 }
 0x9f5   :  { %v4059_v16 = vadd.f32 1.0, %v12880_v28  ;;  %v12882_v4 = vpop.eup %12881 }
 0x9f6   :  { %12885 = vrcp.f32 %v4058_v34  ;;  %v12884_v63 = vpop.eup %12883  ;;  %v4060_v22 = vadd.f32 1.0, %v12882_v4 }
 0x9f7   :  { %12887 = vrcp.f32 %v4059_v16  ;;  %v9178_v16 = vmul.f32 -1.442695, %v12548_v29  ;;  %v17041_v29 = vld [vmem:[#allocation38_spill] sm:$0xff] }
 0x9f8   :  { %12889 = vrcp.f32 %v4060_v22  ;;  %v17029_v22 = vld [vmem:[#allocation26_spill] sm:$0xff] }
 0xa00   :  { %v12886_v41 = vpop.eup %12885 }
 0xa01   :  { %v12888_v36 = vpop.eup %12887  ;;  %v4072_v62 = vmul.f32 %v12886_v41, %v12884_v63 }
 0xa02   :  { %v4071_v10 = vmul.f32 %v12888_v36, %v4069_v11  ;;  %v12890_v53 = vpop.eup %12889 }
 0xa04   :  { %v14758_v15 = vadd.f32 %v4072_v62, %v4071_v10  ;;  %v17026_v62 = vld [vmem:[#allocation23_spill] sm:$0xff] }
 0xa05   :  { %v17034_v10 = vld [vmem:[#allocation31_spill] sm:$0xff] }
 0xa06   :  { %12891 = vtanh.f32 %v14758_v15 }
 0xa10   :  { %v12892_v5 = vpop.eup %12891 }
 0xa11   :  { %v14761_v12 = vmul.f32 %v12892_v5, %v12890_v53  ;;  %v17035_v53 = vld [vmem:[#allocation32_spill] sm:$0xff]  ;;  %v17037_v5 = vld [vmem:[#allocation34_spill] sm:$0xff] }
 0xa13   :  { %v9182_v48 = vmul.f32 -1.442695, %v14761_v12 }
 0xa15   :  { %12893 = vpow2.f32 %v9182_v48  ;;  %v17038_v48 = vld [vmem:[#allocation35_spill] sm:$0xff] }
 0xa1f   :  { %v12894_v60 = vpop.eup %12893 }
 0xa20   :  { %v4079_v28 = vadd.f32 1.0, %v12894_v60  ;;  %v17039_v60 = vld [vmem:[#allocation36_spill] sm:$0xff] }
 0xa22   :  { %12895 = vrcp.f32 %v4079_v28  ;;  %v17040_v28 = vld [vmem:[#allocation37_spill] sm:$0xff] }
 0xa23   :  { %12897 = vpow2.f32 %v9178_v16  ;;  %v17043_v16 = vld [vmem:[#allocation40_spill] sm:$0xff] }
 0xa24   :  { %12899 = vtanh.f32 %v14751_v30 }
 0xa2c   :  { %v12896_v34 = vpop.eup %12895 }
 0xa2d   :  { %v4083_v4 = vrot.slane %v12896_v34, 6  ;;  %v12898_v23 = vpop.eup %12897  ;;  %v17042_v34 = vld [vmem:[#allocation39_spill] sm:$0xff] }
 0xa2e   :  { %v3875_v63 = vadd.f32 1.0, %v12898_v23  ;;  %v12900_v41 = vpop.eup %12899  ;;  %v17045_v23 = vld [vmem:[#allocation42_spill] sm:$0xff] }
 0xa2f   :  { %4150 = vmatmul.mubr.f32.vlgmr.msra.gmra.mrb[28].mxu0 %v4083_v4  ;;  %4221 = vmatmul.mubr.f32.vlgmr.msra.gmra.mrb[28].mxu1 %v4083_v4  ;;  %v17044_v4 = vld [vmem:[#allocation41_spill] sm:$0xff] }
 0xa30   :  { %10648 = vmatpush1.bf16.msra.mxu0 %v16722_v37  ;;  %10680 = vmatpush1.bf16.msra.mxu1 %v16723_v31  ;;  %12901 = vrcp.f32 %v3875_v63  ;;  %v17046_v63 = vld [vmem:[#allocation43_spill] sm:$0xff] }
 0xa31   :  { %10650 = vmatprep.subr.bf16.mxu0 %v16724_v19  ;;  %10682 = vmatprep.subr.bf16.mxu1 %v16725_v14 }
 0xa32   :  { %4291 = vmatprep.mubr.f32.mxu0 %v16672_v39  ;;  %4362 = vmatprep.mubr.f32.mxu1 %v16672_v39 }
 0xa34   :  { %10652 = vmatpush1.bf16.msra.mxu0 %v16726_v20  ;;  %10684 = vmatpush1.bf16.msra.mxu1 %v16782_v35 }
 0xa35   :  { %10654 = vmatprep.subr.bf16.mxu0 %v16783_v24  ;;  %10686 = vmatprep.subr.bf16.mxu1 %v16784_v52 }
 0xa38   :  { %10656 = vmatpush1.bf16.msra.mxu0 %v16785_v8  ;;  %10688 = vmatpush1.bf16.msra.mxu1 %v16731_v2 }
 0xa39   :  { %10658 = vmatprep.subr.bf16.mxu0 %v16732_v56  ;;  %10690 = vmatprep.subr.bf16.mxu1 %v16733_v54 }
 0xa3a   :  { %v12902_v11 = vpop.eup %12901 }
 0xa3b   :  { %v3887_v36 = vmul.f32 %v12902_v11, %v12900_v41  ;;  %v17047_v41 = vld [vmem:[#allocation44_spill] sm:$0xff]  ;;  %v17048_v11 = vld [vmem:[#allocation45_spill] sm:$0xff] }
 0xa3c   :  { %10660 = vmatpush1.bf16.msra.mxu0 %v16734_v18  ;;  %10692 = vmatpush1.bf16.msra.mxu1 %v16735_v33 }
 0xa3d   :  { %10662 = vmatprep.subr.bf16.mxu0 %v16736_v25  ;;  %10694 = vmatprep.subr.bf16.mxu1 %v16737_v27 }
 0xa40   :  { %10664 = vmatpush1.bf16.msra.mxu0 %v16738_v0  ;;  %10696 = vmatpush1.bf16.msra.mxu1 %v16739_v6 }
 0xa41   :  { %10666 = vmatprep.subr.bf16.mxu0 %v16786_v58  ;;  %10698 = vmatprep.subr.bf16.mxu1 %v13990_v3 }
 0xa44   :  { %10668 = vmatpush1.bf16.msra.mxu0 %v13994_v45  ;;  %10700 = vmatpush1.bf16.msra.mxu1 %v13996_v26 }
 0xa45   :  { %10670 = vmatprep.subr.bf16.mxu0 %v14000_v46  ;;  %10702 = vmatprep.subr.bf16.mxu1 %v14002_v47 }
 0xa48   :  { %10672 = vmatpush1.bf16.msra.mxu0 %v14006_v21  ;;  %10704 = vmatpush1.bf16.msra.mxu1 %v14008_v57 }
 0xa49   :  { %10674 = vmatprep.subr.bf16.mxu0 %v14012_v43  ;;  %10706 = vmatprep.subr.bf16.mxu1 %v14014_v9 }
 0xa4c   :  { %10676 = vmatpush1.bf16.msra.mxu0 %v14018_v1  ;;  %10708 = vmatpush1.bf16.msra.mxu1 %v14020_v32 }
 0xa4d   :  { %10710 = vmatprep.subr.bf16.mxu0 %v13694_v38  ;;  %10742 = vmatprep.subr.bf16.mxu1 %v13696_v42  ;;  %v17027_v38 = vld [vmem:[#allocation24_spill] sm:$0xff]  ;;  %v17028_v42 = vld [vmem:[#allocation25_spill] sm:$0xff] }
 0xa4f   :  { %4292 = vmatmul.mubr.f32.vlgmr.msra.gmra.mrb[28].mxu0 %v3887_v36  ;;  %4363 = vmatmul.mubr.f32.vlgmr.msra.gmra.mrb[28].mxu1 %v3887_v36  ;;  %v17049_v36 = vld [vmem:[#allocation46_spill] sm:$0xff] }
 0xa50   :  { %10712 = vmatpush1.bf16.msra.mxu0 %v13701_v49  ;;  %10744 = vmatpush1.bf16.msra.mxu1 %v13704_v50  ;;  %v17030_v49 = vld [vmem:[#allocation27_spill] sm:$0xff]  ;;  %v17031_v50 = vld [vmem:[#allocation28_spill] sm:$0xff] }
 0xa51   :  { %10714 = vmatprep.subr.bf16.mxu0 %v13706_v51  ;;  %10746 = vmatprep.subr.bf16.mxu1 %v13709_v55  ;;  %v17032_v51 = vld [vmem:[#allocation29_spill] sm:$0xff]  ;;  %v17033_v55 = vld [vmem:[#allocation30_spill] sm:$0xff] }
 0xa52   :  { %4464 = vmatprep.mubr.f32.mxu0 %v16672_v39  ;;  %4535 = vmatprep.mubr.f32.mxu1 %v16672_v39 }
 0xa54   :  { %10716 = vmatpush1.bf16.msra.mxu0 %v13712_v61  ;;  %10748 = vmatpush1.bf16.msra.mxu1 %v17026_v62  ;;  %v17036_v61 = vld [vmem:[#allocation33_spill] sm:$0xff]  ;;  %v17050_v62 = vld [vmem:[#allocation47_spill] sm:$0xff] }
 0xa55   :  { %10718 = vmatprep.subr.bf16.mxu0 %v17027_v38  ;;  %10750 = vmatprep.subr.bf16.mxu1 %v17028_v42  ;;  %v4398_v38 = vrot.slane %v14761_v12, 6  ;;  %v17051_v42 = vld [vmem:[#allocation48_spill] sm:$0xff]  ;;  %v17058_v12 = vld [vmem:[#allocation55_spill] sm:$0xff] }
 0xa58   :  { %10720 = vmatpush1.bf16.msra.mxu0 %v17029_v22  ;;  %10752 = vmatpush1.bf16.msra.mxu1 %v17030_v49  ;;  %v17052_v22 = vld [vmem:[#allocation49_spill] sm:$0xff]  ;;  %v17053_v49 = vld [vmem:[#allocation50_spill] sm:$0xff] }
 0xa59   :  { %10722 = vmatprep.subr.bf16.mxu0 %v17031_v50  ;;  %10754 = vmatprep.subr.bf16.mxu1 %v17032_v51  ;;  %v17054_v50 = vld [vmem:[#allocation51_spill] sm:$0xff]  ;;  %v17055_v51 = vld [vmem:[#allocation52_spill] sm:$0xff] }
 0xa5c   :  { %10724 = vmatpush1.bf16.msra.mxu0 %v17033_v55  ;;  %10756 = vmatpush1.bf16.msra.mxu1 %v17034_v10  ;;  %v17056_v55 = vld [vmem:[#allocation53_spill] sm:$0xff]  ;;  %v17057_v10 = vld [vmem:[#allocation54_spill] sm:$0xff] }
 0xa5d   :  { %10726 = vmatprep.subr.bf16.mxu0 %v17035_v53  ;;  %10758 = vmatprep.subr.bf16.mxu1 %v17036_v61  ;;  %v17059_v53 = vld [vmem:[#allocation56_spill] sm:$0xff]  ;;  %v17060_v61 = vld [vmem:[#allocation57_spill] sm:$0xff] }
 0xa60   :  { %10728 = vmatpush1.bf16.msra.mxu0 %v17037_v5  ;;  %10760 = vmatpush1.bf16.msra.mxu1 %v17038_v48  ;;  %v17061_v5 = vld [vmem:[#allocation58_spill] sm:$0xff]  ;;  %v17062_v48 = vld [vmem:[#allocation59_spill] sm:$0xff] }
 0xa61   :  { %10730 = vmatprep.subr.bf16.mxu0 %v17039_v60  ;;  %10762 = vmatprep.subr.bf16.mxu1 %v17040_v28  ;;  %v17063_v60 = vld [vmem:[#allocation60_spill] sm:$0xff]  ;;  %v17064_v28 = vld [vmem:[#allocation61_spill] sm:$0xff] }
 0xa64   :  { %10732 = vmatpush1.bf16.msra.mxu0 %v17041_v29  ;;  %10764 = vmatpush1.bf16.msra.mxu1 %v17042_v34  ;;  %v17065_v29 = vld [vmem:[#allocation62_spill] sm:$0xff]  ;;  %v17066_v34 = vld [vmem:[#allocation63_spill] sm:$0xff] }
 0xa65   :  { %10734 = vmatprep.subr.bf16.mxu0 %v17043_v16  ;;  %10766 = vmatprep.subr.bf16.mxu1 %v17044_v4  ;;  %v17067_v16 = vld [vmem:[#allocation64_spill] sm:$0xff]  ;;  %v17068_v4 = vld [vmem:[#allocation65_spill] sm:$0xff] }
 0xa68   :  { %10736 = vmatpush1.bf16.msra.mxu0 %v17045_v23  ;;  %10768 = vmatpush1.bf16.msra.mxu1 %v17046_v63  ;;  %v17069_v23 = vld [vmem:[#allocation66_spill] sm:$0xff]  ;;  %v17070_v63 = vld [vmem:[#allocation67_spill] sm:$0xff] }
 0xa69   :  { %10738 = vmatprep.subr.bf16.mxu0 %v17047_v41  ;;  %10770 = vmatprep.subr.bf16.mxu1 %v17048_v11  ;;  %v17071_v41 = vld [vmem:[#allocation68_spill] sm:$0xff]  ;;  %v17072_v11 = vld [vmem:[#allocation69_spill] sm:$0xff] }
 0xa6c   :  { %10740 = vmatpush1.bf16.msra.mxu0 %v17049_v36  ;;  %10772 = vmatpush1.bf16.msra.mxu1 %v17050_v62  ;;  %v17073_v36 = vld [vmem:[#allocation70_spill] sm:$0xff]  ;;  %v17074_v62 = vld [vmem:[#allocation71_spill] sm:$0xff] }
 0xa6d   :  { %10774 = vmatprep.subr.bf16.mxu0 %v17051_v42  ;;  %10806 = vmatprep.subr.bf16.mxu1 %v17052_v22  ;;  %v17076_v42 = vld [vmem:[#allocation73_spill] sm:$0xff]  ;;  %v17077_v22 = vld [vmem:[#allocation74_spill] sm:$0xff] }
 0xa6f   :  { %4465 = vmatmul.mubr.f32.vlgmr.msra.gmra.mrb[30].mxu0 %v4398_v38  ;;  %4536 = vmatmul.mubr.f32.vlgmr.msra.gmra.mrb[30].mxu1 %v4398_v38  ;;  %v17075_v38 = vld [vmem:[#allocation72_spill] sm:$0xff] }
 0xa70   :  { %10776 = vmatpush1.bf16.msra.mxu0 %v17053_v49  ;;  %10808 = vmatpush1.bf16.msra.mxu1 %v17054_v50  ;;  %v17078_v49 = vld [vmem:[#allocation75_spill] sm:$0xff]  ;;  %v17079_v50 = vld [vmem:[#allocation76_spill] sm:$0xff] }
 0xa71   :  { %10778 = vmatprep.subr.bf16.mxu0 %v17055_v51  ;;  %10810 = vmatprep.subr.bf16.mxu1 %v17056_v55  ;;  %v17080_v51 = vld [vmem:[#allocation77_spill] sm:$0xff]  ;;  %v17081_v55 = vld [vmem:[#allocation78_spill] sm:$0xff] }
 0xa72   :  { %4658 = vmatprep.mubr.f32.mxu0 %v16672_v39  ;;  %4729 = vmatprep.mubr.f32.mxu1 %v16672_v39 }
 0xa74   :  { %10780 = vmatpush1.bf16.msra.mxu0 %v17057_v10  ;;  %10812 = vmatpush1.bf16.msra.mxu1 %v17058_v12  ;;  %v17082_v10 = vld [vmem:[#allocation79_spill] sm:$0xff]  ;;  %v17083_v12 = vld [vmem:[#allocation80_spill] sm:$0xff] }
 0xa75   :  { %10782 = vmatprep.subr.bf16.mxu0 %v17059_v53  ;;  %10814 = vmatprep.subr.bf16.mxu1 %v17060_v61  ;;  %v17084_v53 = vld [vmem:[#allocation81_spill] sm:$0xff] }
 0xa78   :  { %10784 = vmatpush1.bf16.msra.mxu0 %v17061_v5  ;;  %10816 = vmatpush1.bf16.msra.mxu1 %v17062_v48  ;;  %v17085_v48 = vld [vmem:[#allocation110_spill] sm:$0xff] }
 0xa79   :  { %10786 = vmatprep.subr.bf16.mxu0 %v17063_v60  ;;  %10818 = vmatprep.subr.bf16.mxu1 %v17064_v28 }
 0xa7c   :  { %10788 = vmatpush1.bf16.msra.mxu0 %v17065_v29  ;;  %10820 = vmatpush1.bf16.msra.mxu1 %v17066_v34 }
 0xa7d   :  { %10790 = vmatprep.subr.bf16.mxu0 %v17067_v16  ;;  %10822 = vmatprep.subr.bf16.mxu1 %v17068_v4 }
 0xa80   :  { %10792 = vmatpush1.bf16.msra.mxu0 %v17069_v23  ;;  %10824 = vmatpush1.bf16.msra.mxu1 %v17070_v63  ;;  %v17086_v23 = vld [vmem:[#allocation112_spill] sm:$0xff] }
 0xa81   :  { %10794 = vmatprep.subr.bf16.mxu0 %v17071_v41  ;;  %10826 = vmatprep.subr.bf16.mxu1 %v17072_v11 }
 0xa84   :  { %10796 = vmatpush1.bf16.msra.mxu0 %v17073_v36  ;;  %10828 = vmatpush1.bf16.msra.mxu1 %v17074_v62 }
 0xa85   :  { %10798 = vmatprep.subr.bf16.mxu0 %v17075_v38  ;;  %10830 = vmatprep.subr.bf16.mxu1 %v17076_v42 }
 0xa88   :  { %10800 = vmatpush1.bf16.msra.mxu0 %v17077_v22  ;;  %10832 = vmatpush1.bf16.msra.mxu1 %v17078_v49 }
 0xa89   :  { %10802 = vmatprep.subr.bf16.mxu0 %v17079_v50  ;;  %10834 = vmatprep.subr.bf16.mxu1 %v17080_v51 }
 0xa8c   :  { %10804 = vmatpush1.bf16.msra.mxu0 %v17081_v55  ;;  %10836 = vmatpush1.bf16.msra.mxu1 %v17082_v10 }
 0xa8d   :  { %10838 = vmatprep.subr.bf16.mxu0 %v17083_v12  ;;  %10870 = vmatprep.subr.bf16.mxu1 %v17084_v53 }
 0xb22   :  { %v4293_v61 = vpop.f32.mrb[28].mxu0  ;;  %v4364_v5 = vpop.f32.mrb[28].mxu1 }
 0xb23   :  { %v12549_v60 = vadd.f32 %v4293_v61, %v17085_v48  ;;  %v4295_v28 = vpop.f32.mrb[29].mxu0  ;;  %v14871_v29 = vpop.f32.mrb[29].mxu1  ;;  %v12551_v63 = vadd.f32 %v4364_v5, %v17086_v23 }
 0xb24   :  { %v12550_v34 = vadd.f32 %v4295_v28, %v16780_v7 }
 0xb25   :  { %v9183_v16 = vmul.f32 -1.442695, %v12549_v60 }
 0xb26   :  { %v9184_v4 = vmul.f32 -1.442695, %v12550_v34 }
 0xb27   :  { %12903 = vpow2.f32 %v9183_v16 }
 0xb28   :  { %12905 = vpow2.f32 %v9184_v4 }
 0xb29   :  { %12907 = vtanh.f32 %v12551_v63 }
 0xb31   :  { %v12904_v41 = vpop.eup %12903 }
 0xb32   :  { %v12906_v11 = vpop.eup %12905  ;;  %v4382_v36 = vadd.f32 1.0, %v12904_v41 }
 0xb33   :  { %v4383_v62 = vadd.f32 1.0, %v12906_v11  ;;  %v12908_v38 = vpop.eup %12907 }
 0xb34   :  { %12909 = vrcp.f32 %v4382_v36 }
 0xb35   :  { %12911 = vrcp.f32 %v4383_v62 }
 0xb3e   :  { %v12910_v42 = vpop.eup %12909 }
 0xb3f   :  { %v12912_v22 = vpop.eup %12911  ;;  %v4393_v49 = vmul.f32 %v12910_v42, %v12908_v38 }
 0xb40   :  { %v4392_v50 = vmul.f32 %v12912_v22, %v14751_v30 }
 0xb42   :  { %v14876_v51 = vadd.f32 %v4393_v49, %v4392_v50  ;;  %v4466_v55 = vpop.f32.mrb[30].mxu0  ;;  %v4537_v10 = vpop.f32.mrb[30].mxu1  ;;  %v4578_v49 = vrot.slane %v14758_v15, 7 }
 0xb43   :  { %v4546_v12 = vrot.slane %v4466_v55, 1  ;;  %v4468_v53 = vpop.f32.mrb[31].mxu0  ;;  %v4539_v61 = vpop.f32.mrb[31].mxu1  ;;  %v4548_v30 = vrot.slane %v4537_v10, 1 }
 0xb44   :  { %v4547_v5 = vrot.slane %v4468_v53, 1  ;;  %v4549_v4 = vrot.slane %v4539_v61, 1 }
 0xb45   :  { %v4554_v60 = vadd.f32 %v4546_v12, %v16716_v59  ;;  %v4556_v11 = vadd.f32 %v4548_v30, %v16719_v40 }
 0xb46   :  { %v4555_v28 = vadd.f32 %v4547_v5, %v16717_v44  ;;  %v4557_v63 = vadd.f32 %v4549_v4, %v16718_v13 }
 0xb47   :  { %v9186_v34 = vmul.f32 -1.442695, %v4554_v60 }
 0xb48   :  { %v9187_v16 = vmul.f32 -1.442695, %v4555_v28  ;;  %v9188_v41 = vmul.f32 -1.442695, %v4557_v63  ;;  %v434_v63 = vld [vmem:[#allocation10 + $0x98] sm:$0xff] }
 0xb49   :  { %12913 = vpow2.f32 %v9186_v34  ;;  %v12552_v34 = vadd.f32 %v14871_v29, %v14137_v17  ;;  %v436_v29 = vld [vmem:[#allocation10 + $0xa8] sm:$0xff] }
 0xb4a   :  { %12915 = vpow2.f32 %v9187_v16 }
 0xb4b   :  { %12917 = vpow2.f32 %v9188_v41  ;;  %v9185_v15 = vmul.f32 -1.442695, %v12552_v34  ;;  %v438_v41 = vld [vmem:[#allocation10 + $0xb8] sm:$0xff]  ;;  %v452_v34 = vld [vmem:[#allocation10 + $0x128] sm:$0xff] }
 0xb4c   :  { %12919 = vtanh.f32 %v4556_v11  ;;  %v431_v11 = vld [vmem:[#allocation10 + $0x80] sm:$0xff] }
 0xb53   :  { %v12914_v36 = vpop.eup %12913 }
 0xb54   :  { %v12916_v62 = vpop.eup %12915  ;;  %v4567_v38 = vadd.f32 1.0, %v12914_v36  ;;  %v435_v36 = vld [vmem:[#allocation10 + $0xa0] sm:$0xff] }
 0xb55   :  { %v4568_v42 = vadd.f32 1.0, %v12916_v62  ;;  %v12918_v59 = vpop.eup %12917  ;;  %v10941_v62 = vpack.c.bf16 %v438_v41, %v434_v63  ;;  %v474_v41 = vld [vmem:[#allocation10 + $0x1d8] sm:$0xff] }
 0xb56   :  { %12921 = vrcp.f32 %v4567_v38  ;;  %v12920_v44 = vpop.eup %12919  ;;  %v4569_v13 = vadd.f32 1.0, %v12918_v59  ;;  %v10911_v38 = vpack.c.bf16 %v435_v36, %v431_v11  ;;  %v437_v59 = vld [vmem:[#allocation10 + $0xb0] sm:$0xff]  ;;  %v478_v11 = vld [vmem:[#allocation10 + $0x1f8] sm:$0xff] }
 0xb57   :  { %12923 = vrcp.f32 %v4568_v42  ;;  %v433_v42 = vld [vmem:[#allocation10 + $0x90] sm:$0xff] }
 0xb58   :  { %12925 = vrcp.f32 %v4569_v13  ;;  %v446_v13 = vld [vmem:[#allocation10 + $0xf8] sm:$0xff] }
 0xb60   :  { %v12922_v22 = vpop.eup %12921 }
 0xb61   :  { %v12924_v50 = vpop.eup %12923  ;;  %v4581_v55 = vmul.f32 %v12922_v22, %v12920_v44  ;;  %v10943_v44 = vpack.c.bf16 %v437_v59, %v433_v42  ;;  %v440_v22 = vld [vmem:[#allocation10 + $0xc8] sm:$0xff]  ;;  %v475_v42 = vld [vmem:[#allocation10 + $0x1e0] sm:$0xff]  ;;  %v473_v59 = vld [vmem:[#allocation10 + $0x1d0] sm:$0xff] }
 0xb62   :  { %v4580_v10 = vmul.f32 %v12924_v50, %v4578_v49  ;;  %v12926_v40 = vpop.eup %12925  ;;  %v444_v49 = vld [vmem:[#allocation10 + $0xe8] sm:$0xff]  ;;  %v442_v50 = vld [vmem:[#allocation10 + $0xd8] sm:$0xff] }
 0xb64   :  { %v4582_v12 = vadd.f32 %v4581_v55, %v4580_v10  ;;  %v10913_v55 = vpack.c.bf16 %v444_v49, %v440_v22  ;;  %v439_v10 = vld [vmem:[#allocation10 + $0xc0] sm:$0xff]  ;;  %v477_v22 = vld [vmem:[#allocation10 + $0x1f0] sm:$0xff]  ;;  %v480_v49 = vld [vmem:[#allocation11 + $0x8] sm:$0xff] }
 0xb66   :  { %12927 = vtanh.f32 %v4582_v12  ;;  %v443_v12 = vld [vmem:[#allocation10 + $0xe0] sm:$0xff] }
 0xb70   :  { %v12928_v53 = vpop.eup %12927 }
 0xb71   :  { %v4584_v61 = vmul.f32 %v12928_v53, %v12926_v40  ;;  %v10945_v40 = vpack.c.bf16 %v446_v13, %v442_v50  ;;  %v10915_v53 = vpack.c.bf16 %v443_v12, %v439_v10  ;;  %v484_v50 = vld [vmem:[#allocation11 + $0x28] sm:$0xff]  ;;  %v482_v10 = vld [vmem:[#allocation11 + $0x18] sm:$0xff] }
 0xb72   :  { %v14920_v13 = vpack.c.bf16 %v484_v50, %v480_v49  ;;  %v486_v12 = vld [vmem:[#allocation11 + $0x38] sm:$0xff]  ;;  %v508_v49 = vld [vmem:[#allocation11 + $0xe8] sm:$0xff] }
 0xb73   :  { %v9189_v5 = vmul.f32 -1.442695, %v4584_v61  ;;  %v441_v61 = vld [vmem:[#allocation10 + $0xd0] sm:$0xff]  ;;  %v506_v50 = vld [vmem:[#allocation11 + $0xd8] sm:$0xff] }
 0xb75   :  { %12929 = vpow2.f32 %v9189_v5  ;;  %v445_v5 = vld [vmem:[#allocation10 + $0xf0] sm:$0xff] }
 0xb7f   :  { %v12930_v60 = vpop.eup %12929 }
 0xb80   :  { %v4588_v28 = vadd.f32 1.0, %v12930_v60  ;;  %v10947_v60 = vpack.c.bf16 %v445_v5, %v441_v61 }
 0xb82   :  { %12931 = vrcp.f32 %v4588_v28  ;;  %v448_v28 = vld [vmem:[#allocation10 + $0x108] sm:$0xff] }
 0xb83   :  { %12933 = vpow2.f32 %v9185_v15  ;;  %v10917_v15 = vpack.c.bf16 %v452_v34, %v448_v28 }
 0xb84   :  { %12935 = vtanh.f32 %v14876_v51 }
 0xb8c   :  { %v12932_v16 = vpop.eup %12931 }
 0xb8d   :  { %v4592_v4 = vrot.slane %v12932_v16, 7  ;;  %v450_v16 = vld [vmem:[#allocation10 + $0x118] sm:$0xff] }
 0xb8f   :  { %4659 = vmatmul.mubr.f32.vlgmr.msra.gmra.mrb[32].mxu0 %v4592_v4  ;;  %4730 = vmatmul.mubr.f32.vlgmr.msra.gmra.mrb[32].mxu1 %v4592_v4  ;;  %v454_v4 = vld [vmem:[#allocation10 + $0x138] sm:$0xff] }
 0xb90   :  { %10840 = vmatpush1.bf16.msra.mxu0 %v16722_v37  ;;  %10872 = vmatpush1.bf16.msra.mxu1 %v16723_v31  ;;  %v12934_v37 = vpop.eup %12933 }
 0xb91   :  { %10842 = vmatprep.subr.bf16.mxu0 %v16724_v19  ;;  %10874 = vmatprep.subr.bf16.mxu1 %v16725_v14  ;;  %v4384_v31 = vadd.f32 1.0, %v12934_v37  ;;  %v447_v37 = vld [vmem:[#allocation10 + $0x100] sm:$0xff] }
 0xb92   :  { %4800 = vmatprep.mubr.f32.mxu0 %v16672_v39  ;;  %4871 = vmatprep.mubr.f32.mxu1 %v16672_v39 }
 0xb93   :  { %12937 = vrcp.f32 %v4384_v31  ;;  %v451_v31 = vld [vmem:[#allocation10 + $0x120] sm:$0xff] }
 0xb94   :  { %10844 = vmatpush1.bf16.msra.mxu0 %v16726_v20  ;;  %10876 = vmatpush1.bf16.msra.mxu1 %v16782_v35  ;;  %v417_v20 = vld [vmem:[#allocation10 + $0x10] sm:$0xff] }
 0xb95   :  { %10846 = vmatprep.subr.bf16.mxu0 %v16783_v24  ;;  %10878 = vmatprep.subr.bf16.mxu1 %v16784_v52  ;;  %v425_v24 = vld [vmem:[#allocation10 + $0x50] sm:$0xff] }
 0xb96   :  { %v429_v52 = vld [vmem:[#allocation10 + $0x70] sm:$0xff] }
 0xb98   :  { %10848 = vmatpush1.bf16.msra.mxu0 %v16785_v8  ;;  %10880 = vmatpush1.bf16.msra.mxu1 %v16731_v2  ;;  %v10939_v8 = vpack.c.bf16 %v429_v52, %v425_v24 }
 0xb99   :  { %10850 = vmatprep.subr.bf16.mxu0 %v16732_v56  ;;  %10882 = vmatprep.subr.bf16.mxu1 %v16733_v54  ;;  %v430_v56 = vld [vmem:[#allocation10 + $0x78] sm:$0xff]  ;;  %v423_v54 = vld [vmem:[#allocation10 + $0x40] sm:$0xff] }
 0xb9c   :  { %10852 = vmatpush1.bf16.msra.mxu0 %v16734_v18  ;;  %10884 = vmatpush1.bf16.msra.mxu1 %v16735_v33  ;;  %v427_v18 = vld [vmem:[#allocation10 + $0x60] sm:$0xff] }
 0xb9d   :  { %10854 = vmatprep.subr.bf16.mxu0 %v16736_v25  ;;  %10886 = vmatprep.subr.bf16.mxu1 %v16737_v27  ;;  %v12936_v25 = vpop.eup %12935  ;;  %v424_v27 = vld [vmem:[#allocation10 + $0x48] sm:$0xff]  ;;  %v10907_v35 = vpack.c.bf16 %v427_v18, %v423_v54  ;;  %v470_v18 = vld [vmem:[#allocation10 + $0x1b8] sm:$0xff] }
 0xb9e   :  { %v12938_v19 = vpop.eup %12937 }
 0xba0   :  { %10856 = vmatpush1.bf16.msra.mxu0 %v16738_v0  ;;  %10888 = vmatpush1.bf16.msra.mxu1 %v16739_v6  ;;  %v428_v0 = vld [vmem:[#allocation10 + $0x68] sm:$0xff]  ;;  %v426_v6 = vld [vmem:[#allocation10 + $0x58] sm:$0xff] }
 0xba1   :  { %10858 = vmatprep.subr.bf16.mxu0 %v16786_v58  ;;  %10890 = vmatprep.subr.bf16.mxu1 %v13990_v3  ;;  %v4396_v3 = vmul.f32 %v12938_v19, %v12936_v25  ;;  %v10905_v2 = vpack.c.bf16 %v428_v0, %v424_v27  ;;  %v10937_v33 = vpack.c.bf16 %v430_v56, %v426_v6  ;;  %v432_v58 = vld [vmem:[#allocation10 + $0x88] sm:$0xff]  ;;  %v461_v27 = vld [vmem:[#allocation10 + $0x170] sm:$0xff]  ;;  %v466_v56 = vld [vmem:[#allocation10 + $0x198] sm:$0xff] }
 0xba2   :  { %v10909_v30 = vpack.c.bf16 %v436_v29, %v432_v58  ;;  %v10949_v25 = vpack.c.bf16 %v454_v4, %v450_v16  ;;  %v10919_v19 = vpack.c.bf16 %v451_v31, %v447_v37  ;;  %v464_v6 = vld [vmem:[#allocation10 + $0x188] sm:$0xff]  ;;  %v10957_v24 = vpack.c.bf16 %v470_v18, %v466_v56  ;;  %v469_v58 = vld [vmem:[#allocation10 + $0x1b0] sm:$0xff]  ;;  %v491_v18 = vld [vmem:[#allocation11 + $0x60] sm:$0xff] }
 0xba3   :  { %v472_v29 = vld [vmem:[#allocation10 + $0x1c8] sm:$0xff] }
 0xba4   :  { %10860 = vmatpush1.bf16.msra.mxu0 %v13994_v45  ;;  %10892 = vmatpush1.bf16.msra.mxu1 %v13996_v26  ;;  %v416_v45 = vld [vmem:[#allocation10 + $0x8] sm:$0xff] }
 0xba5   :  { %10862 = vmatprep.subr.bf16.mxu0 %v14000_v46  ;;  %10894 = vmatprep.subr.bf16.mxu1 %v14002_v47  ;;  %v420_v26 = vld [vmem:[#allocation10 + $0x28] sm:$0xff]  ;;  %v418_v46 = vld [vmem:[#allocation10 + $0x18] sm:$0xff] }
 0xba6   :  { %v10901_v47 = vpack.c.bf16 %v420_v26, %v416_v45  ;;  %v453_v45 = vld [vmem:[#allocation10 + $0x130] sm:$0xff] }
 0xba8   :  { %10864 = vmatpush1.bf16.msra.mxu0 %v14006_v21  ;;  %10896 = vmatpush1.bf16.msra.mxu1 %v14008_v57  ;;  %v422_v21 = vld [vmem:[#allocation10 + $0x38] sm:$0xff]  ;;  %v415_v57 = vld [vmem:[#allocation10] sm:$0xff] }
 0xba9   :  { %10866 = vmatprep.subr.bf16.mxu0 %v14012_v43  ;;  %10898 = vmatprep.subr.bf16.mxu1 %v14014_v9  ;;  %v419_v43 = vld [vmem:[#allocation10 + $0x20] sm:$0xff]  ;;  %v10933_v9 = vpack.c.bf16 %v422_v21, %v418_v46  ;;  %v456_v46 = vld [vmem:[#allocation10 + $0x148] sm:$0xff]  ;;  %v458_v21 = vld [vmem:[#allocation10 + $0x158] sm:$0xff] }
 0xbaa   :  { %v10903_v14 = vpack.c.bf16 %v419_v43, %v415_v57  ;;  %v462_v43 = vld [vmem:[#allocation10 + $0x178] sm:$0xff] }
 0xbac   :  { %10868 = vmatpush1.bf16.msra.mxu0 %v14018_v1  ;;  %10900 = vmatpush1.bf16.msra.mxu1 %v14020_v32  ;;  %v421_v1 = vld [vmem:[#allocation10 + $0x30] sm:$0xff] }
 0xbad   :  { %10902 = vmatprep.subr.bf16.mxu0 %v10901_v47  ;;  %v10935_v32 = vpack.c.bf16 %v421_v1, %v417_v20  ;;  %10934 = vmatprep.subr.bf16.mxu1 %v10933_v9  ;;  %v460_v47 = vld [vmem:[#allocation10 + $0x168] sm:$0xff]  ;;  %v455_v9 = vld [vmem:[#allocation10 + $0x140] sm:$0xff]  ;;  %v10953_v20 = vpack.c.bf16 %v462_v43, %v458_v21 }
 0xbae   :  { %v10921_v57 = vpack.c.bf16 %v460_v47, %v456_v46 }
 0xbaf   :  { %4801 = vmatmul.mubr.f32.vlgmr.msra.gmra.mrb[32].mxu0 %v4396_v3  ;;  %4872 = vmatmul.mubr.f32.vlgmr.msra.gmra.mrb[32].mxu1 %v4396_v3  ;;  %v449_v3 = vld [vmem:[#allocation10 + $0x110] sm:$0xff] }
 0xbb0   :  { %4992 = vmatprep.mubr.f32.mxu0 %v16672_v39  ;;  %5063 = vmatprep.mubr.f32.mxu1 %v16672_v39  ;;  %v10951_v26 = vpack.c.bf16 %v453_v45, %v449_v3 }
 0xbb1   :  { %10904 = vmatpush1.bf16.msra.mxu0 %v10903_v14  ;;  %10936 = vmatpush1.bf16.msra.mxu1 %v10935_v32  ;;  %v459_v14 = vld [vmem:[#allocation10 + $0x160] sm:$0xff]  ;;  %v457_v32 = vld [vmem:[#allocation10 + $0x150] sm:$0xff] }
 0xbb2   :  { %10906 = vmatprep.subr.bf16.mxu0 %v10905_v2  ;;  %10938 = vmatprep.subr.bf16.mxu1 %v10937_v33  ;;  %v10923_v1 = vpack.c.bf16 %v459_v14, %v455_v9  ;;  %v10955_v0 = vpack.c.bf16 %v461_v27, %v457_v32  ;;  %v468_v2 = vld [vmem:[#allocation10 + $0x1a8] sm:$0xff]  ;;  %v463_v33 = vld [vmem:[#allocation10 + $0x180] sm:$0xff]  ;;  %v485_v32 = vld [vmem:[#allocation11 + $0x30] sm:$0xff] }
 0xbb3   :  { %v10925_v54 = vpack.c.bf16 %v468_v2, %v464_v6  ;;  %v479_v14 = vld [vmem:[#allocation11] sm:$0xff]  ;;  %v488_v27 = vld [vmem:[#allocation11 + $0x48] sm:$0xff]  ;;  %v490_v6 = vld [vmem:[#allocation11 + $0x58] sm:$0xff] }
 0xbb4   :  { %v494_v2 = vld [vmem:[#allocation11 + $0x78] sm:$0xff] }
 0xbb5   :  { %10908 = vmatpush1.bf16.msra.mxu0 %v10907_v35  ;;  %10940 = vmatpush1.bf16.msra.mxu1 %v10939_v8  ;;  %v467_v35 = vld [vmem:[#allocation10 + $0x1a0] sm:$0xff]  ;;  %v465_v8 = vld [vmem:[#allocation10 + $0x190] sm:$0xff] }
 0xbb6   :  { %10910 = vmatprep.subr.bf16.mxu0 %v10909_v30  ;;  %10942 = vmatprep.subr.bf16.mxu1 %v10941_v62  ;;  %v10927_v52 = vpack.c.bf16 %v467_v35, %v463_v33  ;;  %v10959_v63 = vpack.c.bf16 %v469_v58, %v465_v8  ;;  %v476_v30 = vld [vmem:[#allocation10 + $0x1e8] sm:$0xff]  ;;  %v10961_v62 = vpack.c.bf16 %v478_v11, %v474_v41 }
 0xbb7   :  { %v10929_v36 = vpack.c.bf16 %v476_v30, %v472_v29  ;;  %v14937_v35 = vpack.c.bf16 %v494_v2, %v490_v6  ;;  %v496_v8 = vld [vmem:[#allocation11 + $0x88] sm:$0xff]  ;;  %v502_v30 = vld [vmem:[#allocation11 + $0xb8] sm:$0xff] }
 0xbb8   :  { %v500_v29 = vld [vmem:[#allocation11 + $0xa8] sm:$0xff]  ;;  %v530_v6 = vld [vmem:[#allocation11 + $0x198] sm:$0xff] }
 0xbb9   :  { %10912 = vmatpush1.bf16.msra.mxu0 %v10911_v38  ;;  %10944 = vmatpush1.bf16.msra.mxu1 %v10943_v44  ;;  %v471_v38 = vld [vmem:[#allocation10 + $0x1c0] sm:$0xff]  ;;  %v534_v2 = vld [vmem:[#allocation11 + $0x1b8] sm:$0xff] }
 0xbba   :  { %10914 = vmatprep.subr.bf16.mxu0 %v10913_v55  ;;  %10946 = vmatprep.subr.bf16.mxu1 %v10945_v40  ;;  %v10931_v44 = vpack.c.bf16 %v475_v42, %v471_v38  ;;  %v10963_v55 = vpack.c.bf16 %v477_v22, %v473_v59  ;;  %v14922_v40 = vpack.c.bf16 %v486_v12, %v482_v10  ;;  %v497_v59 = vld [vmem:[#allocation11 + $0x90] sm:$0xff]  ;;  %v504_v22 = vld [vmem:[#allocation11 + $0xc8] sm:$0xff] }
 0xbbb   :  { %v14947_v38 = vpack.c.bf16 %v500_v29, %v496_v8  ;;  %v529_v29 = vld [vmem:[#allocation11 + $0x190] sm:$0xff] }
 0xbbd   :  { %10916 = vmatpush1.bf16.msra.mxu0 %v10915_v53  ;;  %10948 = vmatpush1.bf16.msra.mxu1 %v10947_v60  ;;  %17088 = vst [vmem:[#allocation86_spill] sm:$0xff] %v14947_v38 }
 0xbbe   :  { %10918 = vmatprep.subr.bf16.mxu0 %v10917_v15  ;;  %10950 = vmatprep.subr.bf16.mxu1 %v10949_v25 }
 0xbc1   :  { %10920 = vmatpush1.bf16.msra.mxu0 %v10919_v19  ;;  %10952 = vmatpush1.bf16.msra.mxu1 %v10951_v26 }
 0xbc2   :  { %10922 = vmatprep.subr.bf16.mxu0 %v10921_v57  ;;  %10954 = vmatprep.subr.bf16.mxu1 %v10953_v20  ;;  %v483_v20 = vld [vmem:[#allocation11 + $0x20] sm:$0xff] }
 0xbc3   :  { %v14931_v56 = vpack.c.bf16 %v483_v20, %v479_v14 }
 0xbc5   :  { %10924 = vmatpush1.bf16.msra.mxu0 %v10923_v1  ;;  %10956 = vmatpush1.bf16.msra.mxu1 %v10955_v0  ;;  %v481_v1 = vld [vmem:[#allocation11 + $0x10] sm:$0xff]  ;;  %v492_v0 = vld [vmem:[#allocation11 + $0x68] sm:$0xff] }
 0xbc6   :  { %10926 = vmatprep.subr.bf16.mxu0 %v10925_v54  ;;  %10958 = vmatprep.subr.bf16.mxu1 %v10957_v24  ;;  %v14933_v54 = vpack.c.bf16 %v485_v32, %v481_v1  ;;  %v14935_v33 = vpack.c.bf16 %v492_v0, %v488_v27  ;;  %v489_v24 = vld [vmem:[#allocation11 + $0x50] sm:$0xff]  ;;  %v528_v27 = vld [vmem:[#allocation11 + $0x188] sm:$0xff] }
 0xbc7   :  { %v521_v1 = vld [vmem:[#allocation11 + $0x150] sm:$0xff]  ;;  %v532_v0 = vld [vmem:[#allocation11 + $0x1a8] sm:$0xff] }
 0xbc8   :  { %v525_v32 = vld [vmem:[#allocation11 + $0x170] sm:$0xff]  ;;  %v14997_v8 = vpack.c.bf16 %v532_v0, %v528_v27  ;;  %v559_v0 = vld [vmem:[#allocation13 + $0x78] sm:$0xff] }
 0xbc9   :  { %10928 = vmatpush1.bf16.msra.mxu0 %v10927_v52  ;;  %10960 = vmatpush1.bf16.msra.mxu1 %v10959_v63  ;;  %v493_v52 = vld [vmem:[#allocation11 + $0x70] sm:$0xff]  ;;  %v498_v63 = vld [vmem:[#allocation11 + $0x98] sm:$0xff] }
 0xbca   :  { %10930 = vmatprep.subr.bf16.mxu0 %v10929_v36  ;;  %10962 = vmatprep.subr.bf16.mxu1 %v10961_v62  ;;  %v14943_v11 = vpack.c.bf16 %v493_v52, %v489_v24  ;;  %v495_v36 = vld [vmem:[#allocation11 + $0x80] sm:$0xff]  ;;  %v14949_v42 = vpack.c.bf16 %v502_v30, %v498_v63  ;;  %17104 = vst [vmem:[#allocation107_spill] sm:$0xff] %v14997_v8  ;;  %v533_v63 = vld [vmem:[#allocation11 + $0x1b0] sm:$0xff]  ;;  %v536_v30 = vld [vmem:[#allocation11 + $0x1c8] sm:$0xff] }
 0xbcb   :  { %v499_v62 = vld [vmem:[#allocation11 + $0xa0] sm:$0xff] }
 0xbcc   :  { %17087 = vst [vmem:[#allocation85_spill] sm:$0xff] %v14943_v11  ;;  %17089 = vst [vmem:[#allocation88_spill] sm:$0xff] %v14949_v42  ;;  %v14955_v10 = vpack.c.bf16 %v499_v62, %v495_v36  ;;  %v527_v24 = vld [vmem:[#allocation11 + $0x180] sm:$0xff]  ;;  %v540_v36 = vld [vmem:[#allocation11 + $0x1e8] sm:$0xff] }
 0xbcd   :  { %10932 = vmatpush1.bf16.msra.mxu0 %v10931_v44  ;;  %10964 = vmatpush1.bf16.msra.mxu1 %v10963_v55  ;;  %v501_v44 = vld [vmem:[#allocation11 + $0xb0] sm:$0xff]  ;;  %v510_v55 = vld [vmem:[#allocation11 + $0xf8] sm:$0xff]  ;;  %v531_v52 = vld [vmem:[#allocation11 + $0x1a0] sm:$0xff] }
 0xbce   :  { %10966 = vmatprep.subr.bf16.mxu0 %v14920_v13  ;;  %10998 = vmatprep.subr.bf16.mxu1 %v14922_v40  ;;  %17090 = vst [vmem:[#allocation89_spill] sm:$0xff] %v14955_v10  ;;  %v14957_v12 = vpack.c.bf16 %v501_v44, %v497_v59  ;;  %v538_v62 = vld [vmem:[#allocation11 + $0x1d8] sm:$0xff]  ;;  %v15003_v44 = vpack.c.bf16 %v531_v52, %v527_v24 }
 0xbcf   :  { %v542_v59 = vld [vmem:[#allocation11 + $0x1f8] sm:$0xff] }
 0xbd0   :  { %17091 = vst [vmem:[#allocation90_spill] sm:$0xff] %v14957_v12  ;;  %17106 = vst [vmem:[#allocation111_spill] sm:$0xff] %v15003_v44 }
 0xc82   :  { %v4802_v53 = vpop.f32.mrb[32].mxu0  ;;  %v4873_v61 = vpop.f32.mrb[32].mxu1 }
 0xc83   :  { %v12553_v5 = vadd.f32 %v4802_v53, %v17085_v48  ;;  %v4804_v60 = vpop.f32.mrb[33].mxu0  ;;  %v4875_v28 = vpop.f32.mrb[33].mxu1  ;;  %v12555_v31 = vadd.f32 %v4873_v61, %v17086_v23  ;;  %v503_v53 = vld [vmem:[#allocation11 + $0xc0] sm:$0xff] }
 0xc84   :  { %v12554_v34 = vadd.f32 %v4804_v60, %v16780_v7  ;;  %v12556_v4 = vadd.f32 %v4875_v28, %v14137_v17  ;;  %v507_v61 = vld [vmem:[#allocation11 + $0xe0] sm:$0xff]  ;;  %v14963_v60 = vpack.c.bf16 %v510_v55, %v506_v50  ;;  %v505_v28 = vld [vmem:[#allocation11 + $0xd0] sm:$0xff]  ;;  %v15009_v50 = vpack.c.bf16 %v540_v36, %v536_v30  ;;  %v561_v36 = vld [vmem:[#allocation13 + $0x88] sm:$0xff] }
 0xc85   :  { %v9190_v16 = vmul.f32 -1.442695, %v12553_v5  ;;  %v14961_v5 = vpack.c.bf16 %v508_v49, %v504_v22  ;;  %v15005_v22 = vpack.c.bf16 %v533_v63, %v529_v29  ;;  %v535_v49 = vld [vmem:[#allocation11 + $0x1c0] sm:$0xff]  ;;  %v15011_v55 = vpack.c.bf16 %v542_v59, %v538_v62  ;;  %v554_v29 = vld [vmem:[#allocation13 + $0x50] sm:$0xff]  ;;  %v565_v62 = vld [vmem:[#allocation13 + $0xa8] sm:$0xff] }
 0xc86   :  { %v9191_v15 = vmul.f32 -1.442695, %v12554_v34  ;;  %v9192_v37 = vmul.f32 -1.442695, %v12556_v4  ;;  %17093 = vst [vmem:[#allocation92_spill] sm:$0xff] %v14963_v60  ;;  %v509_v34 = vld [vmem:[#allocation11 + $0xf0] sm:$0xff] }
 0xc87   :  { %12939 = vpow2.f32 %v9190_v16  ;;  %17092 = vst [vmem:[#allocation91_spill] sm:$0xff] %v14961_v5  ;;  %v512_v16 = vld [vmem:[#allocation11 + $0x108] sm:$0xff]  ;;  %v514_v4 = vld [vmem:[#allocation11 + $0x118] sm:$0xff]  ;;  %17107 = vst [vmem:[#allocation96_spill] sm:$0xff] %v15005_v22 }
 0xc88   :  { %12941 = vpow2.f32 %v9191_v15  ;;  %v516_v15 = vld [vmem:[#allocation11 + $0x128] sm:$0xff]  ;;  %17108 = vst [vmem:[#allocation97_spill] sm:$0xff] %v15009_v50  ;;  %17109 = vst [vmem:[#allocation98_spill] sm:$0xff] %v15011_v55  ;;  %v558_v63 = vld [vmem:[#allocation13 + $0x70] sm:$0xff] }
 0xc89   :  { %12943 = vpow2.f32 %v9192_v37  ;;  %v518_v37 = vld [vmem:[#allocation11 + $0x138] sm:$0xff]  ;;  %v15046_v30 = vpack.c.bf16 %v558_v63, %v554_v29  ;;  %v570_v29 = vld [vmem:[#allocation13 + $0xd0] sm:$0xff] }
 0xc8a   :  { %12945 = vtanh.f32 %v12555_v31  ;;  %v14967_v31 = vpack.c.bf16 %v507_v61, %v503_v53  ;;  %v539_v53 = vld [vmem:[#allocation11 + $0x1e0] sm:$0xff]  ;;  %v537_v61 = vld [vmem:[#allocation11 + $0x1d0] sm:$0xff]  ;;  %v563_v59 = vld [vmem:[#allocation13 + $0x98] sm:$0xff] }
 0xc8b   :  { %17119 = vst [vmem:[#allocation30_spill] sm:$0xff] %v15046_v30  ;;  %v574_v63 = vld [vmem:[#allocation13 + $0xf0] sm:$0xff] }
 0xc8c   :  { %17094 = vst [vmem:[#allocation93_spill] sm:$0xff] %v14967_v31 }
 0xc91   :  { %v12940_v25 = vpop.eup %12939 }
 0xc92   :  { %v12942_v19 = vpop.eup %12941  ;;  %v4891_v3 = vadd.f32 1.0, %v12940_v25  ;;  %v14969_v25 = vpack.c.bf16 %v509_v34, %v505_v28  ;;  %v541_v28 = vld [vmem:[#allocation11 + $0x1f0] sm:$0xff]  ;;  %v15015_v34 = vpack.c.bf16 %v539_v53, %v535_v49  ;;  %v15051_v49 = vpack.c.bf16 %v565_v62, %v561_v36  ;;  %v567_v53 = vld [vmem:[#allocation13 + $0xb8] sm:$0xff]  ;;  %v577_v62 = vld [vmem:[#allocation13 + $0x108] sm:$0xff] }
 0xc93   :  { %v4892_v45 = vadd.f32 1.0, %v12942_v19  ;;  %v12944_v48 = vpop.eup %12943  ;;  %v511_v19 = vld [vmem:[#allocation11 + $0x100] sm:$0xff]  ;;  %v15070_v36 = vpack.c.bf16 %v574_v63, %v570_v29  ;;  %v589_v29 = vld [vmem:[#allocation13 + $0x168] sm:$0xff]  ;;  %v587_v63 = vld [vmem:[#allocation13 + $0x158] sm:$0xff] }
 0xc94   :  { %12947 = vrcp.f32 %v4891_v3  ;;  %v12946_v26 = vpop.eup %12945  ;;  %v4893_v21 = vadd.f32 1.0, %v12944_v48  ;;  %17095 = vst [vmem:[#allocation94_spill] sm:$0xff] %v14969_v25  ;;  %v515_v3 = vld [vmem:[#allocation11 + $0x120] sm:$0xff]  ;;  %v14975_v48 = vpack.c.bf16 %v518_v37, %v514_v4  ;;  %17110 = vst [vmem:[#allocation99_spill] sm:$0xff] %v15015_v34  ;;  %v549_v4 = vld [vmem:[#allocation13 + $0x28] sm:$0xff] }
 0xc95   :  { %12949 = vrcp.f32 %v4892_v45  ;;  %v14973_v45 = vpack.c.bf16 %v516_v15, %v512_v16  ;;  %v15017_v16 = vpack.c.bf16 %v541_v28, %v537_v61  ;;  %v545_v15 = vld [vmem:[#allocation13 + $0x8] sm:$0xff]  ;;  %v547_v37 = vld [vmem:[#allocation13 + $0x18] sm:$0xff]  ;;  %17120 = vst [vmem:[#allocation31_spill] sm:$0xff] %v15051_v49  ;;  %v560_v61 = vld [vmem:[#allocation13 + $0x80] sm:$0xff] }
 0xc96   :  { %12951 = vrcp.f32 %v4893_v21  ;;  %17097 = vst [vmem:[#allocation100_spill] sm:$0xff] %v14975_v48  ;;  %v522_v21 = vld [vmem:[#allocation11 + $0x158] sm:$0xff]  ;;  %v564_v28 = vld [vmem:[#allocation13 + $0xa0] sm:$0xff]  ;;  %17127 = vst [vmem:[#allocation38_spill] sm:$0xff] %v15070_v36 }
 0xc97   :  { %17096 = vst [vmem:[#allocation95_spill] sm:$0xff] %v14973_v45  ;;  %17111 = vst [vmem:[#allocation109_spill] sm:$0xff] %v15017_v16 }
 0xc9e   :  { %v12948_v7 = vpop.eup %12947 }
 0xc9f   :  { %v12950_v46 = vpop.eup %12949  ;;  %v4902_v47 = vmul.f32 %v12948_v7, %v12946_v26  ;;  %v513_v26 = vld [vmem:[#allocation11 + $0x110] sm:$0xff] }
 0xca0   :  { %v4901_v57 = vmul.f32 %v12950_v46, %v14876_v51  ;;  %v12952_v23 = vpop.eup %12951  ;;  %v487_v51 = vld [vmem:[#allocation11 + $0x40] sm:$0xff]  ;;  %v517_v7 = vld [vmem:[#allocation11 + $0x130] sm:$0xff]  ;;  %v520_v46 = vld [vmem:[#allocation11 + $0x148] sm:$0xff] }
 0xca1   :  { %v14941_v41 = vpack.c.bf16 %v491_v18, %v487_v51  ;;  %v14993_v18 = vpack.c.bf16 %v525_v32, %v521_v1  ;;  %v557_v1 = vld [vmem:[#allocation13 + $0x68] sm:$0xff]  ;;  %v555_v32 = vld [vmem:[#allocation13 + $0x58] sm:$0xff] }
 0xca2   :  { %v4903_v17 = vadd.f32 %v4902_v47, %v4901_v57  ;;  %v524_v47 = vld [vmem:[#allocation11 + $0x168] sm:$0xff]  ;;  %v526_v57 = vld [vmem:[#allocation11 + $0x178] sm:$0xff]  ;;  %v15041_v24 = vpack.c.bf16 %v559_v0, %v555_v32  ;;  %v568_v32 = vld [vmem:[#allocation13 + $0xc0] sm:$0xff] }
 0xca3   :  { %v14985_v14 = vpack.c.bf16 %v524_v47, %v520_v46  ;;  %v14987_v20 = vpack.c.bf16 %v526_v57, %v522_v21  ;;  %17103 = vst [vmem:[#allocation106_spill] sm:$0xff] %v14993_v18  ;;  %v546_v21 = vld [vmem:[#allocation13 + $0x10] sm:$0xff]  ;;  %v572_v0 = vld [vmem:[#allocation13 + $0xe0] sm:$0xff] }
 0xca4   :  { %12953 = vtanh.f32 %v4903_v17  ;;  %v14979_v17 = vpack.c.bf16 %v515_v3, %v511_v19  ;;  %v15027_v19 = vpack.c.bf16 %v549_v4, %v545_v15  ;;  %v551_v3 = vld [vmem:[#allocation13 + $0x38] sm:$0xff]  ;;  %v550_v57 = vld [vmem:[#allocation13 + $0x30] sm:$0xff]  ;;  %17117 = vst [vmem:[#allocation28_spill] sm:$0xff] %v15041_v24  ;;  %v15053_v15 = vpack.c.bf16 %v567_v53, %v563_v59  ;;  %v581_v59 = vld [vmem:[#allocation13 + $0x128] sm:$0xff] }
 0xca5   :  { %17100 = vst [vmem:[#allocation103_spill] sm:$0xff] %v14985_v14  ;;  %17101 = vst [vmem:[#allocation104_spill] sm:$0xff] %v14987_v20  ;;  %v15029_v46 = vpack.c.bf16 %v551_v3, %v547_v37  ;;  %v15055_v4 = vpack.c.bf16 %v564_v28, %v560_v61  ;;  %v562_v37 = vld [vmem:[#allocation13 + $0x90] sm:$0xff]  ;;  %v579_v53 = vld [vmem:[#allocation13 + $0x118] sm:$0xff]  ;;  %v15075_v61 = vpack.c.bf16 %v581_v59, %v577_v62 }
 0xca6   :  { %17098 = vst [vmem:[#allocation101_spill] sm:$0xff] %v14979_v17  ;;  %17112 = vst [vmem:[#allocation23_spill] sm:$0xff] %v15027_v19  ;;  %v566_v3 = vld [vmem:[#allocation13 + $0xb0] sm:$0xff]  ;;  %v583_v28 = vld [vmem:[#allocation13 + $0x138] sm:$0xff] }
 0xca7   :  { %17113 = vst [vmem:[#allocation24_spill] sm:$0xff] %v15029_v46  ;;  %17121 = vst [vmem:[#allocation32_spill] sm:$0xff] %v15053_v15  ;;  %v591_v59 = vld [vmem:[#allocation13 + $0x178] sm:$0xff] }
 0xca8   :  { %17122 = vst [vmem:[#allocation33_spill] sm:$0xff] %v15055_v4  ;;  %17128 = vst [vmem:[#allocation39_spill] sm:$0xff] %v15075_v61 }
 0xcae   :  { %v12954_v43 = vpop.eup %12953 }
 0xcaf   :  { %v4905_v9 = vmul.f32 %v12954_v43, %v12952_v23  ;;  %v14981_v23 = vpack.c.bf16 %v517_v7, %v513_v26  ;;  %v519_v43 = vld [vmem:[#allocation11 + $0x140] sm:$0xff] }
 0xcb0   :  { %v544_v26 = vld [vmem:[#allocation13] sm:$0xff] }
 0xcb1   :  { %12955 = vtanh.f32 %v4905_v9  ;;  %17099 = vst [vmem:[#allocation102_spill] sm:$0xff] %v14981_v23  ;;  %v523_v9 = vld [vmem:[#allocation11 + $0x160] sm:$0xff] }
 0xcb2   :  { %v14991_v51 = vpack.c.bf16 %v523_v9, %v519_v43  ;;  %v548_v7 = vld [vmem:[#allocation13 + $0x20] sm:$0xff]  ;;  %v15034_v43 = vpack.c.bf16 %v550_v57, %v546_v21  ;;  %v553_v9 = vld [vmem:[#allocation13 + $0x48] sm:$0xff]  ;;  %v571_v57 = vld [vmem:[#allocation13 + $0xd8] sm:$0xff] }
 0xcb3   :  { %v15031_v47 = vpack.c.bf16 %v548_v7, %v544_v26  ;;  %v15039_v27 = vpack.c.bf16 %v557_v1, %v553_v9  ;;  %v15058_v26 = vpack.c.bf16 %v566_v3, %v562_v37  ;;  %v569_v7 = vld [vmem:[#allocation13 + $0xc8] sm:$0xff]  ;;  %v575_v1 = vld [vmem:[#allocation13 + $0xf8] sm:$0xff]  ;;  %v576_v37 = vld [vmem:[#allocation13 + $0x100] sm:$0xff] }
 0xcb4   :  { %17102 = vst [vmem:[#allocation105_spill] sm:$0xff] %v14991_v51  ;;  %17115 = vst [vmem:[#allocation26_spill] sm:$0xff] %v15034_v43  ;;  %v573_v21 = vld [vmem:[#allocation13 + $0xe8] sm:$0xff]  ;;  %v580_v3 = vld [vmem:[#allocation13 + $0x120] sm:$0xff] }
 0xcb5   :  { %17114 = vst [vmem:[#allocation25_spill] sm:$0xff] %v15031_v47  ;;  %17116 = vst [vmem:[#allocation27_spill] sm:$0xff] %v15039_v27  ;;  %v15063_v9 = vpack.c.bf16 %v573_v21, %v569_v7  ;;  %v15077_v7 = vpack.c.bf16 %v583_v28, %v579_v53  ;;  %v15079_v21 = vpack.c.bf16 %v580_v3, %v576_v37  ;;  %v584_v53 = vld [vmem:[#allocation13 + $0x140] sm:$0xff] }
 0xcb6   :  { %17123 = vst [vmem:[#allocation34_spill] sm:$0xff] %v15058_v26  ;;  %v588_v28 = vld [vmem:[#allocation13 + $0x160] sm:$0xff]  ;;  %v15089_v37 = vpack.c.bf16 %v591_v59, %v587_v63  ;;  %v599_v63 = vld [vmem:[#allocation13 + $0x1b8] sm:$0xff] }
 0xcb7   :  { %17124 = vst [vmem:[#allocation35_spill] sm:$0xff] %v15063_v9  ;;  %17129 = vst [vmem:[#allocation40_spill] sm:$0xff] %v15077_v7  ;;  %v15091_v3 = vpack.c.bf16 %v588_v28, %v584_v53  ;;  %v592_v59 = vld [vmem:[#allocation13 + $0x180] sm:$0xff] }
 0xcb8   :  { %17130 = vst [vmem:[#allocation41_spill] sm:$0xff] %v15079_v21  ;;  %17133 = vst [vmem:[#allocation44_spill] sm:$0xff] %v15089_v37  ;;  %v596_v53 = vld [vmem:[#allocation13 + $0x1a0] sm:$0xff] }
 0xcb9   :  { %17134 = vst [vmem:[#allocation45_spill] sm:$0xff] %v15091_v3 }
 0xcbb   :  { %v12956_v58 = vpop.eup %12955 }
 0xcbc   :  { %4993 = vmatmul.mubr.f32.vlgmr.msra.gmra.mrb[34].mxu0 %v12956_v58  ;;  %5064 = vmatmul.mubr.f32.vlgmr.msra.gmra.mrb[34].mxu1 %v12956_v58  ;;  %v14999_v58 = vpack.c.bf16 %v534_v2, %v530_v6  ;;  %v552_v6 = vld [vmem:[#allocation13 + $0x40] sm:$0xff] }
 0xcbd   :  { %10968 = vmatpush1.bf16.msra.mxu0 %v14931_v56  ;;  %11000 = vmatpush1.bf16.msra.mxu1 %v14933_v54  ;;  %v556_v2 = vld [vmem:[#allocation13 + $0x60] sm:$0xff] }
 0xcbe   :  { %10970 = vmatprep.subr.bf16.mxu0 %v14935_v33  ;;  %11002 = vmatprep.subr.bf16.mxu1 %v14937_v35  ;;  %17105 = vst [vmem:[#allocation108_spill] sm:$0xff] %v14999_v58  ;;  %v15043_v52 = vpack.c.bf16 %v556_v2, %v552_v6  ;;  %v15065_v6 = vpack.c.bf16 %v575_v1, %v571_v57  ;;  %v578_v57 = vld [vmem:[#allocation13 + $0x110] sm:$0xff] }
 0xcbf   :  { %5134 = vmatprep.mubr.f32.mxu0 %v16672_v39  ;;  %5205 = vmatprep.mubr.f32.mxu1 %v16672_v39  ;;  %v15067_v2 = vpack.c.bf16 %v572_v0, %v568_v32  ;;  %v582_v1 = vld [vmem:[#allocation13 + $0x130] sm:$0xff]  ;;  %v585_v0 = vld [vmem:[#allocation13 + $0x148] sm:$0xff] }
 0xcc0   :  { %17118 = vst [vmem:[#allocation29_spill] sm:$0xff] %v15043_v52  ;;  %17125 = vst [vmem:[#allocation36_spill] sm:$0xff] %v15065_v6  ;;  %v15082_v32 = vpack.c.bf16 %v582_v1, %v578_v57  ;;  %v15087_v62 = vpack.c.bf16 %v589_v29, %v585_v0  ;;  %v586_v57 = vld [vmem:[#allocation13 + $0x150] sm:$0xff]  ;;  %v597_v0 = vld [vmem:[#allocation13 + $0x1a8] sm:$0xff] }
 0xcc1   :  { %10972 = vmatpush1.bf16.msra.mxu0 %v14941_v41  ;;  %11004 = vmatpush1.bf16.msra.mxu1 %v14943_v11  ;;  %17126 = vst [vmem:[#allocation37_spill] sm:$0xff] %v15067_v2  ;;  %v590_v1 = vld [vmem:[#allocation13 + $0x170] sm:$0xff]  ;;  %v595_v29 = vld [vmem:[#allocation13 + $0x198] sm:$0xff] }
 0xcc2   :  { %10974 = vmatprep.subr.bf16.mxu0 %v14947_v38  ;;  %11006 = vmatprep.subr.bf16.mxu1 %v14949_v42  ;;  %17131 = vst [vmem:[#allocation42_spill] sm:$0xff] %v15082_v32  ;;  %17132 = vst [vmem:[#allocation43_spill] sm:$0xff] %v15087_v62  ;;  %v15101_v28 = vpack.c.bf16 %v599_v63, %v595_v29  ;;  %v600_v29 = vld [vmem:[#allocation13 + $0x1c0] sm:$0xff] }
 0xcc3   :  { %v604_v63 = vld [vmem:[#allocation13 + $0x1e0] sm:$0xff] }
 0xcc4   :  { %17137 = vst [vmem:[#allocation48_spill] sm:$0xff] %v15101_v28 }
 0xcc5   :  { %10976 = vmatpush1.bf16.msra.mxu0 %v14955_v10  ;;  %11008 = vmatpush1.bf16.msra.mxu1 %v14957_v12 }
 0xcc6   :  { %10978 = vmatprep.subr.bf16.mxu0 %v14961_v5  ;;  %11010 = vmatprep.subr.bf16.mxu1 %v14963_v60 }
 0xcc9   :  { %10980 = vmatpush1.bf16.msra.mxu0 %v14967_v31  ;;  %11012 = vmatpush1.bf16.msra.mxu1 %v14969_v25 }
 0xcca   :  { %10982 = vmatprep.subr.bf16.mxu0 %v14973_v45  ;;  %11014 = vmatprep.subr.bf16.mxu1 %v14975_v48 }
 0xccd   :  { %10984 = vmatpush1.bf16.msra.mxu0 %v14979_v17  ;;  %11016 = vmatpush1.bf16.msra.mxu1 %v14981_v23 }
 0xcce   :  { %10986 = vmatprep.subr.bf16.mxu0 %v14985_v14  ;;  %11018 = vmatprep.subr.bf16.mxu1 %v14987_v20 }
 0xcd1   :  { %10988 = vmatpush1.bf16.msra.mxu0 %v14991_v51  ;;  %11020 = vmatpush1.bf16.msra.mxu1 %v14993_v18 }
 0xcd2   :  { %10990 = vmatprep.subr.bf16.mxu0 %v14997_v8  ;;  %11022 = vmatprep.subr.bf16.mxu1 %v14999_v58 }
 0xcd5   :  { %10992 = vmatpush1.bf16.msra.mxu0 %v15003_v44  ;;  %11024 = vmatpush1.bf16.msra.mxu1 %v15005_v22 }
 0xcd6   :  { %10994 = vmatprep.subr.bf16.mxu0 %v15009_v50  ;;  %11026 = vmatprep.subr.bf16.mxu1 %v15011_v55 }
 0xcd9   :  { %10996 = vmatpush1.bf16.msra.mxu0 %v15015_v34  ;;  %11028 = vmatpush1.bf16.msra.mxu1 %v15017_v16 }
 0xcda   :  { %11030 = vmatprep.subr.bf16.mxu0 %v15027_v19  ;;  %11062 = vmatprep.subr.bf16.mxu1 %v15029_v46 }
 0xcdc   :  { %5135 = vmatmul.mubr.f32.vlgmr.msra.gmra.mrb[36].mxu0 %v16672_v39  ;;  %5206 = vmatmul.mubr.f32.vlgmr.msra.gmra.mrb[36].mxu1 %v16672_v39 }
 0xcdd   :  { %5331 = vmatprep.mubr.f32.mxu0 %v16672_v39  ;;  %5402 = vmatprep.mubr.f32.mxu1 %v16672_v39 }
 0xcde   :  { %11032 = vmatpush1.bf16.msra.mxu0 %v15031_v47  ;;  %11064 = vmatpush1.bf16.msra.mxu1 %v15034_v43 }
 0xcdf   :  { %11034 = vmatprep.subr.bf16.mxu0 %v15039_v27  ;;  %11066 = vmatprep.subr.bf16.mxu1 %v15041_v24 }
 0xce2   :  { %11036 = vmatpush1.bf16.msra.mxu0 %v15043_v52  ;;  %11068 = vmatpush1.bf16.msra.mxu1 %v15046_v30 }
 0xce3   :  { %11038 = vmatprep.subr.bf16.mxu0 %v15051_v49  ;;  %11070 = vmatprep.subr.bf16.mxu1 %v15053_v15  ;;  %v635_v49 = vld [vmem:[#allocation14 + $0xd8] sm:$0xff] }
 0xce6   :  { %11040 = vmatpush1.bf16.msra.mxu0 %v15055_v4  ;;  %11072 = vmatpush1.bf16.msra.mxu1 %v15058_v26 }
 0xce7   :  { %11042 = vmatprep.subr.bf16.mxu0 %v15063_v9  ;;  %11074 = vmatprep.subr.bf16.mxu1 %v15065_v6 }
 0xcea   :  { %11044 = vmatpush1.bf16.msra.mxu0 %v15067_v2  ;;  %11076 = vmatpush1.bf16.msra.mxu1 %v15070_v36  ;;  %v603_v36 = vld [vmem:[#allocation13 + $0x1d8] sm:$0xff] }
 0xceb   :  { %11046 = vmatprep.subr.bf16.mxu0 %v15075_v61  ;;  %11078 = vmatprep.subr.bf16.mxu1 %v15077_v7  ;;  %v15094_v7 = vpack.c.bf16 %v590_v1, %v586_v57  ;;  %v15103_v61 = vpack.c.bf16 %v596_v53, %v592_v59  ;;  %v594_v57 = vld [vmem:[#allocation13 + $0x190] sm:$0xff]  ;;  %v607_v2 = vld [vmem:[#allocation13 + $0x1f8] sm:$0xff]  ;;  %v15115_v53 = vpack.c.bf16 %v604_v63, %v600_v29 }
 0xcec   :  { %v598_v1 = vld [vmem:[#allocation13 + $0x1b0] sm:$0xff] }
 0xced   :  { %17135 = vst [vmem:[#allocation46_spill] sm:$0xff] %v15094_v7  ;;  %17138 = vst [vmem:[#allocation49_spill] sm:$0xff] %v15103_v61  ;;  %v602_v59 = vld [vmem:[#allocation13 + $0x1d0] sm:$0xff] }
 0xcee   :  { %11048 = vmatpush1.bf16.msra.mxu0 %v15079_v21  ;;  %11080 = vmatpush1.bf16.msra.mxu1 %v15082_v32  ;;  %v593_v32 = vld [vmem:[#allocation13 + $0x188] sm:$0xff]  ;;  %17142 = vst [vmem:[#allocation53_spill] sm:$0xff] %v15115_v53 }
 0xcef   :  { %11050 = vmatprep.subr.bf16.mxu0 %v15087_v62  ;;  %11082 = vmatprep.subr.bf16.mxu1 %v15089_v37  ;;  %v15099_v21 = vpack.c.bf16 %v597_v0, %v593_v32  ;;  %v601_v62 = vld [vmem:[#allocation13 + $0x1c8] sm:$0xff]  ;;  %v15112_v0 = vpack.c.bf16 %v607_v2, %v603_v36  ;;  %v611_v2 = vld [vmem:[#allocation14 + $0x18] sm:$0xff] }
 0xcf0   :  { %v605_v37 = vld [vmem:[#allocation13 + $0x1e8] sm:$0xff]  ;;  %v615_v36 = vld [vmem:[#allocation14 + $0x38] sm:$0xff] }
 0xcf1   :  { %17136 = vst [vmem:[#allocation47_spill] sm:$0xff] %v15099_v21  ;;  %v15110_v32 = vpack.c.bf16 %v605_v37, %v601_v62  ;;  %17141 = vst [vmem:[#allocation52_spill] sm:$0xff] %v15112_v0  ;;  %v15123_v37 = vpack.c.bf16 %v615_v36, %v611_v2 }
 0xcf2   :  { %11052 = vmatpush1.bf16.msra.mxu0 %v15091_v3  ;;  %11084 = vmatpush1.bf16.msra.mxu1 %v15094_v7  ;;  %v15106_v3 = vpack.c.bf16 %v598_v1, %v594_v57  ;;  %v606_v57 = vld [vmem:[#allocation13 + $0x1f0] sm:$0xff]  ;;  %v609_v1 = vld [vmem:[#allocation14 + $0x8] sm:$0xff] }
 0xcf3   :  { %11054 = vmatprep.subr.bf16.mxu0 %v15099_v21  ;;  %11086 = vmatprep.subr.bf16.mxu1 %v15101_v28  ;;  %17140 = vst [vmem:[#allocation51_spill] sm:$0xff] %v15110_v32  ;;  %v613_v21 = vld [vmem:[#allocation14 + $0x28] sm:$0xff]  ;;  %v15119_v28 = vpack.c.bf16 %v606_v57, %v602_v59  ;;  %17145 = vst [vmem:[#allocation56_spill] sm:$0xff] %v15123_v37  ;;  %v17146_v59 = vld [vmem:[#allocation82_spill] sm:$0xff] }
 0xcf4   :  { %17139 = vst [vmem:[#allocation50_spill] sm:$0xff] %v15106_v3  ;;  %v15121_v62 = vpack.c.bf16 %v613_v21, %v609_v1  ;;  %v543_v21 = vld [vmem:[%s16233_s9] sm:$0xf]  ;;  %v17147_v1 = vld [vmem:[#allocation83_spill] sm:$0xff]  ;;  %v17150_v7 = vld [vmem:[#allocation84_spill] sm:$0xff] }
 0xcf5   :  { %17143 = vst [vmem:[#allocation54_spill] sm:$0xff] %v15119_v28  ;;  %v4911_v57 = vrot.slane %v543_v21, %v17146_v59  ;;  %v4915_v2 = vrot.slane %v543_v21, %v17147_v1  ;;  %v4923_v6 = vrot.slane %v543_v21, %v17150_v7 }
 0xcf6   :  { %11056 = vmatpush1.bf16.msra.mxu0 %v15103_v61  ;;  %11088 = vmatpush1.bf16.msra.mxu1 %v15106_v3  ;;  %17144 = vst [vmem:[#allocation55_spill] sm:$0xff] %v15121_v62 }
 0xcf7   :  { %11058 = vmatprep.subr.bf16.mxu0 %v15110_v32  ;;  %11090 = vmatprep.subr.bf16.mxu1 %v15112_v0 }
 0xcfa   :  { %11060 = vmatpush1.bf16.msra.mxu0 %v15115_v53  ;;  %11092 = vmatpush1.bf16.msra.mxu1 %v15119_v28 }
 0xcfb   :  { %11094 = vmatprep.subr.bf16.mxu0 %v15121_v62  ;;  %11126 = vmatprep.subr.bf16.mxu1 %v15123_v37 }
 0xd8f   :  { %v4994_v29 = vpop.f32.mrb[34].mxu0  ;;  %v5065_v63 = vpop.f32.mrb[34].mxu1 }
 0xd90   :  { %v4996_v32 = vpop.f32.mrb[35].mxu0  ;;  %v5067_v0 = vpop.f32.mrb[35].mxu1  ;;  %v15134_v36 = vadd.f32 %v4994_v29, %v4911_v57  ;;  %v17152_v29 = vld [vmem:[#allocation87_spill] sm:$0xff] }
 0xd91   :  { %v15136_v53 = vadd.f32 %v4996_v32, %v4915_v2  ;;  %v15141_v59 = vadd.f32 %v5067_v0, %v4923_v6  ;;  %v4919_v57 = vrot.slane %v543_v21, %v17152_v29  ;;  %v631_v29 = vld [vmem:[#allocation14 + $0xb8] sm:$0xff] }
 0xd92   :  { %17148 = vst [vmem:[#allocation57_spill] sm:$0xff] %v15134_v36 }
 0xd93   :  { %17149 = vst [vmem:[#allocation58_spill] sm:$0xff] %v15136_v53  ;;  %17151 = vst [vmem:[#allocation59_spill] sm:$0xff] %v15141_v59  ;;  %v15145_v2 = vadd.f32 %v5065_v63, %v4919_v57  ;;  %v608_v57 = vld [vmem:[#allocation14] sm:$0xff] }
 0xd95   :  { %17153 = vst [vmem:[#allocation60_spill] sm:$0xff] %v15145_v2 }
 0xdaf   :  { %v5136_v28 = vpop.f32.mrb[36].mxu0  ;;  %v5207_v62 = vpop.f32.mrb[36].mxu1 }
 0xdb0   :  { %v5212_v37 = vadd.f32 %v5136_v28, %v15134_v36  ;;  %v5138_v3 = vpop.f32.mrb[37].mxu0  ;;  %v5209_v61 = vpop.f32.mrb[37].mxu1  ;;  %v5214_v28 = vadd.f32 %v5207_v62, %v15145_v2 }
 0xdb1   :  { %v5213_v9 = vadd.f32 %v5138_v3, %v15136_v53  ;;  %v5215_v32 = vadd.f32 %v5209_v61, %v15141_v59  ;;  %v629_v59 = vld [vmem:[#allocation14 + $0xa8] sm:$0xff]  ;;  %v627_v53 = vld [vmem:[#allocation14 + $0x98] sm:$0xff] }
 0xdb2   :  { %v9193_v26 = vmul.f32 -1.442695, %v5212_v37 }
 0xdb3   :  { %v9194_v4 = vmul.f32 -1.442695, %v5213_v9  ;;  %v9195_v1 = vmul.f32 -1.442695, %v5215_v32  ;;  %v612_v32 = vld [vmem:[#allocation14 + $0x20] sm:$0xff] }
 0xdb4   :  { %12957 = vpow2.f32 %v9193_v26 }
 0xdb5   :  { %12959 = vpow2.f32 %v9194_v4 }
 0xdb6   :  { %12961 = vpow2.f32 %v9195_v1 }
 0xdb7   :  { %12963 = vtanh.f32 %v5214_v28  ;;  %v610_v28 = vld [vmem:[#allocation14 + $0x10] sm:$0xff] }
 0xdbe   :  { %v12958_v36 = vpop.eup %12957 }
 0xdbf   :  { %v12960_v15 = vpop.eup %12959  ;;  %v5225_v7 = vadd.f32 1.0, %v12958_v36 }
 0xdc0   :  { %v5226_v3 = vadd.f32 1.0, %v12960_v15  ;;  %v12962_v26 = vpop.eup %12961 }
 0xdc1   :  { %12965 = vrcp.f32 %v5225_v7  ;;  %v12964_v9 = vpop.eup %12963  ;;  %v5227_v37 = vadd.f32 1.0, %v12962_v26  ;;  %v617_v26 = vld [vmem:[#allocation14 + $0x48] sm:$0xff] }
 0xdc2   :  { %12967 = vrcp.f32 %v5226_v3  ;;  %v614_v3 = vld [vmem:[#allocation14 + $0x30] sm:$0xff] }
 0xdc3   :  { %12969 = vrcp.f32 %v5227_v37  ;;  %v15156_v37 = vpack.c.bf16 %v614_v3, %v610_v28  ;;  %v624_v28 = vld [vmem:[#allocation14 + $0x80] sm:$0xff] }
 0xdc4   :  { %v628_v3 = vld [vmem:[#allocation14 + $0xa0] sm:$0xff] }
 0xdc5   :  { %17156 = vst [vmem:[#allocation63_spill] sm:$0xff] %v15156_v37 }
 0xdcb   :  { %v12966_v4 = vpop.eup %12965 }
 0xdcc   :  { %v12968_v6 = vpop.eup %12967  ;;  %v5236_v0 = vmul.f32 %v12966_v4, %v12964_v9  ;;  %v621_v9 = vld [vmem:[#allocation14 + $0x68] sm:$0xff]  ;;  %v619_v4 = vld [vmem:[#allocation14 + $0x58] sm:$0xff] }
 0xdcd   :  { %v5235_v61 = vmul.f32 0.0, %v12968_v6  ;;  %v12970_v62 = vpop.eup %12969  ;;  %v623_v6 = vld [vmem:[#allocation14 + $0x78] sm:$0xff] }
 0xdcf   :  { %v15148_v63 = vadd.f32 %v5236_v0, %v5235_v61  ;;  %v15154_v0 = vpack.c.bf16 %v612_v32, %v608_v57  ;;  %v616_v61 = vld [vmem:[#allocation14 + $0x40] sm:$0xff] }
 0xdd1   :  { %17154 = vst [vmem:[#allocation61_spill] sm:$0xff] %v15148_v63  ;;  %12971 = vtanh.f32 %v15148_v63  ;;  %17155 = vst [vmem:[#allocation62_spill] sm:$0xff] %v15154_v0  ;;  %v625_v63 = vld [vmem:[#allocation14 + $0x88] sm:$0xff] }
 0xddb   :  { %v12972_v21 = vpop.eup %12971 }
 0xddc   :  { %v15151_v36 = vmul.f32 %v12972_v21, %v12970_v62  ;;  %v620_v62 = vld [vmem:[#allocation14 + $0x60] sm:$0xff]  ;;  %v15158_v21 = vpack.c.bf16 %v621_v9, %v617_v26  ;;  %v15170_v26 = vpack.c.bf16 %v629_v59, %v625_v63  ;;  %v15172_v9 = vpack.c.bf16 %v631_v29, %v627_v53 }
 0xddd   :  { %v15164_v57 = vpack.c.bf16 %v620_v62, %v616_v61  ;;  %v15178_v61 = vpack.c.bf16 %v628_v3, %v624_v28  ;;  %v632_v53 = vld [vmem:[#allocation14 + $0xc0] sm:$0xff] }
 0xdde   :  { %v9196_v15 = vmul.f32 -1.442695, %v15151_v36  ;;  %17157 = vst [vmem:[#allocation64_spill] sm:$0xff] %v15158_v21  ;;  %17161 = vst [vmem:[#allocation68_spill] sm:$0xff] %v15170_v26  ;;  %v636_v29 = vld [vmem:[#allocation14 + $0xe0] sm:$0xff] }
 0xddf   :  { %17159 = vst [vmem:[#allocation66_spill] sm:$0xff] %v15164_v57  ;;  %17162 = vst [vmem:[#allocation69_spill] sm:$0xff] %v15172_v9  ;;  %v15190_v28 = vpack.c.bf16 %v636_v29, %v632_v53 }
 0xde0   :  { %12973 = vpow2.f32 %v9196_v15  ;;  %v15160_v15 = vpack.c.bf16 %v623_v6, %v619_v4  ;;  %v626_v4 = vld [vmem:[#allocation14 + $0x90] sm:$0xff]  ;;  %v633_v6 = vld [vmem:[#allocation14 + $0xc8] sm:$0xff]  ;;  %17163 = vst [vmem:[#allocation70_spill] sm:$0xff] %v15178_v61 }
 0xde1   :  { %17167 = vst [vmem:[#allocation74_spill] sm:$0xff] %v15190_v28 }
 0xde2   :  { %17158 = vst [vmem:[#allocation65_spill] sm:$0xff] %v15160_v15 }
 0xdea   :  { %v12974_v7 = vpop.eup %12973 }
 0xdeb   :  { %v5243_v1 = vadd.f32 1.0, %v12974_v7  ;;  %v618_v7 = vld [vmem:[#allocation14 + $0x50] sm:$0xff] }
 0xded   :  { %12975 = vrcp.f32 %v5243_v1  ;;  %v622_v1 = vld [vmem:[#allocation14 + $0x70] sm:$0xff] }
 0xdee   :  { %v15166_v32 = vpack.c.bf16 %v622_v1, %v618_v7  ;;  %v634_v7 = vld [vmem:[#allocation14 + $0xd0] sm:$0xff] }
 0xdef   :  { %v638_v1 = vld [vmem:[#allocation14 + $0xf0] sm:$0xff] }
 0xdf0   :  { %17160 = vst [vmem:[#allocation67_spill] sm:$0xff] %v15166_v32  ;;  %v15192_v3 = vpack.c.bf16 %v638_v1, %v634_v7  ;;  %v648_v7 = vld [vmem:[#allocation14 + $0x140] sm:$0xff] }
 0xdf1   :  { %v652_v1 = vld [vmem:[#allocation14 + $0x160] sm:$0xff] }
 0xdf2   :  { %17168 = vst [vmem:[#allocation75_spill] sm:$0xff] %v15192_v3 }
 0xdf7   :  { %v12976_v2 = vpop.eup %12975 }
 0xdf8   :  { %5332 = vmatmul.mubr.f32.vlgmr.msra.gmra.mrb[38].mxu0 %v12976_v2  ;;  %5403 = vmatmul.mubr.f32.vlgmr.msra.gmra.mrb[38].mxu1 %v12976_v2  ;;  %v630_v2 = vld [vmem:[#allocation14 + $0xb0] sm:$0xff] }
 0xdf9   :  { %11096 = vmatpush1.bf16.msra.mxu0 %v15154_v0  ;;  %11128 = vmatpush1.bf16.msra.mxu1 %v15156_v37  ;;  %v637_v0 = vld [vmem:[#allocation14 + $0xe8] sm:$0xff]  ;;  %v639_v37 = vld [vmem:[#allocation14 + $0xf8] sm:$0xff]  ;;  %v15180_v59 = vpack.c.bf16 %v630_v2, %v626_v4  ;;  %v640_v4 = vld [vmem:[#allocation14 + $0x100] sm:$0xff] }
 0xdfa   :  { %11098 = vmatprep.subr.bf16.mxu0 %v15158_v21  ;;  %11130 = vmatprep.subr.bf16.mxu1 %v15160_v15  ;;  %v15184_v63 = vpack.c.bf16 %v637_v0, %v633_v6  ;;  %v15186_v62 = vpack.c.bf16 %v639_v37, %v635_v49  ;;  %v641_v15 = vld [vmem:[#allocation14 + $0x108] sm:$0xff]  ;;  %v643_v21 = vld [vmem:[#allocation14 + $0x118] sm:$0xff]  ;;  %v644_v2 = vld [vmem:[#allocation14 + $0x120] sm:$0xff] }
 0xdfb   :  { %5473 = vmatprep.mubr.f32.mxu0 %v16672_v39  ;;  %5544 = vmatprep.mubr.f32.mxu1 %v16672_v39  ;;  %17164 = vst [vmem:[#allocation71_spill] sm:$0xff] %v15180_v59  ;;  %v642_v37 = vld [vmem:[#allocation14 + $0x110] sm:$0xff]  ;;  %v15202_v53 = vpack.c.bf16 %v644_v2, %v640_v4  ;;  %v15214_v4 = vpack.c.bf16 %v652_v1, %v648_v7 }
 0xdfc   :  { %17165 = vst [vmem:[#allocation72_spill] sm:$0xff] %v15184_v63  ;;  %17166 = vst [vmem:[#allocation73_spill] sm:$0xff] %v15186_v62  ;;  %v646_v6 = vld [vmem:[#allocation14 + $0x130] sm:$0xff] }
 0xdfd   :  { %11100 = vmatpush1.bf16.msra.mxu0 %v15164_v57  ;;  %11132 = vmatpush1.bf16.msra.mxu1 %v15166_v32  ;;  %v645_v57 = vld [vmem:[#allocation14 + $0x128] sm:$0xff]  ;;  %v647_v32 = vld [vmem:[#allocation14 + $0x138] sm:$0xff]  ;;  %17171 = vst [vmem:[#allocation78_spill] sm:$0xff] %v15202_v53  ;;  %v15204_v29 = vpack.c.bf16 %v646_v6, %v642_v37  ;;  %v656_v37 = vld [vmem:[#allocation14 + $0x180] sm:$0xff] }
 0xdfe   :  { %11102 = vmatprep.subr.bf16.mxu0 %v15170_v26  ;;  %11134 = vmatprep.subr.bf16.mxu1 %v15172_v9  ;;  %v15196_v49 = vpack.c.bf16 %v645_v57, %v641_v15  ;;  %v15198_v0 = vpack.c.bf16 %v647_v32, %v643_v21  ;;  %v649_v9 = vld [vmem:[#allocation14 + $0x148] sm:$0xff]  ;;  %v651_v26 = vld [vmem:[#allocation14 + $0x158] sm:$0xff]  ;;  %v650_v57 = vld [vmem:[#allocation14 + $0x150] sm:$0xff] }
 0xdff   :  { %17172 = vst [vmem:[#allocation79_spill] sm:$0xff] %v15204_v29  ;;  %v654_v32 = vld [vmem:[#allocation14 + $0x170] sm:$0xff]  ;;  %v660_v6 = vld [vmem:[#allocation14 + $0x1a0] sm:$0xff] }
 0xe00   :  { %17169 = vst [vmem:[#allocation76_spill] sm:$0xff] %v15196_v49  ;;  %17170 = vst [vmem:[#allocation77_spill] sm:$0xff] %v15198_v0  ;;  %v15216_v2 = vpack.c.bf16 %v654_v32, %v650_v57  ;;  %v15226_v7 = vpack.c.bf16 %v660_v6, %v656_v37  ;;  %v664_v57 = vld [vmem:[#allocation14 + $0x1c0] sm:$0xff]  ;;  %v670_v32 = vld [vmem:[#allocation14 + $0x1f0] sm:$0xff] }
 0xe01   :  { %11104 = vmatpush1.bf16.msra.mxu0 %v15178_v61  ;;  %11136 = vmatpush1.bf16.msra.mxu1 %v15180_v59  ;;  %v653_v61 = vld [vmem:[#allocation14 + $0x168] sm:$0xff]  ;;  %v655_v59 = vld [vmem:[#allocation14 + $0x178] sm:$0xff] }
 0xe02   :  { %11106 = vmatprep.subr.bf16.mxu0 %v15184_v63  ;;  %11138 = vmatprep.subr.bf16.mxu1 %v15186_v62  ;;  %v15208_v21 = vpack.c.bf16 %v653_v61, %v649_v9  ;;  %v15210_v15 = vpack.c.bf16 %v655_v59, %v651_v26  ;;  %v657_v62 = vld [vmem:[#allocation14 + $0x188] sm:$0xff]  ;;  %v659_v63 = vld [vmem:[#allocation14 + $0x198] sm:$0xff]  ;;  %v658_v61 = vld [vmem:[#allocation14 + $0x190] sm:$0xff] }
 0xe03   :  { %v662_v59 = vld [vmem:[#allocation14 + $0x1b0] sm:$0xff] }
 0xe04   :  { %17173 = vst [vmem:[#allocation80_spill] sm:$0xff] %v15208_v21  ;;  %v15228_v1 = vpack.c.bf16 %v662_v59, %v658_v61  ;;  %v17179_v61 = vld [vmem:[#allocation36_spill] sm:$0xff]  ;;  %v17180_v59 = vld [vmem:[#allocation37_spill] sm:$0xff] }
 0xe05   :  { %11108 = vmatpush1.bf16.msra.mxu0 %v15190_v28  ;;  %11140 = vmatpush1.bf16.msra.mxu1 %v15192_v3  ;;  %v661_v28 = vld [vmem:[#allocation14 + $0x1a8] sm:$0xff]  ;;  %v663_v3 = vld [vmem:[#allocation14 + $0x1b8] sm:$0xff] }
 0xe06   :  { %11110 = vmatprep.subr.bf16.mxu0 %v15196_v49  ;;  %11142 = vmatprep.subr.bf16.mxu1 %v15198_v0  ;;  %v15220_v26 = vpack.c.bf16 %v661_v28, %v657_v62  ;;  %v15222_v9 = vpack.c.bf16 %v663_v3, %v659_v63  ;;  %v665_v0 = vld [vmem:[#allocation14 + $0x1c8] sm:$0xff]  ;;  %v667_v49 = vld [vmem:[#allocation14 + $0x1d8] sm:$0xff]  ;;  %v668_v28 = vld [vmem:[#allocation14 + $0x1e0] sm:$0xff] }
 0xe07   :  { %v666_v3 = vld [vmem:[#allocation14 + $0x1d0] sm:$0xff]  ;;  %v15238_v37 = vpack.c.bf16 %v668_v28, %v664_v57  ;;  %v17181_v57 = vld [vmem:[#allocation38_spill] sm:$0xff]  ;;  %v17182_v28 = vld [vmem:[#allocation39_spill] sm:$0xff] }
 0xe08   :  { %v15240_v6 = vpack.c.bf16 %v670_v32, %v666_v3  ;;  %v17183_v3 = vld [vmem:[#allocation40_spill] sm:$0xff]  ;;  %v17184_v32 = vld [vmem:[#allocation41_spill] sm:$0xff] }
 0xe09   :  { %11112 = vmatpush1.bf16.msra.mxu0 %v15202_v53  ;;  %11144 = vmatpush1.bf16.msra.mxu1 %v15204_v29  ;;  %v669_v53 = vld [vmem:[#allocation14 + $0x1e8] sm:$0xff]  ;;  %v671_v29 = vld [vmem:[#allocation14 + $0x1f8] sm:$0xff] }
 0xe0a   :  { %11114 = vmatprep.subr.bf16.mxu0 %v15208_v21  ;;  %11146 = vmatprep.subr.bf16.mxu1 %v15210_v15  ;;  %v15232_v63 = vpack.c.bf16 %v669_v53, %v665_v0  ;;  %v15234_v62 = vpack.c.bf16 %v671_v29, %v667_v49  ;;  %v17174_v49 = vld [vmem:[#allocation31_spill] sm:$0xff]  ;;  %v17175_v0 = vld [vmem:[#allocation32_spill] sm:$0xff]  ;;  %v17177_v53 = vld [vmem:[#allocation34_spill] sm:$0xff] }
 0xe0b   :  { %v17178_v29 = vld [vmem:[#allocation35_spill] sm:$0xff] }
 0xe0d   :  { %11116 = vmatpush1.bf16.msra.mxu0 %v15214_v4  ;;  %11148 = vmatpush1.bf16.msra.mxu1 %v15216_v2 }
 0xe0e   :  { %11118 = vmatprep.subr.bf16.mxu0 %v15220_v26  ;;  %11150 = vmatprep.subr.bf16.mxu1 %v15222_v9 }
 0xe11   :  { %11120 = vmatpush1.bf16.msra.mxu0 %v15226_v7  ;;  %11152 = vmatpush1.bf16.msra.mxu1 %v15228_v1 }
 0xe12   :  { %11122 = vmatprep.subr.bf16.mxu0 %v15232_v63  ;;  %11154 = vmatprep.subr.bf16.mxu1 %v15234_v62 }
 0xe15   :  { %11124 = vmatpush1.bf16.msra.mxu0 %v15238_v37  ;;  %11156 = vmatpush1.bf16.msra.mxu1 %v15240_v6 }
 0xe16   :  { %11158 = vmatprep.subr.bf16.mxu0 %v14920_v13  ;;  %11190 = vmatprep.subr.bf16.mxu1 %v14922_v40 }
 0xe18   :  { %5474 = vmatmul.mubr.f32.vlgmr.msra.gmra.mrb[38].mxu0 %v16672_v39  ;;  %5545 = vmatmul.mubr.f32.vlgmr.msra.gmra.mrb[38].mxu1 %v16672_v39 }
 0xe19   :  { %11160 = vmatpush1.bf16.msra.mxu0 %v14931_v56  ;;  %11192 = vmatpush1.bf16.msra.mxu1 %v14933_v54 }
 0xe1a   :  { %11162 = vmatprep.subr.bf16.mxu0 %v14935_v33  ;;  %11194 = vmatprep.subr.bf16.mxu1 %v14937_v35 }
 0xe1b   :  { %5643 = vmatprep.mubr.f32.mxu0 %v16672_v39  ;;  %5714 = vmatprep.mubr.f32.mxu1 %v16672_v39 }
 0xe1d   :  { %11164 = vmatpush1.bf16.msra.mxu0 %v14941_v41  ;;  %11196 = vmatpush1.bf16.msra.mxu1 %v14943_v11 }
 0xe1e   :  { %11166 = vmatprep.subr.bf16.mxu0 %v14947_v38  ;;  %11198 = vmatprep.subr.bf16.mxu1 %v14949_v42 }
 0xe21   :  { %11168 = vmatpush1.bf16.msra.mxu0 %v14955_v10  ;;  %11200 = vmatpush1.bf16.msra.mxu1 %v14957_v12 }
 0xe22   :  { %11170 = vmatprep.subr.bf16.mxu0 %v14961_v5  ;;  %11202 = vmatprep.subr.bf16.mxu1 %v14963_v60 }
 0xe25   :  { %11172 = vmatpush1.bf16.msra.mxu0 %v14967_v31  ;;  %11204 = vmatpush1.bf16.msra.mxu1 %v14969_v25 }
 0xe26   :  { %11174 = vmatprep.subr.bf16.mxu0 %v14973_v45  ;;  %11206 = vmatprep.subr.bf16.mxu1 %v14975_v48 }
 0xe29   :  { %11176 = vmatpush1.bf16.msra.mxu0 %v14979_v17  ;;  %11208 = vmatpush1.bf16.msra.mxu1 %v14981_v23 }
 0xe2a   :  { %11178 = vmatprep.subr.bf16.mxu0 %v14985_v14  ;;  %11210 = vmatprep.subr.bf16.mxu1 %v14987_v20 }
 0xe2d   :  { %11180 = vmatpush1.bf16.msra.mxu0 %v14991_v51  ;;  %11212 = vmatpush1.bf16.msra.mxu1 %v14993_v18 }
 0xe2e   :  { %11182 = vmatprep.subr.bf16.mxu0 %v14997_v8  ;;  %11214 = vmatprep.subr.bf16.mxu1 %v14999_v58 }
 0xe31   :  { %11184 = vmatpush1.bf16.msra.mxu0 %v15003_v44  ;;  %11216 = vmatpush1.bf16.msra.mxu1 %v15005_v22 }
 0xe32   :  { %11186 = vmatprep.subr.bf16.mxu0 %v15009_v50  ;;  %11218 = vmatprep.subr.bf16.mxu1 %v15011_v55  ;;  %v17209_v55 = vld [vmem:[#allocation60_spill] sm:$0xff] }
 0xe35   :  { %11188 = vmatpush1.bf16.msra.mxu0 %v15015_v34  ;;  %11220 = vmatpush1.bf16.msra.mxu1 %v15017_v16 }
 0xe36   :  { %11222 = vmatprep.subr.bf16.mxu0 %v15027_v19  ;;  %11254 = vmatprep.subr.bf16.mxu1 %v15029_v46 }
 0xe38   :  { %5644 = vmatmul.mubr.f32.vlgmr.msra.gmra.mrb[40].mxu0 %v15151_v36  ;;  %5715 = vmatmul.mubr.f32.vlgmr.msra.gmra.mrb[40].mxu1 %v15151_v36  ;;  %v17176_v36 = vld [vmem:[#allocation33_spill] sm:$0xff] }
 0xe39   :  { %11224 = vmatpush1.bf16.msra.mxu0 %v15031_v47  ;;  %11256 = vmatpush1.bf16.msra.mxu1 %v15034_v43 }
 0xe3a   :  { %11226 = vmatprep.subr.bf16.mxu0 %v15039_v27  ;;  %11258 = vmatprep.subr.bf16.mxu1 %v15041_v24  ;;  %v17204_v24 = vld [vmem:[#allocation87_spill] sm:$0xff] }
 0xe3b   :  { %5819 = vmatprep.mubr.f32.mxu0 %v16672_v39  ;;  %5890 = vmatprep.mubr.f32.mxu1 %v16672_v39 }
 0xe3d   :  { %11228 = vmatpush1.bf16.msra.mxu0 %v15043_v52  ;;  %11260 = vmatpush1.bf16.msra.mxu1 %v15046_v30 }
 0xe3e   :  { %11230 = vmatprep.subr.bf16.mxu0 %v17174_v49  ;;  %11262 = vmatprep.subr.bf16.mxu1 %v17175_v0  ;;  %v17185_v49 = vld [vmem:[#allocation42_spill] sm:$0xff]  ;;  %v17186_v0 = vld [vmem:[#allocation43_spill] sm:$0xff] }
 0xe41   :  { %11232 = vmatpush1.bf16.msra.mxu0 %v17176_v36  ;;  %11264 = vmatpush1.bf16.msra.mxu1 %v17177_v53  ;;  %v17187_v36 = vld [vmem:[#allocation44_spill] sm:$0xff]  ;;  %v17188_v53 = vld [vmem:[#allocation45_spill] sm:$0xff] }
 0xe42   :  { %11234 = vmatprep.subr.bf16.mxu0 %v17178_v29  ;;  %11266 = vmatprep.subr.bf16.mxu1 %v17179_v61  ;;  %v17189_v29 = vld [vmem:[#allocation46_spill] sm:$0xff]  ;;  %v17190_v61 = vld [vmem:[#allocation47_spill] sm:$0xff] }
 0xe45   :  { %11236 = vmatpush1.bf16.msra.mxu0 %v17180_v59  ;;  %11268 = vmatpush1.bf16.msra.mxu1 %v17181_v57  ;;  %v17191_v59 = vld [vmem:[#allocation48_spill] sm:$0xff]  ;;  %v17192_v57 = vld [vmem:[#allocation49_spill] sm:$0xff] }
 0xe46   :  { %11238 = vmatprep.subr.bf16.mxu0 %v17182_v28  ;;  %11270 = vmatprep.subr.bf16.mxu1 %v17183_v3  ;;  %v17193_v28 = vld [vmem:[#allocation50_spill] sm:$0xff]  ;;  %v17194_v3 = vld [vmem:[#allocation51_spill] sm:$0xff] }
 0xe49   :  { %11240 = vmatpush1.bf16.msra.mxu0 %v17184_v32  ;;  %11272 = vmatpush1.bf16.msra.mxu1 %v17185_v49  ;;  %v17195_v32 = vld [vmem:[#allocation52_spill] sm:$0xff]  ;;  %v17196_v49 = vld [vmem:[#allocation53_spill] sm:$0xff] }
 0xe4a   :  { %11242 = vmatprep.subr.bf16.mxu0 %v17186_v0  ;;  %11274 = vmatprep.subr.bf16.mxu1 %v17187_v36  ;;  %v17197_v0 = vld [vmem:[#allocation54_spill] sm:$0xff]  ;;  %v17198_v36 = vld [vmem:[#allocation55_spill] sm:$0xff] }
 0xe4d   :  { %11244 = vmatpush1.bf16.msra.mxu0 %v17188_v53  ;;  %11276 = vmatpush1.bf16.msra.mxu1 %v17189_v29  ;;  %v17199_v53 = vld [vmem:[#allocation56_spill] sm:$0xff] }
 0xe4e   :  { %11246 = vmatprep.subr.bf16.mxu0 %v17190_v61  ;;  %11278 = vmatprep.subr.bf16.mxu1 %v17191_v59  ;;  %v15323_v59 = vld [vmem:[%s16236_s12] sm:$0xf] }
 0xe51   :  { %11248 = vmatpush1.bf16.msra.mxu0 %v17192_v57  ;;  %11280 = vmatpush1.bf16.msra.mxu1 %v17193_v28  ;;  %v17200_v57 = vld [vmem:[#allocation82_spill] sm:$0xff] }
 0xe52   :  { %11250 = vmatprep.subr.bf16.mxu0 %v17194_v3  ;;  %11282 = vmatprep.subr.bf16.mxu1 %v17195_v32  ;;  %v15327_v28 = vrot.slane %v15323_v59, %v17200_v57  ;;  %v17202_v3 = vld [vmem:[#allocation83_spill] sm:$0xff]  ;;  %v15337_v57 = vrot.slane %v15323_v59, %v17204_v24  ;;  %v17206_v24 = vld [vmem:[#allocation57_spill] sm:$0xff] }
 0xe53   :  { %v15331_v32 = vrot.slane %v15323_v59, %v17202_v3 }
 0xe54   :  { %17201 = vst [vmem:[#allocation81_spill] sm:$0xff] %v15327_v28  ;;  %17205 = vst [vmem:[#allocation112_spill] sm:$0xff] %v15337_v57 }
 0xe55   :  { %11252 = vmatpush1.bf16.msra.mxu0 %v17196_v49  ;;  %11284 = vmatpush1.bf16.msra.mxu1 %v17197_v0  ;;  %17203 = vst [vmem:[#allocation110_spill] sm:$0xff] %v15331_v32 }
 0xe56   :  { %11286 = vmatprep.subr.bf16.mxu0 %v17198_v36  ;;  %11318 = vmatprep.subr.bf16.mxu1 %v17199_v53 }
 0xeeb   :  { %v5475_v49 = vpop.f32.mrb[38].mxu0  ;;  %v5546_v61 = vpop.f32.mrb[38].mxu1 }
 0xeec   :  { %v12557_v0 = vadd.f32 %v5475_v49, %v15327_v28  ;;  %v5477_v36 = vpop.f32.mrb[39].mxu0  ;;  %v5548_v29 = vpop.f32.mrb[39].mxu1  ;;  %v12559_v27 = vadd.f32 %v5546_v61, %v15337_v57  ;;  %v17207_v57 = vld [vmem:[#allocation58_spill] sm:$0xff] }
 0xeed   :  { %v12558_v53 = vadd.f32 %v5477_v36, %v15331_v32 }
 0xeee   :  { %v9197_v30 = vmul.f32 -1.442695, %v12557_v0 }
 0xeef   :  { %v9198_v52 = vmul.f32 -1.442695, %v12558_v53 }
 0xef0   :  { %12977 = vpow2.f32 %v9197_v30 }
 0xef1   :  { %12979 = vpow2.f32 %v9198_v52 }
 0xef2   :  { %12981 = vtanh.f32 %v12559_v27 }
 0xefa   :  { %v12978_v3 = vpop.eup %12977 }
 0xefb   :  { %v12980_v43 = vpop.eup %12979  ;;  %v5564_v47 = vadd.f32 1.0, %v12978_v3 }
 0xefc   :  { %v5565_v46 = vadd.f32 1.0, %v12980_v43  ;;  %v12982_v49 = vpop.eup %12981 }
 0xefd   :  { %12983 = vrcp.f32 %v5564_v47 }
 0xefe   :  { %12985 = vrcp.f32 %v5565_v46  ;;  %v17208_v46 = vld [vmem:[#allocation59_spill] sm:$0xff] }
 0xf07   :  { %v12984_v28 = vpop.eup %12983 }
 0xf08   :  { %v12986_v36 = vpop.eup %12985  ;;  %v5575_v0 = vmul.f32 %v12984_v28, %v12982_v49 }
 0xf09   :  { %v5574_v53 = vmul.f32 0.0, %v12986_v36 }
 0xf0b   :  { %v15340_v30 = vadd.f32 %v5575_v0, %v5574_v53  ;;  %v5645_v52 = vpop.f32.mrb[40].mxu0  ;;  %v5716_v32 = vpop.f32.mrb[40].mxu1 }
 0xf0c   :  { %v5721_v19 = vadd.f32 %v5645_v52, %v17206_v24  ;;  %v5647_v16 = vpop.f32.mrb[41].mxu0  ;;  %v5718_v61 = vpop.f32.mrb[41].mxu1  ;;  %v5723_v28 = vadd.f32 %v5716_v32, %v17209_v55 }
 0xf0d   :  { %v5722_v34 = vadd.f32 %v5647_v16, %v17207_v57  ;;  %v5724_v47 = vadd.f32 %v5718_v61, %v17208_v46 }
 0xf0e   :  { %v9200_v3 = vmul.f32 -1.442695, %v5721_v19 }
 0xf0f   :  { %v9201_v27 = vmul.f32 -1.442695, %v5722_v34  ;;  %v9202_v43 = vmul.f32 -1.442695, %v5724_v47 }
 0xf10   :  { %12987 = vpow2.f32 %v9200_v3 }
 0xf11   :  { %12989 = vpow2.f32 %v9201_v27  ;;  %v17210_v27 = vld [vmem:[#allocation61_spill] sm:$0xff] }
 0xf12   :  { %12991 = vpow2.f32 %v9202_v43 }
 0xf13   :  { %12993 = vtanh.f32 %v5723_v28 }
 0xf1a   :  { %v12988_v49 = vpop.eup %12987 }
 0xf1b   :  { %v12990_v36 = vpop.eup %12989  ;;  %v5734_v0 = vadd.f32 1.0, %v12988_v49 }
 0xf1c   :  { %v5735_v53 = vadd.f32 1.0, %v12990_v36  ;;  %v12992_v52 = vpop.eup %12991 }
 0xf1d   :  { %12995 = vrcp.f32 %v5734_v0  ;;  %v12994_v24 = vpop.eup %12993  ;;  %v5736_v3 = vadd.f32 1.0, %v12992_v52  ;;  %v17211_v0 = vld [vmem:[#allocation84_spill] sm:$0xff] }
 0xf1e   :  { %12997 = vrcp.f32 %v5735_v53 }
 0xf1f   :  { %12999 = vrcp.f32 %v5736_v3  ;;  %v17215_v3 = vld [vmem:[#allocation65_spill] sm:$0xff] }
 0xf27   :  { %v12996_v16 = vpop.eup %12995 }
 0xf28   :  { %v12998_v19 = vpop.eup %12997  ;;  %v5745_v34 = vmul.f32 %v12996_v16, %v12994_v24  ;;  %v15355_v24 = vrot.slane %v15323_v59, %v17211_v0  ;;  %v17212_v16 = vld [vmem:[#allocation62_spill] sm:$0xff] }
 0xf29   :  { %v5744_v57 = vmul.f32 %v12998_v19, %v17210_v27  ;;  %v13000_v32 = vpop.eup %12999  ;;  %v17213_v19 = vld [vmem:[#allocation63_spill] sm:$0xff]  ;;  %v17216_v59 = vld [vmem:[#allocation66_spill] sm:$0xff]  ;;  %v17218_v27 = vld [vmem:[#allocation68_spill] sm:$0xff] }
 0xf2b   :  { %v15347_v61 = vadd.f32 %v5745_v34, %v5744_v57  ;;  %v12560_v57 = vadd.f32 %v5548_v29, %v15355_v24  ;;  %v17214_v34 = vld [vmem:[#allocation64_spill] sm:$0xff]  ;;  %v17217_v29 = vld [vmem:[#allocation67_spill] sm:$0xff] }
 0xf2d   :  { %13001 = vtanh.f32 %v15347_v61  ;;  %v9199_v53 = vmul.f32 -1.442695, %v12560_v57  ;;  %v17224_v57 = vld [vmem:[#allocation74_spill] sm:$0xff] }
 0xf37   :  { %v13002_v47 = vpop.eup %13001 }
 0xf38   :  { %v15350_v43 = vmul.f32 %v13002_v47, %v13000_v32  ;;  %v17219_v32 = vld [vmem:[#allocation69_spill] sm:$0xff]  ;;  %v17220_v47 = vld [vmem:[#allocation70_spill] sm:$0xff] }
 0xf3a   :  { %v9203_v28 = vmul.f32 -1.442695, %v15350_v43 }
 0xf3c   :  { %13003 = vpow2.f32 %v9203_v28  ;;  %v17221_v28 = vld [vmem:[#allocation71_spill] sm:$0xff] }
 0xf46   :  { %v13004_v49 = vpop.eup %13003 }
 0xf47   :  { %v5752_v36 = vadd.f32 1.0, %v13004_v49  ;;  %v17222_v49 = vld [vmem:[#allocation72_spill] sm:$0xff] }
 0xf49   :  { %13005 = vrcp.f32 %v5752_v36  ;;  %v17223_v36 = vld [vmem:[#allocation73_spill] sm:$0xff] }
 0xf4a   :  { %13007 = vpow2.f32 %v9199_v53  ;;  %v17225_v53 = vld [vmem:[#allocation75_spill] sm:$0xff] }
 0xf4b   :  { %13009 = vtanh.f32 %v15340_v30 }
 0xf53   :  { %v13006_v52 = vpop.eup %13005 }
 0xf54   :  { %5820 = vmatmul.mubr.f32.vlgmr.msra.gmra.mrb[42].mxu0 %v13006_v52  ;;  %5891 = vmatmul.mubr.f32.vlgmr.msra.gmra.mrb[42].mxu1 %v13006_v52  ;;  %v13008_v0 = vpop.eup %13007  ;;  %v17226_v52 = vld [vmem:[#allocation76_spill] sm:$0xff] }
 0xf55   :  { %11288 = vmatpush1.bf16.msra.mxu0 %v17212_v16  ;;  %11320 = vmatpush1.bf16.msra.mxu1 %v17213_v19 }
 0xf56   :  { %11290 = vmatprep.subr.bf16.mxu0 %v17214_v34  ;;  %11322 = vmatprep.subr.bf16.mxu1 %v17215_v3 }
 0xf57   :  { %5961 = vmatprep.mubr.f32.mxu0 %v16672_v39  ;;  %6032 = vmatprep.mubr.f32.mxu1 %v16672_v39 }
 0xf59   :  { %11292 = vmatpush1.bf16.msra.mxu0 %v17216_v59  ;;  %11324 = vmatpush1.bf16.msra.mxu1 %v17217_v29  ;;  %v17227_v29 = vld [vmem:[#allocation77_spill] sm:$0xff] }
 0xf5a   :  { %11294 = vmatprep.subr.bf16.mxu0 %v17218_v27  ;;  %11326 = vmatprep.subr.bf16.mxu1 %v17219_v32  ;;  %v5566_v27 = vadd.f32 1.0, %v13008_v0  ;;  %v17228_v32 = vld [vmem:[#allocation78_spill] sm:$0xff]  ;;  %v13010_v0 = vpop.eup %13009 }
 0xf5c   :  { %13011 = vrcp.f32 %v5566_v27 }
 0xf5d   :  { %11296 = vmatpush1.bf16.msra.mxu0 %v17220_v47  ;;  %11328 = vmatpush1.bf16.msra.mxu1 %v17221_v28  ;;  %v17229_v47 = vld [vmem:[#allocation79_spill] sm:$0xff] }
 0xf5e   :  { %11298 = vmatprep.subr.bf16.mxu0 %v17222_v49  ;;  %11330 = vmatprep.subr.bf16.mxu1 %v17223_v36 }
 0xf61   :  { %11300 = vmatpush1.bf16.msra.mxu0 %v17224_v57  ;;  %11332 = vmatpush1.bf16.msra.mxu1 %v17225_v53 }
 0xf62   :  { %11302 = vmatprep.subr.bf16.mxu0 %v17226_v52  ;;  %11334 = vmatprep.subr.bf16.mxu1 %v17227_v29 }
 0xf65   :  { %11304 = vmatpush1.bf16.msra.mxu0 %v17228_v32  ;;  %11336 = vmatpush1.bf16.msra.mxu1 %v17229_v47 }
 0xf66   :  { %11306 = vmatprep.subr.bf16.mxu0 %v15208_v21  ;;  %11338 = vmatprep.subr.bf16.mxu1 %v15210_v15  ;;  %v13012_v21 = vpop.eup %13011 }
 0xf67   :  { %v15391_v27 = vmul.f32 %v13012_v21, %v13010_v0  ;;  %v17231_v21 = vld [vmem:[#allocation98_spill] sm:$0xff]  ;;  %v17232_v0 = vld [vmem:[#allocation99_spill] sm:$0xff] }
 0xf69   :  { %11308 = vmatpush1.bf16.msra.mxu0 %v15214_v4  ;;  %11340 = vmatpush1.bf16.msra.mxu1 %v15216_v2  ;;  %17230 = vst [vmem:[#allocation82_spill] sm:$0xff] %v15391_v27 }
 0xf6a   :  { %11310 = vmatprep.subr.bf16.mxu0 %v15220_v26  ;;  %11342 = vmatprep.subr.bf16.mxu1 %v15222_v9 }
 0xf6d   :  { %11312 = vmatpush1.bf16.msra.mxu0 %v15226_v7  ;;  %11344 = vmatpush1.bf16.msra.mxu1 %v15228_v1 }
 0xf6e   :  { %11314 = vmatprep.subr.bf16.mxu0 %v15232_v63  ;;  %11346 = vmatprep.subr.bf16.mxu1 %v15234_v62 }
 0xf71   :  { %11316 = vmatpush1.bf16.msra.mxu0 %v15238_v37  ;;  %11348 = vmatpush1.bf16.msra.mxu1 %v15240_v6 }
 0xf72   :  { %11350 = vmatprep.subr.bf16.mxu0 %v14920_v13  ;;  %11382 = vmatprep.subr.bf16.mxu1 %v14922_v40 }
 0xf74   :  { %5962 = vmatmul.mubr.f32.vlgmr.msra.gmra.mrb[42].mxu0 %v15391_v27  ;;  %6033 = vmatmul.mubr.f32.vlgmr.msra.gmra.mrb[42].mxu1 %v15391_v27  ;;  %v17233_v27 = vld [vmem:[#allocation109_spill] sm:$0xff] }
 0xf75   :  { %11352 = vmatpush1.bf16.msra.mxu0 %v14931_v56  ;;  %11384 = vmatpush1.bf16.msra.mxu1 %v14933_v54 }
 0xf76   :  { %11354 = vmatprep.subr.bf16.mxu0 %v14935_v33  ;;  %11386 = vmatprep.subr.bf16.mxu1 %v14937_v35 }
 0xf77   :  { %6131 = vmatprep.mubr.f32.mxu0 %v16672_v39  ;;  %6202 = vmatprep.mubr.f32.mxu1 %v16672_v39 }
 0xf79   :  { %11356 = vmatpush1.bf16.msra.mxu0 %v14941_v41  ;;  %11388 = vmatpush1.bf16.msra.mxu1 %v14943_v11 }
 0xf7a   :  { %11358 = vmatprep.subr.bf16.mxu0 %v14947_v38  ;;  %11390 = vmatprep.subr.bf16.mxu1 %v14949_v42 }
 0xf7d   :  { %11360 = vmatpush1.bf16.msra.mxu0 %v14955_v10  ;;  %11392 = vmatpush1.bf16.msra.mxu1 %v14957_v12 }
 0xf7e   :  { %11362 = vmatprep.subr.bf16.mxu0 %v14961_v5  ;;  %11394 = vmatprep.subr.bf16.mxu1 %v14963_v60 }
 0xf81   :  { %11364 = vmatpush1.bf16.msra.mxu0 %v14967_v31  ;;  %11396 = vmatpush1.bf16.msra.mxu1 %v14969_v25 }
 0xf82   :  { %11366 = vmatprep.subr.bf16.mxu0 %v14973_v45  ;;  %11398 = vmatprep.subr.bf16.mxu1 %v14975_v48 }
 0xf85   :  { %11368 = vmatpush1.bf16.msra.mxu0 %v14979_v17  ;;  %11400 = vmatpush1.bf16.msra.mxu1 %v14981_v23  ;;  %v17269_v23 = vld [vmem:[#allocation110_spill] sm:$0xff] }
 0xf86   :  { %11370 = vmatprep.subr.bf16.mxu0 %v14985_v14  ;;  %11402 = vmatprep.subr.bf16.mxu1 %v14987_v20  ;;  %v17234_v20 = vld [vmem:[#allocation23_spill] sm:$0xff] }
 0xf89   :  { %11372 = vmatpush1.bf16.msra.mxu0 %v14991_v51  ;;  %11404 = vmatpush1.bf16.msra.mxu1 %v14993_v18  ;;  %v17235_v51 = vld [vmem:[#allocation24_spill] sm:$0xff]  ;;  %v17268_v18 = vld [vmem:[#allocation81_spill] sm:$0xff] }
 0xf8a   :  { %11374 = vmatprep.subr.bf16.mxu0 %v14997_v8  ;;  %11406 = vmatprep.subr.bf16.mxu1 %v14999_v58  ;;  %v17236_v58 = vld [vmem:[#allocation25_spill] sm:$0xff]  ;;  %v17250_v8 = vld [vmem:[#allocation39_spill] sm:$0xff] }
 0xf8d   :  { %11376 = vmatpush1.bf16.msra.mxu0 %v15003_v44  ;;  %11408 = vmatpush1.bf16.msra.mxu1 %v15005_v22  ;;  %v17237_v44 = vld [vmem:[#allocation26_spill] sm:$0xff]  ;;  %v17238_v22 = vld [vmem:[#allocation27_spill] sm:$0xff] }
 0xf8e   :  { %11378 = vmatprep.subr.bf16.mxu0 %v15009_v50  ;;  %11410 = vmatprep.subr.bf16.mxu1 %v17231_v21  ;;  %v17239_v50 = vld [vmem:[#allocation28_spill] sm:$0xff]  ;;  %v17249_v21 = vld [vmem:[#allocation38_spill] sm:$0xff] }
 0xf91   :  { %11380 = vmatpush1.bf16.msra.mxu0 %v17232_v0  ;;  %11412 = vmatpush1.bf16.msra.mxu1 %v17233_v27  ;;  %v17240_v27 = vld [vmem:[#allocation29_spill] sm:$0xff]  ;;  %v17243_v0 = vld [vmem:[#allocation32_spill] sm:$0xff] }
 0xf92   :  { %11414 = vmatprep.subr.bf16.mxu0 %v17234_v20  ;;  %11446 = vmatprep.subr.bf16.mxu1 %v17235_v51  ;;  %v17241_v20 = vld [vmem:[#allocation30_spill] sm:$0xff]  ;;  %v17242_v51 = vld [vmem:[#allocation31_spill] sm:$0xff] }
 0xf94   :  { %6132 = vmatmul.mubr.f32.vlgmr.msra.gmra.mrb[44].mxu0 %v15350_v43  ;;  %6203 = vmatmul.mubr.f32.vlgmr.msra.gmra.mrb[44].mxu1 %v15350_v43  ;;  %v17244_v43 = vld [vmem:[#allocation33_spill] sm:$0xff] }
 0xf95   :  { %11416 = vmatpush1.bf16.msra.mxu0 %v17236_v58  ;;  %11448 = vmatpush1.bf16.msra.mxu1 %v17237_v44  ;;  %v17245_v58 = vld [vmem:[#allocation34_spill] sm:$0xff]  ;;  %v17246_v44 = vld [vmem:[#allocation35_spill] sm:$0xff] }
 0xf96   :  { %11418 = vmatprep.subr.bf16.mxu0 %v17238_v22  ;;  %11450 = vmatprep.subr.bf16.mxu1 %v17239_v50  ;;  %v17247_v22 = vld [vmem:[#allocation36_spill] sm:$0xff]  ;;  %v17248_v50 = vld [vmem:[#allocation37_spill] sm:$0xff] }
 0xf97   :  { %6307 = vmatprep.mubr.f32.mxu0 %v16672_v39  ;;  %6378 = vmatprep.mubr.f32.mxu1 %v16672_v39 }
 0xf99   :  { %11420 = vmatpush1.bf16.msra.mxu0 %v17240_v27  ;;  %11452 = vmatpush1.bf16.msra.mxu1 %v17241_v20  ;;  %v17251_v27 = vld [vmem:[#allocation40_spill] sm:$0xff]  ;;  %v17252_v20 = vld [vmem:[#allocation41_spill] sm:$0xff] }
 0xf9a   :  { %11422 = vmatprep.subr.bf16.mxu0 %v17242_v51  ;;  %11454 = vmatprep.subr.bf16.mxu1 %v17243_v0  ;;  %v17253_v51 = vld [vmem:[#allocation42_spill] sm:$0xff]  ;;  %v17254_v0 = vld [vmem:[#allocation43_spill] sm:$0xff] }
 0xf9d   :  { %11424 = vmatpush1.bf16.msra.mxu0 %v17244_v43  ;;  %11456 = vmatpush1.bf16.msra.mxu1 %v17245_v58  ;;  %v17255_v43 = vld [vmem:[#allocation44_spill] sm:$0xff]  ;;  %v17256_v58 = vld [vmem:[#allocation45_spill] sm:$0xff] }
 0xf9e   :  { %11426 = vmatprep.subr.bf16.mxu0 %v17246_v44  ;;  %11458 = vmatprep.subr.bf16.mxu1 %v17247_v22  ;;  %v17257_v44 = vld [vmem:[#allocation46_spill] sm:$0xff]  ;;  %v17258_v22 = vld [vmem:[#allocation47_spill] sm:$0xff] }
 0xfa1   :  { %11428 = vmatpush1.bf16.msra.mxu0 %v17248_v50  ;;  %11460 = vmatpush1.bf16.msra.mxu1 %v17249_v21  ;;  %v17259_v50 = vld [vmem:[#allocation48_spill] sm:$0xff]  ;;  %v17260_v21 = vld [vmem:[#allocation49_spill] sm:$0xff] }
 0xfa2   :  { %11430 = vmatprep.subr.bf16.mxu0 %v17250_v8  ;;  %11462 = vmatprep.subr.bf16.mxu1 %v17251_v27  ;;  %v17261_v8 = vld [vmem:[#allocation50_spill] sm:$0xff]  ;;  %v17262_v27 = vld [vmem:[#allocation51_spill] sm:$0xff] }
 0xfa5   :  { %11432 = vmatpush1.bf16.msra.mxu0 %v17252_v20  ;;  %11464 = vmatpush1.bf16.msra.mxu1 %v17253_v51  ;;  %v17263_v20 = vld [vmem:[#allocation52_spill] sm:$0xff]  ;;  %v17264_v51 = vld [vmem:[#allocation53_spill] sm:$0xff] }
 0xfa6   :  { %11434 = vmatprep.subr.bf16.mxu0 %v17254_v0  ;;  %11466 = vmatprep.subr.bf16.mxu1 %v17255_v43  ;;  %v17265_v0 = vld [vmem:[#allocation54_spill] sm:$0xff]  ;;  %v17266_v43 = vld [vmem:[#allocation55_spill] sm:$0xff] }
 0xfa9   :  { %11436 = vmatpush1.bf16.msra.mxu0 %v17256_v58  ;;  %11468 = vmatpush1.bf16.msra.mxu1 %v17257_v44  ;;  %v17267_v58 = vld [vmem:[#allocation56_spill] sm:$0xff] }
 0xfaa   :  { %11438 = vmatprep.subr.bf16.mxu0 %v17258_v22  ;;  %11470 = vmatprep.subr.bf16.mxu1 %v17259_v50 }
 0xfad   :  { %11440 = vmatpush1.bf16.msra.mxu0 %v17260_v21  ;;  %11472 = vmatpush1.bf16.msra.mxu1 %v17261_v8 }
 0xfae   :  { %11442 = vmatprep.subr.bf16.mxu0 %v17262_v27  ;;  %11474 = vmatprep.subr.bf16.mxu1 %v17263_v20  ;;  %v17270_v20 = vld [vmem:[#allocation112_spill] sm:$0xff] }
 0xfb1   :  { %11444 = vmatpush1.bf16.msra.mxu0 %v17264_v51  ;;  %11476 = vmatpush1.bf16.msra.mxu1 %v17265_v0 }
 0xfb2   :  { %11478 = vmatprep.subr.bf16.mxu0 %v17266_v43  ;;  %11510 = vmatprep.subr.bf16.mxu1 %v17267_v58 }
0x1047   :  { %v5963_v44 = vpop.f32.mrb[42].mxu0  ;;  %v6034_v22 = vpop.f32.mrb[42].mxu1 }
0x1048   :  { %v12561_v50 = vadd.f32 %v5963_v44, %v17268_v18  ;;  %v5965_v14 = vpop.f32.mrb[43].mxu0  ;;  %v6036_v21 = vpop.f32.mrb[43].mxu1  ;;  %v12563_v51 = vadd.f32 %v6034_v22, %v17270_v20 }
0x1049   :  { %v12562_v8 = vadd.f32 %v5965_v14, %v17269_v23  ;;  %v17272_v23 = vld [vmem:[#allocation58_spill] sm:$0xff] }
0x104a   :  { %v9204_v17 = vmul.f32 -1.442695, %v12561_v50  ;;  %v17271_v50 = vld [vmem:[#allocation57_spill] sm:$0xff] }
0x104b   :  { %v9205_v27 = vmul.f32 -1.442695, %v12562_v8 }
0x104c   :  { %13013 = vpow2.f32 %v9204_v17 }
0x104d   :  { %13015 = vpow2.f32 %v9205_v27 }
0x104e   :  { %13017 = vtanh.f32 %v12563_v51 }
0x1056   :  { %v13014_v48 = vpop.eup %13013 }
0x1057   :  { %v13016_v0 = vpop.eup %13015  ;;  %v6052_v45 = vadd.f32 1.0, %v13014_v48 }
0x1058   :  { %v6053_v43 = vadd.f32 1.0, %v13016_v0  ;;  %v13018_v58 = vpop.eup %13017 }
0x1059   :  { %13019 = vrcp.f32 %v6052_v45 }
0x105a   :  { %13021 = vrcp.f32 %v6053_v43 }
0x1063   :  { %v13020_v25 = vpop.eup %13019 }
0x1064   :  { %v13022_v44 = vpop.eup %13021  ;;  %v6063_v18 = vmul.f32 %v13020_v25, %v13018_v58 }
0x1065   :  { %v6062_v31 = vmul.f32 %v13022_v44, %v15340_v30 }
0x1067   :  { %v15471_v14 = vadd.f32 %v6063_v18, %v6062_v31  ;;  %v6133_v8 = vpop.f32.mrb[44].mxu0  ;;  %v6204_v17 = vpop.f32.mrb[44].mxu1 }
0x1068   :  { %v6209_v27 = vadd.f32 %v6133_v8, %v17271_v50  ;;  %v6135_v22 = vpop.f32.mrb[45].mxu0  ;;  %v6206_v20 = vpop.f32.mrb[45].mxu1  ;;  %v6211_v25 = vadd.f32 %v6204_v17, %v17209_v55 }
0x1069   :  { %v6210_v48 = vadd.f32 %v6135_v22, %v17272_v23  ;;  %v6212_v45 = vadd.f32 %v6206_v20, %v17208_v46 }
0x106a   :  { %v9207_v51 = vmul.f32 -1.442695, %v6209_v27 }
0x106b   :  { %v9208_v0 = vmul.f32 -1.442695, %v6210_v48  ;;  %v9209_v43 = vmul.f32 -1.442695, %v6212_v45 }
0x106c   :  { %13023 = vpow2.f32 %v9207_v51 }
0x106d   :  { %13025 = vpow2.f32 %v9208_v0 }
0x106e   :  { %13027 = vpow2.f32 %v9209_v43 }
0x106f   :  { %13029 = vtanh.f32 %v6211_v25 }
0x1076   :  { %v13024_v58 = vpop.eup %13023 }
0x1077   :  { %v13026_v31 = vpop.eup %13025  ;;  %v6222_v18 = vadd.f32 1.0, %v13024_v58 }
0x1078   :  { %v6223_v30 = vadd.f32 1.0, %v13026_v31  ;;  %v13028_v44 = vpop.eup %13027 }
0x1079   :  { %13031 = vrcp.f32 %v6222_v18  ;;  %v13030_v8 = vpop.eup %13029  ;;  %v6224_v51 = vadd.f32 1.0, %v13028_v44  ;;  %v12564_v18 = vadd.f32 %v6036_v21, %v15355_v24  ;;  %v17274_v21 = vld [vmem:[#allocation68_spill] sm:$0xff] }
0x107a   :  { %13033 = vrcp.f32 %v6223_v30 }
0x107b   :  { %13035 = vrcp.f32 %v6224_v51  ;;  %v9206_v30 = vmul.f32 -1.442695, %v12564_v18  ;;  %v17277_v51 = vld [vmem:[#allocation80_spill] sm:$0xff] }
0x107c   :  { %v17282_v18 = vld [vmem:[#allocation100_spill] sm:$0xff] }
0x1083   :  { %v13032_v22 = vpop.eup %13031 }
0x1084   :  { %v13034_v27 = vpop.eup %13033  ;;  %v6233_v48 = vmul.f32 %v13032_v22, %v13030_v8  ;;  %v17275_v8 = vld [vmem:[#allocation69_spill] sm:$0xff]  ;;  %v17276_v22 = vld [vmem:[#allocation70_spill] sm:$0xff] }
0x1085   :  { %v6232_v0 = vmul.f32 %v13034_v27, %v15347_v61  ;;  %v13036_v17 = vpop.eup %13035  ;;  %v17273_v61 = vld [vmem:[#allocation67_spill] sm:$0xff] }
0x1087   :  { %v15478_v20 = vadd.f32 %v6233_v48, %v6232_v0 }
0x1089   :  { %13037 = vtanh.f32 %v15478_v20 }
0x1093   :  { %v13038_v45 = vpop.eup %13037 }
0x1094   :  { %v15481_v43 = vmul.f32 %v13038_v45, %v13036_v17 }
0x1096   :  { %v9210_v25 = vmul.f32 -1.442695, %v15481_v43 }
0x1098   :  { %13039 = vpow2.f32 %v9210_v25  ;;  %v17279_v25 = vld [vmem:[#allocation93_spill] sm:$0xff] }
0x10a2   :  { %v13040_v58 = vpop.eup %13039 }
0x10a3   :  { %v6240_v31 = vadd.f32 1.0, %v13040_v58  ;;  %v17280_v58 = vld [vmem:[#allocation94_spill] sm:$0xff] }
0x10a5   :  { %13041 = vrcp.f32 %v6240_v31  ;;  %v17281_v31 = vld [vmem:[#allocation95_spill] sm:$0xff] }
0x10a6   :  { %13043 = vpow2.f32 %v9206_v30  ;;  %v17283_v30 = vld [vmem:[#allocation101_spill] sm:$0xff] }
0x10a7   :  { %13045 = vtanh.f32 %v15471_v14 }
0x10af   :  { %v13042_v44 = vpop.eup %13041 }
0x10b0   :  { %6308 = vmatmul.mubr.f32.vlgmr.msra.gmra.mrb[46].mxu0 %v13042_v44  ;;  %6379 = vmatmul.mubr.f32.vlgmr.msra.gmra.mrb[46].mxu1 %v13042_v44  ;;  %v13044_v27 = vpop.eup %13043  ;;  %v17284_v44 = vld [vmem:[#allocation102_spill] sm:$0xff] }
0x10b1   :  { %11480 = vmatpush1.bf16.msra.mxu0 %v17212_v16  ;;  %11512 = vmatpush1.bf16.msra.mxu1 %v17213_v19  ;;  %v6054_v48 = vadd.f32 1.0, %v13044_v27  ;;  %v13046_v0 = vpop.eup %13045  ;;  %v17285_v27 = vld [vmem:[#allocation103_spill] sm:$0xff] }
0x10b2   :  { %11482 = vmatprep.subr.bf16.mxu0 %v17214_v34  ;;  %11514 = vmatprep.subr.bf16.mxu1 %v17215_v3 }
0x10b3   :  { %6449 = vmatprep.mubr.f32.mxu0 %v16672_v39  ;;  %6520 = vmatprep.mubr.f32.mxu1 %v16672_v39  ;;  %13047 = vrcp.f32 %v6054_v48  ;;  %v17286_v48 = vld [vmem:[#allocation104_spill] sm:$0xff] }
0x10b5   :  { %11484 = vmatpush1.bf16.msra.mxu0 %v17216_v59  ;;  %11516 = vmatpush1.bf16.msra.mxu1 %v17273_v61 }
0x10b6   :  { %11486 = vmatprep.subr.bf16.mxu0 %v17274_v21  ;;  %11518 = vmatprep.subr.bf16.mxu1 %v17275_v8 }
0x10b9   :  { %11488 = vmatpush1.bf16.msra.mxu0 %v17276_v22  ;;  %11520 = vmatpush1.bf16.msra.mxu1 %v17221_v28 }
0x10ba   :  { %11490 = vmatprep.subr.bf16.mxu0 %v17222_v49  ;;  %11522 = vmatprep.subr.bf16.mxu1 %v17223_v36 }
0x10bd   :  { %11492 = vmatpush1.bf16.msra.mxu0 %v17224_v57  ;;  %11524 = vmatpush1.bf16.msra.mxu1 %v17225_v53  ;;  %v13048_v17 = vpop.eup %13047 }
0x10be   :  { %11494 = vmatprep.subr.bf16.mxu0 %v17226_v52  ;;  %11526 = vmatprep.subr.bf16.mxu1 %v17227_v29  ;;  %v15518_v45 = vmul.f32 %v13048_v17, %v13046_v0  ;;  %v17287_v0 = vld [vmem:[#allocation105_spill] sm:$0xff]  ;;  %v17288_v17 = vld [vmem:[#allocation106_spill] sm:$0xff] }
0x10c0   :  { %17278 = vst [vmem:[#allocation83_spill] sm:$0xff] %v15518_v45 }
0x10c1   :  { %11496 = vmatpush1.bf16.msra.mxu0 %v17228_v32  ;;  %11528 = vmatpush1.bf16.msra.mxu1 %v17229_v47 }
0x10c2   :  { %11498 = vmatprep.subr.bf16.mxu0 %v17277_v51  ;;  %11530 = vmatprep.subr.bf16.mxu1 %v15210_v15 }
0x10c5   :  { %11500 = vmatpush1.bf16.msra.mxu0 %v15214_v4  ;;  %11532 = vmatpush1.bf16.msra.mxu1 %v15216_v2 }
0x10c6   :  { %11502 = vmatprep.subr.bf16.mxu0 %v15220_v26  ;;  %11534 = vmatprep.subr.bf16.mxu1 %v15222_v9 }
0x10c9   :  { %11504 = vmatpush1.bf16.msra.mxu0 %v15226_v7  ;;  %11536 = vmatpush1.bf16.msra.mxu1 %v15228_v1 }
0x10ca   :  { %11506 = vmatprep.subr.bf16.mxu0 %v15232_v63  ;;  %11538 = vmatprep.subr.bf16.mxu1 %v15234_v62 }
0x10cd   :  { %11508 = vmatpush1.bf16.msra.mxu0 %v15238_v37  ;;  %11540 = vmatpush1.bf16.msra.mxu1 %v15240_v6 }
0x10ce   :  { %11542 = vmatprep.subr.bf16.mxu0 %v14920_v13  ;;  %11574 = vmatprep.subr.bf16.mxu1 %v14922_v40 }
0x10d0   :  { %6450 = vmatmul.mubr.f32.vlgmr.msra.gmra.mrb[46].mxu0 %v15518_v45  ;;  %6521 = vmatmul.mubr.f32.vlgmr.msra.gmra.mrb[46].mxu1 %v15518_v45  ;;  %v17289_v45 = vld [vmem:[#allocation107_spill] sm:$0xff] }
0x10d1   :  { %11544 = vmatpush1.bf16.msra.mxu0 %v14931_v56  ;;  %11576 = vmatpush1.bf16.msra.mxu1 %v14933_v54 }
0x10d2   :  { %11546 = vmatprep.subr.bf16.mxu0 %v14935_v33  ;;  %11578 = vmatprep.subr.bf16.mxu1 %v14937_v35 }
0x10d3   :  { %6619 = vmatprep.mubr.f32.mxu0 %v16672_v39  ;;  %6690 = vmatprep.mubr.f32.mxu1 %v16672_v39 }
0x10d5   :  { %11548 = vmatpush1.bf16.msra.mxu0 %v14941_v41  ;;  %11580 = vmatpush1.bf16.msra.mxu1 %v14943_v11 }
0x10d6   :  { %11550 = vmatprep.subr.bf16.mxu0 %v14947_v38  ;;  %11582 = vmatprep.subr.bf16.mxu1 %v14949_v42 }
0x10d9   :  { %11552 = vmatpush1.bf16.msra.mxu0 %v14955_v10  ;;  %11584 = vmatpush1.bf16.msra.mxu1 %v14957_v12 }
0x10da   :  { %11554 = vmatprep.subr.bf16.mxu0 %v14961_v5  ;;  %11586 = vmatprep.subr.bf16.mxu1 %v14963_v60  ;;  %v17332_v5 = vld [vmem:[#allocation110_spill] sm:$0xff] }
0x10dd   :  { %11556 = vmatpush1.bf16.msra.mxu0 %v17279_v25  ;;  %11588 = vmatpush1.bf16.msra.mxu1 %v17280_v58  ;;  %v17290_v25 = vld [vmem:[#allocation108_spill] sm:$0xff]  ;;  %v17291_v58 = vld [vmem:[#allocation111_spill] sm:$0xff] }
0x10de   :  { %11558 = vmatprep.subr.bf16.mxu0 %v17281_v31  ;;  %11590 = vmatprep.subr.bf16.mxu1 %v17282_v18  ;;  %v17292_v31 = vld [vmem:[#allocation96_spill] sm:$0xff]  ;;  %v17293_v18 = vld [vmem:[#allocation97_spill] sm:$0xff] }
0x10e1   :  { %11560 = vmatpush1.bf16.msra.mxu0 %v17283_v30  ;;  %11592 = vmatpush1.bf16.msra.mxu1 %v17284_v44  ;;  %v17294_v30 = vld [vmem:[#allocation98_spill] sm:$0xff]  ;;  %v17295_v44 = vld [vmem:[#allocation99_spill] sm:$0xff] }
0x10e2   :  { %11562 = vmatprep.subr.bf16.mxu0 %v17285_v27  ;;  %11594 = vmatprep.subr.bf16.mxu1 %v17286_v48  ;;  %v17296_v27 = vld [vmem:[#allocation109_spill] sm:$0xff]  ;;  %v17297_v48 = vld [vmem:[#allocation23_spill] sm:$0xff] }
0x10e5   :  { %11564 = vmatpush1.bf16.msra.mxu0 %v17287_v0  ;;  %11596 = vmatpush1.bf16.msra.mxu1 %v17288_v17  ;;  %v17298_v0 = vld [vmem:[#allocation24_spill] sm:$0xff]  ;;  %v17331_v17 = vld [vmem:[#allocation81_spill] sm:$0xff] }
0x10e6   :  { %11566 = vmatprep.subr.bf16.mxu0 %v17289_v45  ;;  %11598 = vmatprep.subr.bf16.mxu1 %v17290_v25  ;;  %v17299_v25 = vld [vmem:[#allocation25_spill] sm:$0xff]  ;;  %v17313_v45 = vld [vmem:[#allocation39_spill] sm:$0xff] }
0x10e9   :  { %11568 = vmatpush1.bf16.msra.mxu0 %v17291_v58  ;;  %11600 = vmatpush1.bf16.msra.mxu1 %v17292_v31  ;;  %v17300_v58 = vld [vmem:[#allocation26_spill] sm:$0xff]  ;;  %v17301_v31 = vld [vmem:[#allocation27_spill] sm:$0xff] }
0x10ea   :  { %11570 = vmatprep.subr.bf16.mxu0 %v17293_v18  ;;  %11602 = vmatprep.subr.bf16.mxu1 %v17294_v30  ;;  %v17302_v18 = vld [vmem:[#allocation28_spill] sm:$0xff]  ;;  %v17312_v30 = vld [vmem:[#allocation38_spill] sm:$0xff] }
0x10ed   :  { %11572 = vmatpush1.bf16.msra.mxu0 %v17295_v44  ;;  %11604 = vmatpush1.bf16.msra.mxu1 %v17296_v27  ;;  %v17303_v27 = vld [vmem:[#allocation29_spill] sm:$0xff]  ;;  %v17306_v44 = vld [vmem:[#allocation32_spill] sm:$0xff] }
0x10ee   :  { %11606 = vmatprep.subr.bf16.mxu0 %v17297_v48  ;;  %11638 = vmatprep.subr.bf16.mxu1 %v17298_v0  ;;  %v17304_v48 = vld [vmem:[#allocation30_spill] sm:$0xff]  ;;  %v17305_v0 = vld [vmem:[#allocation31_spill] sm:$0xff] }
0x10f0   :  { %6620 = vmatmul.mubr.f32.vlgmr.msra.gmra.mrb[48].mxu0 %v15481_v43  ;;  %6691 = vmatmul.mubr.f32.vlgmr.msra.gmra.mrb[48].mxu1 %v15481_v43  ;;  %v17307_v43 = vld [vmem:[#allocation33_spill] sm:$0xff] }
0x10f1   :  { %11608 = vmatpush1.bf16.msra.mxu0 %v17299_v25  ;;  %11640 = vmatpush1.bf16.msra.mxu1 %v17300_v58  ;;  %v17308_v25 = vld [vmem:[#allocation34_spill] sm:$0xff]  ;;  %v17309_v58 = vld [vmem:[#allocation35_spill] sm:$0xff] }
0x10f2   :  { %11610 = vmatprep.subr.bf16.mxu0 %v17301_v31  ;;  %11642 = vmatprep.subr.bf16.mxu1 %v17302_v18  ;;  %v17310_v31 = vld [vmem:[#allocation36_spill] sm:$0xff]  ;;  %v17311_v18 = vld [vmem:[#allocation37_spill] sm:$0xff] }
0x10f3   :  { %6795 = vmatprep.mubr.f32.mxu0 %v16672_v39  ;;  %6866 = vmatprep.mubr.f32.mxu1 %v16672_v39 }
0x10f5   :  { %11612 = vmatpush1.bf16.msra.mxu0 %v17303_v27  ;;  %11644 = vmatpush1.bf16.msra.mxu1 %v17304_v48  ;;  %v17314_v27 = vld [vmem:[#allocation40_spill] sm:$0xff]  ;;  %v17315_v48 = vld [vmem:[#allocation41_spill] sm:$0xff] }
0x10f6   :  { %11614 = vmatprep.subr.bf16.mxu0 %v17305_v0  ;;  %11646 = vmatprep.subr.bf16.mxu1 %v17306_v44  ;;  %v17316_v0 = vld [vmem:[#allocation42_spill] sm:$0xff]  ;;  %v17317_v44 = vld [vmem:[#allocation43_spill] sm:$0xff] }
0x10f9   :  { %11616 = vmatpush1.bf16.msra.mxu0 %v17307_v43  ;;  %11648 = vmatpush1.bf16.msra.mxu1 %v17308_v25  ;;  %v17318_v43 = vld [vmem:[#allocation44_spill] sm:$0xff]  ;;  %v17319_v25 = vld [vmem:[#allocation45_spill] sm:$0xff] }
0x10fa   :  { %11618 = vmatprep.subr.bf16.mxu0 %v17309_v58  ;;  %11650 = vmatprep.subr.bf16.mxu1 %v17310_v31  ;;  %v17320_v58 = vld [vmem:[#allocation46_spill] sm:$0xff]  ;;  %v17321_v31 = vld [vmem:[#allocation47_spill] sm:$0xff] }
0x10fd   :  { %11620 = vmatpush1.bf16.msra.mxu0 %v17311_v18  ;;  %11652 = vmatpush1.bf16.msra.mxu1 %v17312_v30  ;;  %v17322_v18 = vld [vmem:[#allocation48_spill] sm:$0xff]  ;;  %v17323_v30 = vld [vmem:[#allocation49_spill] sm:$0xff] }
0x10fe   :  { %11622 = vmatprep.subr.bf16.mxu0 %v17313_v45  ;;  %11654 = vmatprep.subr.bf16.mxu1 %v17314_v27  ;;  %v17324_v45 = vld [vmem:[#allocation50_spill] sm:$0xff]  ;;  %v17325_v27 = vld [vmem:[#allocation51_spill] sm:$0xff] }
0x1101   :  { %11624 = vmatpush1.bf16.msra.mxu0 %v17315_v48  ;;  %11656 = vmatpush1.bf16.msra.mxu1 %v17316_v0  ;;  %v17326_v48 = vld [vmem:[#allocation52_spill] sm:$0xff]  ;;  %v17327_v0 = vld [vmem:[#allocation53_spill] sm:$0xff] }
0x1102   :  { %11626 = vmatprep.subr.bf16.mxu0 %v17317_v44  ;;  %11658 = vmatprep.subr.bf16.mxu1 %v17318_v43  ;;  %v17328_v44 = vld [vmem:[#allocation54_spill] sm:$0xff]  ;;  %v17329_v43 = vld [vmem:[#allocation55_spill] sm:$0xff] }
0x1105   :  { %11628 = vmatpush1.bf16.msra.mxu0 %v17319_v25  ;;  %11660 = vmatpush1.bf16.msra.mxu1 %v17320_v58  ;;  %v17330_v25 = vld [vmem:[#allocation56_spill] sm:$0xff] }
0x1106   :  { %11630 = vmatprep.subr.bf16.mxu0 %v17321_v31  ;;  %11662 = vmatprep.subr.bf16.mxu1 %v17322_v18 }
0x1109   :  { %11632 = vmatpush1.bf16.msra.mxu0 %v17323_v30  ;;  %11664 = vmatpush1.bf16.msra.mxu1 %v17324_v45 }
0x110a   :  { %11634 = vmatprep.subr.bf16.mxu0 %v17325_v27  ;;  %11666 = vmatprep.subr.bf16.mxu1 %v17326_v48  ;;  %v17333_v48 = vld [vmem:[#allocation112_spill] sm:$0xff] }
0x110d   :  { %11636 = vmatpush1.bf16.msra.mxu0 %v17327_v0  ;;  %11668 = vmatpush1.bf16.msra.mxu1 %v17328_v44 }
0x110e   :  { %11670 = vmatprep.subr.bf16.mxu0 %v17329_v43  ;;  %11702 = vmatprep.subr.bf16.mxu1 %v17330_v25 }
0x11a3   :  { %v6451_v58 = vpop.f32.mrb[46].mxu0  ;;  %v6522_v31 = vpop.f32.mrb[46].mxu1 }
0x11a4   :  { %v12565_v18 = vadd.f32 %v6451_v58, %v17331_v17  ;;  %v6453_v60 = vpop.f32.mrb[47].mxu0  ;;  %v6524_v30 = vpop.f32.mrb[47].mxu1  ;;  %v12567_v0 = vadd.f32 %v6522_v31, %v17333_v48 }
0x11a5   :  { %v12566_v45 = vadd.f32 %v6453_v60, %v17332_v5 }
0x11a6   :  { %v9211_v12 = vmul.f32 -1.442695, %v12565_v18 }
0x11a7   :  { %v9212_v27 = vmul.f32 -1.442695, %v12566_v45 }
0x11a8   :  { %13049 = vpow2.f32 %v9211_v12 }
0x11a9   :  { %13051 = vpow2.f32 %v9212_v27 }
0x11aa   :  { %13053 = vtanh.f32 %v12567_v0 }
0x11b2   :  { %v13050_v10 = vpop.eup %13049 }
0x11b3   :  { %v13052_v44 = vpop.eup %13051  ;;  %v6540_v42 = vadd.f32 1.0, %v13050_v10 }
0x11b4   :  { %v6541_v43 = vadd.f32 1.0, %v13052_v44  ;;  %v13054_v25 = vpop.eup %13053 }
0x11b5   :  { %13055 = vrcp.f32 %v6540_v42 }
0x11b6   :  { %13057 = vrcp.f32 %v6541_v43 }
0x11bf   :  { %v13056_v38 = vpop.eup %13055 }
0x11c0   :  { %v13058_v58 = vpop.eup %13057  ;;  %v6551_v17 = vmul.f32 %v13056_v38, %v13054_v25 }
0x11c1   :  { %v6550_v11 = vmul.f32 %v13058_v58, %v15471_v14 }
0x11c3   :  { %v15598_v60 = vadd.f32 %v6551_v17, %v6550_v11  ;;  %v6621_v45 = vpop.f32.mrb[48].mxu0  ;;  %v6692_v12 = vpop.f32.mrb[48].mxu1 }
0x11c4   :  { %v6697_v18 = vadd.f32 %v6621_v45, %v17271_v50  ;;  %v6623_v31 = vpop.f32.mrb[49].mxu0  ;;  %v6694_v27 = vpop.f32.mrb[49].mxu1  ;;  %v6699_v38 = vadd.f32 %v6692_v12, %v17209_v55 }
0x11c5   :  { %v6698_v10 = vadd.f32 %v6623_v31, %v17272_v23  ;;  %v6700_v42 = vadd.f32 %v6694_v27, %v17208_v46 }
0x11c6   :  { %v9214_v0 = vmul.f32 -1.442695, %v6697_v18 }
0x11c7   :  { %v9215_v44 = vmul.f32 -1.442695, %v6698_v10  ;;  %v9216_v43 = vmul.f32 -1.442695, %v6700_v42 }
0x11c8   :  { %13059 = vpow2.f32 %v9214_v0 }
0x11c9   :  { %13061 = vpow2.f32 %v9215_v44 }
0x11ca   :  { %13063 = vpow2.f32 %v9216_v43 }
0x11cb   :  { %13065 = vtanh.f32 %v6699_v38 }
0x11d2   :  { %v13060_v14 = vpop.eup %13059 }
0x11d3   :  { %v13062_v11 = vpop.eup %13061  ;;  %v6710_v25 = vadd.f32 1.0, %v13060_v14 }
0x11d4   :  { %v6711_v17 = vadd.f32 1.0, %v13062_v11  ;;  %v13064_v58 = vpop.eup %13063 }
0x11d5   :  { %13067 = vrcp.f32 %v6710_v25  ;;  %v13066_v45 = vpop.eup %13065  ;;  %v6712_v0 = vadd.f32 1.0, %v13064_v58  ;;  %v12568_v25 = vadd.f32 %v6524_v30, %v15355_v24 }
0x11d6   :  { %13069 = vrcp.f32 %v6711_v17 }
0x11d7   :  { %13071 = vrcp.f32 %v6712_v0  ;;  %v9213_v17 = vmul.f32 -1.442695, %v12568_v25  ;;  %v17336_v0 = vld [vmem:[#allocation86_spill] sm:$0xff] }
0x11d8   :  { %v17343_v25 = vld [vmem:[#allocation94_spill] sm:$0xff] }
0x11df   :  { %v13068_v31 = vpop.eup %13067 }
0x11e0   :  { %v13070_v18 = vpop.eup %13069  ;;  %v6721_v10 = vmul.f32 %v13068_v31, %v13066_v45 }
0x11e1   :  { %v6720_v44 = vmul.f32 %v13070_v18, %v15478_v20  ;;  %v13072_v12 = vpop.eup %13071 }
0x11e3   :  { %v15605_v27 = vadd.f32 %v6721_v10, %v6720_v44  ;;  %v17335_v10 = vld [vmem:[#allocation85_spill] sm:$0xff]  ;;  %v17337_v44 = vld [vmem:[#allocation88_spill] sm:$0xff] }
0x11e5   :  { %13073 = vtanh.f32 %v15605_v27 }
0x11ef   :  { %v13074_v42 = vpop.eup %13073 }
0x11f0   :  { %v15608_v43 = vmul.f32 %v13074_v42, %v13072_v12  ;;  %v17338_v12 = vld [vmem:[#allocation89_spill] sm:$0xff]  ;;  %v17339_v42 = vld [vmem:[#allocation90_spill] sm:$0xff] }
0x11f2   :  { %v9217_v38 = vmul.f32 -1.442695, %v15608_v43 }
0x11f4   :  { %13075 = vpow2.f32 %v9217_v38  ;;  %v17340_v38 = vld [vmem:[#allocation91_spill] sm:$0xff] }
0x11fe   :  { %v13076_v14 = vpop.eup %13075 }
0x11ff   :  { %v6728_v11 = vadd.f32 1.0, %v13076_v14  ;;  %v17341_v14 = vld [vmem:[#allocation92_spill] sm:$0xff] }
0x1201   :  { %13077 = vrcp.f32 %v6728_v11  ;;  %v17342_v11 = vld [vmem:[#allocation93_spill] sm:$0xff] }
0x1202   :  { %13079 = vpow2.f32 %v9213_v17  ;;  %v17344_v17 = vld [vmem:[#allocation95_spill] sm:$0xff] }
0x1203   :  { %13081 = vtanh.f32 %v15598_v60 }
0x120b   :  { %v13078_v58 = vpop.eup %13077 }
0x120c   :  { %6796 = vmatmul.mubr.f32.vlgmr.msra.gmra.mrb[50].mxu0 %v13078_v58  ;;  %6867 = vmatmul.mubr.f32.vlgmr.msra.gmra.mrb[50].mxu1 %v13078_v58  ;;  %v13080_v20 = vpop.eup %13079  ;;  %v17345_v58 = vld [vmem:[#allocation100_spill] sm:$0xff] }
0x120d   :  { %11672 = vmatpush1.bf16.msra.mxu0 %v17212_v16  ;;  %11704 = vmatpush1.bf16.msra.mxu1 %v17213_v19  ;;  %v6542_v30 = vadd.f32 1.0, %v13080_v20  ;;  %v13082_v45 = vpop.eup %13081  ;;  %v17346_v20 = vld [vmem:[#allocation101_spill] sm:$0xff] }
0x120e   :  { %11674 = vmatprep.subr.bf16.mxu0 %v17214_v34  ;;  %11706 = vmatprep.subr.bf16.mxu1 %v17215_v3 }
0x120f   :  { %6937 = vmatprep.mubr.f32.mxu0 %v16672_v39  ;;  %7008 = vmatprep.mubr.f32.mxu1 %v16672_v39  ;;  %13083 = vrcp.f32 %v6542_v30  ;;  %v17347_v30 = vld [vmem:[#allocation102_spill] sm:$0xff] }
0x1211   :  { %11676 = vmatpush1.bf16.msra.mxu0 %v17216_v59  ;;  %11708 = vmatpush1.bf16.msra.mxu1 %v17273_v61 }
0x1212   :  { %11678 = vmatprep.subr.bf16.mxu0 %v17274_v21  ;;  %11710 = vmatprep.subr.bf16.mxu1 %v17275_v8 }
0x1215   :  { %11680 = vmatpush1.bf16.msra.mxu0 %v17276_v22  ;;  %11712 = vmatpush1.bf16.msra.mxu1 %v17221_v28 }
0x1216   :  { %11682 = vmatprep.subr.bf16.mxu0 %v17222_v49  ;;  %11714 = vmatprep.subr.bf16.mxu1 %v17223_v36 }
0x1219   :  { %11684 = vmatpush1.bf16.msra.mxu0 %v17224_v57  ;;  %11716 = vmatpush1.bf16.msra.mxu1 %v17225_v53  ;;  %v13084_v31 = vpop.eup %13083 }
0x121a   :  { %11686 = vmatprep.subr.bf16.mxu0 %v17226_v52  ;;  %11718 = vmatprep.subr.bf16.mxu1 %v17227_v29  ;;  %v15645_v18 = vmul.f32 %v13084_v31, %v13082_v45  ;;  %v17348_v45 = vld [vmem:[#allocation103_spill] sm:$0xff]  ;;  %v17349_v31 = vld [vmem:[#allocation104_spill] sm:$0xff] }
0x121c   :  { %17334 = vst [vmem:[#allocation87_spill] sm:$0xff] %v15645_v18 }
0x121d   :  { %11688 = vmatpush1.bf16.msra.mxu0 %v17228_v32  ;;  %11720 = vmatpush1.bf16.msra.mxu1 %v17229_v47 }
0x121e   :  { %11690 = vmatprep.subr.bf16.mxu0 %v17277_v51  ;;  %11722 = vmatprep.subr.bf16.mxu1 %v15210_v15 }
0x1221   :  { %11692 = vmatpush1.bf16.msra.mxu0 %v15214_v4  ;;  %11724 = vmatpush1.bf16.msra.mxu1 %v15216_v2 }
0x1222   :  { %11694 = vmatprep.subr.bf16.mxu0 %v15220_v26  ;;  %11726 = vmatprep.subr.bf16.mxu1 %v15222_v9 }
0x1225   :  { %11696 = vmatpush1.bf16.msra.mxu0 %v15226_v7  ;;  %11728 = vmatpush1.bf16.msra.mxu1 %v15228_v1 }
0x1226   :  { %11698 = vmatprep.subr.bf16.mxu0 %v15232_v63  ;;  %11730 = vmatprep.subr.bf16.mxu1 %v15234_v62 }
0x1229   :  { %11700 = vmatpush1.bf16.msra.mxu0 %v15238_v37  ;;  %11732 = vmatpush1.bf16.msra.mxu1 %v15240_v6 }
0x122a   :  { %11734 = vmatprep.subr.bf16.mxu0 %v14920_v13  ;;  %11766 = vmatprep.subr.bf16.mxu1 %v14922_v40 }
0x122c   :  { %6938 = vmatmul.mubr.f32.vlgmr.msra.gmra.mrb[50].mxu0 %v15645_v18  ;;  %7009 = vmatmul.mubr.f32.vlgmr.msra.gmra.mrb[50].mxu1 %v15645_v18  ;;  %v17350_v18 = vld [vmem:[#allocation105_spill] sm:$0xff] }
0x122d   :  { %11736 = vmatpush1.bf16.msra.mxu0 %v14931_v56  ;;  %11768 = vmatpush1.bf16.msra.mxu1 %v14933_v54 }
0x122e   :  { %11738 = vmatprep.subr.bf16.mxu0 %v14935_v33  ;;  %11770 = vmatprep.subr.bf16.mxu1 %v14937_v35 }
0x122f   :  { %7107 = vmatprep.mubr.f32.mxu0 %v16672_v39  ;;  %7178 = vmatprep.mubr.f32.mxu1 %v16672_v39 }
0x1231   :  { %11740 = vmatpush1.bf16.msra.mxu0 %v14941_v41  ;;  %11772 = vmatpush1.bf16.msra.mxu1 %v17335_v10 }
0x1232   :  { %11742 = vmatprep.subr.bf16.mxu0 %v17336_v0  ;;  %11774 = vmatprep.subr.bf16.mxu1 %v17337_v44 }
0x1235   :  { %11744 = vmatpush1.bf16.msra.mxu0 %v17338_v12  ;;  %11776 = vmatpush1.bf16.msra.mxu1 %v17339_v42 }
0x1236   :  { %11746 = vmatprep.subr.bf16.mxu0 %v17340_v38  ;;  %11778 = vmatprep.subr.bf16.mxu1 %v17341_v14  ;;  %v17351_v38 = vld [vmem:[#allocation106_spill] sm:$0xff]  ;;  %v17352_v14 = vld [vmem:[#allocation107_spill] sm:$0xff] }
0x1239   :  { %11748 = vmatpush1.bf16.msra.mxu0 %v17342_v11  ;;  %11780 = vmatpush1.bf16.msra.mxu1 %v17343_v25  ;;  %v17353_v11 = vld [vmem:[#allocation108_spill] sm:$0xff]  ;;  %v17354_v25 = vld [vmem:[#allocation111_spill] sm:$0xff] }
0x123a   :  { %11750 = vmatprep.subr.bf16.mxu0 %v17344_v17  ;;  %11782 = vmatprep.subr.bf16.mxu1 %v17345_v58  ;;  %v17355_v17 = vld [vmem:[#allocation96_spill] sm:$0xff]  ;;  %v17356_v58 = vld [vmem:[#allocation97_spill] sm:$0xff] }
0x123d   :  { %11752 = vmatpush1.bf16.msra.mxu0 %v17346_v20  ;;  %11784 = vmatpush1.bf16.msra.mxu1 %v17347_v30  ;;  %v17357_v20 = vld [vmem:[#allocation98_spill] sm:$0xff]  ;;  %v17358_v30 = vld [vmem:[#allocation99_spill] sm:$0xff] }
0x123e   :  { %11754 = vmatprep.subr.bf16.mxu0 %v17348_v45  ;;  %11786 = vmatprep.subr.bf16.mxu1 %v17349_v31  ;;  %v17359_v45 = vld [vmem:[#allocation109_spill] sm:$0xff]  ;;  %v17360_v31 = vld [vmem:[#allocation23_spill] sm:$0xff] }
0x1241   :  { %11756 = vmatpush1.bf16.msra.mxu0 %v17350_v18  ;;  %11788 = vmatpush1.bf16.msra.mxu1 %v17351_v38  ;;  %v17361_v18 = vld [vmem:[#allocation24_spill] sm:$0xff]  ;;  %v17394_v38 = vld [vmem:[#allocation81_spill] sm:$0xff] }
0x1242   :  { %11758 = vmatprep.subr.bf16.mxu0 %v17352_v14  ;;  %11790 = vmatprep.subr.bf16.mxu1 %v17353_v11  ;;  %v17362_v11 = vld [vmem:[#allocation25_spill] sm:$0xff]  ;;  %v17376_v14 = vld [vmem:[#allocation39_spill] sm:$0xff] }
0x1245   :  { %11760 = vmatpush1.bf16.msra.mxu0 %v17354_v25  ;;  %11792 = vmatpush1.bf16.msra.mxu1 %v17355_v17  ;;  %v17363_v25 = vld [vmem:[#allocation26_spill] sm:$0xff]  ;;  %v17364_v17 = vld [vmem:[#allocation27_spill] sm:$0xff] }
0x1246   :  { %11762 = vmatprep.subr.bf16.mxu0 %v17356_v58  ;;  %11794 = vmatprep.subr.bf16.mxu1 %v17357_v20  ;;  %v17365_v58 = vld [vmem:[#allocation28_spill] sm:$0xff]  ;;  %v17375_v20 = vld [vmem:[#allocation38_spill] sm:$0xff] }
0x1249   :  { %11764 = vmatpush1.bf16.msra.mxu0 %v17358_v30  ;;  %11796 = vmatpush1.bf16.msra.mxu1 %v17359_v45  ;;  %v17366_v45 = vld [vmem:[#allocation29_spill] sm:$0xff]  ;;  %v17369_v30 = vld [vmem:[#allocation32_spill] sm:$0xff] }
0x124a   :  { %11798 = vmatprep.subr.bf16.mxu0 %v17360_v31  ;;  %11830 = vmatprep.subr.bf16.mxu1 %v17361_v18  ;;  %v17367_v31 = vld [vmem:[#allocation30_spill] sm:$0xff]  ;;  %v17368_v18 = vld [vmem:[#allocation31_spill] sm:$0xff] }
0x124c   :  { %7108 = vmatmul.mubr.f32.vlgmr.msra.gmra.mrb[52].mxu0 %v15608_v43  ;;  %7179 = vmatmul.mubr.f32.vlgmr.msra.gmra.mrb[52].mxu1 %v15608_v43  ;;  %v17370_v43 = vld [vmem:[#allocation33_spill] sm:$0xff] }
0x124d   :  { %11800 = vmatpush1.bf16.msra.mxu0 %v17362_v11  ;;  %11832 = vmatpush1.bf16.msra.mxu1 %v17363_v25  ;;  %v17371_v11 = vld [vmem:[#allocation34_spill] sm:$0xff]  ;;  %v17372_v25 = vld [vmem:[#allocation35_spill] sm:$0xff] }
0x124e   :  { %11802 = vmatprep.subr.bf16.mxu0 %v17364_v17  ;;  %11834 = vmatprep.subr.bf16.mxu1 %v17365_v58  ;;  %v17373_v17 = vld [vmem:[#allocation36_spill] sm:$0xff]  ;;  %v17374_v58 = vld [vmem:[#allocation37_spill] sm:$0xff] }
0x124f   :  { %7283 = vmatprep.mubr.f32.mxu0 %v16672_v39  ;;  %7354 = vmatprep.mubr.f32.mxu1 %v16672_v39 }
0x1251   :  { %11804 = vmatpush1.bf16.msra.mxu0 %v17366_v45  ;;  %11836 = vmatpush1.bf16.msra.mxu1 %v17367_v31  ;;  %v17377_v45 = vld [vmem:[#allocation40_spill] sm:$0xff]  ;;  %v17378_v31 = vld [vmem:[#allocation41_spill] sm:$0xff] }
0x1252   :  { %11806 = vmatprep.subr.bf16.mxu0 %v17368_v18  ;;  %11838 = vmatprep.subr.bf16.mxu1 %v17369_v30  ;;  %v17379_v18 = vld [vmem:[#allocation42_spill] sm:$0xff]  ;;  %v17380_v30 = vld [vmem:[#allocation43_spill] sm:$0xff] }
0x1255   :  { %11808 = vmatpush1.bf16.msra.mxu0 %v17370_v43  ;;  %11840 = vmatpush1.bf16.msra.mxu1 %v17371_v11  ;;  %v17381_v43 = vld [vmem:[#allocation44_spill] sm:$0xff]  ;;  %v17382_v11 = vld [vmem:[#allocation45_spill] sm:$0xff] }
0x1256   :  { %11810 = vmatprep.subr.bf16.mxu0 %v17372_v25  ;;  %11842 = vmatprep.subr.bf16.mxu1 %v17373_v17  ;;  %v17383_v25 = vld [vmem:[#allocation46_spill] sm:$0xff]  ;;  %v17384_v17 = vld [vmem:[#allocation47_spill] sm:$0xff] }
0x1259   :  { %11812 = vmatpush1.bf16.msra.mxu0 %v17374_v58  ;;  %11844 = vmatpush1.bf16.msra.mxu1 %v17375_v20  ;;  %v17385_v58 = vld [vmem:[#allocation48_spill] sm:$0xff]  ;;  %v17386_v20 = vld [vmem:[#allocation49_spill] sm:$0xff] }
0x125a   :  { %11814 = vmatprep.subr.bf16.mxu0 %v17376_v14  ;;  %11846 = vmatprep.subr.bf16.mxu1 %v17377_v45  ;;  %v17387_v14 = vld [vmem:[#allocation50_spill] sm:$0xff]  ;;  %v17388_v45 = vld [vmem:[#allocation51_spill] sm:$0xff] }
0x125d   :  { %11816 = vmatpush1.bf16.msra.mxu0 %v17378_v31  ;;  %11848 = vmatpush1.bf16.msra.mxu1 %v17379_v18  ;;  %v17389_v31 = vld [vmem:[#allocation52_spill] sm:$0xff]  ;;  %v17390_v18 = vld [vmem:[#allocation53_spill] sm:$0xff] }
0x125e   :  { %11818 = vmatprep.subr.bf16.mxu0 %v17380_v30  ;;  %11850 = vmatprep.subr.bf16.mxu1 %v17381_v43  ;;  %v17391_v30 = vld [vmem:[#allocation54_spill] sm:$0xff]  ;;  %v17392_v43 = vld [vmem:[#allocation55_spill] sm:$0xff] }
0x1261   :  { %11820 = vmatpush1.bf16.msra.mxu0 %v17382_v11  ;;  %11852 = vmatpush1.bf16.msra.mxu1 %v17383_v25  ;;  %v17393_v11 = vld [vmem:[#allocation56_spill] sm:$0xff] }
0x1262   :  { %11822 = vmatprep.subr.bf16.mxu0 %v17384_v17  ;;  %11854 = vmatprep.subr.bf16.mxu1 %v17385_v58 }
0x1265   :  { %11824 = vmatpush1.bf16.msra.mxu0 %v17386_v20  ;;  %11856 = vmatpush1.bf16.msra.mxu1 %v17387_v14 }
0x1266   :  { %11826 = vmatprep.subr.bf16.mxu0 %v17388_v45  ;;  %11858 = vmatprep.subr.bf16.mxu1 %v17389_v31 }
0x1269   :  { %11828 = vmatpush1.bf16.msra.mxu0 %v17390_v18  ;;  %11860 = vmatpush1.bf16.msra.mxu1 %v17391_v30 }
0x126a   :  { %11862 = vmatprep.subr.bf16.mxu0 %v17392_v43  ;;  %11894 = vmatprep.subr.bf16.mxu1 %v17393_v11 }
0x12ff   :  { %v6939_v25 = vpop.f32.mrb[50].mxu0  ;;  %v7010_v17 = vpop.f32.mrb[50].mxu1 }
0x1300   :  { %v12569_v58 = vadd.f32 %v6939_v25, %v17394_v38  ;;  %v6941_v42 = vpop.f32.mrb[51].mxu0  ;;  %v7012_v20 = vpop.f32.mrb[51].mxu1  ;;  %v12571_v18 = vadd.f32 %v7010_v17, %v17333_v48 }
0x1301   :  { %v12570_v14 = vadd.f32 %v6941_v42, %v17332_v5 }
0x1302   :  { %v9218_v12 = vmul.f32 -1.442695, %v12569_v58 }
0x1303   :  { %v9219_v45 = vmul.f32 -1.442695, %v12570_v14 }
0x1304   :  { %13085 = vpow2.f32 %v9218_v12 }
0x1305   :  { %13087 = vpow2.f32 %v9219_v45 }
0x1306   :  { %13089 = vtanh.f32 %v12571_v18 }
0x130e   :  { %v13086_v31 = vpop.eup %13085 }
0x130f   :  { %v13088_v30 = vpop.eup %13087  ;;  %v7028_v44 = vadd.f32 1.0, %v13086_v31 }
0x1310   :  { %v7029_v43 = vadd.f32 1.0, %v13088_v30  ;;  %v13090_v11 = vpop.eup %13089 }
0x1311   :  { %13091 = vrcp.f32 %v7028_v44 }
0x1312   :  { %13093 = vrcp.f32 %v7029_v43 }
0x131b   :  { %v13092_v0 = vpop.eup %13091 }
0x131c   :  { %v13094_v25 = vpop.eup %13093  ;;  %v7039_v38 = vmul.f32 %v13092_v0, %v13090_v11 }
0x131d   :  { %v7038_v10 = vmul.f32 %v13094_v25, %v15598_v60 }
0x131f   :  { %v15725_v42 = vadd.f32 %v7039_v38, %v7038_v10  ;;  %v7109_v14 = vpop.f32.mrb[52].mxu0  ;;  %v7180_v12 = vpop.f32.mrb[52].mxu1 }
0x1320   :  { %v7185_v58 = vadd.f32 %v7109_v14, %v17271_v50  ;;  %v7111_v17 = vpop.f32.mrb[53].mxu0  ;;  %v7182_v45 = vpop.f32.mrb[53].mxu1  ;;  %v7187_v0 = vadd.f32 %v7180_v12, %v17209_v55 }
0x1321   :  { %v7186_v31 = vadd.f32 %v7111_v17, %v17272_v23  ;;  %v7188_v44 = vadd.f32 %v7182_v45, %v17208_v46 }
0x1322   :  { %v9221_v18 = vmul.f32 -1.442695, %v7185_v58 }
0x1323   :  { %v9222_v30 = vmul.f32 -1.442695, %v7186_v31  ;;  %v9223_v43 = vmul.f32 -1.442695, %v7188_v44 }
0x1324   :  { %13095 = vpow2.f32 %v9221_v18 }
0x1325   :  { %13097 = vpow2.f32 %v9222_v30 }
0x1326   :  { %13099 = vpow2.f32 %v9223_v43 }
0x1327   :  { %13101 = vtanh.f32 %v7187_v0 }
0x132e   :  { %v13096_v60 = vpop.eup %13095 }
0x132f   :  { %v13098_v10 = vpop.eup %13097  ;;  %v7198_v38 = vadd.f32 1.0, %v13096_v60 }
0x1330   :  { %v7199_v11 = vadd.f32 1.0, %v13098_v10  ;;  %v13100_v25 = vpop.eup %13099 }
0x1331   :  { %13103 = vrcp.f32 %v7198_v38  ;;  %v13102_v14 = vpop.eup %13101  ;;  %v7200_v18 = vadd.f32 1.0, %v13100_v25  ;;  %v12572_v38 = vadd.f32 %v7012_v20, %v15355_v24 }
0x1332   :  { %13105 = vrcp.f32 %v7199_v11 }
0x1333   :  { %13107 = vrcp.f32 %v7200_v18  ;;  %v9220_v11 = vmul.f32 -1.442695, %v12572_v38  ;;  %v17397_v18 = vld [vmem:[#allocation86_spill] sm:$0xff] }
0x1334   :  { %v17404_v38 = vld [vmem:[#allocation94_spill] sm:$0xff] }
0x133b   :  { %v13104_v17 = vpop.eup %13103 }
0x133c   :  { %v13106_v58 = vpop.eup %13105  ;;  %v7209_v31 = vmul.f32 %v13104_v17, %v13102_v14 }
0x133d   :  { %v7208_v30 = vmul.f32 %v13106_v58, %v15605_v27  ;;  %v13108_v12 = vpop.eup %13107 }
0x133f   :  { %v15732_v45 = vadd.f32 %v7209_v31, %v7208_v30  ;;  %v17396_v31 = vld [vmem:[#allocation85_spill] sm:$0xff]  ;;  %v17398_v30 = vld [vmem:[#allocation88_spill] sm:$0xff] }
0x1341   :  { %13109 = vtanh.f32 %v15732_v45 }
0x134b   :  { %v13110_v44 = vpop.eup %13109 }
0x134c   :  { %v15735_v43 = vmul.f32 %v13110_v44, %v13108_v12  ;;  %v17399_v12 = vld [vmem:[#allocation89_spill] sm:$0xff]  ;;  %v17400_v44 = vld [vmem:[#allocation90_spill] sm:$0xff] }
0x134e   :  { %v9224_v0 = vmul.f32 -1.442695, %v15735_v43 }
0x1350   :  { %13111 = vpow2.f32 %v9224_v0  ;;  %v17401_v0 = vld [vmem:[#allocation91_spill] sm:$0xff] }
0x135a   :  { %v13112_v60 = vpop.eup %13111 }
0x135b   :  { %v7216_v10 = vadd.f32 1.0, %v13112_v60  ;;  %v17402_v60 = vld [vmem:[#allocation92_spill] sm:$0xff] }
0x135d   :  { %13113 = vrcp.f32 %v7216_v10  ;;  %v17403_v10 = vld [vmem:[#allocation93_spill] sm:$0xff] }
0x135e   :  { %13115 = vpow2.f32 %v9220_v11  ;;  %v17405_v11 = vld [vmem:[#allocation95_spill] sm:$0xff] }
0x135f   :  { %13117 = vtanh.f32 %v15725_v42 }
0x1367   :  { %v13114_v25 = vpop.eup %13113 }
0x1368   :  { %7284 = vmatmul.mubr.f32.vlgmr.msra.gmra.mrb[54].mxu0 %v13114_v25  ;;  %7355 = vmatmul.mubr.f32.vlgmr.msra.gmra.mrb[54].mxu1 %v13114_v25  ;;  %v13116_v27 = vpop.eup %13115  ;;  %v17406_v25 = vld [vmem:[#allocation100_spill] sm:$0xff] }
0x1369   :  { %11864 = vmatpush1.bf16.msra.mxu0 %v17212_v16  ;;  %11896 = vmatpush1.bf16.msra.mxu1 %v17213_v19  ;;  %v7030_v20 = vadd.f32 1.0, %v13116_v27  ;;  %v13118_v14 = vpop.eup %13117  ;;  %v17407_v27 = vld [vmem:[#allocation101_spill] sm:$0xff] }
0x136a   :  { %11866 = vmatprep.subr.bf16.mxu0 %v17214_v34  ;;  %11898 = vmatprep.subr.bf16.mxu1 %v17215_v3 }
0x136b   :  { %7425 = vmatprep.mubr.f32.mxu0 %v16672_v39  ;;  %7496 = vmatprep.mubr.f32.mxu1 %v16672_v39  ;;  %13119 = vrcp.f32 %v7030_v20  ;;  %v17408_v20 = vld [vmem:[#allocation102_spill] sm:$0xff] }
0x136d   :  { %11868 = vmatpush1.bf16.msra.mxu0 %v17216_v59  ;;  %11900 = vmatpush1.bf16.msra.mxu1 %v17273_v61 }
0x136e   :  { %11870 = vmatprep.subr.bf16.mxu0 %v17274_v21  ;;  %11902 = vmatprep.subr.bf16.mxu1 %v17275_v8 }
0x1371   :  { %11872 = vmatpush1.bf16.msra.mxu0 %v17276_v22  ;;  %11904 = vmatpush1.bf16.msra.mxu1 %v17221_v28 }
0x1372   :  { %11874 = vmatprep.subr.bf16.mxu0 %v17222_v49  ;;  %11906 = vmatprep.subr.bf16.mxu1 %v17223_v36 }
0x1375   :  { %11876 = vmatpush1.bf16.msra.mxu0 %v17224_v57  ;;  %11908 = vmatpush1.bf16.msra.mxu1 %v17225_v53  ;;  %v13120_v17 = vpop.eup %13119 }
0x1376   :  { %11878 = vmatprep.subr.bf16.mxu0 %v17226_v52  ;;  %11910 = vmatprep.subr.bf16.mxu1 %v17227_v29  ;;  %v15772_v58 = vmul.f32 %v13120_v17, %v13118_v14  ;;  %v17409_v14 = vld [vmem:[#allocation103_spill] sm:$0xff]  ;;  %v17410_v17 = vld [vmem:[#allocation104_spill] sm:$0xff] }
0x1378   :  { %17395 = vst [vmem:[#allocation59_spill] sm:$0xff] %v15772_v58 }
0x1379   :  { %11880 = vmatpush1.bf16.msra.mxu0 %v17228_v32  ;;  %11912 = vmatpush1.bf16.msra.mxu1 %v17229_v47 }
0x137a   :  { %11882 = vmatprep.subr.bf16.mxu0 %v17277_v51  ;;  %11914 = vmatprep.subr.bf16.mxu1 %v15210_v15 }
0x137d   :  { %11884 = vmatpush1.bf16.msra.mxu0 %v15214_v4  ;;  %11916 = vmatpush1.bf16.msra.mxu1 %v15216_v2 }
0x137e   :  { %11886 = vmatprep.subr.bf16.mxu0 %v15220_v26  ;;  %11918 = vmatprep.subr.bf16.mxu1 %v15222_v9 }
0x1381   :  { %11888 = vmatpush1.bf16.msra.mxu0 %v15226_v7  ;;  %11920 = vmatpush1.bf16.msra.mxu1 %v15228_v1 }
0x1382   :  { %11890 = vmatprep.subr.bf16.mxu0 %v15232_v63  ;;  %11922 = vmatprep.subr.bf16.mxu1 %v15234_v62 }
0x1385   :  { %11892 = vmatpush1.bf16.msra.mxu0 %v15238_v37  ;;  %11924 = vmatpush1.bf16.msra.mxu1 %v15240_v6 }
0x1386   :  { %11926 = vmatprep.subr.bf16.mxu0 %v14920_v13  ;;  %11958 = vmatprep.subr.bf16.mxu1 %v14922_v40 }
0x1388   :  { %7426 = vmatmul.mubr.f32.vlgmr.msra.gmra.mrb[54].mxu0 %v15772_v58  ;;  %7497 = vmatmul.mubr.f32.vlgmr.msra.gmra.mrb[54].mxu1 %v15772_v58  ;;  %v17411_v58 = vld [vmem:[#allocation105_spill] sm:$0xff] }
0x1389   :  { %11928 = vmatpush1.bf16.msra.mxu0 %v14931_v56  ;;  %11960 = vmatpush1.bf16.msra.mxu1 %v14933_v54 }
0x138a   :  { %11930 = vmatprep.subr.bf16.mxu0 %v14935_v33  ;;  %11962 = vmatprep.subr.bf16.mxu1 %v14937_v35 }
0x138b   :  { %7595 = vmatprep.mubr.f32.mxu0 %v16672_v39  ;;  %7666 = vmatprep.mubr.f32.mxu1 %v16672_v39 }
0x138d   :  { %11932 = vmatpush1.bf16.msra.mxu0 %v14941_v41  ;;  %11964 = vmatpush1.bf16.msra.mxu1 %v17396_v31 }
0x138e   :  { %11934 = vmatprep.subr.bf16.mxu0 %v17397_v18  ;;  %11966 = vmatprep.subr.bf16.mxu1 %v17398_v30 }
0x1391   :  { %11936 = vmatpush1.bf16.msra.mxu0 %v17399_v12  ;;  %11968 = vmatpush1.bf16.msra.mxu1 %v17400_v44 }
0x1392   :  { %11938 = vmatprep.subr.bf16.mxu0 %v17401_v0  ;;  %11970 = vmatprep.subr.bf16.mxu1 %v17402_v60  ;;  %v17412_v0 = vld [vmem:[#allocation106_spill] sm:$0xff]  ;;  %v17413_v60 = vld [vmem:[#allocation107_spill] sm:$0xff] }
0x1395   :  { %11940 = vmatpush1.bf16.msra.mxu0 %v17403_v10  ;;  %11972 = vmatpush1.bf16.msra.mxu1 %v17404_v38  ;;  %v17414_v10 = vld [vmem:[#allocation108_spill] sm:$0xff]  ;;  %v17415_v38 = vld [vmem:[#allocation111_spill] sm:$0xff] }
0x1396   :  { %11942 = vmatprep.subr.bf16.mxu0 %v17405_v11  ;;  %11974 = vmatprep.subr.bf16.mxu1 %v17406_v25  ;;  %v17416_v11 = vld [vmem:[#allocation96_spill] sm:$0xff]  ;;  %v17417_v25 = vld [vmem:[#allocation97_spill] sm:$0xff] }
0x1399   :  { %11944 = vmatpush1.bf16.msra.mxu0 %v17407_v27  ;;  %11976 = vmatpush1.bf16.msra.mxu1 %v17408_v20  ;;  %v17418_v27 = vld [vmem:[#allocation98_spill] sm:$0xff]  ;;  %v17419_v20 = vld [vmem:[#allocation99_spill] sm:$0xff] }
0x139a   :  { %11946 = vmatprep.subr.bf16.mxu0 %v17409_v14  ;;  %11978 = vmatprep.subr.bf16.mxu1 %v17410_v17  ;;  %v17420_v14 = vld [vmem:[#allocation109_spill] sm:$0xff]  ;;  %v17421_v17 = vld [vmem:[#allocation23_spill] sm:$0xff] }
0x139d   :  { %11948 = vmatpush1.bf16.msra.mxu0 %v17411_v58  ;;  %11980 = vmatpush1.bf16.msra.mxu1 %v17412_v0  ;;  %v17422_v58 = vld [vmem:[#allocation24_spill] sm:$0xff]  ;;  %v17455_v0 = vld [vmem:[#allocation81_spill] sm:$0xff] }
0x139e   :  { %11950 = vmatprep.subr.bf16.mxu0 %v17413_v60  ;;  %11982 = vmatprep.subr.bf16.mxu1 %v17414_v10  ;;  %v17423_v10 = vld [vmem:[#allocation25_spill] sm:$0xff]  ;;  %v17437_v60 = vld [vmem:[#allocation39_spill] sm:$0xff] }
0x13a1   :  { %11952 = vmatpush1.bf16.msra.mxu0 %v17415_v38  ;;  %11984 = vmatpush1.bf16.msra.mxu1 %v17416_v11  ;;  %v17424_v38 = vld [vmem:[#allocation26_spill] sm:$0xff]  ;;  %v17425_v11 = vld [vmem:[#allocation27_spill] sm:$0xff] }
0x13a2   :  { %11954 = vmatprep.subr.bf16.mxu0 %v17417_v25  ;;  %11986 = vmatprep.subr.bf16.mxu1 %v17418_v27  ;;  %v17426_v25 = vld [vmem:[#allocation28_spill] sm:$0xff]  ;;  %v17436_v27 = vld [vmem:[#allocation38_spill] sm:$0xff] }
0x13a5   :  { %11956 = vmatpush1.bf16.msra.mxu0 %v17419_v20  ;;  %11988 = vmatpush1.bf16.msra.mxu1 %v17420_v14  ;;  %v17427_v14 = vld [vmem:[#allocation29_spill] sm:$0xff]  ;;  %v17430_v20 = vld [vmem:[#allocation32_spill] sm:$0xff] }
0x13a6   :  { %11990 = vmatprep.subr.bf16.mxu0 %v17421_v17  ;;  %12022 = vmatprep.subr.bf16.mxu1 %v17422_v58  ;;  %v17428_v17 = vld [vmem:[#allocation30_spill] sm:$0xff]  ;;  %v17429_v58 = vld [vmem:[#allocation31_spill] sm:$0xff] }
0x13a8   :  { %7596 = vmatmul.mubr.f32.vlgmr.msra.gmra.mrb[56].mxu0 %v15735_v43  ;;  %7667 = vmatmul.mubr.f32.vlgmr.msra.gmra.mrb[56].mxu1 %v15735_v43  ;;  %v17431_v43 = vld [vmem:[#allocation33_spill] sm:$0xff] }
0x13a9   :  { %11992 = vmatpush1.bf16.msra.mxu0 %v17423_v10  ;;  %12024 = vmatpush1.bf16.msra.mxu1 %v17424_v38  ;;  %v17432_v10 = vld [vmem:[#allocation34_spill] sm:$0xff]  ;;  %v17433_v38 = vld [vmem:[#allocation35_spill] sm:$0xff] }
0x13aa   :  { %11994 = vmatprep.subr.bf16.mxu0 %v17425_v11  ;;  %12026 = vmatprep.subr.bf16.mxu1 %v17426_v25  ;;  %v17434_v11 = vld [vmem:[#allocation36_spill] sm:$0xff]  ;;  %v17435_v25 = vld [vmem:[#allocation37_spill] sm:$0xff] }
0x13ab   :  { %7771 = vmatprep.mubr.f32.mxu0 %v16672_v39  ;;  %7842 = vmatprep.mubr.f32.mxu1 %v16672_v39 }
0x13ad   :  { %11996 = vmatpush1.bf16.msra.mxu0 %v17427_v14  ;;  %12028 = vmatpush1.bf16.msra.mxu1 %v17428_v17  ;;  %v17438_v14 = vld [vmem:[#allocation40_spill] sm:$0xff]  ;;  %v17439_v17 = vld [vmem:[#allocation41_spill] sm:$0xff] }
0x13ae   :  { %11998 = vmatprep.subr.bf16.mxu0 %v17429_v58  ;;  %12030 = vmatprep.subr.bf16.mxu1 %v17430_v20  ;;  %v17440_v58 = vld [vmem:[#allocation42_spill] sm:$0xff]  ;;  %v17441_v20 = vld [vmem:[#allocation43_spill] sm:$0xff] }
0x13b1   :  { %12000 = vmatpush1.bf16.msra.mxu0 %v17431_v43  ;;  %12032 = vmatpush1.bf16.msra.mxu1 %v17432_v10  ;;  %v17442_v43 = vld [vmem:[#allocation44_spill] sm:$0xff]  ;;  %v17443_v10 = vld [vmem:[#allocation45_spill] sm:$0xff] }
0x13b2   :  { %12002 = vmatprep.subr.bf16.mxu0 %v17433_v38  ;;  %12034 = vmatprep.subr.bf16.mxu1 %v17434_v11  ;;  %v17444_v38 = vld [vmem:[#allocation46_spill] sm:$0xff]  ;;  %v17445_v11 = vld [vmem:[#allocation47_spill] sm:$0xff] }
0x13b5   :  { %12004 = vmatpush1.bf16.msra.mxu0 %v17435_v25  ;;  %12036 = vmatpush1.bf16.msra.mxu1 %v17436_v27  ;;  %v17446_v25 = vld [vmem:[#allocation48_spill] sm:$0xff]  ;;  %v17447_v27 = vld [vmem:[#allocation49_spill] sm:$0xff] }
0x13b6   :  { %12006 = vmatprep.subr.bf16.mxu0 %v17437_v60  ;;  %12038 = vmatprep.subr.bf16.mxu1 %v17438_v14  ;;  %v17448_v60 = vld [vmem:[#allocation50_spill] sm:$0xff]  ;;  %v17449_v14 = vld [vmem:[#allocation51_spill] sm:$0xff] }
0x13b9   :  { %12008 = vmatpush1.bf16.msra.mxu0 %v17439_v17  ;;  %12040 = vmatpush1.bf16.msra.mxu1 %v17440_v58  ;;  %v17450_v17 = vld [vmem:[#allocation52_spill] sm:$0xff]  ;;  %v17451_v58 = vld [vmem:[#allocation53_spill] sm:$0xff] }
0x13ba   :  { %12010 = vmatprep.subr.bf16.mxu0 %v17441_v20  ;;  %12042 = vmatprep.subr.bf16.mxu1 %v17442_v43  ;;  %v17452_v20 = vld [vmem:[#allocation54_spill] sm:$0xff]  ;;  %v17453_v43 = vld [vmem:[#allocation55_spill] sm:$0xff] }
0x13bd   :  { %12012 = vmatpush1.bf16.msra.mxu0 %v17443_v10  ;;  %12044 = vmatpush1.bf16.msra.mxu1 %v17444_v38  ;;  %v17454_v10 = vld [vmem:[#allocation56_spill] sm:$0xff] }
0x13be   :  { %12014 = vmatprep.subr.bf16.mxu0 %v17445_v11  ;;  %12046 = vmatprep.subr.bf16.mxu1 %v17446_v25 }
0x13c1   :  { %12016 = vmatpush1.bf16.msra.mxu0 %v17447_v27  ;;  %12048 = vmatpush1.bf16.msra.mxu1 %v17448_v60 }
0x13c2   :  { %12018 = vmatprep.subr.bf16.mxu0 %v17449_v14  ;;  %12050 = vmatprep.subr.bf16.mxu1 %v17450_v17 }
0x13c5   :  { %12020 = vmatpush1.bf16.msra.mxu0 %v17451_v58  ;;  %12052 = vmatpush1.bf16.msra.mxu1 %v17452_v20 }
0x13c6   :  { %12054 = vmatprep.subr.bf16.mxu0 %v17453_v43  ;;  %12086 = vmatprep.subr.bf16.mxu1 %v17454_v10 }
0x145b   :  { %v7427_v38 = vpop.f32.mrb[54].mxu0  ;;  %v7498_v11 = vpop.f32.mrb[54].mxu1 }
0x145c   :  { %v12573_v25 = vadd.f32 %v7427_v38, %v17455_v0  ;;  %v7429_v44 = vpop.f32.mrb[55].mxu0  ;;  %v7500_v27 = vpop.f32.mrb[55].mxu1  ;;  %v12575_v58 = vadd.f32 %v7498_v11, %v17333_v48 }
0x145d   :  { %v12574_v60 = vadd.f32 %v7429_v44, %v17332_v5 }
0x145e   :  { %v9225_v12 = vmul.f32 -1.442695, %v12573_v25 }
0x145f   :  { %v9226_v14 = vmul.f32 -1.442695, %v12574_v60 }
0x1460   :  { %13121 = vpow2.f32 %v9225_v12 }
0x1461   :  { %13123 = vpow2.f32 %v9226_v14 }
0x1462   :  { %13125 = vtanh.f32 %v12575_v58 }
0x146a   :  { %v13122_v17 = vpop.eup %13121 }
0x146b   :  { %v13124_v20 = vpop.eup %13123  ;;  %v7516_v30 = vadd.f32 1.0, %v13122_v17 }
0x146c   :  { %v7517_v43 = vadd.f32 1.0, %v13124_v20  ;;  %v13126_v10 = vpop.eup %13125 }
0x146d   :  { %13127 = vrcp.f32 %v7516_v30 }
0x146e   :  { %13129 = vrcp.f32 %v7517_v43 }
0x1477   :  { %v13128_v18 = vpop.eup %13127 }
0x1478   :  { %v13130_v38 = vpop.eup %13129  ;;  %v7527_v0 = vmul.f32 %v13128_v18, %v13126_v10 }
0x1479   :  { %v7526_v31 = vmul.f32 %v13130_v38, %v15725_v42 }
0x147b   :  { %v15852_v44 = vadd.f32 %v7527_v0, %v7526_v31  ;;  %v7597_v60 = vpop.f32.mrb[56].mxu0  ;;  %v7668_v12 = vpop.f32.mrb[56].mxu1 }
0x147c   :  { %v7673_v25 = vadd.f32 %v7597_v60, %v17271_v50  ;;  %v7599_v11 = vpop.f32.mrb[57].mxu0  ;;  %v7670_v14 = vpop.f32.mrb[57].mxu1  ;;  %v7675_v18 = vadd.f32 %v7668_v12, %v17209_v55 }
0x147d   :  { %v7674_v17 = vadd.f32 %v7599_v11, %v17272_v23  ;;  %v7676_v30 = vadd.f32 %v7670_v14, %v17208_v46 }
0x147e   :  { %v9228_v58 = vmul.f32 -1.442695, %v7673_v25 }
0x147f   :  { %v9229_v20 = vmul.f32 -1.442695, %v7674_v17  ;;  %v9230_v43 = vmul.f32 -1.442695, %v7676_v30 }
0x1480   :  { %13131 = vpow2.f32 %v9228_v58 }
0x1481   :  { %13133 = vpow2.f32 %v9229_v20 }
0x1482   :  { %13135 = vpow2.f32 %v9230_v43 }
0x1483   :  { %13137 = vtanh.f32 %v7675_v18 }
0x148a   :  { %v13132_v42 = vpop.eup %13131 }
0x148b   :  { %v13134_v31 = vpop.eup %13133  ;;  %v7686_v0 = vadd.f32 1.0, %v13132_v42 }
0x148c   :  { %v7687_v10 = vadd.f32 1.0, %v13134_v31  ;;  %v13136_v38 = vpop.eup %13135 }
0x148d   :  { %13139 = vrcp.f32 %v7686_v0  ;;  %v13138_v60 = vpop.eup %13137  ;;  %v7688_v58 = vadd.f32 1.0, %v13136_v38  ;;  %v12576_v0 = vadd.f32 %v7500_v27, %v15355_v24 }
0x148e   :  { %13141 = vrcp.f32 %v7687_v10 }
0x148f   :  { %13143 = vrcp.f32 %v7688_v58  ;;  %v9227_v10 = vmul.f32 -1.442695, %v12576_v0  ;;  %v17458_v58 = vld [vmem:[#allocation86_spill] sm:$0xff] }
0x1490   :  { %v17465_v0 = vld [vmem:[#allocation94_spill] sm:$0xff] }
0x1497   :  { %v13140_v11 = vpop.eup %13139 }
0x1498   :  { %v13142_v25 = vpop.eup %13141  ;;  %v7697_v17 = vmul.f32 %v13140_v11, %v13138_v60 }
0x1499   :  { %v7696_v20 = vmul.f32 %v13142_v25, %v15732_v45  ;;  %v13144_v12 = vpop.eup %13143 }
0x149b   :  { %v15859_v14 = vadd.f32 %v7697_v17, %v7696_v20  ;;  %v17457_v17 = vld [vmem:[#allocation85_spill] sm:$0xff]  ;;  %v17459_v20 = vld [vmem:[#allocation88_spill] sm:$0xff] }
0x149d   :  { %13145 = vtanh.f32 %v15859_v14 }
0x14a7   :  { %v13146_v30 = vpop.eup %13145 }
0x14a8   :  { %v15862_v43 = vmul.f32 %v13146_v30, %v13144_v12  ;;  %v17460_v12 = vld [vmem:[#allocation89_spill] sm:$0xff]  ;;  %v17461_v30 = vld [vmem:[#allocation90_spill] sm:$0xff] }
0x14aa   :  { %v9231_v18 = vmul.f32 -1.442695, %v15862_v43 }
0x14ac   :  { %13147 = vpow2.f32 %v9231_v18  ;;  %v17462_v18 = vld [vmem:[#allocation91_spill] sm:$0xff] }
0x14b6   :  { %v13148_v42 = vpop.eup %13147 }
0x14b7   :  { %v7704_v31 = vadd.f32 1.0, %v13148_v42  ;;  %v17463_v42 = vld [vmem:[#allocation92_spill] sm:$0xff] }
0x14b9   :  { %13149 = vrcp.f32 %v7704_v31  ;;  %v17464_v31 = vld [vmem:[#allocation93_spill] sm:$0xff] }
0x14ba   :  { %13151 = vpow2.f32 %v9227_v10  ;;  %v17466_v10 = vld [vmem:[#allocation95_spill] sm:$0xff] }
0x14bb   :  { %13153 = vtanh.f32 %v15852_v44 }
0x14c3   :  { %v13150_v38 = vpop.eup %13149 }
0x14c4   :  { %7772 = vmatmul.mubr.f32.vlgmr.msra.gmra.mrb[58].mxu0 %v13150_v38  ;;  %7843 = vmatmul.mubr.f32.vlgmr.msra.gmra.mrb[58].mxu1 %v13150_v38  ;;  %v13152_v45 = vpop.eup %13151  ;;  %v17467_v38 = vld [vmem:[#allocation100_spill] sm:$0xff] }
0x14c5   :  { %12056 = vmatpush1.bf16.msra.mxu0 %v17212_v16  ;;  %12088 = vmatpush1.bf16.msra.mxu1 %v17213_v19  ;;  %v7518_v27 = vadd.f32 1.0, %v13152_v45  ;;  %v13154_v60 = vpop.eup %13153  ;;  %v17468_v45 = vld [vmem:[#allocation101_spill] sm:$0xff] }
0x14c6   :  { %12058 = vmatprep.subr.bf16.mxu0 %v17214_v34  ;;  %12090 = vmatprep.subr.bf16.mxu1 %v17215_v3 }
0x14c7   :  { %7913 = vmatprep.mubr.f32.mxu0 %v16672_v39  ;;  %7984 = vmatprep.mubr.f32.mxu1 %v16672_v39  ;;  %13155 = vrcp.f32 %v7518_v27  ;;  %v17469_v27 = vld [vmem:[#allocation102_spill] sm:$0xff] }
0x14c9   :  { %12060 = vmatpush1.bf16.msra.mxu0 %v17216_v59  ;;  %12092 = vmatpush1.bf16.msra.mxu1 %v17273_v61 }
0x14ca   :  { %12062 = vmatprep.subr.bf16.mxu0 %v17274_v21  ;;  %12094 = vmatprep.subr.bf16.mxu1 %v17275_v8 }
0x14cd   :  { %12064 = vmatpush1.bf16.msra.mxu0 %v17276_v22  ;;  %12096 = vmatpush1.bf16.msra.mxu1 %v17221_v28 }
0x14ce   :  { %12066 = vmatprep.subr.bf16.mxu0 %v17222_v49  ;;  %12098 = vmatprep.subr.bf16.mxu1 %v17223_v36 }
0x14d1   :  { %12068 = vmatpush1.bf16.msra.mxu0 %v17224_v57  ;;  %12100 = vmatpush1.bf16.msra.mxu1 %v17225_v53  ;;  %v13156_v11 = vpop.eup %13155 }
0x14d2   :  { %12070 = vmatprep.subr.bf16.mxu0 %v17226_v52  ;;  %12102 = vmatprep.subr.bf16.mxu1 %v17227_v29  ;;  %v15899_v25 = vmul.f32 %v13156_v11, %v13154_v60  ;;  %v17470_v60 = vld [vmem:[#allocation103_spill] sm:$0xff]  ;;  %v17471_v11 = vld [vmem:[#allocation104_spill] sm:$0xff] }
0x14d4   :  { %17456 = vst [vmem:[#allocation60_spill] sm:$0xff] %v15899_v25 }
0x14d5   :  { %12072 = vmatpush1.bf16.msra.mxu0 %v17228_v32  ;;  %12104 = vmatpush1.bf16.msra.mxu1 %v17229_v47 }
0x14d6   :  { %12074 = vmatprep.subr.bf16.mxu0 %v17277_v51  ;;  %12106 = vmatprep.subr.bf16.mxu1 %v15210_v15 }
0x14d9   :  { %12076 = vmatpush1.bf16.msra.mxu0 %v15214_v4  ;;  %12108 = vmatpush1.bf16.msra.mxu1 %v15216_v2 }
0x14da   :  { %12078 = vmatprep.subr.bf16.mxu0 %v15220_v26  ;;  %12110 = vmatprep.subr.bf16.mxu1 %v15222_v9 }
0x14dd   :  { %12080 = vmatpush1.bf16.msra.mxu0 %v15226_v7  ;;  %12112 = vmatpush1.bf16.msra.mxu1 %v15228_v1 }
0x14de   :  { %12082 = vmatprep.subr.bf16.mxu0 %v15232_v63  ;;  %12114 = vmatprep.subr.bf16.mxu1 %v15234_v62 }
0x14e1   :  { %12084 = vmatpush1.bf16.msra.mxu0 %v15238_v37  ;;  %12116 = vmatpush1.bf16.msra.mxu1 %v15240_v6 }
0x14e2   :  { %12118 = vmatprep.subr.bf16.mxu0 %v14920_v13  ;;  %12150 = vmatprep.subr.bf16.mxu1 %v14922_v40 }
0x14e4   :  { %7914 = vmatmul.mubr.f32.vlgmr.msra.gmra.mrb[58].mxu0 %v15899_v25  ;;  %7985 = vmatmul.mubr.f32.vlgmr.msra.gmra.mrb[58].mxu1 %v15899_v25  ;;  %v17472_v25 = vld [vmem:[#allocation105_spill] sm:$0xff] }
0x14e5   :  { %12120 = vmatpush1.bf16.msra.mxu0 %v14931_v56  ;;  %12152 = vmatpush1.bf16.msra.mxu1 %v14933_v54 }
0x14e6   :  { %12122 = vmatprep.subr.bf16.mxu0 %v14935_v33  ;;  %12154 = vmatprep.subr.bf16.mxu1 %v14937_v35 }
0x14e7   :  { %8083 = vmatprep.mubr.f32.mxu0 %v16672_v39  ;;  %8154 = vmatprep.mubr.f32.mxu1 %v16672_v39 }
0x14e9   :  { %12124 = vmatpush1.bf16.msra.mxu0 %v14941_v41  ;;  %12156 = vmatpush1.bf16.msra.mxu1 %v17457_v17 }
0x14ea   :  { %12126 = vmatprep.subr.bf16.mxu0 %v17458_v58  ;;  %12158 = vmatprep.subr.bf16.mxu1 %v17459_v20 }
0x14ed   :  { %12128 = vmatpush1.bf16.msra.mxu0 %v17460_v12  ;;  %12160 = vmatpush1.bf16.msra.mxu1 %v17461_v30 }
0x14ee   :  { %12130 = vmatprep.subr.bf16.mxu0 %v17462_v18  ;;  %12162 = vmatprep.subr.bf16.mxu1 %v17463_v42  ;;  %v17473_v18 = vld [vmem:[#allocation106_spill] sm:$0xff]  ;;  %v17474_v42 = vld [vmem:[#allocation107_spill] sm:$0xff] }
0x14f1   :  { %12132 = vmatpush1.bf16.msra.mxu0 %v17464_v31  ;;  %12164 = vmatpush1.bf16.msra.mxu1 %v17465_v0  ;;  %v17475_v31 = vld [vmem:[#allocation108_spill] sm:$0xff]  ;;  %v17476_v0 = vld [vmem:[#allocation111_spill] sm:$0xff] }
0x14f2   :  { %12134 = vmatprep.subr.bf16.mxu0 %v17466_v10  ;;  %12166 = vmatprep.subr.bf16.mxu1 %v17467_v38  ;;  %v17477_v10 = vld [vmem:[#allocation96_spill] sm:$0xff]  ;;  %v17478_v38 = vld [vmem:[#allocation97_spill] sm:$0xff] }
0x14f5   :  { %12136 = vmatpush1.bf16.msra.mxu0 %v17468_v45  ;;  %12168 = vmatpush1.bf16.msra.mxu1 %v17469_v27  ;;  %v17479_v45 = vld [vmem:[#allocation98_spill] sm:$0xff]  ;;  %v17480_v27 = vld [vmem:[#allocation99_spill] sm:$0xff] }
0x14f6   :  { %12138 = vmatprep.subr.bf16.mxu0 %v17470_v60  ;;  %12170 = vmatprep.subr.bf16.mxu1 %v17471_v11  ;;  %v17481_v60 = vld [vmem:[#allocation109_spill] sm:$0xff]  ;;  %v17482_v11 = vld [vmem:[#allocation23_spill] sm:$0xff] }
0x14f9   :  { %12140 = vmatpush1.bf16.msra.mxu0 %v17472_v25  ;;  %12172 = vmatpush1.bf16.msra.mxu1 %v17473_v18  ;;  %v17483_v25 = vld [vmem:[#allocation24_spill] sm:$0xff]  ;;  %v17516_v18 = vld [vmem:[#allocation81_spill] sm:$0xff] }
0x14fa   :  { %12142 = vmatprep.subr.bf16.mxu0 %v17474_v42  ;;  %12174 = vmatprep.subr.bf16.mxu1 %v17475_v31  ;;  %v17484_v31 = vld [vmem:[#allocation25_spill] sm:$0xff]  ;;  %v17498_v42 = vld [vmem:[#allocation39_spill] sm:$0xff] }
0x14fd   :  { %12144 = vmatpush1.bf16.msra.mxu0 %v17476_v0  ;;  %12176 = vmatpush1.bf16.msra.mxu1 %v17477_v10  ;;  %v17485_v0 = vld [vmem:[#allocation26_spill] sm:$0xff]  ;;  %v17486_v10 = vld [vmem:[#allocation27_spill] sm:$0xff] }
0x14fe   :  { %12146 = vmatprep.subr.bf16.mxu0 %v17478_v38  ;;  %12178 = vmatprep.subr.bf16.mxu1 %v17479_v45  ;;  %v17487_v38 = vld [vmem:[#allocation28_spill] sm:$0xff]  ;;  %v17497_v45 = vld [vmem:[#allocation38_spill] sm:$0xff] }
0x1501   :  { %12148 = vmatpush1.bf16.msra.mxu0 %v17480_v27  ;;  %12180 = vmatpush1.bf16.msra.mxu1 %v17481_v60  ;;  %v17488_v60 = vld [vmem:[#allocation29_spill] sm:$0xff]  ;;  %v17491_v27 = vld [vmem:[#allocation32_spill] sm:$0xff] }
0x1502   :  { %12182 = vmatprep.subr.bf16.mxu0 %v17482_v11  ;;  %12214 = vmatprep.subr.bf16.mxu1 %v17483_v25  ;;  %v17489_v11 = vld [vmem:[#allocation30_spill] sm:$0xff]  ;;  %v17490_v25 = vld [vmem:[#allocation31_spill] sm:$0xff] }
0x1504   :  { %8084 = vmatmul.mubr.f32.vlgmr.msra.gmra.mrb[60].mxu0 %v15862_v43  ;;  %8155 = vmatmul.mubr.f32.vlgmr.msra.gmra.mrb[60].mxu1 %v15862_v43  ;;  %v17492_v43 = vld [vmem:[#allocation33_spill] sm:$0xff] }
0x1505   :  { %12184 = vmatpush1.bf16.msra.mxu0 %v17484_v31  ;;  %12216 = vmatpush1.bf16.msra.mxu1 %v17485_v0  ;;  %v17493_v31 = vld [vmem:[#allocation34_spill] sm:$0xff]  ;;  %v17494_v0 = vld [vmem:[#allocation35_spill] sm:$0xff] }
0x1506   :  { %12186 = vmatprep.subr.bf16.mxu0 %v17486_v10  ;;  %12218 = vmatprep.subr.bf16.mxu1 %v17487_v38  ;;  %v17495_v10 = vld [vmem:[#allocation36_spill] sm:$0xff]  ;;  %v17496_v38 = vld [vmem:[#allocation37_spill] sm:$0xff] }
0x1507   :  { %8259 = vmatprep.mubr.f32.mxu0 %v16672_v39  ;;  %8330 = vmatprep.mubr.f32.mxu1 %v16672_v39 }
0x1509   :  { %12188 = vmatpush1.bf16.msra.mxu0 %v17488_v60  ;;  %12220 = vmatpush1.bf16.msra.mxu1 %v17489_v11  ;;  %v17499_v60 = vld [vmem:[#allocation40_spill] sm:$0xff]  ;;  %v17500_v11 = vld [vmem:[#allocation41_spill] sm:$0xff] }
0x150a   :  { %12190 = vmatprep.subr.bf16.mxu0 %v17490_v25  ;;  %12222 = vmatprep.subr.bf16.mxu1 %v17491_v27  ;;  %v17501_v25 = vld [vmem:[#allocation42_spill] sm:$0xff]  ;;  %v17502_v27 = vld [vmem:[#allocation43_spill] sm:$0xff] }
0x150d   :  { %12192 = vmatpush1.bf16.msra.mxu0 %v17492_v43  ;;  %12224 = vmatpush1.bf16.msra.mxu1 %v17493_v31  ;;  %v17503_v43 = vld [vmem:[#allocation44_spill] sm:$0xff]  ;;  %v17504_v31 = vld [vmem:[#allocation45_spill] sm:$0xff] }
0x150e   :  { %12194 = vmatprep.subr.bf16.mxu0 %v17494_v0  ;;  %12226 = vmatprep.subr.bf16.mxu1 %v17495_v10  ;;  %v17505_v0 = vld [vmem:[#allocation46_spill] sm:$0xff]  ;;  %v17506_v10 = vld [vmem:[#allocation47_spill] sm:$0xff] }
0x1511   :  { %12196 = vmatpush1.bf16.msra.mxu0 %v17496_v38  ;;  %12228 = vmatpush1.bf16.msra.mxu1 %v17497_v45  ;;  %v17507_v38 = vld [vmem:[#allocation48_spill] sm:$0xff]  ;;  %v17508_v45 = vld [vmem:[#allocation49_spill] sm:$0xff] }
0x1512   :  { %12198 = vmatprep.subr.bf16.mxu0 %v17498_v42  ;;  %12230 = vmatprep.subr.bf16.mxu1 %v17499_v60  ;;  %v17509_v42 = vld [vmem:[#allocation50_spill] sm:$0xff]  ;;  %v17510_v60 = vld [vmem:[#allocation51_spill] sm:$0xff] }
0x1515   :  { %12200 = vmatpush1.bf16.msra.mxu0 %v17500_v11  ;;  %12232 = vmatpush1.bf16.msra.mxu1 %v17501_v25  ;;  %v17511_v11 = vld [vmem:[#allocation52_spill] sm:$0xff]  ;;  %v17512_v25 = vld [vmem:[#allocation53_spill] sm:$0xff] }
0x1516   :  { %12202 = vmatprep.subr.bf16.mxu0 %v17502_v27  ;;  %12234 = vmatprep.subr.bf16.mxu1 %v17503_v43  ;;  %v17513_v27 = vld [vmem:[#allocation54_spill] sm:$0xff]  ;;  %v17514_v43 = vld [vmem:[#allocation55_spill] sm:$0xff] }
0x1519   :  { %12204 = vmatpush1.bf16.msra.mxu0 %v17504_v31  ;;  %12236 = vmatpush1.bf16.msra.mxu1 %v17505_v0  ;;  %v17515_v31 = vld [vmem:[#allocation56_spill] sm:$0xff] }
0x151a   :  { %12206 = vmatprep.subr.bf16.mxu0 %v17506_v10  ;;  %12238 = vmatprep.subr.bf16.mxu1 %v17507_v38 }
0x151d   :  { %12208 = vmatpush1.bf16.msra.mxu0 %v17508_v45  ;;  %12240 = vmatpush1.bf16.msra.mxu1 %v17509_v42 }
0x151e   :  { %12210 = vmatprep.subr.bf16.mxu0 %v17510_v60  ;;  %12242 = vmatprep.subr.bf16.mxu1 %v17511_v11 }
0x1521   :  { %12212 = vmatpush1.bf16.msra.mxu0 %v17512_v25  ;;  %12244 = vmatpush1.bf16.msra.mxu1 %v17513_v27 }
0x1522   :  { %12246 = vmatprep.subr.bf16.mxu0 %v17514_v43  ;;  %12278 = vmatprep.subr.bf16.mxu1 %v17515_v31 }
0x15b7   :  { %v7915_v0 = vpop.f32.mrb[58].mxu0  ;;  %v7986_v10 = vpop.f32.mrb[58].mxu1 }
0x15b8   :  { %v12577_v38 = vadd.f32 %v7915_v0, %v17516_v18  ;;  %v7917_v30 = vpop.f32.mrb[59].mxu0  ;;  %v7988_v45 = vpop.f32.mrb[59].mxu1  ;;  %v12579_v25 = vadd.f32 %v7986_v10, %v17333_v48 }
0x15b9   :  { %v12578_v42 = vadd.f32 %v7917_v30, %v17332_v5 }
0x15ba   :  { %v9232_v12 = vmul.f32 -1.442695, %v12577_v38 }
0x15bb   :  { %v9233_v60 = vmul.f32 -1.442695, %v12578_v42 }
0x15bc   :  { %13157 = vpow2.f32 %v9232_v12 }
0x15bd   :  { %13159 = vpow2.f32 %v9233_v60 }
0x15be   :  { %13161 = vtanh.f32 %v12579_v25 }
0x15c6   :  { %v13158_v11 = vpop.eup %13157 }
0x15c7   :  { %v13160_v27 = vpop.eup %13159  ;;  %v8004_v20 = vadd.f32 1.0, %v13158_v11 }
0x15c8   :  { %v8005_v43 = vadd.f32 1.0, %v13160_v27  ;;  %v13162_v31 = vpop.eup %13161 }
0x15c9   :  { %13163 = vrcp.f32 %v8004_v20 }
0x15ca   :  { %13165 = vrcp.f32 %v8005_v43 }
0x15d3   :  { %v13164_v58 = vpop.eup %13163 }
0x15d4   :  { %v13166_v0 = vpop.eup %13165  ;;  %v8015_v18 = vmul.f32 %v13164_v58, %v13162_v31 }
0x15d5   :  { %v8014_v17 = vmul.f32 %v13166_v0, %v15852_v44 }
0x15d7   :  { %v15979_v30 = vadd.f32 %v8015_v18, %v8014_v17  ;;  %v8085_v42 = vpop.f32.mrb[60].mxu0  ;;  %v8156_v12 = vpop.f32.mrb[60].mxu1 }
0x15d8   :  { %v8161_v38 = vadd.f32 %v8085_v42, %v17271_v50  ;;  %v8087_v10 = vpop.f32.mrb[61].mxu0  ;;  %v8158_v60 = vpop.f32.mrb[61].mxu1  ;;  %v8163_v58 = vadd.f32 %v8156_v12, %v17209_v55 }
0x15d9   :  { %v8162_v11 = vadd.f32 %v8087_v10, %v17272_v23  ;;  %v8164_v20 = vadd.f32 %v8158_v60, %v17208_v46 }
0x15da   :  { %v9235_v25 = vmul.f32 -1.442695, %v8161_v38 }
0x15db   :  { %v9236_v27 = vmul.f32 -1.442695, %v8162_v11  ;;  %v9237_v43 = vmul.f32 -1.442695, %v8164_v20 }
0x15dc   :  { %13167 = vpow2.f32 %v9235_v25 }
0x15dd   :  { %13169 = vpow2.f32 %v9236_v27 }
0x15de   :  { %13171 = vpow2.f32 %v9237_v43 }
0x15df   :  { %13173 = vtanh.f32 %v8163_v58 }
0x15e6   :  { %v13168_v44 = vpop.eup %13167 }
0x15e7   :  { %v13170_v17 = vpop.eup %13169  ;;  %v8174_v18 = vadd.f32 1.0, %v13168_v44 }
0x15e8   :  { %v8175_v31 = vadd.f32 1.0, %v13170_v17  ;;  %v13172_v0 = vpop.eup %13171 }
0x15e9   :  { %13175 = vrcp.f32 %v8174_v18  ;;  %v13174_v42 = vpop.eup %13173  ;;  %v8176_v25 = vadd.f32 1.0, %v13172_v0  ;;  %v12580_v18 = vadd.f32 %v7988_v45, %v15355_v24 }
0x15ea   :  { %13177 = vrcp.f32 %v8175_v31 }
0x15eb   :  { %13179 = vrcp.f32 %v8176_v25  ;;  %v9234_v31 = vmul.f32 -1.442695, %v12580_v18  ;;  %v17520_v25 = vld [vmem:[#allocation89_spill] sm:$0xff] }
0x15ec   :  { %v17532_v18 = vld [vmem:[#allocation105_spill] sm:$0xff] }
0x15f3   :  { %v13176_v10 = vpop.eup %13175 }
0x15f4   :  { %v13178_v38 = vpop.eup %13177  ;;  %v8185_v11 = vmul.f32 %v13176_v10, %v13174_v42 }
0x15f5   :  { %v8184_v27 = vmul.f32 %v13178_v38, %v15859_v14  ;;  %v13180_v12 = vpop.eup %13179 }
0x15f7   :  { %v15986_v60 = vadd.f32 %v8185_v11, %v8184_v27  ;;  %v17519_v11 = vld [vmem:[#allocation88_spill] sm:$0xff]  ;;  %v17525_v27 = vld [vmem:[#allocation94_spill] sm:$0xff] }
0x15f9   :  { %13181 = vtanh.f32 %v15986_v60 }
0x1603   :  { %v13182_v20 = vpop.eup %13181 }
0x1604   :  { %v15989_v43 = vmul.f32 %v13182_v20, %v13180_v12  ;;  %v17526_v12 = vld [vmem:[#allocation95_spill] sm:$0xff]  ;;  %v17528_v20 = vld [vmem:[#allocation101_spill] sm:$0xff] }
0x1606   :  { %v9238_v58 = vmul.f32 -1.442695, %v15989_v43 }
0x1608   :  { %13183 = vpow2.f32 %v9238_v58  ;;  %v17529_v58 = vld [vmem:[#allocation102_spill] sm:$0xff] }
0x1612   :  { %v13184_v44 = vpop.eup %13183 }
0x1613   :  { %v8192_v17 = vadd.f32 1.0, %v13184_v44  ;;  %v17530_v44 = vld [vmem:[#allocation103_spill] sm:$0xff] }
0x1615   :  { %13185 = vrcp.f32 %v8192_v17  ;;  %v17531_v17 = vld [vmem:[#allocation104_spill] sm:$0xff] }
0x1616   :  { %13187 = vpow2.f32 %v9234_v31  ;;  %v17533_v31 = vld [vmem:[#allocation106_spill] sm:$0xff] }
0x1617   :  { %13189 = vtanh.f32 %v15979_v30 }
0x161f   :  { %v13186_v0 = vpop.eup %13185 }
0x1620   :  { %8260 = vmatmul.mubr.f32.vlgmr.msra.gmra.mrb[62].mxu0 %v13186_v0  ;;  %8331 = vmatmul.mubr.f32.vlgmr.msra.gmra.mrb[62].mxu1 %v13186_v0  ;;  %v13188_v14 = vpop.eup %13187  ;;  %v17534_v0 = vld [vmem:[#allocation107_spill] sm:$0xff] }
0x1621   :  { %12248 = vmatpush1.bf16.msra.mxu0 %v17212_v16  ;;  %12280 = vmatpush1.bf16.msra.mxu1 %v17213_v19  ;;  %v8006_v45 = vadd.f32 1.0, %v13188_v14  ;;  %v13190_v42 = vpop.eup %13189  ;;  %v17535_v14 = vld [vmem:[#allocation108_spill] sm:$0xff] }
0x1622   :  { %12250 = vmatprep.subr.bf16.mxu0 %v17214_v34  ;;  %12282 = vmatprep.subr.bf16.mxu1 %v17215_v3 }
0x1623   :  { %8401 = vmatprep.mubr.f32.mxu0 %v16672_v39  ;;  %8472 = vmatprep.mubr.f32.mxu1 %v16672_v39  ;;  %13191 = vrcp.f32 %v8006_v45  ;;  %v17536_v45 = vld [vmem:[#allocation111_spill] sm:$0xff] }
0x1625   :  { %12252 = vmatpush1.bf16.msra.mxu0 %v17216_v59  ;;  %12284 = vmatpush1.bf16.msra.mxu1 %v17273_v61 }
0x1626   :  { %12254 = vmatprep.subr.bf16.mxu0 %v17274_v21  ;;  %12286 = vmatprep.subr.bf16.mxu1 %v17275_v8 }
0x1629   :  { %12256 = vmatpush1.bf16.msra.mxu0 %v17276_v22  ;;  %12288 = vmatpush1.bf16.msra.mxu1 %v17221_v28 }
0x162a   :  { %12258 = vmatprep.subr.bf16.mxu0 %v17222_v49  ;;  %12290 = vmatprep.subr.bf16.mxu1 %v17223_v36 }
0x162d   :  { %12260 = vmatpush1.bf16.msra.mxu0 %v17224_v57  ;;  %12292 = vmatpush1.bf16.msra.mxu1 %v17225_v53  ;;  %v13192_v10 = vpop.eup %13191 }
0x162e   :  { %12262 = vmatprep.subr.bf16.mxu0 %v17226_v52  ;;  %12294 = vmatprep.subr.bf16.mxu1 %v17227_v29  ;;  %v16026_v38 = vmul.f32 %v13192_v10, %v13190_v42  ;;  %v17537_v42 = vld [vmem:[#allocation96_spill] sm:$0xff]  ;;  %v17538_v10 = vld [vmem:[#allocation97_spill] sm:$0xff] }
0x1631   :  { %12264 = vmatpush1.bf16.msra.mxu0 %v17228_v32  ;;  %12296 = vmatpush1.bf16.msra.mxu1 %v17229_v47 }
0x1632   :  { %12266 = vmatprep.subr.bf16.mxu0 %v17277_v51  ;;  %12298 = vmatprep.subr.bf16.mxu1 %v15210_v15 }
0x1635   :  { %12268 = vmatpush1.bf16.msra.mxu0 %v15214_v4  ;;  %12300 = vmatpush1.bf16.msra.mxu1 %v15216_v2 }
0x1636   :  { %12270 = vmatprep.subr.bf16.mxu0 %v15220_v26  ;;  %12302 = vmatprep.subr.bf16.mxu1 %v15222_v9 }
0x1639   :  { %12272 = vmatpush1.bf16.msra.mxu0 %v15226_v7  ;;  %12304 = vmatpush1.bf16.msra.mxu1 %v15228_v1 }
0x163a   :  { %12274 = vmatprep.subr.bf16.mxu0 %v15232_v63  ;;  %12306 = vmatprep.subr.bf16.mxu1 %v15234_v62 }
0x163d   :  { %12276 = vmatpush1.bf16.msra.mxu0 %v15238_v37  ;;  %12308 = vmatpush1.bf16.msra.mxu1 %v15240_v6 }
0x163e   :  { %12310 = vmatprep.subr.bf16.mxu0 %v14920_v13  ;;  %12342 = vmatprep.subr.bf16.mxu1 %v14922_v40  ;;  %v17517_v13 = vld [vmem:[#allocation85_spill] sm:$0xff]  ;;  %v17518_v40 = vld [vmem:[#allocation86_spill] sm:$0xff] }
0x1640   :  { %8402 = vmatmul.mubr.f32.vlgmr.msra.gmra.mrb[62].mxu0 %v16026_v38  ;;  %8473 = vmatmul.mubr.f32.vlgmr.msra.gmra.mrb[62].mxu1 %v16026_v38 }
0x1641   :  { %12312 = vmatpush1.bf16.msra.mxu0 %v14931_v56  ;;  %12344 = vmatpush1.bf16.msra.mxu1 %v14933_v54  ;;  %v17521_v56 = vld [vmem:[#allocation90_spill] sm:$0xff]  ;;  %v17522_v54 = vld [vmem:[#allocation91_spill] sm:$0xff] }
0x1642   :  { %12314 = vmatprep.subr.bf16.mxu0 %v14935_v33  ;;  %12346 = vmatprep.subr.bf16.mxu1 %v14937_v35  ;;  %v17523_v33 = vld [vmem:[#allocation92_spill] sm:$0xff]  ;;  %v17524_v35 = vld [vmem:[#allocation93_spill] sm:$0xff] }
0x1643   :  { %8571 = vmatprep.mubr.f32.mxu0 %v16672_v39  ;;  %8642 = vmatprep.mubr.f32.mxu1 %v16672_v39 }
0x1645   :  { %12316 = vmatpush1.bf16.msra.mxu0 %v14941_v41  ;;  %12348 = vmatpush1.bf16.msra.mxu1 %v17517_v13  ;;  %v17527_v41 = vld [vmem:[#allocation100_spill] sm:$0xff]  ;;  %v17539_v13 = vld [vmem:[#allocation98_spill] sm:$0xff] }
0x1646   :  { %12318 = vmatprep.subr.bf16.mxu0 %v17518_v40  ;;  %12350 = vmatprep.subr.bf16.mxu1 %v17519_v11  ;;  %v17540_v40 = vld [vmem:[#allocation99_spill] sm:$0xff]  ;;  %v17541_v11 = vld [vmem:[#allocation109_spill] sm:$0xff] }
0x1649   :  { %12320 = vmatpush1.bf16.msra.mxu0 %v17520_v25  ;;  %12352 = vmatpush1.bf16.msra.mxu1 %v17521_v56  ;;  %v17542_v25 = vld [vmem:[#allocation23_spill] sm:$0xff]  ;;  %v17543_v56 = vld [vmem:[#allocation24_spill] sm:$0xff] }
0x164a   :  { %12322 = vmatprep.subr.bf16.mxu0 %v17522_v54  ;;  %12354 = vmatprep.subr.bf16.mxu1 %v17523_v33  ;;  %v17544_v54 = vld [vmem:[#allocation25_spill] sm:$0xff]  ;;  %v17545_v33 = vld [vmem:[#allocation26_spill] sm:$0xff] }
0x164d   :  { %12324 = vmatpush1.bf16.msra.mxu0 %v17524_v35  ;;  %12356 = vmatpush1.bf16.msra.mxu1 %v17525_v27  ;;  %v17546_v35 = vld [vmem:[#allocation27_spill] sm:$0xff]  ;;  %v17547_v27 = vld [vmem:[#allocation28_spill] sm:$0xff] }
0x164e   :  { %12326 = vmatprep.subr.bf16.mxu0 %v17526_v12  ;;  %12358 = vmatprep.subr.bf16.mxu1 %v17527_v41  ;;  %v17548_v12 = vld [vmem:[#allocation29_spill] sm:$0xff]  ;;  %v17549_v41 = vld [vmem:[#allocation30_spill] sm:$0xff] }
0x1651   :  { %12328 = vmatpush1.bf16.msra.mxu0 %v17528_v20  ;;  %12360 = vmatpush1.bf16.msra.mxu1 %v17529_v58  ;;  %v17550_v20 = vld [vmem:[#allocation31_spill] sm:$0xff]  ;;  %v17551_v58 = vld [vmem:[#allocation32_spill] sm:$0xff] }
0x1652   :  { %12330 = vmatprep.subr.bf16.mxu0 %v17530_v44  ;;  %12362 = vmatprep.subr.bf16.mxu1 %v17531_v17  ;;  %v17553_v44 = vld [vmem:[#allocation34_spill] sm:$0xff]  ;;  %v17554_v17 = vld [vmem:[#allocation35_spill] sm:$0xff] }
0x1655   :  { %12332 = vmatpush1.bf16.msra.mxu0 %v17532_v18  ;;  %12364 = vmatpush1.bf16.msra.mxu1 %v17533_v31  ;;  %v17555_v18 = vld [vmem:[#allocation36_spill] sm:$0xff]  ;;  %v17556_v31 = vld [vmem:[#allocation37_spill] sm:$0xff] }
0x1656   :  { %12334 = vmatprep.subr.bf16.mxu0 %v17534_v0  ;;  %12366 = vmatprep.subr.bf16.mxu1 %v17535_v14  ;;  %v17557_v0 = vld [vmem:[#allocation38_spill] sm:$0xff]  ;;  %v17558_v14 = vld [vmem:[#allocation39_spill] sm:$0xff] }
0x1659   :  { %12336 = vmatpush1.bf16.msra.mxu0 %v17536_v45  ;;  %12368 = vmatpush1.bf16.msra.mxu1 %v17537_v42  ;;  %v17559_v45 = vld [vmem:[#allocation40_spill] sm:$0xff]  ;;  %v17560_v42 = vld [vmem:[#allocation41_spill] sm:$0xff] }
0x165a   :  { %12338 = vmatprep.subr.bf16.mxu0 %v17538_v10  ;;  %12370 = vmatprep.subr.bf16.mxu1 %v17539_v13  ;;  %v17561_v10 = vld [vmem:[#allocation42_spill] sm:$0xff]  ;;  %v17562_v13 = vld [vmem:[#allocation43_spill] sm:$0xff] }
0x165d   :  { %12340 = vmatpush1.bf16.msra.mxu0 %v17540_v40  ;;  %12372 = vmatpush1.bf16.msra.mxu1 %v17541_v11  ;;  %v17563_v40 = vld [vmem:[#allocation44_spill] sm:$0xff]  ;;  %v17564_v11 = vld [vmem:[#allocation45_spill] sm:$0xff] }
0x165e   :  { %12374 = vmatprep.subr.bf16.mxu0 %v17542_v25  ;;  %12406 = vmatprep.subr.bf16.mxu1 %v17543_v56  ;;  %v17565_v25 = vld [vmem:[#allocation46_spill] sm:$0xff]  ;;  %v17566_v56 = vld [vmem:[#allocation47_spill] sm:$0xff] }
0x1660   :  { %8572 = vmatmul.mubr.f32.vlgmr.msra.gmra.mrb[64].mxu0 %v15989_v43  ;;  %8643 = vmatmul.mubr.f32.vlgmr.msra.gmra.mrb[64].mxu1 %v15989_v43  ;;  %v17552_v43 = vld [vmem:[#allocation33_spill] sm:$0xff] }
0x1661   :  { %12376 = vmatpush1.bf16.msra.mxu0 %v17544_v54  ;;  %12408 = vmatpush1.bf16.msra.mxu1 %v17545_v33  ;;  %v17567_v54 = vld [vmem:[#allocation48_spill] sm:$0xff]  ;;  %v17568_v33 = vld [vmem:[#allocation49_spill] sm:$0xff] }
0x1662   :  { %12378 = vmatprep.subr.bf16.mxu0 %v17546_v35  ;;  %12410 = vmatprep.subr.bf16.mxu1 %v17547_v27  ;;  %v17569_v35 = vld [vmem:[#allocation50_spill] sm:$0xff]  ;;  %v17570_v27 = vld [vmem:[#allocation51_spill] sm:$0xff] }
0x1663   :  { %8747 = vmatprep.mubr.f32.mxu0 %v16672_v39  ;;  %8818 = vmatprep.mubr.f32.mxu1 %v16672_v39 }
0x1665   :  { %12380 = vmatpush1.bf16.msra.mxu0 %v17548_v12  ;;  %12412 = vmatpush1.bf16.msra.mxu1 %v17549_v41  ;;  %v17571_v12 = vld [vmem:[#allocation52_spill] sm:$0xff]  ;;  %v17572_v41 = vld [vmem:[#allocation53_spill] sm:$0xff] }
0x1666   :  { %12382 = vmatprep.subr.bf16.mxu0 %v17550_v20  ;;  %12414 = vmatprep.subr.bf16.mxu1 %v17551_v58  ;;  %v17573_v20 = vld [vmem:[#allocation54_spill] sm:$0xff]  ;;  %v17574_v58 = vld [vmem:[#allocation55_spill] sm:$0xff] }
0x1669   :  { %12384 = vmatpush1.bf16.msra.mxu0 %v17552_v43  ;;  %12416 = vmatpush1.bf16.msra.mxu1 %v17553_v44  ;;  %v17575_v43 = vld [vmem:[#allocation56_spill] sm:$0xff] }
0x166a   :  { %12386 = vmatprep.subr.bf16.mxu0 %v17554_v17  ;;  %12418 = vmatprep.subr.bf16.mxu1 %v17555_v18  ;;  %v17576_v18 = vld [vmem:[#allocation81_spill] sm:$0xff] }
0x166d   :  { %12388 = vmatpush1.bf16.msra.mxu0 %v17556_v31  ;;  %12420 = vmatpush1.bf16.msra.mxu1 %v17557_v0 }
0x166e   :  { %12390 = vmatprep.subr.bf16.mxu0 %v17558_v14  ;;  %12422 = vmatprep.subr.bf16.mxu1 %v17559_v45 }
0x1671   :  { %12392 = vmatpush1.bf16.msra.mxu0 %v17560_v42  ;;  %12424 = vmatpush1.bf16.msra.mxu1 %v17561_v10 }
0x1672   :  { %12394 = vmatprep.subr.bf16.mxu0 %v17562_v13  ;;  %12426 = vmatprep.subr.bf16.mxu1 %v17563_v40 }
0x1675   :  { %12396 = vmatpush1.bf16.msra.mxu0 %v17564_v11  ;;  %12428 = vmatpush1.bf16.msra.mxu1 %v17565_v25 }
0x1676   :  { %12398 = vmatprep.subr.bf16.mxu0 %v17566_v56  ;;  %12430 = vmatprep.subr.bf16.mxu1 %v17567_v54 }
0x1679   :  { %12400 = vmatpush1.bf16.msra.mxu0 %v17568_v33  ;;  %12432 = vmatpush1.bf16.msra.mxu1 %v17569_v35 }
0x167a   :  { %12402 = vmatprep.subr.bf16.mxu0 %v17570_v27  ;;  %12434 = vmatprep.subr.bf16.mxu1 %v17571_v12 }
0x167d   :  { %12404 = vmatpush1.bf16.msra.mxu0 %v17572_v41  ;;  %12436 = vmatpush1.bf16.msra.mxu1 %v17573_v20 }
0x167e   :  { %12438 = vmatprep.subr.bf16.mxu0 %v17574_v58  ;;  %12470 = vmatprep.subr.bf16.mxu1 %v17575_v43 }
0x1713   :  { %v8403_v44 = vpop.f32.mrb[62].mxu0  ;;  %v8474_v17 = vpop.f32.mrb[62].mxu1 }
0x1714   :  { %v12581_v31 = vadd.f32 %v8403_v44, %v17576_v18  ;;  %v8405_v0 = vpop.f32.mrb[63].mxu0  ;;  %v8476_v14 = vpop.f32.mrb[63].mxu1  ;;  %v12583_v13 = vadd.f32 %v8474_v17, %v17333_v48 }
0x1715   :  { %v12582_v45 = vadd.f32 %v8405_v0, %v17332_v5 }
0x1716   :  { %v9239_v42 = vmul.f32 -1.442695, %v12581_v31 }
0x1717   :  { %v9240_v10 = vmul.f32 -1.442695, %v12582_v45 }
0x1718   :  { %13193 = vpow2.f32 %v9239_v42 }
0x1719   :  { %13195 = vpow2.f32 %v9240_v10 }
0x171a   :  { %13197 = vtanh.f32 %v12583_v13 }
0x1722   :  { %v13194_v40 = vpop.eup %13193 }
0x1723   :  { %v13196_v11 = vpop.eup %13195  ;;  %v8492_v25 = vadd.f32 1.0, %v13194_v40 }
0x1724   :  { %v8493_v56 = vadd.f32 1.0, %v13196_v11  ;;  %v13198_v54 = vpop.eup %13197 }
0x1725   :  { %13199 = vrcp.f32 %v8492_v25 }
0x1726   :  { %13201 = vrcp.f32 %v8493_v56 }
0x172f   :  { %v13200_v33 = vpop.eup %13199 }
0x1730   :  { %v13202_v35 = vpop.eup %13201  ;;  %v8503_v27 = vmul.f32 %v13200_v33, %v13198_v54 }
0x1731   :  { %v8502_v12 = vmul.f32 %v13202_v35, %v15979_v30 }
0x1733   :  { %v16106_v41 = vadd.f32 %v8503_v27, %v8502_v12  ;;  %v8573_v20 = vpop.f32.mrb[64].mxu0  ;;  %v8644_v58 = vpop.f32.mrb[64].mxu1 }
0x1734   :  { %v8649_v43 = vadd.f32 %v8573_v20, %v17271_v50  ;;  %v8575_v44 = vpop.f32.mrb[65].mxu0  ;;  %v8646_v17 = vpop.f32.mrb[65].mxu1  ;;  %v8651_v13 = vadd.f32 %v8644_v58, %v17209_v55 }
0x1735   :  { %v8650_v31 = vadd.f32 %v8575_v44, %v17272_v23  ;;  %v8652_v42 = vadd.f32 %v8646_v17, %v17208_v46  ;;  %v12584_v17 = vadd.f32 %v8476_v14, %v15355_v24 }
0x1736   :  { %v9242_v0 = vmul.f32 -1.442695, %v8649_v43 }
0x1737   :  { %v9243_v45 = vmul.f32 -1.442695, %v8650_v31  ;;  %v9244_v10 = vmul.f32 -1.442695, %v8652_v42  ;;  %v9241_v31 = vmul.f32 -1.442695, %v12584_v17 }
0x1738   :  { %13203 = vpow2.f32 %v9242_v0  ;;  %v17580_v17 = vld [vmem:[#allocation60_spill] sm:$0xff] }
0x1739   :  { %13205 = vpow2.f32 %v9243_v45 }
0x173a   :  { %13207 = vpow2.f32 %v9244_v10 }
0x173b   :  { %13209 = vtanh.f32 %v8651_v13 }
0x1742   :  { %v13204_v30 = vpop.eup %13203 }
0x1743   :  { %v13206_v40 = vpop.eup %13205  ;;  %v8662_v11 = vadd.f32 1.0, %v13204_v30 }
0x1744   :  { %v8663_v25 = vadd.f32 1.0, %v13206_v40  ;;  %v13208_v50 = vpop.eup %13207 }
0x1745   :  { %13211 = vrcp.f32 %v8662_v11  ;;  %v13210_v56 = vpop.eup %13209  ;;  %v8664_v35 = vadd.f32 1.0, %v13208_v50 }
0x1746   :  { %13213 = vrcp.f32 %v8663_v25 }
0x1747   :  { %13215 = vrcp.f32 %v8664_v35 }
0x174f   :  { %v13212_v23 = vpop.eup %13211 }
0x1750   :  { %v13214_v54 = vpop.eup %13213  ;;  %v8673_v33 = vmul.f32 %v13212_v23, %v13210_v56 }
0x1751   :  { %v8672_v27 = vmul.f32 %v13214_v54, %v15986_v60  ;;  %v13216_v55 = vpop.eup %13215 }
0x1753   :  { %v8674_v46 = vadd.f32 %v8673_v33, %v8672_v27 }
0x1755   :  { %13217 = vtanh.f32 %v8674_v46 }
0x175f   :  { %v13218_v12 = vpop.eup %13217 }
0x1760   :  { %v8676_v20 = vmul.f32 %v13218_v12, %v13216_v55 }
0x1762   :  { %v9245_v58 = vmul.f32 -1.442695, %v8676_v20  ;;  %v17578_v20 = vld [vmem:[#allocation87_spill] sm:$0xff] }
0x1764   :  { %13219 = vpow2.f32 %v9245_v58  ;;  %v8999_v58 = vrot.slane %v17578_v20, 6 }
0x176e   :  { %v13220_v43 = vpop.eup %13219 }
0x176f   :  { %v8680_v44 = vadd.f32 1.0, %v13220_v43  ;;  %v17579_v43 = vld [vmem:[#allocation59_spill] sm:$0xff] }
0x1771   :  { %13221 = vrcp.f32 %v8680_v44  ;;  %v9002_v44 = vrot.slane %v17579_v43, 5 }
0x1772   :  { %13223 = vpow2.f32 %v9241_v31  ;;  %v9005_v31 = vrot.slane %v17580_v17, 4 }
0x1773   :  { %13225 = vtanh.f32 %v16106_v41 }
0x177b   :  { %v13222_v0 = vpop.eup %13221 }
0x177c   :  { %8748 = vmatmul.mubr.f32.vlgmr.msra.gmra.mrb[66].mxu0 %v13222_v0  ;;  %8819 = vmatmul.mubr.f32.vlgmr.msra.gmra.mrb[66].mxu1 %v13222_v0 }
0x177d   :  { %12440 = vmatpush1.bf16.msra.mxu0 %v17212_v16  ;;  %12472 = vmatpush1.bf16.msra.mxu1 %v17213_v19  ;;  %v13224_v16 = vpop.eup %13223 }
0x177e   :  { %12442 = vmatprep.subr.bf16.mxu0 %v17214_v34  ;;  %12474 = vmatprep.subr.bf16.mxu1 %v17215_v3  ;;  %v8494_v19 = vadd.f32 1.0, %v13224_v16  ;;  %v13226_v34 = vpop.eup %13225  ;;  %v17581_v16 = vld [vmem:[#allocation82_spill] sm:$0xff] }
0x177f   :  { %8889 = vmatprep.mubr.f32.mxu0 %v16672_v39  ;;  %8960 = vmatprep.mubr.f32.mxu1 %v16672_v39 }
0x1780   :  { %13227 = vrcp.f32 %v8494_v19 }
0x1781   :  { %12444 = vmatpush1.bf16.msra.mxu0 %v17216_v59  ;;  %12476 = vmatpush1.bf16.msra.mxu1 %v17273_v61  ;;  %v9036_v59 = vld [vmem:[%s16237_s13 + $0x30] sm:$0xff]  ;;  %v9043_v61 = vld [vmem:[%s16237_s13 + $0x68] sm:$0xff] }
0x1782   :  { %12446 = vmatprep.subr.bf16.mxu0 %v17274_v21  ;;  %12478 = vmatprep.subr.bf16.mxu1 %v17275_v8  ;;  %v9044_v8 = vld [vmem:[%s16237_s13 + $0x70] sm:$0xff] }
0x1785   :  { %12448 = vmatpush1.bf16.msra.mxu0 %v17276_v22  ;;  %12480 = vmatpush1.bf16.msra.mxu1 %v17221_v28  ;;  %v9039_v28 = vld [vmem:[%s16237_s13 + $0x48] sm:$0xff] }
0x1786   :  { %12450 = vmatprep.subr.bf16.mxu0 %v17222_v49  ;;  %12482 = vmatprep.subr.bf16.mxu1 %v17223_v36  ;;  %v9040_v36 = vld [vmem:[%s16237_s13 + $0x50] sm:$0xff] }
0x1789   :  { %12452 = vmatpush1.bf16.msra.mxu0 %v17224_v57  ;;  %12484 = vmatpush1.bf16.msra.mxu1 %v17225_v53  ;;  %v9041_v57 = vld [vmem:[%s16237_s13 + $0x58] sm:$0xff] }
0x178a   :  { %12454 = vmatprep.subr.bf16.mxu0 %v17226_v52  ;;  %12486 = vmatprep.subr.bf16.mxu1 %v17227_v29  ;;  %v13228_v3 = vpop.eup %13227  ;;  %v9037_v29 = vld [vmem:[%s16237_s13 + $0x38] sm:$0xff]  ;;  %v12517_v53 = vpack.c.bf16 %v9041_v57, %v9040_v36  ;;  %v9042_v52 = vld [vmem:[%s16237_s13 + $0x60] sm:$0xff] }
0x178b   :  { %v12520_v21 = vpack.c.bf16 %v9043_v61, %v9042_v52 }
0x178d   :  { %12456 = vmatpush1.bf16.msra.mxu0 %v17228_v32  ;;  %12488 = vmatpush1.bf16.msra.mxu1 %v17229_v47  ;;  %v12511_v32 = vpack.c.bf16 %v9037_v29, %v9036_v59  ;;  %v9038_v47 = vld [vmem:[%s16237_s13 + $0x40] sm:$0xff] }
0x178e   :  { %12458 = vmatprep.subr.bf16.mxu0 %v17277_v51  ;;  %12490 = vmatprep.subr.bf16.mxu1 %v15210_v15  ;;  %v16147_v15 = vmul.f32 %v13228_v3, %v13226_v34  ;;  %v12514_v49 = vpack.c.bf16 %v9039_v28, %v9038_v47  ;;  %v9008_v34 = vrot.slane %v16026_v38, 3 }
0x1790   :  { %v9011_v3 = vrot.slane %v16147_v15, 2 }
0x1791   :  { %12460 = vmatpush1.bf16.msra.mxu0 %v15214_v4  ;;  %12492 = vmatpush1.bf16.msra.mxu1 %v15216_v2  ;;  %v9030_v4 = vld [vmem:[%s16237_s13] sm:$0xff]  ;;  %v9031_v2 = vld [vmem:[%s16237_s13 + $0x8] sm:$0xff] }
0x1792   :  { %12462 = vmatprep.subr.bf16.mxu0 %v15220_v26  ;;  %12494 = vmatprep.subr.bf16.mxu1 %v15222_v9  ;;  %v12502_v26 = vpack.c.bf16 %v9031_v2, %v9030_v4  ;;  %v13466_v9 = vmov 0.0|0.0  }
0x1795   :  { %12464 = vmatpush1.bf16.msra.mxu0 %v15226_v7  ;;  %12496 = vmatpush1.bf16.msra.mxu1 %v15228_v1  ;;  %v9032_v7 = vld [vmem:[%s16237_s13 + $0x10] sm:$0xff]  ;;  %v9033_v1 = vld [vmem:[%s16237_s13 + $0x18] sm:$0xff] }
0x1796   :  { %12466 = vmatprep.subr.bf16.mxu0 %v15232_v63  ;;  %12498 = vmatprep.subr.bf16.mxu1 %v15234_v62  ;;  %v12505_v63 = vpack.c.bf16 %v9033_v1, %v9032_v7  ;;  %v9034_v62 = vld [vmem:[%s16237_s13 + $0x20] sm:$0xff] }
0x1799   :  { %12468 = vmatpush1.bf16.msra.mxu0 %v15238_v37  ;;  %12500 = vmatpush1.bf16.msra.mxu1 %v15240_v6  ;;  %v9035_v37 = vld [vmem:[%s16237_s13 + $0x28] sm:$0xff] }
0x179a   :  { %12501 = vmatprep.subr.bf16.mxu0 %v13466_v9  ;;  %v12508_v6 = vpack.c.bf16 %v9035_v37, %v9034_v62 }
0x179c   :  { %8890 = vmatmul.mubr.f32.vlgmr.msra.gmra.mrb[66].mxu0 %v16147_v15  ;;  %8961 = vmatmul.mubr.f32.vlgmr.msra.gmra.mrb[66].mxu1 %v16147_v15 }
0x179d   :  { %12503 = vmatpush3.bf16.msra.mxu0 %v12502_v26  ;;  %9298 = vmatprep.mubr.msk.f32.mxu0 %vm13467_vm0, %v16672_v39  ;;  %v9045_v39 = vld [vmem:[%s16237_s13 + $0x78] sm:$0xff]  ;;  %s13468_s13 = smov [#allocation16]  }
0x179e   :  { %12504 = vmatprep.subr.bf16.mxu0 %v13466_v9  ;;  %v12523_v22 = vpack.c.bf16 %v9045_v39, %v9044_v8  ;;  %s9124_s17 = sshll.u32 %s13468_s13, 4  ;;  %s9125_s17 = int_to_ptr.vmem [resolvable:$true] %s9124_s17 }
0x179f   :  { %s13421_s18 = scalar_lea.vmem %s9125_s17, 128  ;;  %p13426_p9 = scmp.lt.s32.totalorder %s9125_s17, %s9125_s17 }
0x17a0   :  { %p13422_p8 = scmp.ne.s32.totalorder %s9125_s17, %s13421_s18  ;;  %p13427_p10 = scmp.lt.s32.totalorder %s13421_s18, %s13421_s18 }
0x17a1   :  { %12506 = vmatpush3.bf16.msra.mxu0 %v12505_v63 }
0x17a2   :  { %12507 = vmatprep.subr.bf16.mxu0 %v13466_v9  ;;  %p13428_p11 = por %p13427_p10, %p13426_p9 }
0x17a4   :  { %p13429_p12 = pnand %p13428_p11, %p13422_p8 }
0x17a5   :  { %12509 = vmatpush3.bf16.msra.mxu0 %v12508_v6 }
0x17a6   :  { %12510 = vmatprep.subr.bf16.mxu0 %v13466_v9 }
0x17a9   :  { %12512 = vmatpush3.bf16.msra.mxu0 %v12511_v32 }
0x17aa   :  { %12513 = vmatprep.subr.bf16.mxu0 %v13466_v9 }
0x17ad   :  { %12515 = vmatpush3.bf16.msra.mxu0 %v12514_v49 }
0x17ae   :  { %12516 = vmatprep.subr.bf16.mxu0 %v13466_v9 }
0x17b1   :  { %12518 = vmatpush3.bf16.msra.mxu0 %v12517_v53 }
0x17b2   :  { %12519 = vmatprep.subr.bf16.mxu0 %v13466_v9 }
0x17b5   :  { %12521 = vmatpush3.bf16.msra.mxu0 %v12520_v21 }
0x17b6   :  { %12522 = vmatprep.subr.bf16.mxu0 %v13466_v9 }
0x17b9   :  { %12524 = vmatpush3.bf16.msra.mxu0 %v12523_v22 }
0x186f   :  { %v8891_v51 = vpop.f32.mrb[66].mxu0  ;;  %v8962_v60 = vpop.f32.mrb[66].mxu1 }
0x1870   :  { %v12585_v14 = vadd.f32 %v8891_v51, %v17576_v18  ;;  %v8893_v45 = vpop.f32.mrb[67].mxu0  ;;  %v8964_v42 = vpop.f32.mrb[67].mxu1  ;;  %v12587_v25 = vadd.f32 %v8962_v60, %v17333_v48  ;;  %v17577_v48 = vld [vmem:[#allocation83_spill] sm:$0xff] }
0x1871   :  { %v12586_v10 = vadd.f32 %v8893_v45, %v17332_v5  ;;  %v12588_v40 = vadd.f32 %v8964_v42, %v15355_v24  ;;  %v8996_v12 = vrot.slane %v17577_v48, 7 }
0x1872   :  { %v9246_v13 = vmul.f32 -1.442695, %v12585_v14 }
0x1873   :  { %v9247_v30 = vmul.f32 -1.442695, %v12586_v10  ;;  %v9248_v11 = vmul.f32 -1.442695, %v12588_v40  ;;  %v9017_v19 = vsel %vm9016_vm1, %v17581_v16, %v8996_v12 }
0x1874   :  { %13229 = vpow2.f32 %v9246_v13  ;;  %v9019_v4 = vsel %vm9018_vm2, %v9017_v19, %v8999_v58 }
0x1875   :  { %13231 = vpow2.f32 %v9247_v30  ;;  %v9021_v26 = vsel %vm9020_vm3, %v9019_v4, %v9002_v44 }
0x1876   :  { %13233 = vpow2.f32 %v9248_v11  ;;  %v9023_v9 = vsel %vm9022_vm4, %v9021_v26, %v9005_v31 }
0x1877   :  { %13235 = vtanh.f32 %v12587_v25  ;;  %v9025_v1 = vsel %vm9024_vm5, %v9023_v9, %v9008_v34 }
0x1878   :  { %v9027_v63 = vsel %vm9026_vm6, %v9025_v1, %v9011_v3 }
0x187e   :  { %v13230_v50 = vpop.eup %13229 }
0x187f   :  { %v13232_v56 = vpop.eup %13231  ;;  %v8980_v23 = vadd.f32 1.0, %v13230_v50 }
0x1880   :  { %v8981_v54 = vadd.f32 1.0, %v13232_v56  ;;  %v13234_v18 = vpop.eup %13233 }
0x1881   :  { %13237 = vrcp.f32 %v8980_v23  ;;  %v13236_v33 = vpop.eup %13235  ;;  %v8982_v46 = vadd.f32 1.0, %v13234_v18 }
0x1882   :  { %13239 = vrcp.f32 %v8981_v54 }
0x1883   :  { %13241 = vrcp.f32 %v8982_v46 }
0x188b   :  { %v13238_v5 = vpop.eup %13237 }
0x188c   :  { %v13240_v35 = vpop.eup %13239  ;;  %v8991_v27 = vmul.f32 %v13238_v5, %v13236_v33 }
0x188d   :  { %v8990_v55 = vmul.f32 %v13240_v35, %v16106_v41  ;;  %v13242_v0 = vpop.eup %13241 }
0x188f   :  { %v8992_v24 = vadd.f32 %v8991_v27, %v8990_v55 }
0x1891   :  { %13243 = vtanh.f32 %v8992_v24 }
0x189b   :  { %v13244_v41 = vpop.eup %13243 }
0x189c   :  { %v8994_v2 = vmul.f32 %v13244_v41, %v13242_v0 }
0x189e   :  { %v9014_v7 = vrot.slane %v8994_v2, 1 }
0x18a0   :  { %v9029_v62 = vsel %vm9028_vm7, %v9027_v63, %v9014_v7 }
0x18a1   :  { %9299 = vmatmul.mubr.f32.vlgmr.msra.gmra.mrb[68].mxu0 %v9029_v62 }
0x1974   :  { %v9112_v38 = vpop.f32.mrb[68].mxu0 }
0x1975   :  { %v9300_v37 = vpop.f32.mrb[69].mxu0  ;;  %9117 = vst.msk [vmem:[#allocation16] sm:$0xff] %vm9116_vm8, %v9112_v38 }
0x1976   :  { %13432 = shalt.err (!%p13429_p12)
}
0x1977   :  { %s13433_s5 = scalar_lea.hbm %s16238_s14, 128 }
0x1978   :  { %p13434_p13 = scmp.ne.s32.totalorder %s16238_s14, %s13433_s5  ;;  %p13437_p0 = scmp.lt.u32.totalorder %s13433_s5, %s16238_s14 }
0x197a   :  { %p13439_p1 = pnand %p13437_p0, %p13434_p13 }
0x197c   :  { %13442 = shalt.err (!%p13439_p1)
}
0x197d   :  { %9127 = dma.vmem_to_hbm [thread:$0]  %s9125_s17, 128, %s16238_s14, [#allocation4]  }
0x197e   :  { %13453 = dma.done.wait [#allocation4], 128  }
0x197f   :  { %13454 = vsyncadd [#allocation4], 4294967168 }
0x1980   :  { %9131 = vsyncpa [#allocation3], 1 }
0x1981   :  { %9132 = vsyncpa [#allocation6], 1 }
0x1982   :  { %9133 = vsyncpa [#allocation9], 1 }
0x1983   :  { %9134 = vsyncpa [#allocation12], 1 }
0x1984   :  { %9135 = vsyncpa [#allocation15], 1 }
0x1985   :  { %9136 = vsyncpa [#allocation4], 1 }

</bundles_post_ra>
